<compile_context>
chip_gen: v5e
topology: v5e:2x2
jax: 0.10.0
libtpu: 0.0.40
codegen_flags: <defaults>
</compile_context>

<pallas_src>
import jax
import jax.numpy as jnp
from jax.experimental import pallas as pl
from jax.experimental.pallas import tpu as pltpu

THETA = 1e-35
MOYAL_SCALE = THETA * 1e20  # == 1e-15, matches torch.sin(nkat_repr * theta * 1e20)

D_IN, H1, D_REPR, H2, D_OUT = 64, 128, 64, 32, 1


def _round_up(n, m):
    return ((n + m - 1) // m) * m


def _nkat_kernel(x_ref,
                 w1_ref, b1_ref,
                 w2_ref, b2_ref,
                 w3_ref, b3_ref,
                 w4_ref, b4_ref,
                 comp_ref, repr_ref):
    # x arrives f32 straight from HBM; cast to bf16 in-register so the MXU
    # sees its native input dtype without an extra wrapper-side HBM pass.
    x = x_ref[...].astype(jnp.bfloat16)                                # (T, 64)

    # nkat_layers: Linear(64,128) -> ReLU -> Linear(128,64) -> Tanh
    h1 = jnp.dot(x, w1_ref[...], preferred_element_type=jnp.float32) + b1_ref[...]
    h1 = jnp.maximum(h1, 0.0)                                          # (T, 128) f32
    r = jnp.tanh(
        jnp.dot(h1.astype(jnp.bfloat16), w2_ref[...],
                preferred_element_type=jnp.float32) + b2_ref[...])     # (T, 64) f32
    repr_ref[...] = r.astype(repr_ref.dtype)

    # Moyal effect (elementwise; sin on the EUP/VPU)
    moyal = jnp.sin(r * MOYAL_SCALE).astype(jnp.bfloat16)

    # complexity_analyzer: Linear(64,32) -> ReLU -> Linear(32,1) -> Sigmoid
    h2 = jnp.dot(moyal, w3_ref[...], preferred_element_type=jnp.float32) + b3_ref[...]
    h2 = jnp.maximum(h2, 0.0)                                          # (T, 32) f32
    logit = jnp.dot(h2, w4_ref[...],
                    preferred_element_type=jnp.float32) + b4_ref[...]  # (T, 1)
    comp_ref[...] = 1.0 / (1.0 + jnp.exp(-logit))


def nkat_complexity_analyzer(x, params, *, tile_b=2048, max_tile=8192,
                             repr_dtype=jnp.float32):
    """x: (B, 64) float32.  params from prepare_params (bf16 W1..W3).

    Returns (complexity (B, 1) f32, nkat_repr (B, 64) `repr_dtype`).
    """
    (w1, b1, w2, b2, w3, b3, w4, b4) = params
    B = x.shape[0]

    # Tile selection: one full-batch tile (rounded to the 8-sublane grain) for
    # small B, otherwise a large multiple of 128.  Cap at `max_tile` so the
    # f32 intermediates stay well inside the scoped-VMEM default on every
    # generation (v7x has half the VMEM of v5e/v6e).
    tile_cap = min(_round_up(tile_b, 128), max_tile)
    if B <= tile_cap:
        tile = _round_up(max(B, 1), 8)
    else:
        tile = tile_cap
    grid = (pl.cdiv(B, tile),)  # ragged last block handled by Pallas masking

    def rep2d(shape):
        # Replicated operand: constant index_map -> resident across grid steps.
        # TODO(synk): pipeline_mode=pl.Buffered(1) would drop the (tiny) dead
        # second buffer for these once that knob is universally available.
        return pl.BlockSpec(shape, lambda i: (0, 0))

    itemsize_repr = jnp.dtype(repr_dtype).itemsize
    flops = 2 * B * (D_IN * H1 + H1 * D_REPR + D_REPR * H2 + H2 * D_OUT)
    transcendentals = B * (D_REPR + D_REPR + 1)          # tanh + sin + sigmoid-exp
    bytes_accessed = (
        B * D_IN * 4                                     # x (f32, read once)
        + B * D_REPR * itemsize_repr                     # nkat_repr out
        + B * D_OUT * 4                                  # complexity out
        + (D_IN * H1 + H1 * D_REPR + D_REPR * H2) * 2    # bf16 weights
        + (H1 + D_REPR + H2 + H2 * D_OUT + D_OUT) * 4)   # biases + W4 (f32)

    comp, nkat_repr = pl.pallas_call(
        _nkat_kernel,
        out_shape=(
            jax.ShapeDtypeStruct((B, D_OUT), jnp.float32),
            jax.ShapeDtypeStruct((B, D_REPR), repr_dtype),
        ),
        grid_spec=pltpu.PrefetchScalarGridSpec(
            num_scalar_prefetch=0,
            grid=grid,
            in_specs=[
                pl.BlockSpec((tile, D_IN), lambda i: (i, 0)),    # x (f32)
                rep2d((D_IN, H1)), rep2d((1, H1)),               # W1, b1
                rep2d((H1, D_REPR)), rep2d((1, D_REPR)),         # W2, b2
                rep2d((D_REPR, H2)), rep2d((1, H2)),             # W3, b3
                rep2d((H2, D_OUT)), rep2d((1, D_OUT)),           # W4 (32,1), b4
            ],
            out_specs=[
                pl.BlockSpec((tile, D_OUT), lambda i: (i, 0)),   # complexity
                pl.BlockSpec((tile, D_REPR), lambda i: (i, 0)),  # nkat_repr
            ],
        ),
        # On v7x, pltpu.CORE_PARALLEL here shards the batch grid axis across
        # both TensorCores; "parallel" is kept for portability to 1-TC chips.
        compiler_params=pltpu.CompilerParams(
            dimension_semantics=("parallel",)),
        cost_estimate=pl.CostEstimate(
            flops=flops,
            transcendentals=transcendentals,
            bytes_accessed=bytes_accessed),
    )(x, w1, b1, w2, b2, w3, b3, w4, b4)

    return comp, nkat_repr


def init_params(key):
    """Deterministic synthetic f32 parameters matching the nn.Linear shapes.

    Stored as (in, out) so the kernel computes x @ W + b (transpose of
    PyTorch's (out, in) storage).  W4 is (32, 1), b4 is (1, 1).
    """
    ks = jax.random.split(key, 8)

    def lin(kw, kb, fan_in, fan_out):
        bound = 1.0 / (fan_in ** 0.5)
        w = jax.random.uniform(kw, (fan_in, fan_out), jnp.float32, -bound, bound)
        b = jax.random.uniform(kb, (1, fan_out), jnp.float32, -bound, bound)
        return w, b

    w1, b1 = lin(ks[0], ks[1], D_IN, H1)      # Linear(64, 128)
    w2, b2 = lin(ks[2], ks[3], H1, D_REPR)    # Linear(128, 64)
    w3, b3 = lin(ks[4], ks[5], D_REPR, H2)    # Linear(64, 32)
    w4, b4 = lin(ks[6], ks[7], H2, D_OUT)     # Linear(32, 1)
    return (w1, b1, w2, b2, w3, b3, w4, b4)


def prepare_params(params):
    """One-time cast of the MXU-input weights to bf16 (outside the hot path)."""
    (w1, b1, w2, b2, w3, b3, w4, b4) = params
    return (w1.astype(jnp.bfloat16), b1,
            w2.astype(jnp.bfloat16), b2,
            w3.astype(jnp.bfloat16), b3,
            w4, b4)


def _reference(x, params_f32):
    """Pure-JAX reference mirroring the kernel's bf16-input / f32-accum casts."""
    (w1, b1, w2, b2, w3, b3, w4, b4) = params_f32
    bf = jnp.bfloat16
    h1 = jnp.maximum(
        jnp.dot(x.astype(bf), w1.astype(bf), preferred_element_type=jnp.float32) + b1,
        0.0)
    r = jnp.tanh(
        jnp.dot(h1.astype(bf), w2.astype(bf), preferred_element_type=jnp.float32) + b2)
    moyal = jnp.sin(r * MOYAL_SCALE)
    h2 = jnp.maximum(
        jnp.dot(moyal.astype(bf), w3.astype(bf), preferred_element_type=jnp.float32) + b3,
        0.0)
    logit = jnp.dot(h2, w4, preferred_element_type=jnp.float32) + b4
    comp = 1.0 / (1.0 + jnp.exp(-logit))
    return comp, r


if __name__ == "__main__":
    key = jax.random.PRNGKey(0)
    k_param, k_x = jax.random.split(key)

    params_f32 = init_params(k_param)
    params = prepare_params(params_f32)

    batch = 200  # deliberately NOT a multiple of 8 or 128
    x = jax.random.normal(k_x, (batch, D_IN), jnp.float32)

    comp_exp, repr_exp = _reference(x, params_f32)

    # Default path: single full-batch tile, grid = (1,).
    comp, nkat_repr = nkat_complexity_analyzer(x, params)
    jax.block_until_ready((comp, nkat_repr))
    assert comp.shape == (batch, D_OUT) and nkat_repr.shape == (batch, D_REPR)
    assert jnp.allclose(comp, comp_exp, atol=2e-3, rtol=2e-3)
    assert jnp.allclose(nkat_repr, repr_exp, atol=2e-3, rtol=2e-3)

    # Multi-step grid with a ragged last tile (exercises Pallas boundary
    # masking; no wrapper-side padding pass through HBM).
    comp2, repr2 = nkat_complexity_analyzer(x, params, tile_b=128)
    jax.block_until_ready((comp2, repr2))
    assert jnp.allclose(comp2, comp_exp, atol=2e-3, rtol=2e-3)
    assert jnp.allclose(repr2, repr_exp, atol=2e-3, rtol=2e-3)

    print("KERNEL_OK")
</pallas_src>

<mosaic_0001>
module attributes {stable_mosaic.version = 11 : i64} {
  func.func @_nkat_kernel(%arg0: i32, %arg1: memref<200x64xf32, #tpu.memory_space<vmem>>, %arg2: memref<64x128xbf16, #tpu.memory_space<vmem>>, %arg3: memref<1x128xf32, #tpu.memory_space<vmem>>, %arg4: memref<128x64xbf16, #tpu.memory_space<vmem>>, %arg5: memref<1x64xf32, #tpu.memory_space<vmem>>, %arg6: memref<64x32xbf16, #tpu.memory_space<vmem>>, %arg7: memref<1x32xf32, #tpu.memory_space<vmem>>, %arg8: memref<32x1xf32, #tpu.memory_space<vmem>>, %arg9: memref<1x1xf32, #tpu.memory_space<vmem>>, %arg10: memref<200x1xf32, #tpu.memory_space<vmem>>, %arg11: memref<200x64xf32, #tpu.memory_space<vmem>>) attributes {dimension_semantics = [#tpu.dimension_semantics<parallel>], iteration_bounds = array<i64: 1>, scalar_prefetch = 0 : i64, scratch_operands = 0 : i64, tpu.core_type = #tpu.core_type<tc>, window_params = [{transform_indices = @transform_0, window_bounds = array<i64: 200, 64>}, {pipeline_mode = #tpu.pipeline_mode<synchronous>, transform_indices = @transform_1, window_bounds = array<i64: 64, 128>}, {pipeline_mode = #tpu.pipeline_mode<synchronous>, transform_indices = @transform_2, window_bounds = array<i64: 1, 128>}, {pipeline_mode = #tpu.pipeline_mode<synchronous>, transform_indices = @transform_3, window_bounds = array<i64: 128, 64>}, {pipeline_mode = #tpu.pipeline_mode<synchronous>, transform_indices = @transform_4, window_bounds = array<i64: 1, 64>}, {pipeline_mode = #tpu.pipeline_mode<synchronous>, transform_indices = @transform_5, window_bounds = array<i64: 64, 32>}, {pipeline_mode = #tpu.pipeline_mode<synchronous>, transform_indices = @transform_6, window_bounds = array<i64: 1, 32>}, {pipeline_mode = #tpu.pipeline_mode<synchronous>, transform_indices = @transform_7, window_bounds = array<i64: 32, 1>}, {pipeline_mode = #tpu.pipeline_mode<synchronous>, transform_indices = @transform_8, window_bounds = array<i64: 1, 1>}, {transform_indices = @transform_9, window_bounds = array<i64: 200, 1>}, {transform_indices = @transform_10, window_bounds = array<i64: 200, 64>}]} {
    %c0 = arith.constant 0 : index
    %c0_0 = arith.constant 0 : index
    %0 = vector.load %arg1[%c0, %c0_0] : memref<200x64xf32, #tpu.memory_space<vmem>>, vector<200x64xf32>
    %1 = arith.truncf %0 : vector<200x64xf32> to vector<200x64xbf16>
    %c0_1 = arith.constant 0 : index
    %c0_2 = arith.constant 0 : index
    %2 = vector.load %arg2[%c0_1, %c0_2] : memref<64x128xbf16, #tpu.memory_space<vmem>>, vector<64x128xbf16>
    %cst = arith.constant dense<0.000000e+00> : vector<200x128xf32>
    %3 = tpu.matmul %1, %2, %cst {dimension_numbers = #tpu.dot_dimension_numbers<[1], [0], [0], [1], [0, 0, 1, 1], [], []>} : vector<200x64xbf16>, vector<64x128xbf16>, vector<200x128xf32> -> vector<200x128xf32>
    %c0_3 = arith.constant 0 : index
    %c0_4 = arith.constant 0 : index
    %4 = vector.load %arg3[%c0_3, %c0_4] : memref<1x128xf32, #tpu.memory_space<vmem>>, vector<1x128xf32>
    %5 = vector.broadcast %4 : vector<1x128xf32> to vector<200x128xf32>
    %6 = arith.addf %3, %5 : vector<200x128xf32>
    %cst_5 = arith.constant 0.000000e+00 : f32
    %7 = vector.broadcast %cst_5 : f32 to vector<200x128xf32>
    %8 = arith.maximumf %6, %7 : vector<200x128xf32>
    %9 = arith.truncf %8 : vector<200x128xf32> to vector<200x128xbf16>
    %c0_6 = arith.constant 0 : index
    %c0_7 = arith.constant 0 : index
    %10 = vector.load %arg4[%c0_6, %c0_7] : memref<128x64xbf16, #tpu.memory_space<vmem>>, vector<128x64xbf16>
    %cst_8 = arith.constant dense<0.000000e+00> : vector<200x64xf32>
    %11 = tpu.matmul %9, %10, %cst_8 {dimension_numbers = #tpu.dot_dimension_numbers<[1], [0], [0], [1], [0, 0, 1, 1], [], []>} : vector<200x128xbf16>, vector<128x64xbf16>, vector<200x64xf32> -> vector<200x64xf32>
    %c0_9 = arith.constant 0 : index
    %c0_10 = arith.constant 0 : index
    %12 = vector.load %arg5[%c0_9, %c0_10] : memref<1x64xf32, #tpu.memory_space<vmem>>, vector<1x64xf32>
    %13 = vector.broadcast %12 : vector<1x64xf32> to vector<200x64xf32>
    %14 = arith.addf %11, %13 : vector<200x64xf32>
    %15 = math.tanh %14 : vector<200x64xf32>
    %c0_11 = arith.constant 0 : index
    %c0_12 = arith.constant 0 : index
    %16 = vector.load %arg11[%c0_11, %c0_12] : memref<200x64xf32, #tpu.memory_space<vmem>>, vector<200x64xf32>
    tpu.vector_store %arg11[%c0_11, %c0_12], %15 {strides = array<i32>} : memref<200x64xf32, #tpu.memory_space<vmem>>, vector<200x64xf32>,
    %cst_13 = arith.constant 1.000000e-15 : f32
    %17 = vector.broadcast %cst_13 : f32 to vector<200x64xf32>
    %18 = arith.mulf %15, %17 : vector<200x64xf32>
    %19 = math.sin %18 : vector<200x64xf32>
    %20 = arith.truncf %19 : vector<200x64xf32> to vector<200x64xbf16>
    %c0_14 = arith.constant 0 : index
    %c0_15 = arith.constant 0 : index
    %21 = vector.load %arg6[%c0_14, %c0_15] : memref<64x32xbf16, #tpu.memory_space<vmem>>, vector<64x32xbf16>
    %cst_16 = arith.constant dense<0.000000e+00> : vector<200x32xf32>
    %22 = tpu.matmul %20, %21, %cst_16 {dimension_numbers = #tpu.dot_dimension_numbers<[1], [0], [0], [1], [0, 0, 1, 1], [], []>} : vector<200x64xbf16>, vector<64x32xbf16>, vector<200x32xf32> -> vector<200x32xf32>
    %c0_17 = arith.constant 0 : index
    %c0_18 = arith.constant 0 : index
    %23 = vector.load %arg7[%c0_17, %c0_18] : memref<1x32xf32, #tpu.memory_space<vmem>>, vector<1x32xf32>
    %24 = vector.broadcast %23 : vector<1x32xf32> to vector<200x32xf32>
    %25 = arith.addf %22, %24 : vector<200x32xf32>
    %cst_19 = arith.constant 0.000000e+00 : f32
    %26 = vector.broadcast %cst_19 : f32 to vector<200x32xf32>
    %27 = arith.maximumf %25, %26 : vector<200x32xf32>
    %c0_20 = arith.constant 0 : index
    %c0_21 = arith.constant 0 : index
    %28 = vector.load %arg8[%c0_20, %c0_21] : memref<32x1xf32, #tpu.memory_space<vmem>>, vector<32x1xf32>
    %cst_22 = arith.constant dense<0.000000e+00> : vector<200x1xf32>
    %29 = tpu.matmul %27, %28, %cst_22 {dimension_numbers = #tpu.dot_dimension_numbers<[1], [0], [0], [1], [0, 0, 1, 1], [], []>} : vector<200x32xf32>, vector<32x1xf32>, vector<200x1xf32> -> vector<200x1xf32>
    %c0_23 = arith.constant 0 : index
    %c0_24 = arith.constant 0 : index
    %30 = vector.load %arg9[%c0_23, %c0_24] : memref<1x1xf32, #tpu.memory_space<vmem>>, vector<1x1xf32>
    %31 = vector.broadcast %30 : vector<1x1xf32> to vector<200x1xf32>
    %32 = arith.addf %29, %31 : vector<200x1xf32>
    %cst_25 = arith.constant 0.000000e+00 : f32
    %33 = vector.broadcast %cst_25 : f32 to vector<200x1xf32>
    %34 = arith.subf %33, %32 : vector<200x1xf32>
    %35 = math.exp %34 : vector<200x1xf32>
    %cst_26 = arith.constant 1.000000e+00 : f32
    %36 = vector.broadcast %cst_26 : f32 to vector<200x1xf32>
    %37 = arith.addf %36, %35 : vector<200x1xf32>
    %cst_27 = arith.constant 1.000000e+00 : f32
    %38 = vector.broadcast %cst_27 : f32 to vector<200x1xf32>
    %39 = arith.divf %38, %37 : vector<200x1xf32>
    %c0_28 = arith.constant 0 : index
    %c0_29 = arith.constant 0 : index
    %40 = vector.load %arg10[%c0_28, %c0_29] : memref<200x1xf32, #tpu.memory_space<vmem>>, vector<200x1xf32>
    tpu.vector_store %arg10[%c0_28, %c0_29], %39 {strides = array<i32>} : memref<200x1xf32, #tpu.memory_space<vmem>>, vector<200x1xf32>,
    return
  }
  func.func @transform_0(%arg0: i32) -> (i32, i32) {
    %c0_i32 = arith.constant 0 : i32
    %c0_i32_0 = arith.constant 0 : i32
    return %arg0, %c0_i32 : i32, i32
  }
  func.func @transform_1(%arg0: i32) -> (i32, i32) {
    %c0_i32 = arith.constant 0 : i32
    %c0_i32_0 = arith.constant 0 : i32
    %c0_i32_1 = arith.constant 0 : i32
    return %c0_i32, %c0_i32_0 : i32, i32
  }
  func.func @transform_2(%arg0: i32) -> (i32, i32) {
    %c0_i32 = arith.constant 0 : i32
    %c0_i32_0 = arith.constant 0 : i32
    %c0_i32_1 = arith.constant 0 : i32
    return %c0_i32, %c0_i32_0 : i32, i32
  }
  func.func @transform_3(%arg0: i32) -> (i32, i32) {
    %c0_i32 = arith.constant 0 : i32
    %c0_i32_0 = arith.constant 0 : i32
    %c0_i32_1 = arith.constant 0 : i32
    return %c0_i32, %c0_i32_0 : i32, i32
  }
  func.func @transform_4(%arg0: i32) -> (i32, i32) {
    %c0_i32 = arith.constant 0 : i32
    %c0_i32_0 = arith.constant 0 : i32
    %c0_i32_1 = arith.constant 0 : i32
    return %c0_i32, %c0_i32_0 : i32, i32
  }
  func.func @transform_5(%arg0: i32) -> (i32, i32) {
    %c0_i32 = arith.constant 0 : i32
    %c0_i32_0 = arith.constant 0 : i32
    %c0_i32_1 = arith.constant 0 : i32
    return %c0_i32, %c0_i32_0 : i32, i32
  }
  func.func @transform_6(%arg0: i32) -> (i32, i32) {
    %c0_i32 = arith.constant 0 : i32
    %c0_i32_0 = arith.constant 0 : i32
    %c0_i32_1 = arith.constant 0 : i32
    return %c0_i32, %c0_i32_0 : i32, i32
  }
  func.func @transform_7(%arg0: i32) -> (i32, i32) {
    %c0_i32 = arith.constant 0 : i32
    %c0_i32_0 = arith.constant 0 : i32
    %c0_i32_1 = arith.constant 0 : i32
    return %c0_i32, %c0_i32_0 : i32, i32
  }
  func.func @transform_8(%arg0: i32) -> (i32, i32) {
    %c0_i32 = arith.constant 0 : i32
    %c0_i32_0 = arith.constant 0 : i32
    %c0_i32_1 = arith.constant 0 : i32
    return %c0_i32, %c0_i32_0 : i32, i32
  }
  func.func @transform_9(%arg0: i32) -> (i32, i32) {
    %c0_i32 = arith.constant 0 : i32
    %c0_i32_0 = arith.constant 0 : i32
    return %arg0, %c0_i32 : i32, i32
  }
  func.func @transform_10(%arg0: i32) -> (i32, i32) {
    %c0_i32 = arith.constant 0 : i32
    %c0_i32_0 = arith.constant 0 : i32
    return %arg0, %c0_i32 : i32, i32
  }
}

</mosaic_0001>

<bundles_post_ra>
// kernel: tpu_custom_call.1
= control target key start
LH: loop header
LB: loop body
LE: loop exit
PB: predicated region body
PF: predicated region fallthrough
CT: control target
= control target key end

     0   :  { %vm111_vm0 = vcmask 523264   ;;  %s9963_s1 = inlined_call_operand.vmem [shape: bf16[64,128], index: 1, kind: input, shape index: {}]   ;;  %s9964_s2 = inlined_call_operand.vmem [shape: f32[1,128], index: 2, kind: input, shape index: {}]   ;;  %s9965_s0 = inlined_call_operand.vmem [shape: f32[200,64], index: 0, kind: input, shape index: {}]   ;;  %s9966_s3 = inlined_call_operand.vmem [shape: bf16[128,64], index: 3, kind: input, shape index: {}]   ;;  %s9967_s4 = inlined_call_operand.vmem [shape: f32[1,64], index: 4, kind: input, shape index: {}]   ;;  %s9968_s10 = inlined_call_operand.vmem [shape: f32[200,64], index: 10, kind: output, shape index: {1}]   ;;  %s9969_s5 = inlined_call_operand.vmem [shape: bf16[64,32], index: 5, kind: input, shape index: {}]   ;;  %s9970_s6 = inlined_call_operand.vmem [shape: f32[1,32], index: 6, kind: input, shape index: {}]   ;;  %s9971_s7 = inlined_call_operand.vmem [shape: f32[32,1], index: 7, kind: input, shape index: {}]   ;;  %s9972_s8 = inlined_call_operand.<no memory space> [shape: f32[1,1], index: 8, kind: input, shape index: {}]   ;;  %s9973_s9 = inlined_call_operand.vmem [shape: f32[200,1], index: 9, kind: output, shape index: {0}]  }
   0x1   :  { %v5417_v0 = vld [vmem:[%s9963_s1 + $0x18] sm:$0xff]  ;;  %v5416_v1 = vld [vmem:[%s9963_s1 + $0x10] sm:$0xff]  ;;  %v5415_v2 = vld [vmem:[%s9963_s1 + $0x8] sm:$0xff] }
   0x2   :  { %155 = vmatpush.bf16.msra.mxu0 %v5417_v0  ;;  %v5414_v3 = vld [vmem:[%s9963_s1] sm:$0xff]  ;;  %v38_v5 = vld [vmem:[%s9965_s0 + $0x8] sm:$0xff]  ;;  %v39_v7 = vld [vmem:[%s9965_s0 + $0x10] sm:$0xff] }
   0x3   :  { %v37_v4 = vld [vmem:[%s9965_s0] sm:$0xff]  ;;  %v40_v8 = vld [vmem:[%s9965_s0 + $0x18] sm:$0xff]  ;;  %v42_v11 = vld [vmem:[%s9965_s0 + $0x28] sm:$0xff] }
   0x4   :  { %v62_v6 = vpack.c.bf16 %v38_v5, %v37_v4  ;;  %v63_v9 = vpack.c.bf16 %v40_v8, %v39_v7  ;;  %v41_v10 = vld [vmem:[%s9965_s0 + $0x20] sm:$0xff]  ;;  %v43_v13 = vld [vmem:[%s9965_s0 + $0x30] sm:$0xff]  ;;  %v44_v14 = vld [vmem:[%s9965_s0 + $0x38] sm:$0xff] }
   0x5   :  { %v64_v12 = vpack.c.bf16 %v42_v11, %v41_v10  ;;  %v65_v15 = vpack.c.bf16 %v44_v14, %v43_v13  ;;  %v45_v16 = vld [vmem:[%s9965_s0 + $0x40] sm:$0xff]  ;;  %v46_v17 = vld [vmem:[%s9965_s0 + $0x48] sm:$0xff]  ;;  %v5425_v19 = vld [vmem:[%s9966_s3 + $0x38] sm:$0xff] }
   0x6   :  { %156 = vmatpush.bf16.msra.mxu0 %v5416_v1  ;;  %v66_v18 = vpack.c.bf16 %v46_v17, %v45_v16  ;;  %330 = vmatpush.bf16.msra.mxu1 %v5425_v19  ;;  %v47_v20 = vld [vmem:[%s9965_s0 + $0x50] sm:$0xff]  ;;  %v48_v21 = vld [vmem:[%s9965_s0 + $0x58] sm:$0xff]  ;;  %v5423_v24 = vld [vmem:[%s9966_s3 + $0x28] sm:$0xff] }
   0x7   :  { %v67_v22 = vpack.c.bf16 %v48_v21, %v47_v20  ;;  %v5424_v23 = vld [vmem:[%s9966_s3 + $0x30] sm:$0xff]  ;;  %v5422_v25 = vld [vmem:[%s9966_s3 + $0x20] sm:$0xff]  ;;  %v50_v27 = vld [vmem:[%s9965_s0 + $0x68] sm:$0xff] }
   0x8   :  { %v49_v26 = vld [vmem:[%s9965_s0 + $0x60] sm:$0xff]  ;;  %v5421_v28 = vld [vmem:[%s9966_s3 + $0x18] sm:$0xff]  ;;  %v5420_v30 = vld [vmem:[%s9966_s3 + $0x10] sm:$0xff] }
   0x9   :  { %v68_v29 = vpack.c.bf16 %v50_v27, %v49_v26  ;;  %v5419_v31 = vld [vmem:[%s9966_s3 + $0x8] sm:$0xff]  ;;  %v5418_v32 = vld [vmem:[%s9966_s3] sm:$0xff]  ;;  %v51_v33 = vld [vmem:[%s9965_s0 + $0x70] sm:$0xff] }
   0xa   :  { %157 = vmatpush.bf16.msra.mxu0 %v5415_v2  ;;  %331 = vmatpush.bf16.msra.mxu1 %v5424_v23  ;;  %v52_v34 = vld [vmem:[%s9965_s0 + $0x78] sm:$0xff]  ;;  %v53_v36 = vld [vmem:[%s9965_s0 + $0x80] sm:$0xff]  ;;  %v54_v37 = vld [vmem:[%s9965_s0 + $0x88] sm:$0xff] }
   0xb   :  { %v69_v35 = vpack.c.bf16 %v52_v34, %v51_v33  ;;  %v70_v38 = vpack.c.bf16 %v54_v37, %v53_v36  ;;  %v5760_v40 = vld [vmem:[%s9964_s2] ss:$0 sm:$0xff]  ;;  %v55_v46 = vld [vmem:[%s9965_s0 + $0x90] sm:$0xff]  ;;  %v56_v47 = vld [vmem:[%s9965_s0 + $0x98] sm:$0xff] }
   0xc   :  { %v71_v49 = vpack.c.bf16 %v56_v47, %v55_v46  ;;  %v57_v56 = vld [vmem:[%s9965_s0 + $0xa0] sm:$0xff]  ;;  %v58_v57 = vld [vmem:[%s9965_s0 + $0xa8] sm:$0xff]  ;;  %v59_v2 = vld [vmem:[%s9965_s0 + $0xb0] sm:$0xff] }
   0xd   :  { %v72_v59 = vpack.c.bf16 %v58_v57, %v57_v56 }
   0xe   :  { %158 = vmatpush.bf16.msra.mxu0 %v5414_v3  ;;  %332 = vmatpush.bf16.msra.mxu1 %v5423_v24  ;;  %v60_v3 = vld [vmem:[%s9965_s0 + $0xb8] sm:$0xff] }
   0xf   :  { %v73_v5 = vpack.c.bf16 %v60_v3, %v59_v2 }
  0x11   :  { %5240 = vmatmul.msk.bf16.vlgmr.msra.gmra.mxu0 %vm111_vm0, %v62_v6 }
  0x12   :  { %333 = vmatpush.bf16.msra.mxu1 %v5422_v25 }
  0x16   :  { %334 = vmatpush.bf16.msra.mxu1 %v5421_v28 }
  0x1a   :  { %335 = vmatpush.bf16.msra.mxu1 %v5420_v30 }
  0x1e   :  { %336 = vmatpush.bf16.msra.mxu1 %v5419_v31 }
  0x21   :  { %5241 = vmatmul.msk.bf16.gmra.mxu0 %vm111_vm0, %v63_v9 }
  0x22   :  { %337 = vmatpush.bf16.msra.mxu1 %v5418_v32 }
  0x31   :  { %5242 = vmatmul.msk.bf16.gmra.mxu0 %vm111_vm0, %v64_v12  ;;  %v61_v12 = vld [vmem:[%s9965_s0 + $0xc0] sm:$0xff] }
  0x32   :  { %v74_v14 = vpack.c.bf16 %v61_v12, %v61_v12 }
  0x41   :  { %5243 = vmatmul.msk.bf16.gmra.mxu0 %vm111_vm0, %v65_v15 }
  0x51   :  { %5244 = vmatmul.msk.bf16.gmra.mxu0 %vm111_vm0, %v66_v18 }
  0x61   :  { %5245 = vmatmul.msk.bf16.gmra.mxu0 %vm111_vm0, %v67_v22 }
  0x71   :  { %5246 = vmatmul.msk.bf16.gmra.mxu0 %vm111_vm0, %v68_v29 }
  0x81   :  { %5247 = vmatmul.msk.bf16.gmra.mxu0 %vm111_vm0, %v69_v35 }
  0x8e   :  { %v160_v39 = vpop.f32.mrf.mxu0 }
  0x8f   :  { %v161_v41 = vadd.f32 %v5760_v40, %v160_v39 }
  0x91   :  { %5248 = vmatmul.msk.bf16.gmra.mxu0 %vm111_vm0, %v70_v38  ;;  %v224_v44 = vmax.f32 %v161_v41, 0.0 }
  0x96   :  { %v162_v42 = vpop.f32.mrf.mxu0 }
  0x97   :  { %v163_v43 = vadd.f32 %v5760_v40, %v162_v42 }
  0x99   :  { %v225_v45 = vmax.f32 %v163_v43, 0.0 }
  0x9b   :  { %v249_v48 = vpack.c.bf16 %v225_v45, %v224_v44 }
  0x9d   :  { %338 = vmatmul.bf16.vlgmr.msra.gmra.mxu1 %v249_v48  ;;  %v5809_v48 = vld [vmem:[%s9967_s4] ss:$0 sm:$0xff] }
  0x9e   :  { %v165_v50 = vpop.f32.mrf.mxu0 }
  0x9f   :  { %v166_v51 = vadd.f32 %v5760_v40, %v165_v50 }
  0xa1   :  { %5249 = vmatmul.msk.bf16.gmra.mxu0 %vm111_vm0, %v71_v49  ;;  %v226_v54 = vmax.f32 %v166_v51, 0.0 }
  0xa6   :  { %v167_v52 = vpop.f32.mrf.mxu0 }
  0xa7   :  { %v168_v53 = vadd.f32 %v5760_v40, %v167_v52 }
  0xa9   :  { %v227_v55 = vmax.f32 %v168_v53, 0.0 }
  0xab   :  { %v250_v58 = vpack.c.bf16 %v227_v55, %v226_v54 }
  0xad   :  { %343 = vmatmul.bf16.gmra.mxu1 %v250_v58 }
  0xae   :  { %v170_v60 = vpop.f32.mrf.mxu0 }
  0xaf   :  { %v171_v61 = vadd.f32 %v5760_v40, %v170_v60 }
  0xb1   :  { %5250 = vmatmul.msk.bf16.gmra.mxu0 %vm111_vm0, %v72_v59  ;;  %v228_v0 = vmax.f32 %v171_v61, 0.0 }
  0xb6   :  { %v172_v62 = vpop.f32.mrf.mxu0 }
  0xb7   :  { %v173_v63 = vadd.f32 %v5760_v40, %v172_v62 }
  0xb9   :  { %v229_v1 = vmax.f32 %v173_v63, 0.0 }
  0xbb   :  { %v251_v4 = vpack.c.bf16 %v229_v1, %v228_v0 }
  0xbd   :  { %348 = vmatmul.bf16.gmra.mxu1 %v251_v4 }
  0xbe   :  { %v175_v6 = vpop.f32.mrf.mxu0 }
  0xbf   :  { %v176_v7 = vadd.f32 %v5760_v40, %v175_v6 }
  0xc1   :  { %5251 = vmatmul.msk.bf16.gmra.mxu0 %vm111_vm0, %v73_v5  ;;  %v230_v10 = vmax.f32 %v176_v7, 0.0 }
  0xc6   :  { %v177_v8 = vpop.f32.mrf.mxu0 }
  0xc7   :  { %v178_v9 = vadd.f32 %v5760_v40, %v177_v8 }
  0xc9   :  { %v231_v11 = vmax.f32 %v178_v9, 0.0 }
  0xcb   :  { %v252_v13 = vpack.c.bf16 %v231_v11, %v230_v10 }
  0xcd   :  { %353 = vmatmul.bf16.gmra.mxu1 %v252_v13 }
  0xce   :  { %v180_v15 = vpop.f32.mrf.mxu0 }
  0xcf   :  { %v181_v16 = vadd.f32 %v5760_v40, %v180_v15 }
  0xd1   :  { %5252 = vmatmul.msk.bf16.gmra.mxu0 %vm111_vm0, %v74_v14  ;;  %v232_v19 = vmax.f32 %v181_v16, 0.0 }
  0xd6   :  { %v182_v17 = vpop.f32.mrf.mxu0 }
  0xd7   :  { %v183_v18 = vadd.f32 %v5760_v40, %v182_v17 }
  0xd9   :  { %v233_v20 = vmax.f32 %v183_v18, 0.0  ;;  %v9994_v18 = vmov 2475754826  }
  0xdb   :  { %v253_v21 = vpack.c.bf16 %v233_v20, %v232_v19  ;;  %v9979_v20 = vmov 2131351028  }
  0xdd   :  { %358 = vmatmul.bf16.gmra.mxu1 %v253_v21 }
  0xde   :  { %v185_v22 = vpop.f32.mrf.mxu0 }
  0xdf   :  { %v186_v23 = vadd.f32 %v5760_v40, %v185_v22  ;;  %v9986_v22 = vmov 2102212464  }
  0xe1   :  { %v234_v26 = vmax.f32 %v186_v23, 0.0 }
  0xe6   :  { %v187_v24 = vpop.f32.mrf.mxu0 }
  0xe7   :  { %v188_v25 = vadd.f32 %v5760_v40, %v187_v24  ;;  %v9977_v24 = vmov 920167782  }
  0xe9   :  { %v235_v27 = vmax.f32 %v188_v25, 0.0 }
  0xeb   :  { %v254_v28 = vpack.c.bf16 %v235_v27, %v234_v26 }
  0xed   :  { %363 = vmatmul.bf16.gmra.mxu1 %v254_v28 }
  0xee   :  { %v190_v29 = vpop.f32.mrf.mxu0 }
  0xef   :  { %v191_v30 = vadd.f32 %v5760_v40, %v190_v29  ;;  %v9992_v29 = vmov 683565275  }
  0xf1   :  { %v236_v33 = vmax.f32 %v191_v30, 0.0 }
  0xf6   :  { %v192_v31 = vpop.f32.mrf.mxu0 }
  0xf7   :  { %v193_v32 = vadd.f32 %v5760_v40, %v192_v31  ;;  %v9990_v31 = vmov 1326507024  }
  0xf9   :  { %v237_v34 = vmax.f32 %v193_v32, 0.0 }
  0xfb   :  { %v255_v35 = vpack.c.bf16 %v237_v34, %v236_v33 }
  0xfd   :  { %368 = vmatmul.bf16.gmra.mxu1 %v255_v35 }
  0xfe   :  { %v195_v36 = vpop.f32.mrf.mxu0 }
  0xff   :  { %v196_v37 = vadd.f32 %v5760_v40, %v195_v36 }
 0x101   :  { %v238_v41 = vmax.f32 %v196_v37, 0.0 }
 0x106   :  { %v197_v38 = vpop.f32.mrf.mxu0 }
 0x107   :  { %v198_v39 = vadd.f32 %v5760_v40, %v197_v38 }
 0x109   :  { %v239_v42 = vmax.f32 %v198_v39, 0.0 }
 0x10b   :  { %v256_v43 = vpack.c.bf16 %v239_v42, %v238_v41 }
 0x10d   :  { %373 = vmatmul.bf16.gmra.mxu1 %v256_v43 }
 0x10e   :  { %v200_v44 = vpop.f32.mrf.mxu0 }
 0x10f   :  { %v201_v45 = vadd.f32 %v5760_v40, %v200_v44 }
 0x111   :  { %v240_v49 = vmax.f32 %v201_v45, 0.0 }
 0x116   :  { %v202_v46 = vpop.f32.mrf.mxu0 }
 0x117   :  { %v203_v47 = vadd.f32 %v5760_v40, %v202_v46 }
 0x119   :  { %v241_v50 = vmax.f32 %v203_v47, 0.0 }
 0x11a   :  { %v339_v51 = vpop.f32.mrf.mxu1 }
 0x11b   :  { %v340_v52 = vadd.f32 %v5809_v48, %v339_v51  ;;  %v257_v53 = vpack.c.bf16 %v241_v50, %v240_v49 }
 0x11d   :  { %5441 = vtanh.f32 %v340_v52  ;;  %378 = vmatmul.bf16.gmra.mxu1 %v257_v53 }
 0x11e   :  { %v205_v54 = vpop.f32.mrf.mxu0 }
 0x11f   :  { %v206_v59 = vadd.f32 %v5760_v40, %v205_v54 }
 0x121   :  { %v242_v0 = vmax.f32 %v206_v59, 0.0 }
 0x122   :  { %v341_v55 = vpop.f32.mrf.mxu1 }
 0x123   :  { %v5442_v56 = vpop.eup %5441  ;;  %v342_v57 = vadd.f32 %v5809_v48, %v341_v55 }
 0x124   :  { %428 = vst.msk [vmem:[%s9968_s10] sm:$0xff] %vm111_vm0, %v5442_v56  ;;  %v5817_v58 = vmul.f32 1e-15, %v5442_v56 }
 0x125   :  { %5443 = vtanh.f32 %v342_v57 }
 0x126   :  { %v481_v60 = vand.u32 2139095040, %v5817_v58  ;;  %v207_v61 = vpop.f32.mrf.mxu0  ;;  %v478_v9 = vand.u32 2147483647, %v5817_v58 }
 0x127   :  { %v208_v62 = vadd.f32 %v5760_v40, %v207_v61 }
 0x128   :  { %v482_v63 = vshrl.u32 %v481_v60, 23  ;;  %v485_v14 = vand.u32 8388607, %v478_v9 }
 0x129   :  { %v243_v1 = vmax.f32 %v208_v62, 0.0 }
 0x12a   :  { %v5285_v2 = vadd.s32 4294967169, %v482_v63  ;;  %v344_v3 = vpop.f32.mrf.mxu1  ;;  %v486_v28 = vor.u32 8388608, %v485_v14 }
 0x12b   :  { %v5444_v4 = vpop.eup %5443  ;;  %v345_v5 = vadd.f32 %v5809_v48, %v344_v3  ;;  %v258_v6 = vpack.c.bf16 %v243_v1, %v242_v0 }
 0x12c   :  { %v488_v7 = vadd.s32 1, %v5285_v2  ;;  %429 = vst.msk [vmem:[%s9968_s10 + $0x8] sm:$0xff] %vm111_vm0, %v5444_v4  ;;  %v5849_v26 = vmul.f32 1e-15, %v5444_v4  ;;  %v5870_v52 = vshll.u32 %v486_v28, 8 }
 0x12d   :  { %5445 = vtanh.f32 %v345_v5  ;;  %383 = vmatmul.bf16.gmra.mxu1 %v258_v6 }
 0x12e   :  { %vm489_vm1 = vcmp.gt.s32.totalorder %v488_v7, 0  ;;  %v210_v8 = vpop.f32.mrf.mxu0  ;;  %v636_v53 = vand.u32 2139095040, %v5849_v26  ;;  %v527_v1 = vand.u32 65535, %v5870_v52  ;;  %v528_v2 = vshrl.u32 %v5870_v52, 16 }
 0x12f   :  { %v490_v10 = vsel %vm489_vm1, %v488_v7, 0  ;;  %v211_v17 = vadd.f32 %v5760_v40, %v210_v8 }
 0x130   :  { %v492_v11 = vand.u32 31, %v490_v10  ;;  %v5858_v37 = vshrl.u32 %v490_v10, 5  ;;  %v637_v62 = vshrl.u32 %v636_v53, 23 }
 0x131   :  { %v244_v38 = vmax.f32 %v211_v17, 0.0 }
 0x132   :  { %v5828_v12 = vsub.s32 32, %v492_v11  ;;  %v346_v13 = vpop.f32.mrf.mxu1  ;;  %v495_v30 = vshll.u32 %v9992_v29, %v492_v11  ;;  %v498_v34 = vshll.u32 %v9994_v18, %v492_v11  ;;  %v501_v35 = vshll.u32 %v9979_v20, %v492_v11 }
 0x133   :  { %v5832_v15 = vpop.eup %5445  ;;  %v347_v16 = vadd.f32 %v5809_v48, %v346_v13  ;;  %v504_v36 = vshll.u32 %v9986_v22, %v492_v11  ;;  %v507_v41 = vshll.u32 %v9977_v24, %v492_v11  ;;  %vm510_vm2 = vcmp.lt.s32.totalorder %v5858_v37, 1 }
 0x134   :  { %430 = vst.msk [vmem:[%s9968_s10 + $0x10] sm:$0xff] %vm111_vm0, %v5832_v15  ;;  %v496_v19 = vshrl.u32 %v9994_v18, %v5828_v12  ;;  %v499_v21 = vshrl.u32 %v9979_v20, %v5828_v12  ;;  %v502_v23 = vshrl.u32 %v9986_v22, %v5828_v12  ;;  %v505_v25 = vshrl.u32 %v9977_v24, %v5828_v12 }
 0x135   :  { %5447 = vtanh.f32 %v347_v16  ;;  %v508_v32 = vshrl.u32 %v9990_v31, %v5828_v12  ;;  %vm512_vm3 = vcmp.lt.s32.totalorder %v5858_v37, 3  ;;  %vm513_vm4 = vcmp.lt.s32.totalorder %v5858_v37, 4 }
 0x136   :  { %v212_v27 = vpop.f32.mrf.mxu0  ;;  %v5860_v39 = vor.u32 %v496_v19, %v495_v30  ;;  %v5863_v43 = vor.u32 %v499_v21, %v498_v34  ;;  %v5865_v44 = vor.u32 %v502_v23, %v501_v35  ;;  %v506_v45 = vor.u32 %v505_v25, %v504_v36 }
 0x137   :  { %v213_v33 = vadd.f32 %v5760_v40, %v212_v27  ;;  %v509_v47 = vor.u32 %v508_v32, %v507_v41  ;;  %vm511_vm5 = vcmp.lt.s32.totalorder %v5858_v37, 2  ;;  %v5288_v13 = vadd.s32 4294967169, %v637_v62 }
 0x138   :  { %v518_v54 = vsel %vm510_vm2, %v5860_v39, %v5863_v43  ;;  %v519_v55 = vsel %vm513_vm4, %v506_v45, 920167782  ;;  %v522_v56 = vsel %vm510_vm2, %v5863_v43, %v5865_v44  ;;  %v9976_v37 = vand.u32 2147483647, %v5849_v26 }
 0x139   :  { %v245_v42 = vmax.f32 %v213_v33, 0.0  ;;  %v520_v59 = vsel %vm512_vm3, %v5865_v44, %v519_v55  ;;  %v523_v60 = vsel %vm513_vm4, %v509_v47, 1326507024  ;;  %v643_v32 = vadd.s32 1, %v5288_v13 }
 0x13a   :  { %v349_v46 = vpop.f32.mrf.mxu1  ;;  %v524_v61 = vsel %vm512_vm3, %v506_v45, %v523_v60  ;;  %v521_v63 = vsel %vm511_vm5, %v518_v54, %v520_v59  ;;  %v9974_v33 = vmov 0  }
 0x13b   :  { %v5867_v49 = vpop.eup %5447  ;;  %v350_v50 = vadd.f32 %v5809_v48, %v349_v46  ;;  %v259_v51 = vpack.c.bf16 %v245_v42, %v244_v38  ;;  %v525_v0 = vsel %vm511_vm5, %v522_v56, %v524_v61  ;;  %v552_v11 = vshrl.u32 %v521_v63, 16 }
 0x13c   :  { %431 = vst.msk [vmem:[%s9968_s10 + $0x18] sm:$0xff] %vm111_vm0, %v5867_v49  ;;  %v529_v3 = vand.u32 65535, %v525_v0  ;;  %v530_v4 = vshrl.u32 %v525_v0, 16  ;;  %v551_v25 = vand.u32 65535, %v521_v63  ;;  %vm644_vm8 = vcmp.gt.s32.totalorder %v643_v32, 0 }
 0x13d   :  { %5449 = vtanh.f32 %v350_v50  ;;  %388 = vmatmul.bf16.gmra.mxu1 %v259_v51  ;;  %v554_v30 = vmul.u32 %v552_v11, %v527_v1  ;;  %v556_v56 = vmul.u32 %v552_v11, %v528_v2  ;;  %v645_v62 = vsel %vm644_vm8, %v643_v32, 0 }
 0x13e   :  { %v215_v57 = vpop.f32.mrf.mxu0  ;;  %v532_v8 = vmul.u32 %v530_v4, %v527_v1  ;;  %v533_v10 = vmul.u32 %v529_v3, %v528_v2  ;;  %v531_v16 = vmul.u32 %v529_v3, %v527_v1  ;;  %v534_v21 = vmul.u32 %v530_v4, %v528_v2 }
 0x13f   :  { %v216_v14 = vadd.f32 %v5760_v40, %v215_v57  ;;  %v553_v45 = vmul.u32 %v551_v25, %v527_v1  ;;  %v555_v46 = vmul.u32 %v551_v25, %v528_v2  ;;  %v557_v54 = vshll.u32 %v554_v30, 16 }
 0x140   :  { %v535_v17 = vshll.u32 %v532_v8, 16  ;;  %v537_v23 = vshll.u32 %v533_v10, 16  ;;  %v536_v55 = vshrl.u32 %v532_v8, 16  ;;  %v515_v1 = vsel %vm513_vm4, %v5865_v44, 2102212464 }
 0x141   :  { %v246_v35 = vmax.f32 %v216_v14, 0.0  ;;  %vm561_vm9 = vc.u32 %v553_v45, %v557_v54  ;;  %v559_v59 = vshll.u32 %v555_v46, 16  ;;  %v563_v61 = vadd.s32 %v557_v54, %v553_v45 }
 0x142   :  { %v351_v5 = vpop.f32.mrf.mxu1  ;;  %vm539_vm6 = vc.u32 %v531_v16, %v535_v17  ;;  %v541_v28 = vadd.s32 %v535_v17, %v531_v16  ;;  %v562_v60 = vsel %vm561_vm9, 1, %v9974_v33  ;;  %v494_v4 = vshrl.u32 %v9992_v29, %v5828_v12 }
 0x143   :  { %v5905_v6 = vpop.eup %5449  ;;  %v352_v7 = vadd.f32 %v5809_v48, %v351_v5  ;;  %v540_v34 = vsel %vm539_vm6, 1, %v9974_v33  ;;  %v564_v0 = vadd.s32 %v562_v60, %v556_v56  ;;  %vm565_vm10 = vc.u32 %v563_v61, %v559_v59 }
 0x144   :  { %432 = vst.msk [vmem:[%s9968_s10 + $0x20] sm:$0xff] %vm111_vm0, %v5905_v6  ;;  %v542_v38 = vadd.s32 %v540_v34, %v534_v21  ;;  %vm543_vm7 = vc.u32 %v541_v28, %v537_v23  ;;  %v538_v2 = vshrl.u32 %v533_v10, 16  ;;  %v566_v5 = vsel %vm565_vm10, 1, %v9974_v33 }
 0x145   :  { %5451 = vtanh.f32 %v352_v7  ;;  %v544_v42 = vsel %vm543_vm7, 1, %v9974_v33  ;;  %v5933_v7 = vand.u32 31, %v645_v62  ;;  %v558_v11 = vshrl.u32 %v554_v30, 16 }
 0x146   :  { %v217_v19 = vpop.f32.mrf.mxu0  ;;  %v546_v53 = vadd.s32 %v544_v42, %v542_v38  ;;  %v568_v13 = vadd.s32 %v566_v5, %v564_v0  ;;  %v514_v44 = vsel %vm510_vm2, %v494_v4, %v5860_v39  ;;  %v560_v10 = vshrl.u32 %v555_v46, 16 }
 0x147   :  { %v218_v27 = vadd.f32 %v5760_v40, %v217_v19  ;;  %v5951_v21 = vadd.s32 %v563_v61, %v559_v59  ;;  %v5954_v39 = vsub.s32 32, %v5933_v7  ;;  %v5968_v42 = vmul.f32 1e-15, %v5832_v15 }
 0x148   :  { %v547_v63 = vadd.s32 %v546_v53, %v536_v55  ;;  %v569_v17 = vadd.s32 %v568_v13, %v558_v11  ;;  %v662_v46 = vshll.u32 %v9977_v24, %v5933_v7  ;;  %v5986_v53 = vmul.f32 1e-15, %v5867_v49  ;;  %v5428_v11 = vld [vmem:[%s9969_s5 + $0x10] sm:$0xff] }
 0x149   :  { %v247_v36 = vmax.f32 %v218_v27, 0.0  ;;  %v657_v45 = vshrl.u32 %v9986_v22, %v5954_v39  ;;  %v653_v54 = vshll.u32 %v9994_v18, %v5933_v7  ;;  %v656_v55 = vshll.u32 %v9979_v20, %v5933_v7 }
 0x14a   :  { %v354_v41 = vpop.f32.mrf.mxu1  ;;  %v5944_v12 = vadd.s32 %v547_v63, %v538_v2  ;;  %v570_v25 = vadd.s32 %v569_v17, %v560_v10  ;;  %v640_v60 = vand.u32 8388607, %v9976_v37  ;;  %v659_v49 = vshll.u32 %v9986_v22, %v5933_v7 }
 0x14b   :  { %v5917_v47 = vpop.eup %5451  ;;  %v355_v50 = vadd.f32 %v5809_v48, %v354_v41  ;;  %v260_v51 = vpack.c.bf16 %v247_v36, %v246_v35  ;;  %v663_v35 = vshrl.u32 %v9990_v31, %v5954_v39  ;;  %vm480_vm6 = vcmp.lt.s32.totalorder %v5817_v58, 0 }
 0x14c   :  { %433 = vst.msk [vmem:[%s9968_s10 + $0x28] sm:$0xff] %vm111_vm0, %v5917_v47  ;;  %vm573_vm11 = vc.u32 %v5944_v12, %v5951_v21  ;;  %v574_v27 = vadd.s32 1, %v570_v25  ;;  %vm6129_vm9 = vcmp.le.f32.partialorder %v478_v9, 0.7853982 }
 0x14d   :  { %5453 = vtanh.f32 %v355_v50  ;;  %393 = vmatmul.bf16.gmra.mxu1 %v260_v51  ;;  %v5981_v50 = vshrl.u32 %v645_v62, 5  ;;  %v660_v51 = vshrl.u32 %v9977_v24, %v5954_v39  ;;  %v664_v56 = vor.u32 %v663_v35, %v662_v46 }
 0x14e   :  { %v220_v57 = vpop.f32.mrf.mxu0  ;;  %v575_v34 = vsel %vm573_vm11, %v574_v27, %v570_v25  ;;  %v6003_v62 = vor.u32 %v657_v45, %v656_v55 }
 0x14f   :  { %v221_v3 = vadd.f32 %v5760_v40, %v220_v57  ;;  %v516_v40 = vsel %vm512_vm3, %v5863_v43, %v515_v1  ;;  %v5429_v57 = vld [vmem:[%s9969_s5 + $0x18] sm:$0xff]  ;;  %v661_v0 = vor.u32 %v660_v51, %v659_v49  ;;  %vm668_vm12 = vcmp.lt.s32.totalorder %v5981_v50, 4 }
 0x150   :  { %v517_v43 = vsel %vm511_vm5, %v514_v44, %v516_v40  ;;  %4445 = vmatpush.bf16.msra.mxu2 %v5429_v57  ;;  %v791_v1 = vand.u32 2139095040, %v5968_v42  ;;  %v678_v2 = vsel %vm668_vm12, %v664_v56, 1326507024  ;;  %vm665_vm13 = vcmp.lt.s32.totalorder %v5981_v50, 1 }
 0x151   :  { %v248_v19 = vmax.f32 %v221_v3, 0.0  ;;  %v571_v30 = vmul.u32 %v5870_v52, %v517_v43  ;;  %v654_v52 = vshrl.u32 %v9979_v20, %v5954_v39  ;;  %v946_v3 = vand.u32 2139095040, %v5986_v53  ;;  %v5427_v43 = vld [vmem:[%s9969_s5 + $0x8] sm:$0xff] }
 0x152   :  { %v356_v8 = vpop.f32.mrf.mxu1  ;;  %vm667_vm14 = vcmp.lt.s32.totalorder %v5981_v50, 3  ;;  %v792_v17 = vshrl.u32 %v791_v1, 23  ;;  %vm666_vm1 = vcmp.lt.s32.totalorder %v5981_v50, 2  ;;  %v674_v45 = vsel %vm668_vm12, %v661_v0, 920167782 }
 0x153   :  { %v5935_v14 = vpop.eup %5453  ;;  %v357_v16 = vadd.f32 %v5809_v48, %v356_v8  ;;  %v261_v28 = vpack.c.bf16 %v248_v19, %v248_v19  ;;  %v576_v41 = vadd.s32 %v575_v34, %v571_v30  ;;  %v6001_v61 = vor.u32 %v654_v52, %v653_v54 }
 0x154   :  { %434 = vst.msk [vmem:[%s9968_s10 + $0x30] sm:$0xff] %vm111_vm0, %v5935_v14  ;;  %4446 = vmatpush.bf16.msra.mxu2 %v5428_v11  ;;  %v679_v10 = vsel %vm667_vm14, %v661_v0, %v678_v2  ;;  %v651_v19 = vshrl.u32 %v9994_v18, %v5954_v39  ;;  %v5291_v35 = vadd.s32 4294967169, %v792_v17  ;;  %v6063_v57 = vmul.f32 1e-15, %v5917_v47 }
 0x155   :  { %5455 = vtanh.f32 %v357_v16  ;;  %v577_v15 = vadd.s32 536870912, %v576_v41  ;;  %v641_v16 = vor.u32 8388608, %v640_v60  ;;  %v677_v44 = vsel %vm665_vm13, %v6001_v61, %v6003_v62 }
 0x156   :  { %v222_v23 = vpop.f32.mrf.mxu0  ;;  %v680_v34 = vsel %vm666_vm1, %v677_v44, %v679_v10  ;;  %v572_v0 = vadd.s32 %v5951_v21, %v5944_v12  ;;  %v670_v9 = vsel %vm668_vm12, %v6003_v62, 2102212464 }
 0x157   :  { %v5995_v59 = vshrl.u32 %v577_v15, 30  ;;  %v947_v23 = vshrl.u32 %v946_v3, 23  ;;  %v6041_v27 = vshll.u32 %v641_v16, 8  ;;  %v684_v51 = vand.u32 65535, %v680_v34 }
 0x158   :  { %4447 = vmatpush.bf16.msra.mxu2 %v5427_v43  ;;  %v685_v54 = vshrl.u32 %v680_v34, 16  ;;  %v675_v3 = vsel %vm667_vm14, %v6003_v62, %v674_v45  ;;  %v6085_v16 = vadd.s32 1, %v5291_v35  ;;  %v671_v62 = vsel %vm667_vm14, %v6001_v61, %v670_v9 }
 0x159   :  { %v579_v63 = vshll.u32 %v5995_v59, 30  ;;  %v682_v15 = vand.u32 65535, %v6041_v27  ;;  %v5294_v55 = vadd.s32 4294967169, %v947_v23  ;;  %v683_v49 = vshrl.u32 %v6041_v27, 16 }
 0x15a   :  { %v359_v32 = vpop.f32.mrf.mxu1  ;;  %vm799_vm5 = vcmp.gt.s32.totalorder %v6085_v16, 0 }
 0x15b   :  { %v5963_v36 = vpop.eup %5455  ;;  %v360_v38 = vadd.f32 %v5809_v48, %v359_v32  ;;  %v6017_v13 = vsub.s32 %v576_v41, %v579_v63  ;;  %v650_v32 = vshll.u32 %v9992_v29, %v5933_v7  ;;  %v5426_v7 = vld [vmem:[%s9969_s5] sm:$0xff]  ;;  %v6071_v63 = vmul.u32 %v685_v54, %v682_v15 }
 0x15c   :  { %435 = vst.msk [vmem:[%s9968_s10 + $0x38] sm:$0xff] %vm111_vm0, %v5963_v36  ;;  %4448 = vmatpush.bf16.msra.mxu2 %v5426_v7  ;;  %v686_v2 = vmul.u32 %v684_v51, %v682_v15  ;;  %v6087_v44 = vadd.s32 1, %v5294_v55  ;;  %v6102_v45 = vmul.f32 1e-15, %v5963_v36 }
 0x15d   :  { %5457 = vtanh.f32 %v360_v38  ;;  %398 = vmatmul.bf16.gmra.mxu1 %v261_v28  ;;  %vm581_vm15 = vcmp.lt.s32.totalorder %v6017_v13, 0  ;;  %v582_v40 = vsub.s32 0, %v6017_v13  ;;  %v6044_v28 = vmul.f32 1e-15, %v5905_v6 }
 0x15e   :  { %v6050_v52 = vor.u32 %v651_v19, %v650_v32  ;;  %v690_v11 = vshll.u32 %v6071_v63, 16  ;;  %v6093_v19 = vmul.f32 1e-15, %v5935_v14  ;;  %10076 = vst [vmem:[#allocation3_spill] sm:$0xff] %v6102_v45  ;;  %vm954_vm7 = vcmp.gt.s32.totalorder %v6087_v44, 0 }
 0x15f   :  { %v583_v25 = vsel %vm581_vm15, %v582_v40, %v6017_v13  ;;  %v1101_v56 = vand.u32 2139095040, %v6044_v28  ;;  %v1256_v40 = vand.u32 2139095040, %v6063_v57 }
 0x160   :  { %v584_v30 = vclz %v583_v25  ;;  %v673_v47 = vsel %vm665_vm13, %v6050_v52, %v6001_v61  ;;  %vm694_vm3 = vc.u32 %v686_v2, %v690_v11  ;;  %v689_v25 = vmul.u32 %v685_v54, %v683_v49 }
 0x161   :  { %v1102_v12 = vshrl.u32 %v1101_v56, 23  ;;  %v676_v17 = vsel %vm666_vm1, %v673_v47, %v675_v3  ;;  %v1257_v54 = vshrl.u32 %v1256_v40, 23  ;;  %v1411_v55 = vand.u32 2139095040, %v6093_v19 }
 0x162   :  { %v361_v4 = vpop.f32.mrf.mxu1  ;;  %v5286_v41 = vadd.s32 4294967294, %v584_v30  ;;  %v695_v30 = vsel %vm694_vm3, 1, %v9974_v33  ;;  %v1566_v3 = vand.u32 2139095040, %v6102_v45  ;;  %v800_v61 = vsel %vm799_vm5, %v6085_v16, 0 }
 0x163   :  { %v6011_v5 = vpop.eup %5457  ;;  %v362_v8 = vadd.f32 %v5809_v48, %v361_v4  ;;  %v1412_v40 = vshrl.u32 %v1411_v55, 23 }
 0x164   :  { %436 = vst.msk [vmem:[%s9968_s10 + $0x40] sm:$0xff] %vm111_vm0, %v6011_v5  ;;  %vm5287_vm2 = vcmp.lt.s32.totalorder %v5286_v41, 0 }
 0x165   :  { %5459 = vtanh.f32 %v362_v8  ;;  %v587_v60 = vsel %vm5287_vm2, 0, %v5286_v41  ;;  %v6082_v8 = vmul.u32 %v684_v51, %v683_v49  ;;  %v696_v41 = vadd.s32 %v690_v11, %v686_v2 }
 0x166   :  { %v588_v1 = vsub.s32 32, %v587_v60  ;;  %v592_v4 = vsub.s32 4294967266, %v587_v60  ;;  %v589_v43 = vshll.u32 %v6017_v13, %v587_v60  ;;  %v706_v13 = vand.u32 65535, %v676_v17 }
 0x167   :  { %v697_v51 = vadd.s32 %v695_v30, %v689_v25  ;;  %v691_v25 = vshrl.u32 %v6071_v63, 16 }
 0x168   :  { %v590_v21 = vshrl.u32 %v572_v0, %v588_v1  ;;  %v593_v10 = vadd.s32 127, %v592_v4  ;;  %v5297_v0 = vadd.s32 4294967169, %v1102_v12  ;;  %v710_v47 = vmul.u32 %v706_v13, %v683_v49 }
 0x169   :  { %v708_v2 = vmul.u32 %v706_v13, %v682_v15 }
 0x16a   :  { %v364_v38 = vpop.f32.mrf.mxu1  ;;  %v594_v35 = vshll.u32 %v593_v10, 23  ;;  %v591_v14 = vor.u32 %v590_v21, %v589_v43  ;;  %v5300_v21 = vadd.s32 4294967169, %v1257_v54  ;;  %v6116_v10 = vmul.f32 1e-15, %v6011_v5 }
 0x16b   :  { %v6054_v46 = vpop.eup %5459  ;;  %v365_v6 = vadd.f32 %v5809_v48, %v364_v38  ;;  %v692_v38 = vshll.u32 %v6082_v8, 16  ;;  %v1108_v54 = vadd.s32 1, %v5297_v0  ;;  %v715_v0 = vshrl.u32 %v710_v47, 16 }
 0x16c   :  { %437 = vst.msk [vmem:[%s9968_s10 + $0x48] sm:$0xff] %vm111_vm0, %v6054_v46  ;;  %v595_v7 = vor.u32 4788187, %v594_v35  ;;  %v598_v1 = vcvt.s32.f32 %v591_v14  ;;  %v1567_v35 = vshrl.u32 %v1566_v3, 23  ;;  %v1721_v14 = vand.u32 2139095040, %v6116_v10 }
 0x16d   :  { %5461 = vtanh.f32 %v365_v6  ;;  %v707_v6 = vshrl.u32 %v676_v17, 16  ;;  %vm698_vm4 = vc.u32 %v696_v41, %v692_v38  ;;  %10077 = vst [vmem:[#allocation4_spill] sm:$0xff] %v6116_v10  ;;  %v1263_v55 = vadd.s32 1, %v5300_v21 }
 0x16e   :  { %v699_v56 = vsel %vm698_vm4, 1, %v9974_v33  ;;  %v596_v60 = vand.u32 2147483647, %v595_v7  ;;  %v6141_v7 = vmul.f32 1e-15, %v6054_v46  ;;  %v1722_v46 = vshrl.u32 %v1721_v14, 23 }
 0x16f   :  { %v709_v36 = vmul.u32 %v707_v6, %v682_v15  ;;  %v701_v4 = vadd.s32 %v699_v56, %v697_v51  ;;  %v711_v30 = vmul.u32 %v707_v6, %v683_v49  ;;  %v649_v15 = vshrl.u32 %v9992_v29, %v5954_v39 }
 0x170   :  { %v599_v12 = vmul.f32 %v598_v1, %v596_v60  ;;  %v5303_v6 = vadd.s32 4294967169, %v1412_v40  ;;  %10080 = vst [vmem:[#allocation5_spill] sm:$0xff] %v6141_v7  ;;  %v693_v39 = vshrl.u32 %v6082_v8, 16  ;;  %v5306_v1 = vadd.s32 4294967169, %v1567_v35 }
 0x171   :  { %v712_v11 = vshll.u32 %v709_v36, 16  ;;  %v702_v38 = vadd.s32 %v701_v4, %v691_v25  ;;  %v713_v56 = vshrl.u32 %v709_v36, 16  ;;  %v669_v3 = vsel %vm665_vm13, %v649_v15, %v6050_v52 }
 0x172   :  { %v366_v23 = vpop.f32.mrf.mxu1  ;;  %v600_v13 = vxor.u32 2147483648, %v599_v12  ;;  %v1418_v21 = vadd.s32 1, %v5303_v6  ;;  %v1876_v40 = vand.u32 2139095040, %v6141_v7  ;;  %v955_v25 = vsel %vm954_vm7, %v6087_v44, 0 }
 0x173   :  { %v6097_v32 = vpop.eup %5461  ;;  %v367_v34 = vadd.f32 %v5809_v48, %v366_v23  ;;  %vm716_vm8 = vc.u32 %v708_v2, %v712_v11  ;;  %v718_v49 = vadd.s32 %v712_v11, %v708_v2  ;;  %v6151_v4 = vadd.s32 %v702_v38, %v693_v39 }
 0x174   :  { %438 = vst.msk [vmem:[%s9968_s10 + $0x50] sm:$0xff] %vm111_vm0, %v6097_v32  ;;  %v717_v63 = vsel %vm716_vm8, 1, %v9974_v33  ;;  %v601_v8 = vsel %vm480_vm6, %v600_v13, %v599_v12  ;;  %v672_v12 = vsel %vm666_vm1, %v669_v3, %v671_v62  ;;  %vm1109_vm12 = vcmp.gt.s32.totalorder %v1108_v54, 0 }
 0x175   :  { %5463 = vtanh.f32 %v367_v34  ;;  %v714_v34 = vshll.u32 %v710_v47, 16  ;;  %v719_v41 = vadd.s32 %v717_v63, %v711_v30  ;;  %v602_v47 = vsub.s32 4, %v5995_v59 }
 0x176   :  { %v6178_v16 = vsel %vm6129_vm9, %v5817_v58, %v601_v8  ;;  %v1573_v30 = vadd.s32 1, %v5306_v1  ;;  %v5309_v15 = vadd.s32 4294967169, %v1722_v46  ;;  %vm1264_vm13 = vcmp.gt.s32.totalorder %v1263_v55, 0 }
 0x177   :  { %vm720_vm10 = vc.u32 %v718_v49, %v714_v34  ;;  %vm1419_vm14 = vcmp.gt.s32.totalorder %v1418_v21, 0  ;;  %v1877_v50 = vshrl.u32 %v1876_v40, 23  ;;  %v726_v63 = vmul.u32 %v6041_v27, %v672_v12 }
 0x178   :  { %v721_v51 = vsel %vm720_vm10, 1, %v9974_v33  ;;  %v603_v44 = vsel %vm480_vm6, %v602_v47, %v5995_v59  ;;  %v6190_v35 = vmul.f32 %v6178_v16, %v6178_v16  ;;  %v1110_v14 = vsel %vm1109_vm12, %v1108_v54, 0 }
 0x179   :  { %v723_v60 = vadd.s32 %v721_v51, %v719_v41  ;;  %v6192_v41 = vand.u32 31, %v955_v25  ;;  %v1265_v9 = vsel %vm1264_vm13, %v1263_v55, 0  ;;  %v1420_v6 = vsel %vm1419_vm14, %v1418_v21, 0 }
 0x17a   :  { %v369_v17 = vpop.f32.mrf.mxu1  ;;  %vm1574_vm15 = vcmp.gt.s32.totalorder %v1573_v30, 0  ;;  %v1728_v39 = vadd.s32 1, %v5309_v15  ;;  %v605_v59 = vsel %vm6129_vm9, 0, %v603_v44  ;;  %v6199_v3 = vshrl.u32 %v800_v61, 5 }
 0x17b   :  { %v6118_v23 = vpop.eup %5463  ;;  %v370_v43 = vadd.f32 %v5809_v48, %v369_v17  ;;  %v724_v11 = vadd.s32 %v723_v60, %v713_v56  ;;  %v6159_v17 = vadd.s32 %v718_v49, %v714_v34  ;;  %v6183_v49 = vand.u32 31, %v800_v61 }
 0x17c   :  { %439 = vst.msk [vmem:[%s9968_s10 + $0x58] sm:$0xff] %vm111_vm0, %v6118_v23  ;;  %v5312_v56 = vadd.s32 4294967169, %v1877_v50  ;;  %v6204_v54 = vand.u32 31, %v1110_v14  ;;  %v614_v55 = vmul.f32 -0.00019511016, %v6190_v35  ;;  %v6212_v46 = vshrl.u32 %v955_v25, 5 }
 0x17d   :  { %5465 = vtanh.f32 %v370_v43  ;;  %v725_v43 = vadd.s32 %v724_v11, %v715_v0  ;;  %vm728_vm11 = vc.u32 %v6151_v4, %v6159_v17  ;;  %v6202_v62 = vsub.s32 32, %v6183_v49 }
 0x17e   :  { %v1575_v5 = vsel %vm1574_vm15, %v1573_v30, 0  ;;  %v6216_v8 = vand.u32 31, %v1265_v9  ;;  %v6218_v0 = vand.u32 31, %v1420_v6  ;;  %vm1729_vm1 = vcmp.gt.s32.totalorder %v1728_v39, 0 }
 0x17f   :  { %v729_v34 = vadd.s32 1, %v725_v43  ;;  %v622_v11 = vadd.s32 3, %v605_v59  ;;  %v6221_v21 = vsub.s32 32, %v6192_v41  ;;  %v1883_v40 = vadd.s32 1, %v5312_v56 }
 0x180   :  { %10081 = vst [vmem:[#allocation6_spill] sm:$0xff] %v6218_v0  ;;  %v6225_v47 = vshrl.u32 %v1110_v14, 5  ;;  %v6228_v12 = vsub.s32 32, %v6204_v54  ;;  %v615_v25 = vadd.f32 0.008332121, %v614_v55  ;;  %v6232_v30 = vshrl.u32 %v1265_v9, 5 }
 0x181   :  { %v730_v38 = vsel %vm728_vm11, %v729_v34, %v725_v43  ;;  %v6230_v43 = vand.u32 31, %v1575_v5  ;;  %v6234_v15 = vsel %vm1729_vm1, %v1728_v39, 0  ;;  %v6237_v34 = vmul.f32 1e-15, %v6097_v32 }
 0x182   :  { %v371_v2 = vpop.f32.mrf.mxu1  ;;  %v731_v13 = vadd.s32 %v730_v38, %v726_v63  ;;  %v6240_v63 = vsub.s32 32, %v6216_v8  ;;  %v6242_v44 = vshrl.u32 %v1420_v6, 5  ;;  %v6245_v38 = vsub.s32 32, %v6218_v0 }
 0x183   :  { %v6155_v36 = vpop.eup %5465  ;;  %v372_v52 = vadd.f32 %v5809_v48, %v371_v2  ;;  %10082 = vst [vmem:[#allocation7_spill] sm:$0xff] %v6230_v43  ;;  %v6247_v14 = vand.u32 3, %v622_v11  ;;  %vm1884_vm2 = vcmp.gt.s32.totalorder %v1883_v40, 0  ;;  %v6251_v56 = vshrl.u32 %v1575_v5, 5 }
 0x184   :  { %440 = vst.msk [vmem:[%s9968_s10 + $0x60] sm:$0xff] %vm111_vm0, %v6155_v36  ;;  %v732_v1 = vadd.s32 536870912, %v731_v13  ;;  %v6254_v32 = vsub.s32 32, %v6230_v43  ;;  %v616_v6 = vmul.f32 %v615_v25, %v6190_v35  ;;  %v815_v55 = vshrl.u32 %v9977_v24, %v6202_v62 }
 0x185   :  { %5467 = vtanh.f32 %v372_v52  ;;  %v607_v52 = vmul.f32 -0.001358992, %v6190_v35  ;;  %10083 = vst [vmem:[#allocation8_spill] sm:$0xff] %v6237_v34  ;;  %v6269_v5 = vsel %vm1884_vm2, %v1883_v40, 0  ;;  %v812_v25 = vshrl.u32 %v9986_v22, %v6202_v62 }
 0x186   :  { %v6214_v2 = vshrl.u32 %v732_v1, 30  ;;  %10084 = vst [vmem:[#allocation9_spill] sm:$0xff] %v6242_v44  ;;  %v818_v37 = vshrl.u32 %v9990_v31, %v6202_v62  ;;  %v617_v40 = vadd.f32 -0.16666654, %v616_v6  ;;  %v808_v1 = vshll.u32 %v9994_v18, %v6183_v49 }
 0x187   :  { %10085 = vst [vmem:[#allocation10_spill] sm:$0xff] %v6245_v38  ;;  %v608_v9 = vadd.f32 0.041655596, %v607_v52  ;;  %v806_v52 = vshrl.u32 %v9994_v18, %v6202_v62  ;;  %v727_v6 = vadd.s32 %v6159_v17, %v6151_v4  ;;  %vm823_vm5 = vcmp.lt.s32.totalorder %v6199_v3, 4 }
 0x188   :  { %v734_v61 = vshll.u32 %v6214_v2, 30  ;;  %10086 = vst [vmem:[#allocation11_spill] sm:$0xff] %v6251_v56  ;;  %v618_v43 = vmul.f32 %v617_v40, %v6190_v35  ;;  %vm820_vm6 = vcmp.lt.s32.totalorder %v6199_v3, 1  ;;  %vm822_vm7 = vcmp.lt.s32.totalorder %v6199_v3, 3 }
 0x189   :  { %10087 = vst [vmem:[#allocation12_spill] sm:$0xff] %v6254_v32  ;;  %v609_v33 = vmul.f32 %v608_v9, %v6190_v35  ;;  %vm635_vm8 = vcmp.lt.s32.totalorder %v5849_v26, 0  ;;  %vm821_vm9 = vcmp.lt.s32.totalorder %v6199_v3, 2  ;;  %v10092_v40 = vand.u32 2147483647, %v5849_v26 }
 0x18a   :  { %v374_v27 = vpop.f32.mrf.mxu1  ;;  %v735_v50 = vsub.s32 %v731_v13, %v734_v61  ;;  %v6257_v13 = vshrl.u32 %v6234_v15, 5  ;;  %v809_v61 = vshrl.u32 %v9979_v20, %v6202_v62  ;;  %v10089_v20 = vand.u32 2147483647, %v5968_v42 }
 0x18b   :  { %v6194_v51 = vpop.eup %5467  ;;  %v375_v60 = vadd.f32 %v5809_v48, %v374_v27  ;;  %vm6332_vm10 = vcmp.le.f32.partialorder %v10092_v40, 0.7853982  ;;  %vm625_vm12 = vcmp.eq.s32.totalorder %v6247_v14, 0  ;;  %vm628_vm15 = vcmp.eq.s32.totalorder %v6247_v14, 2 }
 0x18c   :  { %441 = vst.msk [vmem:[%s9968_s10 + $0x68] sm:$0xff] %vm111_vm0, %v6194_v51  ;;  %vm736_vm3 = vcmp.lt.s32.totalorder %v735_v50, 0  ;;  %v737_v39 = vsub.s32 0, %v735_v50  ;;  %v795_v9 = vand.u32 8388607, %v10089_v20  ;;  %v6296_v31 = vor.u32 %v809_v61, %v808_v1 }
 0x18d   :  { %5469 = vtanh.f32 %v375_v60  ;;  %10088 = vst [vmem:[#allocation13_spill] sm:$0xff] %v6257_v13  ;;  %v2031_v60 = vand.u32 2139095040, %v6237_v34  ;;  %v10090_v34 = vmov 2131351028   ;;  %vm624_vm1 = vcmp.lt.s32.totalorder %v6247_v14, 2 }
 0x18e   :  { %v738_v59 = vsel %vm736_vm3, %v737_v39, %v735_v50  ;;  %v814_v39 = vshll.u32 %v9986_v22, %v6183_v49  ;;  %v811_v7 = vshll.u32 %v10090_v34, %v6183_v49  ;;  %v10091_v22 = vmov 920167782  }
 0x18f   :  { %v739_v11 = vclz %v738_v59  ;;  %v805_v59 = vshll.u32 %v9992_v29, %v6183_v49  ;;  %v817_v10 = vshll.u32 %v10091_v22, %v6183_v49  ;;  %v610_v29 = vadd.f32 -0.4999988, %v609_v33 }
 0x190   :  { %v816_v13 = vor.u32 %v815_v55, %v814_v39  ;;  %v6298_v56 = vor.u32 %v812_v25, %v811_v7  ;;  %v796_v49 = vor.u32 8388608, %v795_v9  ;;  %v757_v9 = vsub.s32 4, %v6214_v2 }
 0x191   :  { %v5289_v24 = vadd.s32 4294967294, %v739_v11  ;;  %v6294_v11 = vor.u32 %v806_v52, %v805_v59  ;;  %v819_v20 = vor.u32 %v818_v37, %v817_v10  ;;  %v6311_v10 = vshrl.u32 %v2031_v60, 23 }
 0x192   :  { %v829_v4 = vsel %vm823_vm5, %v816_v13, 920167782  ;;  %v832_v1 = vsel %vm820_vm6, %v6296_v31, %v6298_v56  ;;  %v619_v60 = vadd.f32 1.0, %v618_v43  ;;  %v6328_v39 = vshll.u32 %v796_v49, 8 }
 0x193   :  { %v6249_v27 = vpop.eup %5469  ;;  %vm5290_vm4 = vcmp.lt.s32.totalorder %v5289_v24, 0  ;;  %v828_v37 = vsel %vm820_vm6, %v6294_v11, %v6296_v31  ;;  %v830_v17 = vsel %vm822_vm7, %v6298_v56, %v829_v4  ;;  %vm621_vm3 = vweird.f32 %v5817_v58 }
 0x194   :  { %442 = vst.msk [vmem:[%s9968_s10 + $0x70] sm:$0xff] %vm111_vm0, %v6249_v27  ;;  %v742_v18 = vsel %vm5290_vm4, 0, %v5289_v24  ;;  %v831_v61 = vsel %vm821_vm9, %v828_v37, %v830_v17  ;;  %v6343_v37 = vmul.f32 1e-15, %v6118_v23  ;;  %v10096_v17 = vmov 683565275  }
 0x195   :  { %v743_v32 = vsub.s32 32, %v742_v18  ;;  %v747_v55 = vsub.s32 4294967266, %v742_v18  ;;  %v744_v24 = vshll.u32 %v735_v50, %v742_v18  ;;  %v833_v18 = vsel %vm823_vm5, %v819_v20, 1326507024 }
 0x196   :  { %v611_v50 = vmul.f32 %v610_v29, %v6190_v35  ;;  %v834_v25 = vsel %vm822_vm7, %v816_v13, %v833_v18  ;;  %v837_v20 = vand.u32 65535, %v6328_v39  ;;  %v838_v13 = vshrl.u32 %v6328_v39, 16  ;;  %10095 = vst [vmem:[#allocation14_spill] sm:$0xff] %v6343_v37 }
 0x197   :  { %v745_v33 = vshrl.u32 %v727_v6, %v743_v32  ;;  %v748_v7 = vadd.s32 127, %v747_v55  ;;  %v835_v43 = vsel %vm821_vm9, %v832_v1, %v834_v25  ;;  %v376_v6 = vpop.f32.mrf.mxu1  ;;  %v804_v18 = vshrl.u32 %v10096_v17, %v6202_v62 }
 0x198   :  { %v839_v55 = vand.u32 65535, %v835_v43  ;;  %v840_v49 = vshrl.u32 %v835_v43, 16  ;;  %v6350_v43 = vmul.f32 %v619_v60, %v6178_v16  ;;  %v10097_v16 = vmov 0  }
 0x199   :  { %v746_v32 = vor.u32 %v745_v33, %v744_v24  ;;  %v749_v52 = vshll.u32 %v748_v7, 23  ;;  %v377_v24 = vadd.f32 %v5809_v48, %v376_v6  ;;  %v861_v33 = vand.u32 65535, %v831_v61 }
 0x19a   :  { %v862_v7 = vshrl.u32 %v831_v61, 16  ;;  %v843_v1 = vmul.u32 %v839_v55, %v838_v13  ;;  %v758_v48 = vsel %vm635_vm8, %v757_v9, %v6214_v2  ;;  %v841_v61 = vmul.u32 %v839_v55, %v837_v20 }
 0x19b   :  { %v750_v29 = vor.u32 4788187, %v749_v52  ;;  %v753_v35 = vcvt.s32.f32 %v746_v32  ;;  %v842_v32 = vmul.u32 %v840_v49, %v837_v20  ;;  %v6347_v52 = vadd.f32 1.0, %v611_v50 }
 0x19c   :  { %5471 = vtanh.f32 %v377_v24  ;;  %v864_v40 = vmul.u32 %v862_v7, %v837_v20  ;;  %v844_v6 = vmul.u32 %v840_v49, %v838_v13  ;;  %v863_v45 = vmul.u32 %v861_v33, %v837_v20 }
 0x19d   :  { %v751_v4 = vand.u32 2147483647, %v750_v29  ;;  %v845_v23 = vshll.u32 %v842_v32, 16  ;;  %v847_v44 = vshll.u32 %v843_v1, 16  ;;  %v865_v0 = vmul.u32 %v861_v33, %v838_v13 }
 0x19e   :  { %v867_v62 = vshll.u32 %v864_v40, 16  ;;  %v866_v24 = vmul.u32 %v862_v7, %v838_v13  ;;  %v6371_v13 = vld [vmem:[%s9967_s4] ss:$0 sm:$0xff]  ;;  %v824_v59 = vsel %vm820_vm6, %v804_v18, %v6294_v11  ;;  %v960_v58 = vshll.u32 %v10096_v17, %v6192_v41 }
 0x19f   :  { %v754_v25 = vmul.f32 %v753_v35, %v751_v4  ;;  %vm849_vm11 = vc.u32 %v841_v61, %v845_v23  ;;  %v851_v50 = vadd.s32 %v845_v23, %v841_v61  ;;  %v846_v4 = vshrl.u32 %v842_v32, 16  ;;  %v379_v9 = vpop.f32.mrf.mxu1 }
 0x1a0   :  { %v850_v60 = vsel %vm849_vm11, 1, %v10097_v16  ;;  %vm871_vm14 = vc.u32 %v863_v45, %v867_v62  ;;  %v380_v33 = vadd.f32 %v6371_v13, %v379_v9  ;;  %v873_v61 = vadd.s32 %v867_v62, %v863_v45 }
 0x1a1   :  { %v755_v29 = vxor.u32 2147483648, %v754_v25  ;;  %v852_v20 = vadd.s32 %v850_v60, %v844_v6  ;;  %vm853_vm13 = vc.u32 %v851_v50, %v847_v44  ;;  %v872_v32 = vsel %vm871_vm14, 1, %v10097_v16 }
 0x1a2   :  { %v6364_v55 = vpop.eup %5471  ;;  %v854_v7 = vsel %vm853_vm13, 1, %v10097_v16  ;;  %v874_v23 = vadd.s32 %v872_v32, %v866_v24  ;;  %5473 = vtanh.f32 %v380_v33  ;;  %v825_v60 = vsel %vm823_vm5, %v6298_v56, 2102212464 }
 0x1a3   :  { %v756_v35 = vsel %vm635_vm8, %v755_v29, %v754_v25  ;;  %10098 = vst [vmem:[#allocation15_spill] sm:$0xff] %v6364_v55  ;;  %v856_v44 = vadd.s32 %v854_v7, %v852_v20  ;;  %v869_v25 = vshll.u32 %v865_v0, 16  ;;  %v626_v29 = vxor.u32 2147483648, %v6350_v43 }
 0x1a4   :  { %v6362_v2 = vsel %vm6332_vm10, %v5849_v26, %v756_v35  ;;  %443 = vst.msk [vmem:[%s9968_s10 + $0x78] sm:$0xff] %vm111_vm0, %v6364_v55  ;;  %v760_v35 = vsel %vm6332_vm10, 0, %v758_v48  ;;  %v848_v45 = vshrl.u32 %v843_v1, 16  ;;  %v629_v24 = vxor.u32 2147483648, %v6347_v52 }
 0x1a5   :  { %v761_v49 = vmul.f32 %v6362_v2, %v6362_v2  ;;  %v857_v9 = vadd.s32 %v856_v44, %v846_v4  ;;  %vm875_vm2 = vc.u32 %v873_v61, %v869_v25  ;;  %v868_v48 = vshrl.u32 %v864_v40, 16 }
 0x1a6   :  { %v876_v62 = vsel %vm875_vm2, 1, %v10097_v16  ;;  %v826_v56 = vsel %vm822_vm7, %v6296_v31, %v825_v60  ;;  %v5315_v1 = vadd.s32 4294967169, %v6311_v10  ;;  %v777_v44 = vadd.s32 3, %v760_v35 }
 0x1a7   :  { %v762_v6 = vmul.f32 -0.001358992, %v761_v49  ;;  %v769_v50 = vmul.f32 -0.00019511016, %v761_v49  ;;  %v878_v33 = vadd.s32 %v876_v62, %v874_v23  ;;  %v6398_v4 = vadd.s32 %v857_v9, %v848_v45 }
 0x1a8   :  { %v6401_v55 = vpop.eup %5473  ;;  %v627_v11 = vsel %vm625_vm12, %v6347_v52, %v626_v29  ;;  %v6406_v23 = vadd.s32 %v873_v61, %v869_v25  ;;  %v6410_v31 = vmul.f32 1e-15, %v6155_v36  ;;  %v778_v61 = vand.u32 3, %v777_v44 }
 0x1a9   :  { %v763_v20 = vadd.f32 0.041655596, %v762_v6  ;;  %v770_v7 = vadd.f32 0.008332121, %v769_v50  ;;  %v870_v6 = vshrl.u32 %v865_v0, 16  ;;  %v879_v50 = vadd.s32 %v878_v33, %v868_v48  ;;  %444 = vst.msk [vmem:[%s9968_s10 + $0x80] sm:$0xff] %vm111_vm0, %v6401_v55 }
 0x1aa   :  { %10099 = vst [vmem:[#allocation16_spill] sm:$0xff] %v6410_v31  ;;  %v827_v0 = vsel %vm821_vm9, %v824_v59, %v826_v56  ;;  %vm883_vm4 = vc.u32 %v6398_v4, %v6406_v23  ;;  %v10007_v35 = vand.u32 2147483647, %v5986_v53  ;;  %v6427_v60 = vadd.s32 1, %v5315_v1 }
 0x1ab   :  { %v764_v32 = vmul.f32 %v763_v20, %v761_v49  ;;  %v771_v38 = vmul.f32 %v770_v7, %v761_v49  ;;  %v2186_v20 = vand.u32 2139095040, %v6343_v37  ;;  %v880_v10 = vadd.s32 %v879_v50, %v870_v6 }
 0x1ac   :  { %v881_v7 = vmul.u32 %v6328_v39, %v827_v0  ;;  %vm776_vm5 = vweird.f32 %v5849_v26  ;;  %vm779_vm6 = vcmp.lt.s32.totalorder %v778_v61, 2  ;;  %vm780_vm7 = vcmp.eq.s32.totalorder %v778_v61, 0 }
 0x1ad   :  { %v765_v18 = vadd.f32 -0.4999988, %v764_v32  ;;  %v772_v40 = vadd.f32 -0.16666654, %v771_v38  ;;  %v630_v38 = vsel %vm628_vm15, %v629_v24, %v6350_v43  ;;  %v884_v29 = vadd.s32 1, %v880_v10 }
 0x1ae   :  { %v631_v36 = vsel %vm624_vm1, %v627_v11, %v630_v38  ;;  %v2187_v45 = vshrl.u32 %v2186_v20, 23  ;;  %v2341_v43 = vand.u32 2139095040, %v6410_v31  ;;  %vm783_vm8 = vcmp.eq.s32.totalorder %v778_v61, 2 }
 0x1af   :  { %v766_v52 = vmul.f32 %v765_v18, %v761_v49  ;;  %v773_v25 = vmul.f32 %v772_v40, %v761_v49  ;;  %v885_v49 = vsel %vm883_vm4, %v884_v29, %v880_v10  ;;  %v632_v14 = vsel %vm621_vm3, nan, %v631_v36 }
 0x1b0   :  { %v886_v59 = vadd.s32 %v885_v49, %v881_v7  ;;  %v950_v48 = vand.u32 8388607, %v10007_v35  ;;  %v10100_v32 = vmov 2475754826   ;;  %v964_v1 = vshrl.u32 %v10090_v34, %v6221_v21 }
 0x1b1   :  { %v767_v3 = vadd.f32 1.0, %v766_v52  ;;  %v774_v9 = vadd.f32 1.0, %v773_v25  ;;  %v961_v56 = vshrl.u32 %v10100_v32, %v6221_v21  ;;  %v970_v6 = vshrl.u32 %v10091_v22, %v6221_v21 }
 0x1b2   :  { %v887_v33 = vadd.s32 536870912, %v886_v59  ;;  %v10102_v50 = vmov 1326507024   ;;  %v963_v0 = vshll.u32 %v10100_v32, %v6192_v41  ;;  %v966_v38 = vshll.u32 %v10090_v34, %v6192_v41 }
 0x1b3   :  { %v775_v62 = vmul.f32 %v774_v9, %v6362_v2  ;;  %v784_v24 = vxor.u32 2147483648, %v767_v3  ;;  %v10101_v2 = vmov 2102212464   ;;  %v973_v11 = vshrl.u32 %v10102_v50, %v6221_v21 }
 0x1b4   :  { %v967_v44 = vshrl.u32 %v10101_v2, %v6221_v21  ;;  %v6449_v20 = vshrl.u32 %v887_v33, 30  ;;  %v969_v52 = vshll.u32 %v10101_v2, %v6192_v41  ;;  %v972_v25 = vshll.u32 %v10091_v22, %v6192_v41 }
 0x1b5   :  { %v781_v39 = vxor.u32 2147483648, %v775_v62  ;;  %v785_v40 = vsel %vm783_vm8, %v784_v24, %v775_v62  ;;  %v6465_v9 = vor.u32 %v964_v1, %v963_v0  ;;  %v6468_v24 = vand.u32 31, %v6234_v15 }
 0x1b6   :  { %v889_v29 = vshll.u32 %v6449_v20, 30  ;;  %v968_v7 = vor.u32 %v967_v44, %v966_v38  ;;  %v971_v49 = vor.u32 %v970_v6, %v969_v52  ;;  %v974_v62 = vor.u32 %v973_v11, %v972_v25 }
 0x1b7   :  { %v782_v18 = vsel %vm780_vm7, %v767_v3, %v781_v39  ;;  %v6463_v3 = vor.u32 %v961_v56, %v960_v58  ;;  %v6471_v39 = vand.u32 31, %v6269_v5  ;;  %vm2039_vm9 = vcmp.gt.s32.totalorder %v6427_v60, 0 }
 0x1b8   :  { %v786_v10 = vsel %vm779_vm6, %v782_v18, %v785_v40  ;;  %v890_v26 = vsub.s32 %v886_v59, %v889_v29  ;;  %v5318_v41 = vadd.s32 4294967169, %v2187_v45  ;;  %v2342_v33 = vshrl.u32 %v2341_v43, 23 }
 0x1b9   :  { %v787_v36 = vsel %vm776_vm5, nan, %v786_v10  ;;  %10103 = vst [vmem:[#allocation17_spill] sm:$0xff] %v6471_v39  ;;  %v951_v56 = vor.u32 8388608, %v950_v48  ;;  %vm975_vm10 = vcmp.lt.s32.totalorder %v6212_v46, 1  ;;  %vm978_vm12 = vcmp.lt.s32.totalorder %v6212_v46, 4 }
 0x1ba   :  { %v4353_v61 = vpack.c.bf16 %v787_v36, %v632_v14  ;;  %vm891_vm11 = vcmp.lt.s32.totalorder %v890_v26, 0  ;;  %v892_v14 = vsub.s32 0, %v890_v26  ;;  %v983_v15 = vsel %vm975_vm10, %v6463_v3, %v6465_v9 }
 0x1bb   :  { %vm977_vm13 = vcmp.lt.s32.totalorder %v6212_v46, 3  ;;  %v984_v45 = vsel %vm978_vm12, %v971_v49, 920167782  ;;  %v987_v43 = vsel %vm975_vm10, %v6465_v9, %v968_v7  ;;  %v988_v59 = vsel %vm978_vm12, %v974_v62, 1326507024 }
 0x1bc   :  { %5376 = vmatmul.msk.bf16.vlgmr.msra.gmra.mxu2 %vm111_vm0, %v4353_v61  ;;  %v893_v48 = vsel %vm891_vm11, %v892_v14, %v890_v26  ;;  %vm976_vm14 = vcmp.lt.s32.totalorder %v6212_v46, 2  ;;  %v985_v1 = vsel %vm977_vm13, %v968_v7, %v984_v45  ;;  %v989_v58 = vsel %vm977_vm13, %v971_v49, %v988_v59 }
 0x1bd   :  { %v894_v44 = vclz %v893_v48  ;;  %v986_v6 = vsel %vm976_vm14, %v983_v15, %v985_v1  ;;  %v990_v11 = vsel %vm976_vm14, %v987_v43, %v989_v58  ;;  %v6498_v18 = vshll.u32 %v951_v56, 8 }
 0x1be   :  { %v6501_v40 = vsub.s32 32, %v6468_v24  ;;  %v6504_v0 = vshrl.u32 %v6269_v5, 5  ;;  %v6507_v10 = vsub.s32 32, %v6471_v39  ;;  %v994_v38 = vand.u32 65535, %v990_v11 }
 0x1bf   :  { %v5292_v52 = vadd.s32 4294967294, %v894_v44  ;;  %v992_v25 = vand.u32 65535, %v6498_v18  ;;  %v993_v36 = vshrl.u32 %v6498_v18, 16  ;;  %v995_v29 = vshrl.u32 %v990_v11, 16 }
 0x1c0   :  { %10104 = vst [vmem:[#allocation18_spill] sm:$0xff] %v6504_v0  ;;  %v6514_v61 = vsel %vm2039_vm9, %v6427_v60, 0  ;;  %v6516_v49 = vadd.s32 1, %v5318_v41  ;;  %v5321_v62 = vadd.s32 4294967169, %v2342_v33  ;;  %v1017_v5 = vshrl.u32 %v986_v6, 16 }
 0x1c1   :  { %10105 = vst [vmem:[#allocation19_spill] sm:$0xff] %v6507_v10  ;;  %vm5293_vm15 = vcmp.lt.s32.totalorder %v5292_v52, 0  ;;  %v959_v56 = vshrl.u32 %v10096_v17, %v6221_v21  ;;  %v997_v14 = vmul.u32 %v995_v29, %v992_v25  ;;  %v998_v15 = vmul.u32 %v994_v38, %v993_v36 }
 0x1c2   :  { %v882_v45 = vadd.s32 %v6406_v23, %v6398_v4  ;;  %v897_v43 = vsel %vm5293_vm15, 0, %v5292_v52  ;;  %v1016_v59 = vand.u32 65535, %v986_v6  ;;  %v1019_v48 = vmul.u32 %v1017_v5, %v992_v25 }
 0x1c3   :  { %v898_v1 = vsub.s32 32, %v897_v43  ;;  %v902_v58 = vsub.s32 4294967266, %v897_v43  ;;  %v996_v60 = vmul.u32 %v994_v38, %v992_v25  ;;  %v1000_v44 = vshll.u32 %v997_v14, 16 }
 0x1c4   :  { %v899_v41 = vshll.u32 %v890_v26, %v897_v43  ;;  %v980_v33 = vsel %vm978_vm12, %v968_v7, 2102212464  ;;  %v999_v11 = vmul.u32 %v995_v29, %v993_v36  ;;  %v1002_v35 = vshll.u32 %v998_v15, 16 }
 0x1c5   :  { %v900_v31 = vshrl.u32 %v882_v45, %v898_v1  ;;  %v903_v21 = vadd.s32 127, %v902_v58  ;;  %vm1004_vm1 = vc.u32 %v996_v60, %v1000_v44  ;;  %v1006_v37 = vadd.s32 %v1000_v44, %v996_v60 }
 0x1c6   :  { %v1005_v0 = vsel %vm1004_vm1, 1, %v10097_v16  ;;  %v1018_v4 = vmul.u32 %v1016_v59, %v992_v25  ;;  %v1020_v23 = vmul.u32 %v1016_v59, %v993_v36  ;;  %v1022_v6 = vshll.u32 %v1019_v48, 16 }
 0x1c7   :  { %v901_v52 = vor.u32 %v900_v31, %v899_v41  ;;  %v904_v39 = vshll.u32 %v903_v21, 23  ;;  %v1007_v10 = vadd.s32 %v1005_v0, %v999_v11  ;;  %vm1008_vm2 = vc.u32 %v1006_v37, %v1002_v35 }
 0x1c8   :  { %v979_v26 = vsel %vm975_vm10, %v959_v56, %v6463_v3  ;;  %v1009_v7 = vsel %vm1008_vm2, 1, %v10097_v16  ;;  %v1021_v38 = vmul.u32 %v1017_v5, %v993_v36  ;;  %vm1026_vm3 = vc.u32 %v1018_v4, %v1022_v6 }
 0x1c9   :  { %v905_v29 = vor.u32 4788187, %v904_v39  ;;  %v1001_v45 = vshrl.u32 %v997_v14, 16  ;;  %v1011_v43 = vadd.s32 %v1009_v7, %v1007_v10  ;;  %v1027_v1 = vsel %vm1026_vm3, 1, %v10097_v16 }
 0x1ca   :  { %v981_v31 = vsel %vm977_vm13, %v6465_v9, %v980_v33  ;;  %v1024_v25 = vshll.u32 %v1020_v23, 16  ;;  %v1028_v0 = vadd.s32 %v1022_v6, %v1018_v4  ;;  %v1029_v37 = vadd.s32 %v1027_v1, %v1021_v38 }
 0x1cb   :  { %v906_v35 = vand.u32 2147483647, %v905_v29  ;;  %v908_v59 = vcvt.s32.f32 %v901_v52  ;;  %v1012_v58 = vadd.s32 %v1011_v43, %v1001_v45  ;;  %v10016_v3 = vand.u32 2147483647, %v6044_v28 }
 0x1cc   :  { %vm2194_vm4 = vcmp.gt.s32.totalorder %v6516_v49, 0  ;;  %v6535_v36 = vadd.s32 1, %v5321_v62  ;;  %vm790_vm5 = vcmp.lt.s32.totalorder %v5968_v42, 0  ;;  %vm1030_vm6 = vc.u32 %v1028_v0, %v1024_v25 }
 0x1cd   :  { %v6539_v39 = vmul.f32 1e-15, %v6194_v51  ;;  %v909_v10 = vmul.f32 %v908_v59, %v906_v35  ;;  %v1003_v9 = vshrl.u32 %v998_v15, 16  ;;  %v1031_v5 = vsel %vm1030_vm6, 1, %v10097_v16 }
 0x1ce   :  { %v982_v56 = vsel %vm976_vm14, %v979_v26, %v981_v31  ;;  %v1023_v14 = vshrl.u32 %v1019_v48, 16  ;;  %v1025_v60 = vshrl.u32 %v1020_v23, 16  ;;  %v1033_v44 = vadd.s32 %v1031_v5, %v1029_v37 }
 0x1cf   :  { %10106 = vst [vmem:[#allocation20_spill] sm:$0xff] %v6539_v39  ;;  %v910_v41 = vxor.u32 2147483648, %v909_v10  ;;  %v6544_v33 = vadd.s32 %v1012_v58, %v1003_v9  ;;  %v1105_v62 = vand.u32 8388607, %v10016_v3  ;;  %v1119_v51 = vshrl.u32 %v10090_v34, %v6228_v12 }
 0x1d0   :  { %v6550_v11 = vadd.s32 %v1028_v0, %v1024_v25  ;;  %v1034_v15 = vadd.s32 %v1033_v44, %v1023_v14  ;;  %v1115_v21 = vshll.u32 %v10096_v17, %v6204_v54  ;;  %v1122_v46 = vshrl.u32 %v10101_v2, %v6228_v12 }
 0x1d1   :  { %v1116_v48 = vshrl.u32 %v10100_v32, %v6228_v12  ;;  %v1118_v4 = vshll.u32 %v10100_v32, %v6204_v54  ;;  %v1121_v23 = vshll.u32 %v10090_v34, %v6204_v54  ;;  %v1125_v6 = vshrl.u32 %v10091_v22, %v6228_v12 }
 0x1d2   :  { %v1035_v52 = vadd.s32 %v1034_v15, %v1025_v60  ;;  %v1124_v26 = vshll.u32 %v10101_v2, %v6204_v54  ;;  %v1127_v7 = vshll.u32 %v10091_v22, %v6204_v54  ;;  %v1128_v38 = vshrl.u32 %v10102_v50, %v6228_v12 }
 0x1d3   :  { %v911_v29 = vsel %vm790_vm5, %v910_v41, %v909_v10  ;;  %vm1038_vm7 = vc.u32 %v6544_v33, %v6550_v11  ;;  %v1106_v45 = vor.u32 8388608, %v1105_v62  ;;  %v6574_v43 = vor.u32 %v1119_v51, %v1118_v4 }
 0x1d4   :  { %v1039_v1 = vadd.s32 1, %v1035_v52  ;;  %v6576_v31 = vor.u32 %v1122_v46, %v1121_v23  ;;  %v1126_v25 = vor.u32 %v1125_v6, %v1124_v26  ;;  %v1129_v0 = vor.u32 %v1128_v38, %v1127_v7 }
 0x1d5   :  { %v6579_v37 = vand.u32 31, %v6514_v61  ;;  %v2496_v54 = vand.u32 2139095040, %v6539_v39  ;;  %v10108_v35 = vand.u32 2147483647, %v5968_v42  ;;  %v1036_v58 = vmul.u32 %v6498_v18, %v982_v56 }
 0x1d6   :  { %v2195_v10 = vsel %vm2194_vm4, %v6516_v49, 0  ;;  %vm2349_vm9 = vcmp.gt.s32.totalorder %v6535_v36, 0  ;;  %v1040_v9 = vsel %vm1038_vm7, %v1039_v1, %v1035_v52  ;;  %v6593_v5 = vor.u32 %v1116_v48, %v1115_v21 }
 0x1d7   :  { %10107 = vst [vmem:[#allocation21_spill] sm:$0xff] %v6579_v37  ;;  %vm6584_vm8 = vcmp.le.f32.partialorder %v10108_v35, 0.7853982  ;;  %v1041_v60 = vadd.s32 %v1040_v9, %v1036_v58  ;;  %vm1130_vm10 = vcmp.lt.s32.totalorder %v6225_v47, 1  ;;  %vm1133_vm11 = vcmp.lt.s32.totalorder %v6225_v47, 4 }
 0x1d8   :  { %v6598_v14 = vsel %vm6584_vm8, %v5968_v42, %v911_v29  ;;  %v1139_v18 = vsel %vm1133_vm11, %v1126_v25, 920167782  ;;  %v1142_v49 = vsel %vm1130_vm10, %v6574_v43, %v6576_v31  ;;  %v1143_v56 = vsel %vm1133_vm11, %v1129_v0, 1326507024 }
 0x1d9   :  { %v6610_v44 = vshll.u32 %v1106_v45, 8  ;;  %v2497_v41 = vshrl.u32 %v2496_v54, 23  ;;  %v6613_v62 = vmul.f32 1e-15, %v6249_v27  ;;  %v1042_v51 = vadd.s32 536870912, %v1041_v60 }
 0x1da   :  { %vm1132_vm12 = vcmp.lt.s32.totalorder %v6225_v47, 3  ;;  %v912_v15 = vsub.s32 4, %v6449_v20  ;;  %v6619_v21 = vmul.f32 %v6598_v14, %v6598_v14  ;;  %vm1131_vm13 = vcmp.lt.s32.totalorder %v6225_v47, 2 }
 0x1db   :  { %10111 = vst [vmem:[#allocation22_spill] sm:$0xff] %v6613_v62  ;;  %v1144_v46 = vsel %vm1132_vm12, %v1126_v25, %v1143_v56  ;;  %v6624_v48 = vshrl.u32 %v1042_v51, 30  ;;  %v1138_v27 = vsel %vm1130_vm10, %v6593_v5, %v6574_v43  ;;  %v1140_v4 = vsel %vm1132_vm12, %v6576_v31, %v1139_v18 }
 0x1dc   :  { %v1145_v23 = vsel %vm1131_vm13, %v1142_v49, %v1144_v46  ;;  %v1147_v6 = vand.u32 65535, %v6610_v44  ;;  %v1148_v52 = vshrl.u32 %v6610_v44, 16  ;;  %v6638_v38 = vshrl.u32 %v6514_v61, 5 }
 0x1dd   :  { %v1149_v26 = vand.u32 65535, %v1145_v23  ;;  %v1150_v7 = vshrl.u32 %v1145_v23, 16  ;;  %v6641_v29 = vsub.s32 32, %v6579_v37  ;;  %v6643_v45 = vshrl.u32 %v2195_v10, 5 }
 0x1de   :  { %10112 = vst [vmem:[#allocation23_spill] sm:$0xff] %v6638_v38  ;;  %v1044_v1 = vshll.u32 %v6624_v48, 30  ;;  %v6646_v25 = vand.u32 31, %v2195_v10  ;;  %v1141_v0 = vsel %vm1131_vm13, %v1138_v27, %v1140_v4  ;;  %v6655_v61 = vsel %vm2349_vm9, %v6535_v36, 0 }
 0x1df   :  { %10113 = vst [vmem:[#allocation24_spill] sm:$0xff] %v6643_v45  ;;  %v1152_v54 = vmul.u32 %v1150_v7, %v1147_v6  ;;  %v6650_v35 = vmul.u32 %v1149_v26, %v1148_v52  ;;  %v5324_v58 = vadd.s32 4294967169, %v2497_v41  ;;  %v2651_v9 = vand.u32 2139095040, %v6613_v62 }
 0x1e0   :  { %v1045_v18 = vsub.s32 %v1041_v60, %v1044_v1  ;;  %v913_v10 = vsel %vm790_vm5, %v912_v15, %v6449_v20  ;;  %v917_v49 = vmul.f32 -0.001358992, %v6619_v21  ;;  %v1151_v56 = vmul.u32 %v1149_v26, %v1147_v6 }
 0x1e1   :  { %v1155_v51 = vshll.u32 %v1152_v54, 16  ;;  %v924_v46 = vmul.f32 -0.00019511016, %v6619_v21  ;;  %v1172_v4 = vshrl.u32 %v1141_v0, 16  ;;  %v1154_v23 = vmul.u32 %v1150_v7, %v1148_v52 }
 0x1e2   :  { %vm1046_vm14 = vcmp.lt.s32.totalorder %v1045_v18, 0  ;;  %v1047_v27 = vsub.s32 0, %v1045_v18  ;;  %v1157_v36 = vshll.u32 %v6650_v35, 16  ;;  %v915_v60 = vsel %vm6584_vm8, 0, %v913_v10 }
 0x1e3   :  { %vm1159_vm15 = vc.u32 %v1151_v56, %v1155_v51  ;;  %v1161_v41 = vadd.s32 %v1155_v51, %v1151_v56  ;;  %v1171_v15 = vand.u32 65535, %v1141_v0  ;;  %v1114_v26 = vshrl.u32 %v10096_v17, %v6228_v12 }
 0x1e4   :  { %v1048_v1 = vsel %vm1046_vm14, %v1047_v27, %v1045_v18  ;;  %v1160_v20 = vsel %vm1159_vm15, 1, %v10097_v16  ;;  %v918_v39 = vadd.f32 0.041655596, %v917_v49  ;;  %v925_v45 = vadd.f32 0.008332121, %v924_v46 }
 0x1e5   :  { %v1049_v3 = vclz %v1048_v1  ;;  %v1162_v62 = vadd.s32 %v1160_v20, %v1154_v23  ;;  %vm1163_vm1 = vc.u32 %v1161_v41, %v1157_v36  ;;  %v1174_v38 = vmul.u32 %v1172_v4, %v1147_v6 }
 0x1e6   :  { %v1164_v7 = vsel %vm1163_vm1, 1, %v10097_v16  ;;  %v6670_v37 = vadd.s32 1, %v5324_v58  ;;  %v6672_v56 = vshrl.u32 %v2651_v9, 23  ;;  %v932_v59 = vadd.s32 3, %v915_v60 }
 0x1e7   :  { %v5295_v10 = vadd.s32 4294967294, %v1049_v3  ;;  %v1037_v0 = vadd.s32 %v6550_v11, %v6544_v33  ;;  %v1134_v12 = vsel %vm1130_vm10, %v1114_v26, %v6593_v5  ;;  %v1166_v51 = vadd.s32 %v1164_v7, %v1162_v62 }
 0x1e8   :  { %v1175_v27 = vmul.u32 %v1171_v15, %v1148_v52  ;;  %v1135_v49 = vsel %vm1133_vm11, %v6576_v31, 2102212464  ;;  %v1173_v58 = vmul.u32 %v1171_v15, %v1147_v6  ;;  %v1177_v46 = vshll.u32 %v1174_v38, 16 }
 0x1e9   :  { %vm5296_vm2 = vcmp.lt.s32.totalorder %v5295_v10, 0  ;;  %v919_v9 = vmul.f32 %v918_v39, %v6619_v21  ;;  %v926_v3 = vmul.f32 %v925_v45, %v6619_v21  ;;  %v1156_v36 = vshrl.u32 %v1152_v54, 16 }
 0x1ea   :  { %v1052_v23 = vsel %vm5296_vm2, 0, %v5295_v10  ;;  %v1176_v41 = vmul.u32 %v1172_v4, %v1148_v52  ;;  %vm1181_vm3 = vc.u32 %v1173_v58, %v1177_v46  ;;  %v1179_v62 = vshll.u32 %v1175_v27, 16 }
 0x1eb   :  { %v1053_v33 = vsub.s32 32, %v1052_v23  ;;  %v1057_v11 = vsub.s32 4294967266, %v1052_v23  ;;  %v1167_v5 = vadd.s32 %v1166_v51, %v1156_v36  ;;  %v1182_v60 = vsel %vm1181_vm3, 1, %v10097_v16 }
 0x1ec   :  { %v1183_v1 = vadd.s32 %v1177_v46, %v1173_v58  ;;  %v1054_v20 = vshll.u32 %v1045_v18, %v1052_v23  ;;  %v1184_v6 = vadd.s32 %v1182_v60, %v1176_v41  ;;  %v920_v15 = vadd.f32 -0.4999988, %v919_v9  ;;  %v381_v9 = vpop.f32.mrf.mxu1 }
 0x1ed   :  { %v1055_v26 = vshrl.u32 %v1037_v0, %v1053_v33  ;;  %v1058_v31 = vadd.s32 127, %v1057_v11  ;;  %v1136_v39 = vsel %vm1132_vm12, %v6574_v43, %v1135_v49  ;;  %v1158_v45 = vshrl.u32 %v6650_v35, 16 }
 0x1ee   :  { %vm1185_vm4 = vc.u32 %v1183_v1, %v1179_v62  ;;  %v927_v54 = vadd.f32 -0.16666654, %v926_v3  ;;  %vm945_vm5 = vcmp.lt.s32.totalorder %v5986_v53, 0  ;;  %v1178_v18 = vshrl.u32 %v1174_v38, 16 }
 0x1ef   :  { %v1056_v52 = vor.u32 %v1055_v26, %v1054_v20  ;;  %v1059_v4 = vshll.u32 %v1058_v31, 23  ;;  %v1186_v7 = vsel %vm1185_vm4, 1, %v10097_v16  ;;  %v6691_v10 = vadd.s32 %v1167_v5, %v1158_v45 }
 0x1f0   :  { %v1188_v0 = vadd.s32 %v1186_v7, %v1184_v6  ;;  %v6693_v51 = vand.u32 3, %v932_v59  ;;  %v10114_v58 = vand.u32 2147483647, %v5986_v53  ;;  %v1137_v49 = vsel %vm1131_vm13, %v1134_v12, %v1136_v39 }
 0x1f1   :  { %v1060_v35 = vor.u32 4788187, %v1059_v4  ;;  %v921_v46 = vmul.f32 %v920_v15, %v6619_v21  ;;  %v1180_v3 = vshrl.u32 %v1175_v27, 16  ;;  %v6704_v23 = vadd.s32 %v1183_v1, %v1179_v62 }
 0x1f2   :  { %vm6697_vm6 = vcmp.le.f32.partialorder %v10114_v58, 0.7853982  ;;  %v1189_v38 = vadd.s32 %v1188_v0, %v1178_v18  ;;  %v928_v59 = vmul.f32 %v927_v54, %v6619_v21  ;;  %v1063_v33 = vcvt.s32.f32 %v1056_v52 }
 0x1f3   :  { %v1061_v36 = vand.u32 2147483647, %v1060_v35  ;;  %v382_v11 = vadd.f32 %v6371_v13, %v381_v9  ;;  %v1067_v41 = vsub.s32 4, %v6624_v48  ;;  %vm1193_vm7 = vc.u32 %v6691_v10, %v6704_v23 }
 0x1f4   :  { %v1190_v5 = vadd.s32 %v1189_v38, %v1180_v3  ;;  %v10026_v47 = vand.u32 2147483647, %v6063_v57  ;;  %v1274_v27 = vshrl.u32 %v10090_v34, %v6240_v63  ;;  %v1277_v21 = vshrl.u32 %v10101_v2, %v6240_v63  ;;  %v384_v58 = vpop.f32.mrf.mxu1 }
 0x1f5   :  { %v1064_v12 = vmul.f32 %v1063_v33, %v1061_v36  ;;  %5475 = vtanh.f32 %v382_v11  ;;  %v1280_v60 = vshrl.u32 %v10091_v22, %v6240_v63  ;;  %v1282_v1 = vshll.u32 %v10091_v22, %v6216_v8 }
 0x1f6   :  { %v1194_v62 = vadd.s32 1, %v1190_v5  ;;  %v1283_v20 = vshrl.u32 %v10102_v50, %v6240_v63  ;;  %v929_v26 = vadd.f32 1.0, %v928_v59  ;;  %v1191_v6 = vmul.u32 %v6610_v44, %v1137_v49 }
 0x1f7   :  { %v1065_v31 = vxor.u32 2147483648, %v1064_v12  ;;  %v1273_v15 = vshll.u32 %v10100_v32, %v6216_v8  ;;  %v1276_v45 = vshll.u32 %v10090_v34, %v6216_v8  ;;  %v1279_v54 = vshll.u32 %v10101_v2, %v6216_v8 }
 0x1f8   :  { %v1195_v39 = vsel %vm1193_vm7, %v1194_v62, %v1190_v5  ;;  %v1284_v52 = vor.u32 %v1283_v20, %v1282_v1  ;;  %v1068_v7 = vsel %vm945_vm5, %v1067_v41, %v6624_v48  ;;  %v1260_v44 = vand.u32 8388607, %v10026_v47 }
 0x1f9   :  { %v1066_v4 = vsel %vm945_vm5, %v1065_v31, %v1064_v12  ;;  %v1196_v18 = vadd.s32 %v1195_v39, %v1191_v6  ;;  %v6741_v35 = vor.u32 %v1274_v27, %v1273_v15  ;;  %v6743_v49 = vor.u32 %v1277_v21, %v1276_v45 }
 0x1fa   :  { %v6739_v0 = vsel %vm6697_vm6, %v5986_v53, %v1066_v4  ;;  %v1281_v9 = vor.u32 %v1280_v60, %v1279_v54  ;;  %v385_v38 = vadd.f32 %v6371_v13, %v384_v58  ;;  %vm1288_vm8 = vcmp.lt.s32.totalorder %v6232_v30, 4 }
 0x1fb   :  { %v6745_v3 = vpop.eup %5475  ;;  %v1071_v48 = vmul.f32 %v6739_v0, %v6739_v0  ;;  %v1197_v59 = vadd.s32 536870912, %v1196_v18  ;;  %v922_v36 = vadd.f32 1.0, %v921_v46  ;;  %v930_v33 = vmul.f32 %v929_v26, %v6598_v14 }
 0x1fc   :  { %445 = vst.msk [vmem:[%s9968_s10 + $0x88] sm:$0xff] %vm111_vm0, %v6745_v3  ;;  %vm1285_vm9 = vcmp.lt.s32.totalorder %v6232_v30, 1  ;;  %v1298_v11 = vsel %vm1288_vm8, %v1284_v52, 1326507024  ;;  %5477 = vtanh.f32 %v385_v38  ;;  %v1070_v46 = vsel %vm6697_vm6, 0, %v1068_v7 }
 0x1fd   :  { %v1072_v41 = vmul.f32 -0.001358992, %v1071_v48  ;;  %v1079_v5 = vmul.f32 -0.00019511016, %v1071_v48  ;;  %v6760_v13 = vshrl.u32 %v1197_v59, 30  ;;  %v1261_v14 = vor.u32 8388608, %v1260_v44 }
 0x1fe   :  { %vm1287_vm10 = vcmp.lt.s32.totalorder %v6232_v30, 3  ;;  %v1297_v12 = vsel %vm1285_vm9, %v6741_v35, %v6743_v49  ;;  %vm935_vm11 = vcmp.eq.s32.totalorder %v6693_v51, 0  ;;  %v936_v1 = vxor.u32 2147483648, %v930_v33 }
 0x1ff   :  { %v1073_v27 = vadd.f32 0.041655596, %v1072_v41  ;;  %v1080_v21 = vadd.f32 0.008332121, %v1079_v5  ;;  %v1199_v62 = vshll.u32 %v6760_v13, 30  ;;  %v1299_v60 = vsel %vm1287_vm10, %v1281_v9, %v1298_v11 }
 0x200   :  { %v939_v43 = vxor.u32 2147483648, %v922_v36  ;;  %v1271_v20 = vshrl.u32 %v10100_v32, %v6240_v63  ;;  %vm1286_vm12 = vcmp.lt.s32.totalorder %v6232_v30, 2  ;;  %v1087_v15 = vadd.s32 3, %v1070_v46 }
 0x201   :  { %v1074_v26 = vmul.f32 %v1073_v27, %v1071_v48  ;;  %v1081_v31 = vmul.f32 %v1080_v21, %v1071_v48  ;;  %v6775_v6 = vsub.s32 %v1196_v18, %v1199_v62  ;;  %v1270_v39 = vshll.u32 %v10096_v17, %v6216_v8 }
 0x202   :  { %v1300_v45 = vsel %vm1286_vm12, %v1297_v12, %v1299_v60  ;;  %v6782_v54 = vshll.u32 %v1261_v14, 8  ;;  %v6784_v52 = vpop.eup %5477  ;;  %vm934_vm14 = vcmp.lt.s32.totalorder %v6693_v51, 2  ;;  %v937_v44 = vsel %vm935_vm11, %v922_v36, %v936_v1 }
 0x203   :  { %v1075_v4 = vadd.f32 -0.4999988, %v1074_v26  ;;  %v1082_v7 = vadd.f32 -0.16666654, %v1081_v31  ;;  %vm1201_vm13 = vcmp.lt.s32.totalorder %v6775_v6, 0  ;;  %v1202_v18 = vsub.s32 0, %v6775_v6 }
 0x204   :  { %vm938_vm15 = vcmp.eq.s32.totalorder %v6693_v51, 2  ;;  %446 = vst.msk [vmem:[%s9968_s10 + $0x90] sm:$0xff] %vm111_vm0, %v6784_v52  ;;  %v6797_v8 = vor.u32 %v1271_v20, %v1270_v39  ;;  %v1305_v11 = vshrl.u32 %v1300_v45, 16  ;;  %vm931_vm1 = vweird.f32 %v5968_v42 }
 0x205   :  { %v1076_v58 = vmul.f32 %v1075_v4, %v1071_v48  ;;  %v1083_v38 = vmul.f32 %v1082_v7, %v1071_v48  ;;  %v1203_v59 = vsel %vm1201_vm13, %v1202_v18, %v6775_v6  ;;  %vm1086_vm2 = vweird.f32 %v5986_v53 }
 0x206   :  { %v1088_v36 = vand.u32 3, %v1087_v15  ;;  %v1204_v41 = vclz %v1203_v59  ;;  %v1294_v5 = vsel %vm1288_vm8, %v1281_v9, 920167782  ;;  %v940_v46 = vsel %vm938_vm15, %v939_v43, %v930_v33 }
 0x207   :  { %v1077_v14 = vadd.f32 1.0, %v1076_v58  ;;  %v1084_v12 = vadd.f32 1.0, %v1083_v38  ;;  %v1302_v27 = vand.u32 65535, %v6782_v54  ;;  %v941_v48 = vsel %vm934_vm14, %v937_v44, %v940_v46 }
 0x208   :  { %v5298_v21 = vadd.s32 4294967294, %v1204_v41  ;;  %v1293_v62 = vsel %vm1285_vm9, %v6797_v8, %v6741_v35  ;;  %v1304_v60 = vand.u32 65535, %v1300_v45  ;;  %v1295_v9 = vsel %vm1287_vm10, %v6743_v49, %v1294_v5 }
 0x209   :  { %v1085_v1 = vmul.f32 %v1084_v12, %v6739_v0  ;;  %v1094_v20 = vxor.u32 2147483648, %v1077_v14  ;;  %v1307_v33 = vmul.u32 %v1305_v11, %v1302_v27  ;;  %vm1089_vm3 = vcmp.lt.s32.totalorder %v1088_v36, 2 }
 0x20a   :  { %vm1090_vm4 = vcmp.eq.s32.totalorder %v1088_v36, 0  ;;  %vm5299_vm5 = vcmp.lt.s32.totalorder %v5298_v21, 0  ;;  %v1303_v51 = vshrl.u32 %v6782_v54, 16  ;;  %vm1093_vm6 = vcmp.eq.s32.totalorder %v1088_v36, 2 }
 0x20b   :  { %v1091_v43 = vxor.u32 2147483648, %v1085_v1  ;;  %v1192_v26 = vadd.s32 %v6704_v23, %v6691_v10  ;;  %v1207_v31 = vsel %vm5299_vm5, 0, %v5298_v21  ;;  %v1296_v0 = vsel %vm1286_vm12, %v1293_v62, %v1295_v9 }
 0x20c   :  { %v1208_v15 = vsub.s32 32, %v1207_v31  ;;  %v1212_v39 = vsub.s32 4294967266, %v1207_v31  ;;  %v1308_v45 = vmul.u32 %v1304_v60, %v1303_v51  ;;  %v1095_v7 = vsel %vm1093_vm6, %v1094_v20, %v1085_v1 }
 0x20d   :  { %v1092_v4 = vsel %vm1090_vm4, %v1077_v14, %v1091_v43  ;;  %v1306_v18 = vmul.u32 %v1304_v60, %v1302_v27  ;;  %v1310_v44 = vshll.u32 %v1307_v33, 16  ;;  %v1209_v38 = vshll.u32 %v6775_v6, %v1207_v31 }
 0x20e   :  { %v1096_v58 = vsel %vm1089_vm3, %v1092_v4, %v1095_v7  ;;  %v1210_v59 = vshrl.u32 %v1192_v26, %v1208_v15  ;;  %v1213_v41 = vadd.s32 127, %v1212_v39  ;;  %v942_v10 = vsel %vm931_vm1, nan, %v941_v48 }
 0x20f   :  { %v1097_v23 = vsel %vm1086_vm2, nan, %v1096_v58  ;;  %vm1314_vm7 = vc.u32 %v1306_v18, %v1310_v44  ;;  %v1326_v5 = vand.u32 65535, %v1296_v0  ;;  %v1309_v14 = vmul.u32 %v1305_v11, %v1303_v51 }
 0x210   :  { %v4354_v46 = vpack.c.bf16 %v1097_v23, %v942_v10  ;;  %v1211_v12 = vor.u32 %v1210_v59, %v1209_v38  ;;  %v1312_v21 = vshll.u32 %v1308_v45, 16  ;;  %v1214_v62 = vshll.u32 %v1213_v41, 23 }
 0x211   :  { %v1315_v36 = vsel %vm1314_vm7, 1, %v10097_v16  ;;  %v1316_v60 = vadd.s32 %v1310_v44, %v1306_v18  ;;  %v1327_v1 = vshrl.u32 %v1296_v0, 16  ;;  %v6828_v6 = vsub.s32 32, %v6646_v25 }
 0x212   :  { %v6831_v42 = vshrl.u32 %v6655_v61, 5  ;;  %vm2504_vm11 = vcmp.gt.s32.totalorder %v6670_v37, 0  ;;  %5377 = vmatmul.msk.bf16.gmra.mxu2 %vm111_vm0, %v4354_v46  ;;  %v1317_v53 = vadd.s32 %v1315_v36, %v1309_v14  ;;  %v1215_v48 = vor.u32 4788187, %v1214_v62 }
 0x213   :  { %vm1318_vm13 = vc.u32 %v1316_v60, %v1312_v21  ;;  %v1329_v11 = vmul.u32 %v1327_v1, %v1302_v27  ;;  %v1330_v20 = vmul.u32 %v1326_v5, %v1303_v51  ;;  %v5327_v9 = vadd.s32 4294967169, %v6672_v56 }
 0x214   :  { %10117 = vst [vmem:[#allocation25_spill] sm:$0xff] %v6831_v42  ;;  %v1218_v43 = vcvt.s32.f32 %v1211_v12  ;;  %v1311_v26 = vshrl.u32 %v1307_v33, 16  ;;  %v1319_v31 = vsel %vm1318_vm13, 1, %v10097_v16  ;;  %v1216_v15 = vand.u32 2147483647, %v1215_v48 }
 0x215   :  { %v1321_v39 = vadd.s32 %v1319_v31, %v1317_v53  ;;  %v1328_v0 = vmul.u32 %v1326_v5, %v1302_v27  ;;  %v1332_v4 = vshll.u32 %v1329_v11, 16  ;;  %v1269_v7 = vshrl.u32 %v10096_v17, %v6240_v63  ;;  %v10118_v5 = vld [vmem:[#allocation15_spill] sm:$0xff] }
 0x216   :  { %v1290_v18 = vsel %vm1288_vm8, %v6743_v49, 2102212464  ;;  %v1331_v44 = vmul.u32 %v1327_v1, %v1303_v51  ;;  %v1334_v58 = vshll.u32 %v1330_v20, 16  ;;  %v1219_v38 = vmul.f32 %v1218_v43, %v1216_v15  ;;  %v10120_v1 = vld [vmem:[#allocation10_spill] sm:$0xff] }
 0x217   :  { %v1322_v59 = vadd.s32 %v1321_v39, %v1311_v26  ;;  %vm1336_vm14 = vc.u32 %v1328_v0, %v1332_v4  ;;  %v1338_v56 = vadd.s32 %v1332_v4, %v1328_v0  ;;  %v6843_v33 = vand.u32 31, %v6655_v61 }
 0x218   :  { %v1289_v27 = vsel %vm1285_vm9, %v1269_v7, %v6797_v8  ;;  %v1337_v41 = vsel %vm1336_vm14, 1, %v10097_v16  ;;  %v10025_v63 = vand.u32 2147483647, %v6093_v19  ;;  %v1291_v49 = vsel %vm1287_vm10, %v6741_v35, %v1290_v18 }
 0x219   :  { %v1313_v51 = vshrl.u32 %v1308_v45, 16  ;;  %v1339_v10 = vadd.s32 %v1337_v41, %v1331_v44  ;;  %vm1340_vm8 = vc.u32 %v1338_v56, %v1334_v58  ;;  %v6856_v61 = vsel %vm2504_vm11, %v6670_v37, 0 }
 0x21a   :  { %v2658_v23 = vadd.s32 1, %v5327_v9  ;;  %v6859_v46 = vmul.f32 1e-15, %v10118_v5  ;;  %v1341_v8 = vsel %vm1340_vm8, 1, %v10097_v16  ;;  %v1220_v12 = vxor.u32 2147483648, %v1219_v38  ;;  %v10125_v5 = vld [vmem:[#allocation9_spill] sm:$0xff] }
 0x21b   :  { %v6862_v14 = vadd.s32 %v1322_v59, %v1313_v51  ;;  %v1333_v21 = vshrl.u32 %v1329_v11, 16  ;;  %v1343_v62 = vadd.s32 %v1341_v8, %v1339_v10  ;;  %vm1100_vm9 = vcmp.lt.s32.totalorder %v6044_v28, 0  ;;  %v10121_v11 = vld [vmem:[#allocation6_spill] sm:$0xff] }
 0x21c   :  { %10119 = vst [vmem:[#allocation15_spill] sm:$0xff] %v6859_v46  ;;  %v1292_v35 = vsel %vm1286_vm12, %v1289_v27, %v1291_v49  ;;  %v1335_v45 = vshrl.u32 %v1330_v20, 16  ;;  %v1415_v37 = vand.u32 8388607, %v10025_v63  ;;  %v6869_v36 = vadd.s32 %v1338_v56, %v1334_v58 }
 0x21d   :  { %v1344_v60 = vadd.s32 %v1343_v62, %v1333_v21  ;;  %v1426_v53 = vshrl.u32 %v10100_v32, %v10120_v1  ;;  %v1429_v48 = vshrl.u32 %v10090_v34, %v10120_v1  ;;  %v1425_v9 = vshll.u32 %v10096_v17, %v10121_v11 }
 0x21e   :  { %v1432_v30 = vshrl.u32 %v10101_v2, %v10120_v1  ;;  %v1434_v20 = vshll.u32 %v10101_v2, %v10121_v11  ;;  %v1435_v43 = vshrl.u32 %v10091_v22, %v10120_v1  ;;  %v1221_v26 = vsel %vm1100_vm9, %v1220_v12, %v1219_v38 }
 0x21f   :  { %v1345_v31 = vadd.s32 %v1344_v60, %v1335_v45  ;;  %vm1348_vm10 = vc.u32 %v6862_v14, %v6869_v36  ;;  %v1428_v15 = vshll.u32 %v10100_v32, %v10121_v11  ;;  %v1431_v39 = vshll.u32 %v10090_v34, %v10121_v11 }
 0x220   :  { %v1436_v0 = vor.u32 %v1435_v43, %v1434_v20  ;;  %v1437_v4 = vshll.u32 %v10091_v22, %v10121_v11  ;;  %v1438_v7 = vshrl.u32 %v10102_v50, %v10120_v1  ;;  %v10122_v18 = vand.u32 2147483647, %v6044_v28 }
 0x221   :  { %v1349_v58 = vadd.s32 1, %v1345_v31  ;;  %v6901_v38 = vor.u32 %v1426_v53, %v1425_v9  ;;  %v6903_v59 = vor.u32 %v1429_v48, %v1428_v15  ;;  %v1346_v27 = vmul.u32 %v6782_v54, %v1292_v35 }
 0x222   :  { %vm6897_vm12 = vcmp.le.f32.partialorder %v10122_v18, 0.7853982  ;;  %v6911_v41 = vor.u32 %v1432_v30, %v1431_v39  ;;  %v1439_v49 = vor.u32 %v1438_v7, %v1437_v4  ;;  %vm2659_vm15 = vcmp.gt.s32.totalorder %v2658_v23, 0 }
 0x223   :  { %v6908_v56 = vsel %vm6897_vm12, %v6044_v28, %v1221_v26  ;;  %v1350_v51 = vsel %vm1348_vm10, %v1349_v58, %v1345_v31  ;;  %v1416_v10 = vor.u32 8388608, %v1415_v37  ;;  %vm1443_vm1 = vcmp.lt.s32.totalorder %v10125_v5, 4 }
 0x224   :  { %v1222_v8 = vsub.s32 4, %v6760_v13  ;;  %v1351_v12 = vadd.s32 %v1350_v51, %v1346_v27  ;;  %vm1440_vm2 = vcmp.lt.s32.totalorder %v10125_v5, 1  ;;  %v1449_v21 = vsel %vm1443_vm1, %v1436_v0, 920167782 }
 0x225   :  { %v2806_v62 = vand.u32 2139095040, %v6859_v46  ;;  %v6921_v54 = vmul.f32 %v6908_v56, %v6908_v56  ;;  %vm1442_vm3 = vcmp.lt.s32.totalorder %v10125_v5, 3  ;;  %v1448_v35 = vsel %vm1440_vm2, %v6901_v38, %v6903_v59 }
 0x226   :  { %v1352_v45 = vadd.s32 536870912, %v1351_v12  ;;  %v1450_v37 = vsel %vm1442_vm3, %v6911_v41, %v1449_v21  ;;  %v1452_v60 = vsel %vm1440_vm2, %v6903_v59, %v6911_v41  ;;  %v1453_v53 = vsel %vm1443_vm1, %v1439_v49, 1326507024 }
 0x227   :  { %v6938_v48 = vand.u32 31, %v6856_v61  ;;  %vm1441_vm4 = vcmp.lt.s32.totalorder %v10125_v5, 2  ;;  %v1454_v11 = vsel %vm1442_vm3, %v1436_v0, %v1453_v53  ;;  %v6943_v9 = vshll.u32 %v1416_v10, 8 }
 0x228   :  { %v6946_v30 = vsel %vm2659_vm15, %v2658_v23, 0  ;;  %v1223_v20 = vsel %vm1100_vm9, %v1222_v8, %v6760_v13  ;;  %v6951_v43 = vshrl.u32 %v1352_v45, 30  ;;  %v1455_v26 = vsel %vm1441_vm4, %v1452_v60, %v1454_v11 }
 0x229   :  { %10126 = vst [vmem:[#allocation10_spill] sm:$0xff] %v6938_v48  ;;  %v2807_v31 = vshrl.u32 %v2806_v62, 23  ;;  %v6956_v15 = vmul.f32 1e-15, %v6401_v55  ;;  %v1227_v39 = vmul.f32 -0.001358992, %v6921_v54  ;;  %v1451_v0 = vsel %vm1441_vm4, %v1448_v35, %v1450_v37 }
 0x22a   :  { %v1354_v23 = vshll.u32 %v6951_v43, 30  ;;  %v1457_v4 = vand.u32 65535, %v6943_v9  ;;  %v1459_v7 = vand.u32 65535, %v1455_v26  ;;  %v1460_v13 = vshrl.u32 %v1455_v26, 16 }
 0x22b   :  { %10127 = vst [vmem:[#allocation6_spill] sm:$0xff] %v6956_v15  ;;  %v6964_v18 = vsub.s32 32, %v6843_v33  ;;  %v6967_v58 = vshrl.u32 %v6856_v61, 5  ;;  %v1225_v55 = vsel %vm6897_vm12, 0, %v1223_v20  ;;  %v1458_v27 = vshrl.u32 %v6943_v9, 16 }
 0x22c   :  { %v1234_v49 = vmul.f32 -0.00019511016, %v6921_v54  ;;  %v1355_v51 = vsub.s32 %v1351_v12, %v1354_v23  ;;  %v1462_v10 = vmul.u32 %v1460_v13, %v1457_v4  ;;  %v1482_v8 = vshrl.u32 %v1451_v0, 16 }
 0x22d   :  { %10128 = vst [vmem:[#allocation9_spill] sm:$0xff] %v6967_v58  ;;  %v6974_v21 = vsub.s32 32, %v6938_v48  ;;  %v6977_v62 = vand.u32 31, %v6946_v30  ;;  %v5330_v35 = vadd.s32 4294967169, %v2807_v31  ;;  %v1463_v45 = vmul.u32 %v1459_v7, %v1458_v27 }
 0x22e   :  { %v2961_v61 = vand.u32 2139095040, %v6956_v15  ;;  %v1228_v37 = vadd.f32 0.041655596, %v1227_v39  ;;  %vm1356_vm5 = vcmp.lt.s32.totalorder %v1355_v51, 0  ;;  %v1357_v44 = vsub.s32 0, %v1355_v51 }
 0x22f   :  { %10129 = vst [vmem:[#allocation26_spill] sm:$0xff] %v6974_v21  ;;  %v6980_v60 = vadd.s32 3, %v1225_v55  ;;  %v1461_v53 = vmul.u32 %v1459_v7, %v1457_v4  ;;  %v1465_v11 = vshll.u32 %v1462_v10, 16  ;;  %v1481_v12 = vand.u32 65535, %v1451_v0 }
 0x230   :  { %v1235_v20 = vadd.f32 0.008332121, %v1234_v49  ;;  %v1358_v26 = vsel %vm1356_vm5, %v1357_v44, %v1355_v51  ;;  %v1464_v23 = vmul.u32 %v1460_v13, %v1458_v27  ;;  %v1484_v63 = vmul.u32 %v1482_v8, %v1457_v4 }
 0x231   :  { %v1359_v47 = vclz %v1358_v26  ;;  %v1467_v46 = vshll.u32 %v1463_v45, 16  ;;  %vm1469_vm6 = vc.u32 %v1461_v53, %v1465_v11  ;;  %v1471_v58 = vadd.s32 %v1465_v11, %v1461_v53 }
 0x232   :  { %v1229_v31 = vmul.f32 %v1228_v37, %v6921_v54  ;;  %v1347_v39 = vadd.s32 %v6869_v36, %v6862_v14  ;;  %v1424_v55 = vshrl.u32 %v10096_v17, %v10120_v1  ;;  %v1470_v7 = vsel %vm1469_vm6, 1, %v10097_v16 }
 0x233   :  { %v5301_v15 = vadd.s32 4294967294, %v1359_v47  ;;  %v1472_v0 = vadd.s32 %v1470_v7, %v1464_v23  ;;  %vm1473_vm7 = vc.u32 %v1471_v58, %v1467_v46  ;;  %v1485_v49 = vmul.u32 %v1481_v12, %v1458_v27 }
 0x234   :  { %v1236_v13 = vmul.f32 %v1235_v20, %v6921_v54  ;;  %v1474_v44 = vsel %vm1473_vm7, 1, %v10097_v16  ;;  %v1483_v26 = vmul.u32 %v1481_v12, %v1457_v4  ;;  %v1487_v53 = vshll.u32 %v1484_v63, 16 }
 0x235   :  { %vm5302_vm11 = vcmp.lt.s32.totalorder %v5301_v15, 0  ;;  %v1445_v14 = vsel %vm1443_vm1, %v6911_v41, 2102212464  ;;  %v1466_v36 = vshrl.u32 %v1462_v10, 16  ;;  %v1476_v37 = vadd.s32 %v1474_v44, %v1472_v0 }
 0x236   :  { %v1362_v1 = vsel %vm5302_vm11, 0, %v5301_v15  ;;  %v1489_v11 = vshll.u32 %v1485_v49, 16  ;;  %vm1491_vm13 = vc.u32 %v1483_v26, %v1487_v53  ;;  %v1493_v47 = vadd.s32 %v1487_v53, %v1483_v26 }
 0x237   :  { %v1363_v23 = vsub.s32 32, %v1362_v1  ;;  %v1367_v46 = vsub.s32 4294967266, %v1362_v1  ;;  %v1444_v58 = vsel %vm1440_vm2, %v1424_v55, %v6901_v38  ;;  %v1486_v20 = vmul.u32 %v1482_v8, %v1458_v27 }
 0x238   :  { %v1446_v4 = vsel %vm1442_vm3, %v6903_v59, %v1445_v14  ;;  %v1477_v12 = vadd.s32 %v1476_v37, %v1466_v36  ;;  %v1492_v41 = vsel %vm1491_vm13, 1, %v10097_v16  ;;  %vm1495_vm14 = vc.u32 %v1493_v47, %v1489_v11  ;;  %v386_v36 = vpop.f32.mrf.mxu1 }
 0x239   :  { %v1364_v10 = vshll.u32 %v1355_v51, %v1362_v1  ;;  %v1365_v15 = vshrl.u32 %v1347_v39, %v1363_v23  ;;  %v1368_v7 = vadd.s32 127, %v1367_v46  ;;  %v1494_v0 = vadd.s32 %v1492_v41, %v1486_v20  ;;  %v7026_v46 = vld [vmem:[%s9967_s4] ss:$0 sm:$0xff]  ;;  %v10134_v20 = vld [vmem:[#allocation12_spill] sm:$0xff] }
 0x23a   :  { %v1230_v44 = vadd.f32 -0.4999988, %v1229_v31  ;;  %v1237_v26 = vadd.f32 -0.16666654, %v1236_v13  ;;  %v1468_v53 = vshrl.u32 %v1463_v45, 16  ;;  %v1496_v21 = vsel %vm1495_vm14, 1, %v10097_v16 }
 0x23b   :  { %v1366_v48 = vor.u32 %v1365_v15, %v1364_v10  ;;  %v1369_v38 = vshll.u32 %v1368_v7, 23  ;;  %v1488_v27 = vshrl.u32 %v1484_v63, 16  ;;  %v1498_v8 = vadd.s32 %v1496_v21, %v1494_v0  ;;  %v10135_v10 = vld [vmem:[#allocation7_spill] sm:$0xff] }
 0x23c   :  { %v7001_v55 = vadd.s32 1, %v5330_v35  ;;  %v7003_v59 = vshrl.u32 %v2961_v61, 23  ;;  %vm1255_vm8 = vcmp.lt.s32.totalorder %v6063_v57, 0  ;;  %v7006_v14 = vadd.s32 %v1477_v12, %v1468_v53 }
 0x23d   :  { %v10130_v51 = vand.u32 2147483647, %v6063_v57  ;;  %v1370_v45 = vor.u32 4788187, %v1369_v38  ;;  %v1447_v39 = vsel %vm1441_vm4, %v1444_v58, %v1446_v4  ;;  %v1490_v63 = vshrl.u32 %v1485_v49, 16 }
 0x23e   :  { %v1499_v21 = vadd.s32 %v1498_v8, %v1488_v27  ;;  %v1231_v35 = vmul.f32 %v1230_v44, %v6921_v54  ;;  %v1238_v61 = vmul.f32 %v1237_v26, %v6921_v54  ;;  %v7019_v13 = vand.u32 3, %v6980_v60  ;;  %v10133_v60 = vld [vmem:[#allocation3_spill] sm:$0xff] }
 0x23f   :  { %vm7010_vm9 = vcmp.le.f32.partialorder %v10130_v51, 0.7853982  ;;  %v7021_v37 = vadd.s32 %v1493_v47, %v1489_v11  ;;  %v1371_v1 = vand.u32 2147483647, %v1370_v45  ;;  %v1373_v23 = vcvt.s32.f32 %v1366_v48 }
 0x240   :  { %v387_v5 = vadd.f32 %v7026_v46, %v386_v36  ;;  %v1500_v49 = vadd.s32 %v1499_v21, %v1490_v63  ;;  %v1377_v58 = vsub.s32 4, %v6951_v43  ;;  %v1501_v54 = vmul.u32 %v6943_v9, %v1447_v39 }
 0x241   :  { %vm1503_vm10 = vc.u32 %v7006_v14, %v7021_v37  ;;  %v10035_v11 = vand.u32 2147483647, %v10133_v60  ;;  %v1374_v47 = vmul.f32 %v1373_v23, %v1371_v1  ;;  %v1584_v4 = vshrl.u32 %v10090_v34, %v10134_v20 }
 0x242   :  { %5479 = vtanh.f32 %v387_v5  ;;  %v1504_v48 = vadd.s32 1, %v1500_v49  ;;  %v1587_v12 = vshrl.u32 %v10101_v2, %v10134_v20  ;;  %v1590_v41 = vshrl.u32 %v10091_v22, %v10134_v20 }
 0x243   :  { %v1592_v9 = vshll.u32 %v10091_v22, %v10135_v10  ;;  %v1593_v15 = vshrl.u32 %v10102_v50, %v10134_v20  ;;  %v1239_v7 = vadd.f32 1.0, %v1238_v61  ;;  %v1375_v0 = vxor.u32 2147483648, %v1374_v47  ;;  %v389_v61 = vpop.f32.mrf.mxu1 }
 0x244   :  { %v1505_v44 = vsel %vm1503_vm10, %v1504_v48, %v1500_v49  ;;  %v1583_v26 = vshll.u32 %v10100_v32, %v10135_v10  ;;  %v1586_v38 = vshll.u32 %v10090_v34, %v10135_v10  ;;  %v1589_v27 = vshll.u32 %v10101_v2, %v10135_v10 }
 0x245   :  { %v1506_v53 = vadd.s32 %v1505_v44, %v1501_v54  ;;  %v1594_v8 = vor.u32 %v1593_v15, %v1592_v9  ;;  %v1376_v51 = vsel %vm1255_vm8, %v1375_v0, %v1374_v47  ;;  %v1378_v45 = vsel %vm1255_vm8, %v1377_v58, %v6951_v43  ;;  %v10136_v54 = vld [vmem:[#allocation11_spill] sm:$0xff] }
 0x246   :  { %v1570_v39 = vand.u32 8388607, %v10035_v11  ;;  %v7057_v63 = vor.u32 %v1584_v4, %v1583_v26  ;;  %v7062_v21 = vsel %vm7010_vm9, %v6063_v57, %v1376_v51  ;;  %v7064_v1 = vor.u32 %v1587_v12, %v1586_v38 }
 0x247   :  { %v1507_v36 = vadd.s32 536870912, %v1506_v53  ;;  %v1591_v23 = vor.u32 %v1590_v41, %v1589_v27  ;;  %v1240_v49 = vmul.f32 %v1239_v7, %v6908_v56  ;;  %v1381_v43 = vmul.f32 %v7062_v21, %v7062_v21 }
 0x248   :  { %v7066_v5 = vpop.eup %5479  ;;  %v390_v58 = vadd.f32 %v7026_v46, %v389_v61  ;;  %vm1598_vm12 = vcmp.lt.s32.totalorder %v10136_v54, 4  ;;  %v1380_v47 = vsel %vm7010_vm9, 0, %v1378_v45  ;;  %vm1595_vm15 = vcmp.lt.s32.totalorder %v10136_v54, 1 }
 0x249   :  { %447 = vst.msk [vmem:[%s9968_s10 + $0x98] sm:$0xff] %vm111_vm0, %v7066_v5  ;;  %v7080_v48 = vshrl.u32 %v1507_v36, 30  ;;  %v1608_v56 = vsel %vm1598_vm12, %v1594_v8, 1326507024  ;;  %v1382_v4 = vmul.f32 -0.001358992, %v1381_v43  ;;  %v1607_v9 = vsel %vm1595_vm15, %v7057_v63, %v7064_v1 }
 0x24a   :  { %v1389_v12 = vmul.f32 -0.00019511016, %v1381_v43  ;;  %5481 = vtanh.f32 %v390_v58  ;;  %vm1597_vm1 = vcmp.lt.s32.totalorder %v10136_v54, 3  ;;  %v1571_v41 = vor.u32 8388608, %v1570_v39 }
 0x24b   :  { %v1509_v31 = vshll.u32 %v7080_v48, 30  ;;  %v1609_v15 = vsel %vm1597_vm1, %v1591_v23, %v1608_v56  ;;  %v1232_v7 = vadd.f32 1.0, %v1231_v35  ;;  %vm1244_vm2 = vcmp.lt.s32.totalorder %v7019_v13, 2 }
 0x24c   :  { %v1383_v0 = vadd.f32 0.041655596, %v1382_v4  ;;  %v1390_v44 = vadd.f32 0.008332121, %v1389_v12  ;;  %v1246_v26 = vxor.u32 2147483648, %v1240_v49  ;;  %v1581_v27 = vshrl.u32 %v10100_v32, %v10134_v20 }
 0x24d   :  { %v7094_v38 = vsub.s32 %v1506_v53, %v1509_v31  ;;  %vm1596_vm3 = vcmp.lt.s32.totalorder %v10136_v54, 2  ;;  %v1397_v45 = vadd.s32 3, %v1380_v47  ;;  %v1580_v61 = vshll.u32 %v10096_v17, %v10135_v10 }
 0x24e   :  { %v1384_v8 = vmul.f32 %v1383_v0, %v1381_v43  ;;  %v1391_v51 = vmul.f32 %v1390_v44, %v1381_v43  ;;  %v1610_v39 = vsel %vm1596_vm3, %v1607_v9, %v1609_v15  ;;  %v7105_v53 = vshll.u32 %v1571_v41, 8 }
 0x24f   :  { %vm1511_vm4 = vcmp.lt.s32.totalorder %v7094_v38, 0  ;;  %v1512_v35 = vsub.s32 0, %v7094_v38  ;;  %vm1245_vm5 = vcmp.eq.s32.totalorder %v7019_v13, 0  ;;  %v1249_v58 = vxor.u32 2147483648, %v1232_v7 }
 0x250   :  { %v7107_v36 = vpop.eup %5481  ;;  %v1385_v56 = vadd.f32 -0.4999988, %v1384_v8  ;;  %v1392_v4 = vadd.f32 -0.16666654, %v1391_v51  ;;  %vm1248_vm6 = vcmp.eq.s32.totalorder %v7019_v13, 2  ;;  %v7117_v10 = vor.u32 %v1581_v27, %v1580_v61 }
 0x251   :  { %448 = vst.msk [vmem:[%s9968_s10 + $0xa0] sm:$0xff] %vm111_vm0, %v7107_v36  ;;  %v1513_v47 = vsel %vm1511_vm4, %v1512_v35, %v7094_v38  ;;  %v1615_v12 = vshrl.u32 %v1610_v39, 16  ;;  %v1247_v31 = vsel %vm1245_vm5, %v1232_v7, %v1246_v26  ;;  %vm1241_vm7 = vweird.f32 %v6044_v28 }
 0x252   :  { %v1386_v41 = vmul.f32 %v1385_v56, %v1381_v43  ;;  %v1393_v9 = vmul.f32 %v1392_v4, %v1381_v43  ;;  %v1514_v15 = vclz %v1513_v47  ;;  %vm1396_vm11 = vweird.f32 %v6063_v57 }
 0x253   :  { %v1398_v0 = vand.u32 3, %v1397_v45  ;;  %v1604_v44 = vsel %vm1598_vm12, %v1591_v23, 920167782  ;;  %v7124_v8 = vand.u32 65535, %v7105_v53  ;;  %v1250_v51 = vsel %vm1248_vm6, %v1249_v58, %v1240_v49 }
 0x254   :  { %v1387_v35 = vadd.f32 1.0, %v1386_v41  ;;  %v1394_v27 = vadd.f32 1.0, %v1393_v9  ;;  %v5304_v61 = vadd.s32 4294967294, %v1514_v15  ;;  %v1251_v7 = vsel %vm1244_vm2, %v1247_v31, %v1250_v51 }
 0x255   :  { %v1603_v43 = vsel %vm1595_vm15, %v7117_v10, %v7057_v63  ;;  %v1614_v26 = vand.u32 65535, %v1610_v39  ;;  %v7133_v45 = vmul.u32 %v1615_v12, %v7124_v8  ;;  %v1605_v49 = vsel %vm1597_vm1, %v7064_v1, %v1604_v44 }
 0x256   :  { %v1395_v23 = vmul.f32 %v1394_v27, %v7062_v21  ;;  %v1404_v56 = vxor.u32 2147483648, %v1387_v35  ;;  %vm5305_vm13 = vcmp.lt.s32.totalorder %v5304_v61, 0  ;;  %vm1399_vm14 = vcmp.lt.s32.totalorder %v1398_v0, 2 }
 0x257   :  { %vm1400_vm8 = vcmp.eq.s32.totalorder %v1398_v0, 0  ;;  %vm1403_vm9 = vcmp.eq.s32.totalorder %v1398_v0, 2  ;;  %v1517_v13 = vsel %vm5305_vm13, 0, %v5304_v61  ;;  %v1502_v4 = vadd.s32 %v7021_v37, %v7006_v14 }
 0x258   :  { %v1401_v58 = vxor.u32 2147483648, %v1395_v23  ;;  %v1518_v39 = vsub.s32 32, %v1517_v13  ;;  %v1613_v47 = vshrl.u32 %v7105_v53, 16  ;;  %v1522_v31 = vsub.s32 4294967266, %v1517_v13 }
 0x259   :  { %v1606_v21 = vsel %vm1596_vm3, %v1603_v43, %v1605_v49  ;;  %v1616_v41 = vmul.u32 %v1614_v26, %v7124_v8  ;;  %v1620_v9 = vshll.u32 %v7133_v45, 16  ;;  %v1405_v44 = vsel %vm1403_vm9, %v1404_v56, %v1395_v23 }
 0x25a   :  { %v1402_v15 = vsel %vm1400_vm8, %v1387_v35, %v1401_v58  ;;  %v1520_v51 = vshrl.u32 %v1502_v4, %v1518_v39  ;;  %v7146_v27 = vmul.u32 %v1614_v26, %v1613_v47  ;;  %v1519_v14 = vshll.u32 %v7094_v38, %v1517_v13 }
 0x25b   :  { %v1406_v61 = vsel %vm1399_vm14, %v1402_v15, %v1405_v44  ;;  %v1523_v37 = vadd.s32 127, %v1522_v31  ;;  %vm1624_vm10 = vc.u32 %v1616_v41, %v1620_v9  ;;  %v1252_v11 = vsel %vm1241_vm7, nan, %v1251_v7 }
 0x25c   :  { %v1407_v43 = vsel %vm1396_vm11, nan, %v1406_v61  ;;  %v1619_v49 = vmul.u32 %v1615_v12, %v1613_v47  ;;  %v1625_v42 = vsel %vm1624_vm10, 1, %v10097_v16  ;;  %v5333_v35 = vadd.s32 4294967169, %v7003_v59 }
 0x25d   :  { %v4355_v23 = vpack.c.bf16 %v1407_v43, %v1252_v11  ;;  %v1521_v26 = vor.u32 %v1520_v51, %v1519_v14  ;;  %v1524_v56 = vshll.u32 %v1523_v37, 23  ;;  %v1622_v0 = vshll.u32 %v7146_v27, 16 }
 0x25e   :  { %v1626_v58 = vadd.s32 %v1620_v9, %v1616_v41  ;;  %v1627_v38 = vadd.s32 %v1625_v42, %v1619_v49  ;;  %v1636_v13 = vand.u32 65535, %v1606_v21  ;;  %v7158_v4 = vshrl.u32 %v6946_v30, 5  ;;  %v10138_v49 = vld [vmem:[#allocation4_spill] sm:$0xff] }
 0x25f   :  { %vm2814_vm2 = vcmp.gt.s32.totalorder %v7001_v55, 0  ;;  %5378 = vmatmul.msk.bf16.gmra.mxu2 %vm111_vm0, %v4355_v23  ;;  %v1525_v28 = vor.u32 4788187, %v1524_v56  ;;  %v1637_v57 = vshrl.u32 %v1606_v21, 16  ;;  %v1579_v59 = vshrl.u32 %v10096_v17, %v10134_v20 }
 0x260   :  { %10137 = vst [vmem:[#allocation3_spill] sm:$0xff] %v7158_v4  ;;  %v1600_v11 = vsel %vm1598_vm12, %v7064_v1, 2102212464  ;;  %vm1628_vm4 = vc.u32 %v1626_v58, %v1622_v0  ;;  %v1640_v12 = vmul.u32 %v1636_v13, %v1613_v47  ;;  %v1528_v7 = vcvt.s32.f32 %v1521_v26 }
 0x261   :  { %v1526_v42 = vand.u32 2147483647, %v1525_v28  ;;  %v1629_v30 = vsel %vm1628_vm4, 1, %v10097_v16  ;;  %v1639_v39 = vmul.u32 %v1637_v57, %v7124_v8  ;;  %v7170_v31 = vsub.s32 32, %v6977_v62 }
 0x262   :  { %v7173_v21 = vsel %vm2814_vm2, %v7001_v55, 0  ;;  %v7175_v41 = vadd.s32 1, %v5333_v35  ;;  %v1631_v20 = vadd.s32 %v1629_v30, %v1627_v38  ;;  %v1599_v1 = vsel %vm1595_vm15, %v1579_v59, %v7117_v10 }
 0x263   :  { %v1529_v9 = vmul.f32 %v1528_v7, %v1526_v42  ;;  %v1638_v15 = vmul.u32 %v1636_v13, %v7124_v8  ;;  %v1642_v44 = vshll.u32 %v1639_v39, 16  ;;  %v1601_v51 = vsel %vm1597_vm1, %v7057_v63, %v1600_v11 }
 0x264   :  { %v1621_v61 = vshrl.u32 %v7133_v45, 16  ;;  %v1641_v14 = vmul.u32 %v1637_v57, %v1613_v47  ;;  %v1644_v55 = vshll.u32 %v1640_v12, 16  ;;  %v10037_v35 = vand.u32 2147483647, %v10138_v49 }
 0x265   :  { %v1530_v37 = vxor.u32 2147483648, %v1529_v9  ;;  %vm1646_vm12 = vc.u32 %v1638_v15, %v1642_v44  ;;  %v1648_v43 = vadd.s32 %v1642_v44, %v1638_v15  ;;  %v7187_v23 = vand.u32 31, %v7173_v21 }
 0x266   :  { %v7190_v10 = vmul.f32 1e-15, %v6745_v3  ;;  %v1632_v8 = vadd.s32 %v1631_v20, %v1621_v61  ;;  %v1647_v26 = vsel %vm1646_vm12, 1, %v10097_v16  ;;  %vm2969_vm15 = vcmp.gt.s32.totalorder %v7175_v41, 0 }
 0x267   :  { %10139 = vst [vmem:[#allocation12_spill] sm:$0xff] %v7187_v23  ;;  %v10141_v63 = vand.u32 2147483647, %v6093_v19  ;;  %vm1410_vm5 = vcmp.lt.s32.totalorder %v6093_v19, 0  ;;  %v1649_v47 = vadd.s32 %v1647_v26, %v1641_v14  ;;  %vm1650_vm6 = vc.u32 %v1648_v43, %v1644_v55 }
 0x268   :  { %10140 = vst [vmem:[#allocation7_spill] sm:$0xff] %v7190_v10  ;;  %v1531_v56 = vsel %vm1410_vm5, %v1530_v37, %v1529_v9  ;;  %v1602_v3 = vsel %vm1596_vm3, %v1599_v1, %v1601_v51  ;;  %v1623_v0 = vshrl.u32 %v7146_v27, 16  ;;  %v1651_v58 = vsel %vm1650_vm6, 1, %v10097_v16 }
 0x269   :  { %vm7196_vm1 = vcmp.le.f32.partialorder %v10141_v63, 0.7853982  ;;  %v1643_v38 = vshrl.u32 %v1639_v39, 16  ;;  %v1645_v13 = vshrl.u32 %v1640_v12, 16  ;;  %v1653_v28 = vadd.s32 %v1651_v58, %v1649_v47 }
 0x26a   :  { %v1725_v57 = vand.u32 8388607, %v10037_v35  ;;  %v7209_v59 = vadd.s32 %v1632_v8, %v1623_v0  ;;  %v1736_v11 = vshrl.u32 %v10100_v32, %v6501_v40  ;;  %v1739_v42 = vshrl.u32 %v10090_v34, %v6501_v40  ;;  %v10145_v0 = vld [vmem:[#allocation13_spill] sm:$0xff] }
 0x26b   :  { %v1742_v54 = vshrl.u32 %v10101_v2, %v6501_v40  ;;  %v7220_v27 = vsel %vm7196_vm1, %v6093_v19, %v1531_v56  ;;  %v1654_v12 = vadd.s32 %v1653_v28, %v1643_v38  ;;  %v1744_v7 = vshll.u32 %v10101_v2, %v6468_v24 }
 0x26c   :  { %v1745_v30 = vshrl.u32 %v10091_v22, %v6501_v40  ;;  %v7226_v39 = vadd.s32 %v1648_v43, %v1644_v55  ;;  %v1738_v20 = vshll.u32 %v10100_v32, %v6468_v24  ;;  %v1741_v9 = vshll.u32 %v10090_v34, %v6468_v24 }
 0x26d   :  { %v1748_v1 = vshrl.u32 %v10102_v50, %v6501_v40  ;;  %v1655_v15 = vadd.s32 %v1654_v12, %v1645_v13  ;;  %v1735_v44 = vshll.u32 %v10096_v17, %v6468_v24  ;;  %v1747_v61 = vshll.u32 %v10091_v22, %v6468_v24 }
 0x26e   :  { %v1746_v51 = vor.u32 %v1745_v30, %v1744_v7  ;;  %v7240_v14 = vmul.f32 %v7220_v27, %v7220_v27  ;;  %vm1658_vm3 = vc.u32 %v7209_v59, %v7226_v39  ;;  %v7244_v55 = vor.u32 %v1739_v42, %v1738_v20 }
 0x26f   :  { %v7246_v37 = vor.u32 %v1742_v54, %v1741_v9  ;;  %v3116_v43 = vand.u32 2139095040, %v7190_v10  ;;  %v1659_v8 = vadd.s32 1, %v1655_v15  ;;  %v7249_v26 = vor.u32 %v1736_v11, %v1735_v44 }
 0x270   :  { %v1749_v63 = vor.u32 %v1748_v1, %v1747_v61  ;;  %v7252_v47 = vmul.f32 1e-15, %v6784_v52  ;;  %v1656_v24 = vmul.u32 %v7105_v53, %v1602_v3  ;;  %v1726_v56 = vor.u32 8388608, %v1725_v57 }
 0x271   :  { %vm1753_vm7 = vcmp.lt.s32.totalorder %v10145_v0, 4  ;;  %v1532_v58 = vsub.s32 4, %v7080_v48  ;;  %v1660_v38 = vsel %vm1658_vm3, %v1659_v8, %v1655_v15  ;;  %vm1750_vm11 = vcmp.lt.s32.totalorder %v10145_v0, 1 }
 0x272   :  { %10144 = vst [vmem:[#allocation11_spill] sm:$0xff] %v7252_v47  ;;  %v1759_v13 = vsel %vm1753_vm7, %v1746_v51, 920167782  ;;  %v7263_v28 = vsel %vm2969_vm15, %v7175_v41, 0  ;;  %v1544_v52 = vmul.f32 -0.00019511016, %v7240_v14  ;;  %v1661_v11 = vadd.s32 %v1660_v38, %v1656_v24 }
 0x273   :  { %v1762_v53 = vsel %vm1750_vm11, %v7244_v55, %v7246_v37  ;;  %vm1751_vm13 = vcmp.lt.s32.totalorder %v10145_v0, 2  ;;  %vm1752_vm14 = vcmp.lt.s32.totalorder %v10145_v0, 3  ;;  %v1758_v3 = vsel %vm1750_vm11, %v7249_v26, %v7244_v55 }
 0x274   :  { %v1763_v41 = vsel %vm1753_vm7, %v1749_v63, 1326507024  ;;  %v1662_v57 = vadd.s32 536870912, %v1661_v11  ;;  %v1760_v42 = vsel %vm1752_vm14, %v7246_v37, %v1759_v13  ;;  %v7283_v12 = vshll.u32 %v1726_v56, 8 }
 0x275   :  { %v1764_v54 = vsel %vm1752_vm14, %v1746_v51, %v1763_v41  ;;  %v3117_v7 = vshrl.u32 %v3116_v43, 23  ;;  %v3271_v30 = vand.u32 2139095040, %v7252_v47  ;;  %v1533_v20 = vsel %vm1410_vm5, %v1532_v58, %v7080_v48 }
 0x276   :  { %v1765_v9 = vsel %vm1751_vm13, %v1762_v53, %v1764_v54  ;;  %v7292_v1 = vshrl.u32 %v7173_v21, 5  ;;  %v7295_v15 = vsub.s32 32, %v7187_v23  ;;  %v7297_v44 = vshrl.u32 %v1662_v57, 30 }
 0x277   :  { %v1769_v51 = vand.u32 65535, %v1765_v9  ;;  %v1761_v61 = vsel %vm1751_vm13, %v1758_v3, %v1760_v42  ;;  %v1767_v43 = vand.u32 65535, %v7283_v12  ;;  %v1768_v8 = vshrl.u32 %v7283_v12, 16 }
 0x278   :  { %10146 = vst [vmem:[#allocation4_spill] sm:$0xff] %v7292_v1  ;;  %v1770_v48 = vshrl.u32 %v1765_v9, 16  ;;  %v7304_v63 = vand.u32 31, %v7263_v28  ;;  %v1535_v21 = vsel %vm7196_vm1, 0, %v1533_v20  ;;  %v1545_v24 = vadd.f32 0.008332121, %v1544_v52 }
 0x279   :  { %10147 = vst [vmem:[#allocation13_spill] sm:$0xff] %v7295_v15  ;;  %v1664_v56 = vshll.u32 %v7297_v44, 30  ;;  %v7309_v58 = vadd.s32 4294967169, %v3117_v7  ;;  %v7311_v38 = vshrl.u32 %v3271_v30, 23  ;;  %v1773_v53 = vmul.u32 %v1769_v51, %v1768_v8 }
 0x27a   :  { %10148 = vst [vmem:[#allocation27_spill] sm:$0xff] %v7304_v63  ;;  %v1772_v13 = vmul.u32 %v1770_v48, %v1767_v43  ;;  %v7314_v3 = vmul.f32 1e-15, %v7066_v5  ;;  %v1537_v41 = vmul.f32 -0.001358992, %v7240_v14  ;;  %v1792_v42 = vshrl.u32 %v1761_v61, 16 }
 0x27b   :  { %v1665_v57 = vsub.s32 %v1661_v11, %v1664_v56  ;;  %v7317_v54 = vadd.s32 3, %v1535_v21  ;;  %v1734_v45 = vshrl.u32 %v10096_v17, %v6501_v40  ;;  %v1771_v52 = vmul.u32 %v1769_v51, %v1767_v43 }
 0x27c   :  { %10149 = vst [vmem:[#allocation28_spill] sm:$0xff] %v7314_v3  ;;  %v1775_v20 = vshll.u32 %v1772_v13, 16  ;;  %v1546_v7 = vmul.f32 %v1545_v24, %v7240_v14  ;;  %v1791_v9 = vand.u32 65535, %v1761_v61  ;;  %v1774_v35 = vmul.u32 %v1770_v48, %v1768_v8 }
 0x27d   :  { %vm1666_vm8 = vcmp.lt.s32.totalorder %v1665_v57, 0  ;;  %v1667_v30 = vsub.s32 0, %v1665_v57  ;;  %v1777_v47 = vshll.u32 %v1773_v53, 16  ;;  %v1538_v10 = vadd.f32 0.041655596, %v1537_v41 }
 0x27e   :  { %vm1779_vm9 = vc.u32 %v1771_v52, %v1775_v20  ;;  %v1781_v5 = vadd.s32 %v1775_v20, %v1771_v52  ;;  %v1794_v21 = vmul.u32 %v1792_v42, %v1767_v43  ;;  %v1755_v40 = vsel %vm1753_vm7, %v7246_v37, 2102212464 }
 0x27f   :  { %v1668_v1 = vsel %vm1666_vm8, %v1667_v30, %v1665_v57  ;;  %v1780_v11 = vsel %vm1779_vm9, 1, %v10097_v16  ;;  %v1547_v24 = vadd.f32 -0.16666654, %v1546_v7  ;;  %v1657_v61 = vadd.s32 %v7226_v39, %v7209_v59 }
 0x280   :  { %v1669_v56 = vclz %v1668_v1  ;;  %v1782_v51 = vadd.s32 %v1780_v11, %v1774_v35  ;;  %vm1783_vm10 = vc.u32 %v1781_v5, %v1777_v47  ;;  %v1795_v23 = vmul.u32 %v1791_v9, %v1768_v8 }
 0x281   :  { %v1784_v48 = vsel %vm1783_vm10, 1, %v10097_v16  ;;  %v1793_v20 = vmul.u32 %v1791_v9, %v1767_v43  ;;  %v1797_v30 = vshll.u32 %v1794_v21, 16  ;;  %v1539_v15 = vmul.f32 %v1538_v10, %v7240_v14 }
 0x282   :  { %v5307_v52 = vadd.s32 4294967294, %v1669_v56  ;;  %v1786_v41 = vadd.s32 %v1784_v48, %v1782_v51  ;;  %v1754_v1 = vsel %vm1750_vm11, %v1734_v45, %v7249_v26  ;;  %v1756_v35 = vsel %vm1752_vm14, %v7244_v55, %v1755_v40  ;;  %v10150_v55 = vld [vmem:[#allocation5_spill] sm:$0xff] }
 0x283   :  { %v1776_v37 = vshrl.u32 %v1772_v13, 16  ;;  %v1796_v59 = vmul.u32 %v1792_v42, %v1768_v8  ;;  %vm1801_vm4 = vc.u32 %v1793_v20, %v1797_v30  ;;  %v1803_v39 = vadd.s32 %v1797_v30, %v1793_v20 }
 0x284   :  { %vm5308_vm2 = vcmp.lt.s32.totalorder %v5307_v52, 0  ;;  %v1799_v5 = vshll.u32 %v1795_v23, 16  ;;  %v1802_v43 = vsel %vm1801_vm4, 1, %v10097_v16  ;;  %v1548_v10 = vmul.f32 %v1547_v24, %v7240_v14 }
 0x285   :  { %v1672_v47 = vsel %vm5308_vm2, 0, %v5307_v52  ;;  %v1787_v7 = vadd.s32 %v1786_v41, %v1776_v37  ;;  %v1757_v26 = vsel %vm1751_vm13, %v1754_v1, %v1756_v35  ;;  %v1778_v45 = vshrl.u32 %v1773_v53, 16 }
 0x286   :  { %v1673_v9 = vsub.s32 32, %v1672_v47  ;;  %v1677_v11 = vsub.s32 4294967266, %v1672_v47  ;;  %v1804_v56 = vadd.s32 %v1802_v43, %v1796_v59  ;;  %vm1805_vm12 = vc.u32 %v1803_v39, %v1799_v5  ;;  %v10155_v43 = vld [vmem:[#allocation17_spill] sm:$0xff] }
 0x287   :  { %v10046_v13 = vand.u32 2147483647, %v10150_v55  ;;  %v1674_v8 = vshll.u32 %v1665_v57, %v1672_v47  ;;  %v1806_v51 = vsel %vm1805_vm12, 1, %v10097_v16  ;;  %v1540_v48 = vadd.f32 -0.4999988, %v1539_v15 }
 0x288   :  { %v1675_v42 = vshrl.u32 %v1657_v61, %v1673_v9  ;;  %v1678_v40 = vadd.s32 127, %v1677_v11  ;;  %v7342_v52 = vadd.s32 %v1787_v7, %v1778_v45  ;;  %v1798_v41 = vshrl.u32 %v1794_v21, 16  ;;  %v10151_v61 = vld [vmem:[#allocation19_spill] sm:$0xff] }
 0x289   :  { %v1808_v24 = vadd.s32 %v1806_v51, %v1804_v56  ;;  %v1549_v20 = vadd.f32 1.0, %v1548_v10  ;;  %vm1565_vm15 = vcmp.lt.s32.totalorder %v10133_v60, 0  ;;  %v1811_v53 = vmul.u32 %v7283_v12, %v1757_v26 }
 0x28a   :  { %v1676_v0 = vor.u32 %v1675_v42, %v1674_v8  ;;  %v1679_v30 = vshll.u32 %v1678_v40, 23  ;;  %v1800_v1 = vshrl.u32 %v1795_v23, 16  ;;  %v7346_v35 = vadd.s32 %v1803_v39, %v1799_v5  ;;  %v391_v39 = vpop.f32.mrf.mxu1 }
 0x28b   :  { %v1809_v57 = vadd.s32 %v1808_v24, %v1798_v41  ;;  %v1894_v37 = vshrl.u32 %v10090_v34, %v10151_v61  ;;  %v10152_v15 = vand.u32 2147483647, %v10133_v60  ;;  %v1687_v47 = vsub.s32 4, %v7297_v44 }
 0x28c   :  { %v1680_v21 = vor.u32 4788187, %v1679_v30  ;;  %v1880_v7 = vand.u32 8388607, %v10046_v13  ;;  %v1897_v23 = vshrl.u32 %v10101_v2, %v10151_v61  ;;  %v1683_v12 = vcvt.s32.f32 %v1676_v0 }
 0x28d   :  { %vm7352_vm1 = vcmp.le.f32.partialorder %v10152_v15, 0.7853982  ;;  %v1810_v5 = vadd.s32 %v1809_v57, %v1800_v1  ;;  %vm1813_vm5 = vc.u32 %v7342_v52, %v7346_v35  ;;  %v1893_v10 = vshll.u32 %v10100_v32, %v10155_v43 }
 0x28e   :  { %v1681_v9 = vand.u32 2147483647, %v1680_v21  ;;  %v392_v11 = vadd.f32 %v7026_v46, %v391_v39  ;;  %v1896_v26 = vshll.u32 %v10090_v34, %v10155_v43  ;;  %v1900_v45 = vshrl.u32 %v10091_v22, %v10151_v61 }
 0x28f   :  { %v1814_v56 = vadd.s32 1, %v1810_v5  ;;  %v7370_v8 = vor.u32 %v1894_v37, %v1893_v10  ;;  %v1902_v42 = vshll.u32 %v10091_v22, %v10155_v43  ;;  %v1903_v40 = vshrl.u32 %v10102_v50, %v10151_v61 }
 0x290   :  { %v1684_v51 = vmul.f32 %v1683_v12, %v1681_v9  ;;  %5483 = vtanh.f32 %v392_v11  ;;  %v7376_v41 = vor.u32 %v1897_v23, %v1896_v26  ;;  %v1899_v24 = vshll.u32 %v10101_v2, %v10155_v43  ;;  %v10156_v9 = vld [vmem:[#allocation18_spill] sm:$0xff] }
 0x291   :  { %v3426_v0 = vand.u32 2139095040, %v7314_v3  ;;  %v7382_v30 = vand.u32 3, %v7317_v54  ;;  %v1815_v1 = vsel %vm1813_vm5, %v1814_v56, %v1810_v5  ;;  %v1904_v57 = vor.u32 %v1903_v40, %v1902_v42 }
 0x292   :  { %v1541_v37 = vmul.f32 %v1540_v48, %v7240_v14  ;;  %v1685_v15 = vxor.u32 2147483648, %v1684_v51  ;;  %v1816_v21 = vadd.s32 %v1815_v1, %v1811_v53  ;;  %v1901_v12 = vor.u32 %v1900_v45, %v1899_v24 }
 0x293   :  { %v1550_v23 = vmul.f32 %v1549_v20, %v7220_v27  ;;  %v1688_v39 = vsel %vm1565_vm15, %v1687_v47, %v7297_v44  ;;  %v1881_v10 = vor.u32 8388608, %v1880_v7  ;;  %vm1905_vm6 = vcmp.lt.s32.totalorder %v10156_v9, 1  ;;  %v394_v44 = vpop.f32.mrf.mxu1 }
 0x294   :  { %v1686_v54 = vsel %vm1565_vm15, %v1685_v15, %v1684_v51  ;;  %v1817_v11 = vadd.s32 536870912, %v1816_v21  ;;  %vm1908_vm3 = vcmp.lt.s32.totalorder %v10156_v9, 4  ;;  %v1917_v14 = vsel %vm1905_vm6, %v7370_v8, %v7376_v41 }
 0x295   :  { %v7403_v27 = vsel %vm7352_vm1, %v10133_v60, %v1686_v54  ;;  %vm1906_vm7 = vcmp.lt.s32.totalorder %v10156_v9, 2  ;;  %vm1907_vm11 = vcmp.lt.s32.totalorder %v10156_v9, 3  ;;  %v1918_v48 = vsel %vm1908_vm3, %v1904_v57, 1326507024 }
 0x296   :  { %v7409_v20 = vpop.eup %5483  ;;  %v1691_v53 = vmul.f32 %v7403_v27, %v7403_v27  ;;  %v395_v47 = vadd.f32 %v7026_v46, %v394_v44  ;;  %v7414_v7 = vshrl.u32 %v1817_v11, 30  ;;  %v1919_v5 = vsel %vm1907_vm11, %v1901_v12, %v1918_v48 }
 0x297   :  { %v7418_v26 = vshrl.u32 %v3426_v0, 23  ;;  %v1542_v45 = vadd.f32 1.0, %v1541_v37  ;;  %v1690_v56 = vsel %vm7352_vm1, 0, %v1688_v39  ;;  %449 = vst.msk [vmem:[%s9968_s10 + $0xa8] sm:$0xff] %vm111_vm0, %v7409_v20  ;;  %v7429_v46 = vsel %vm1906_vm7, %v1917_v14, %v1919_v5 }
 0x298   :  { %v1692_v42 = vmul.f32 -0.001358992, %v1691_v53  ;;  %v1699_v40 = vmul.f32 -0.00019511016, %v1691_v53  ;;  %5485 = vtanh.f32 %v395_v47  ;;  %v1819_v51 = vshll.u32 %v7414_v7, 30 }
 0x299   :  { %vm1554_vm13 = vcmp.lt.s32.totalorder %v7382_v30, 2  ;;  %v1556_v24 = vxor.u32 2147483648, %v1550_v23  ;;  %v1891_v59 = vshrl.u32 %v10100_v32, %v10151_v61  ;;  %v7435_v0 = vshll.u32 %v1881_v10, 8 }
 0x29a   :  { %vm1555_vm14 = vcmp.eq.s32.totalorder %v7382_v30, 0  ;;  %v1693_v1 = vadd.f32 0.041655596, %v1692_v42  ;;  %v1700_v57 = vadd.f32 0.008332121, %v1699_v40  ;;  %v7438_v37 = vsub.s32 %v1816_v21, %v1819_v51 }
 0x29b   :  { %v1559_v15 = vxor.u32 2147483648, %v1542_v45  ;;  %v1707_v39 = vadd.s32 3, %v1690_v56  ;;  %v1890_v54 = vshll.u32 %v10096_v17, %v10155_v43  ;;  %v1925_v11 = vshrl.u32 %v7429_v46, 16 }
 0x29c   :  { %v1694_v14 = vmul.f32 %v1693_v1, %v1691_v53  ;;  %v1701_v44 = vmul.f32 %v1700_v57, %v1691_v53  ;;  %vm1821_vm8 = vcmp.lt.s32.totalorder %v7438_v37, 0  ;;  %v1822_v10 = vsub.s32 0, %v7438_v37 }
 0x29d   :  { %v1557_v48 = vsel %vm1555_vm14, %v1542_v45, %v1556_v24  ;;  %vm1558_vm9 = vcmp.eq.s32.totalorder %v7382_v30, 2  ;;  %v7446_v47 = vor.u32 %v1891_v59, %v1890_v54  ;;  %v7449_v21 = vand.u32 65535, %v7435_v0 }
 0x29e   :  { %v7451_v5 = vpop.eup %5485  ;;  %v1695_v56 = vadd.f32 -0.4999988, %v1694_v14  ;;  %v1702_v43 = vadd.f32 -0.16666654, %v1701_v44  ;;  %v1823_v42 = vsel %vm1821_vm8, %v1822_v10, %v7438_v37  ;;  %v1924_v40 = vand.u32 65535, %v7429_v46 }
 0x29f   :  { %v1708_v51 = vand.u32 3, %v1707_v39  ;;  %450 = vst.msk [vmem:[%s9968_s10 + $0xb0] sm:$0xff] %vm111_vm0, %v7451_v5  ;;  %v1824_v45 = vclz %v1823_v42  ;;  %v1914_v24 = vsel %vm1908_vm3, %v1901_v12, 920167782  ;;  %v7463_v59 = vmul.u32 %v1925_v11, %v7449_v21 }
 0x2a0   :  { %vm1551_vm10 = vweird.f32 %v6093_v19  ;;  %v1560_v1 = vsel %vm1558_vm9, %v1559_v15, %v1550_v23  ;;  %v1696_v57 = vmul.f32 %v1695_v56, %v1691_v53  ;;  %v1703_v54 = vmul.f32 %v1702_v43, %v1691_v53 }
 0x2a1   :  { %v7467_v46 = vshrl.u32 %v7435_v0, 16  ;;  %v1561_v39 = vsel %vm1554_vm13, %v1557_v48, %v1560_v1  ;;  %vm1706_vm2 = vweird.f32 %v10133_v60  ;;  %v5310_v14 = vadd.s32 4294967294, %v1824_v45 }
 0x2a2   :  { %v1913_v12 = vsel %vm1905_vm6, %v7446_v47, %v7370_v8  ;;  %v1697_v44 = vadd.f32 1.0, %v1696_v57  ;;  %v1704_v10 = vadd.f32 1.0, %v1703_v54  ;;  %v1915_v23 = vsel %vm1907_vm11, %v7376_v41, %v1914_v24 }
 0x2a3   :  { %v7480_v53 = vmul.u32 %v1924_v40, %v7467_v46  ;;  %vm1709_vm4 = vcmp.lt.s32.totalorder %v1708_v51, 2  ;;  %vm1710_vm12 = vcmp.eq.s32.totalorder %v1708_v51, 0  ;;  %vm5311_vm15 = vcmp.lt.s32.totalorder %v5310_v14, 0 }
 0x2a4   :  { %v1930_v30 = vshll.u32 %v7463_v59, 16  ;;  %v1705_v15 = vmul.f32 %v1704_v10, %v7403_v27  ;;  %vm1713_vm1 = vcmp.eq.s32.totalorder %v1708_v51, 2  ;;  %v1714_v48 = vxor.u32 2147483648, %v1697_v44 }
 0x2a5   :  { %v1827_v56 = vsel %vm5311_vm15, 0, %v5310_v14  ;;  %v1812_v43 = vadd.s32 %v7346_v35, %v7342_v52  ;;  %v1916_v45 = vsel %vm1906_vm7, %v1913_v12, %v1915_v23  ;;  %v1926_v24 = vmul.u32 %v1924_v40, %v7449_v21 }
 0x2a6   :  { %v1828_v42 = vsub.s32 32, %v1827_v56  ;;  %v1711_v1 = vxor.u32 2147483648, %v1705_v15  ;;  %v1832_v57 = vsub.s32 4294967266, %v1827_v56  ;;  %v1929_v54 = vmul.u32 %v1925_v11, %v7467_v46 }
 0x2a7   :  { %v1932_v13 = vshll.u32 %v7480_v53, 16  ;;  %v1715_v3 = vsel %vm1713_vm1, %v1714_v48, %v1705_v15  ;;  %v1829_v27 = vshll.u32 %v7438_v37, %v1827_v56  ;;  %vm1934_vm5 = vc.u32 %v1926_v24, %v1930_v30 }
 0x2a8   :  { %v1830_v10 = vshrl.u32 %v1812_v43, %v1828_v42  ;;  %v1712_v14 = vsel %vm1710_vm12, %v1697_v44, %v1711_v1  ;;  %v1833_v52 = vadd.s32 127, %v1832_v57  ;;  %v1935_v35 = vsel %vm1934_vm5, 1, %v10097_v16 }
 0x2a9   :  { %v1936_v4 = vadd.s32 %v1930_v30, %v1926_v24  ;;  %v1562_v40 = vsel %vm1551_vm10, nan, %v1561_v39  ;;  %v1716_v12 = vsel %vm1709_vm4, %v1712_v14, %v1715_v3  ;;  %v1937_v23 = vadd.s32 %v1935_v35, %v1929_v54 }
 0x2aa   :  { %v1946_v11 = vand.u32 65535, %v1916_v45  ;;  %v1717_v15 = vsel %vm1706_vm2, nan, %v1716_v12  ;;  %v1831_v48 = vor.u32 %v1830_v10, %v1829_v27  ;;  %v1834_v37 = vshll.u32 %v1833_v52, 23 }
 0x2ab   :  { %vm1938_vm13 = vc.u32 %v1936_v4, %v1932_v13  ;;  %v7500_v56 = vshrl.u32 %v7263_v28, 5  ;;  %v5339_v44 = vadd.s32 4294967169, %v7311_v38  ;;  %v5342_v30 = vadd.s32 4294967169, %v7418_v26 }
 0x2ac   :  { %v4356_v43 = vpack.c.bf16 %v1717_v15, %v1562_v40  ;;  %v7505_v19 = vsub.s32 32, %v7304_v63  ;;  %v1835_v3 = vor.u32 4788187, %v1834_v37  ;;  %v1939_v51 = vsel %vm1938_vm13, 1, %v10097_v16 }
 0x2ad   :  { %10157 = vst [vmem:[#allocation5_spill] sm:$0xff] %v7500_v56  ;;  %v1947_v39 = vshrl.u32 %v1916_v45, 16  ;;  %v1889_v60 = vshrl.u32 %v10096_v17, %v10151_v61  ;;  %v1910_v4 = vsel %vm1908_vm3, %v7376_v41, 2102212464  ;;  %v1941_v28 = vadd.s32 %v1939_v51, %v1937_v23 }
 0x2ae   :  { %10158 = vst [vmem:[#allocation19_spill] sm:$0xff] %v7505_v19  ;;  %5379 = vmatmul.msk.bf16.gmra.mxu2 %vm111_vm0, %v4356_v43  ;;  %v1950_v38 = vmul.u32 %v1946_v11, %v7467_v46  ;;  %v7516_v13 = vadd.s32 1, %v7309_v58  ;;  %v1836_v26 = vand.u32 2147483647, %v1835_v3  ;;  %v1838_v42 = vcvt.s32.f32 %v1831_v48 }
 0x2af   :  { %v1949_v24 = vmul.u32 %v1947_v39, %v7449_v21  ;;  %v7519_v45 = vadd.s32 1, %v5339_v44  ;;  %v7521_v1 = vadd.s32 1, %v5342_v30  ;;  %v1909_v61 = vsel %vm1905_vm6, %v1889_v60, %v7446_v47  ;;  %v10159_v47 = vld [vmem:[#allocation8_spill] sm:$0xff] }
 0x2b0   :  { %v1931_v41 = vshrl.u32 %v7463_v59, 16  ;;  %v1839_v57 = vmul.f32 %v1838_v42, %v1836_v26  ;;  %v1911_v58 = vsel %vm1907_vm11, %v7370_v8, %v1910_v4  ;;  %v1948_v54 = vmul.u32 %v1946_v11, %v7449_v21  ;;  %v10163_v4 = vld [vmem:[#allocation21_spill] sm:$0xff] }
 0x2b1   :  { %v1952_v27 = vshll.u32 %v1949_v24, 16  ;;  %vm1720_vm3 = vcmp.lt.s32.totalorder %v10138_v49, 0  ;;  %v1951_v14 = vmul.u32 %v1947_v39, %v7467_v46  ;;  %v1954_v52 = vshll.u32 %v1950_v38, 16 }
 0x2b2   :  { %v1942_v10 = vadd.s32 %v1941_v28, %v1931_v41  ;;  %v1840_v35 = vxor.u32 2147483648, %v1839_v57  ;;  %v10050_v12 = vand.u32 2147483647, %v10159_v47  ;;  %v10160_v59 = vand.u32 2147483647, %v10138_v49 }
 0x2b3   :  { %vm1956_vm14 = vc.u32 %v1948_v54, %v1952_v27  ;;  %v1958_v40 = vadd.s32 %v1952_v27, %v1948_v54  ;;  %v1842_v8 = vsub.s32 4, %v7414_v7  ;;  %v1912_v21 = vsel %vm1906_vm7, %v1909_v61, %v1911_v58 }
 0x2b4   :  { %vm7536_vm6 = vcmp.le.f32.partialorder %v10160_v59, 0.7853982  ;;  %v1957_v11 = vsel %vm1956_vm14, 1, %v10097_v16  ;;  %v1841_v46 = vsel %vm1720_vm3, %v1840_v35, %v1839_v57  ;;  %v1933_v15 = vshrl.u32 %v7480_v53, 16 }
 0x2b5   :  { %v1959_v48 = vadd.s32 %v1957_v11, %v1951_v14  ;;  %vm1960_vm11 = vc.u32 %v1958_v40, %v1954_v52  ;;  %v7550_v37 = vsel %vm7536_vm6, %v10138_v49, %v1841_v46  ;;  %v1953_v44 = vshrl.u32 %v1949_v24, 16 }
 0x2b6   :  { %v1955_v30 = vshrl.u32 %v1950_v38, 16  ;;  %v1961_v43 = vsel %vm1960_vm11, 1, %v10097_v16  ;;  %v7553_v9 = vadd.s32 %v1942_v10, %v1933_v15  ;;  %v2035_v51 = vand.u32 8388607, %v10050_v12 }
 0x2b7   :  { %v1963_v3 = vadd.s32 %v1961_v43, %v1959_v48  ;;  %v2049_v53 = vshrl.u32 %v10090_v34, %v6641_v29  ;;  %vm3124_vm7 = vcmp.gt.s32.totalorder %v7516_v13, 0  ;;  %vm3279_vm8 = vcmp.gt.s32.totalorder %v7519_v45, 0 }
 0x2b8   :  { %v7563_v39 = vmul.f32 %v7550_v37, %v7550_v37  ;;  %v2046_v60 = vshrl.u32 %v10100_v32, %v6641_v29  ;;  %v2048_v28 = vshll.u32 %v10100_v32, %v10163_v4  ;;  %v2052_v38 = vshrl.u32 %v10101_v2, %v6641_v29 }
 0x2b9   :  { %v1964_v26 = vadd.s32 %v1963_v3, %v1953_v44  ;;  %v2051_v42 = vshll.u32 %v10090_v34, %v10163_v4  ;;  %v2054_v24 = vshll.u32 %v10101_v2, %v10163_v4  ;;  %v2055_v61 = vshrl.u32 %v10091_v22, %v6641_v29 }
 0x2ba   :  { %v7577_v41 = vadd.s32 %v1958_v40, %v1954_v52  ;;  %v2045_v57 = vshll.u32 %v10096_v17, %v10163_v4  ;;  %v2057_v58 = vshll.u32 %v10091_v22, %v10163_v4  ;;  %v2058_v54 = vshrl.u32 %v10102_v50, %v6641_v29 }
 0x2bb   :  { %v1965_v27 = vadd.s32 %v1964_v26, %v1955_v30  ;;  %v7585_v10 = vor.u32 %v2049_v53, %v2048_v28  ;;  %v7587_v14 = vor.u32 %v2052_v38, %v2051_v42  ;;  %v2056_v35 = vor.u32 %v2055_v61, %v2054_v24  ;;  %v10165_v30 = vld [vmem:[#allocation23_spill] sm:$0xff] }
 0x2bc   :  { %v1843_v52 = vsel %vm1720_vm3, %v1842_v8, %v7414_v7  ;;  %v1854_v40 = vmul.f32 -0.00019511016, %v7563_v39  ;;  %vm1968_vm9 = vc.u32 %v7553_v9, %v7577_v41  ;;  %v2059_v59 = vor.u32 %v2058_v54, %v2057_v58 }
 0x2bd   :  { %vm3434_vm10 = vcmp.gt.s32.totalorder %v7521_v1, 0  ;;  %v7597_v11 = vmul.f32 1e-15, %v7107_v36  ;;  %v1969_v46 = vadd.s32 1, %v1965_v27  ;;  %v7599_v15 = vor.u32 %v2046_v60, %v2045_v57 }
 0x2be   :  { %v1966_v48 = vmul.u32 %v7435_v0, %v1912_v21  ;;  %v2036_v44 = vor.u32 8388608, %v2035_v51  ;;  %vm2060_vm2 = vcmp.lt.s32.totalorder %v10165_v30, 1  ;;  %vm2063_vm4 = vcmp.lt.s32.totalorder %v10165_v30, 4 }
 0x2bf   :  { %10164 = vst [vmem:[#allocation17_spill] sm:$0xff] %v7597_v11  ;;  %v1845_v7 = vsel %vm7536_vm6, 0, %v1843_v52  ;;  %v1970_v8 = vsel %vm1968_vm9, %v1969_v46, %v1965_v27  ;;  %v2069_v43 = vsel %vm2063_vm4, %v2056_v35, 920167782  ;;  %v2072_v36 = vsel %vm2060_vm2, %v7585_v10, %v7587_v14 }
 0x2c0   :  { %v1855_v3 = vadd.f32 0.008332121, %v1854_v40  ;;  %v1971_v53 = vadd.s32 %v1970_v8, %v1966_v48  ;;  %vm2062_vm12 = vcmp.lt.s32.totalorder %v10165_v30, 3  ;;  %v2073_v0 = vsel %vm2063_vm4, %v2059_v59, 1326507024 }
 0x2c1   :  { %v1847_v21 = vmul.f32 -0.001358992, %v7563_v39  ;;  %vm2061_vm15 = vcmp.lt.s32.totalorder %v10165_v30, 2  ;;  %v2068_v23 = vsel %vm2060_vm2, %v7599_v15, %v7585_v10  ;;  %v2074_v51 = vsel %vm2062_vm12, %v2056_v35, %v2073_v0 }
 0x2c2   :  { %v1972_v60 = vadd.s32 536870912, %v1971_v53  ;;  %v2070_v4 = vsel %vm2062_vm12, %v7587_v14, %v2069_v43  ;;  %v2075_v28 = vsel %vm2061_vm15, %v2072_v36, %v2074_v51  ;;  %v7628_v38 = vshll.u32 %v2036_v44, 8 }
 0x2c3   :  { %v3125_v26 = vsel %vm3124_vm7, %v7516_v13, 0  ;;  %v7636_v42 = vsel %vm3279_vm8, %v7519_v45, 0  ;;  %v2079_v24 = vand.u32 65535, %v2075_v28  ;;  %v2080_v61 = vshrl.u32 %v2075_v28, 16 }
 0x2c4   :  { %v7641_v57 = vsel %vm3434_vm10, %v7521_v1, 0  ;;  %v1856_v58 = vmul.f32 %v1855_v3, %v7563_v39  ;;  %v7644_v54 = vshrl.u32 %v1972_v60, 30  ;;  %v2077_v27 = vand.u32 65535, %v7628_v38 }
 0x2c5   :  { %v3581_v13 = vand.u32 2139095040, %v7597_v11  ;;  %v1862_v35 = vadd.s32 3, %v1845_v7  ;;  %v2071_v45 = vsel %vm2061_vm15, %v2068_v23, %v2070_v4  ;;  %v2078_v52 = vshrl.u32 %v7628_v38, 16 }
 0x2c6   :  { %v7651_v40 = vshrl.u32 %v3125_v26, 5  ;;  %v1848_v59 = vadd.f32 0.041655596, %v1847_v21  ;;  %v1974_v1 = vshll.u32 %v7644_v54, 30  ;;  %v2082_v46 = vmul.u32 %v2080_v61, %v2077_v27 }
 0x2c7   :  { %v7654_v48 = vand.u32 31, %v3125_v26  ;;  %v7657_v44 = vand.u32 31, %v7636_v42  ;;  %v7660_v8 = vand.u32 31, %v7641_v57  ;;  %v2083_v7 = vmul.u32 %v2079_v24, %v2078_v52 }
 0x2c8   :  { %10166 = vst [vmem:[#allocation18_spill] sm:$0xff] %v7651_v40  ;;  %v1857_v43 = vadd.f32 -0.16666654, %v1856_v58  ;;  %v1975_v36 = vsub.s32 %v1971_v53, %v1974_v1  ;;  %v2085_v3 = vshll.u32 %v2082_v46, 16  ;;  %v2102_v0 = vshrl.u32 %v2071_v45, 16 }
 0x2c9   :  { %10167 = vst [vmem:[#allocation8_spill] sm:$0xff] %v7660_v8  ;;  %v7662_v23 = vshrl.u32 %v3581_v13, 23  ;;  %v7664_v51 = vand.u32 3, %v1862_v35  ;;  %v2044_v21 = vshrl.u32 %v10096_v17, %v6641_v29  ;;  %v2081_v60 = vmul.u32 %v2079_v24, %v2077_v27 }
 0x2ca   :  { %v1849_v4 = vmul.f32 %v1848_v59, %v7563_v39  ;;  %vm1976_vm1 = vcmp.lt.s32.totalorder %v1975_v36, 0  ;;  %v1977_v28 = vsub.s32 0, %v1975_v36  ;;  %v2101_v26 = vand.u32 65535, %v2071_v45 }
 0x2cb   :  { %v2084_v12 = vmul.u32 %v2080_v61, %v2078_v52  ;;  %v2087_v11 = vshll.u32 %v2083_v7, 16  ;;  %vm2089_vm5 = vc.u32 %v2081_v60, %v2085_v3  ;;  %v2091_v58 = vadd.s32 %v2085_v3, %v2081_v60 }
 0x2cc   :  { %v1858_v53 = vmul.f32 %v1857_v43, %v7563_v39  ;;  %v1978_v1 = vsel %vm1976_vm1, %v1977_v28, %v1975_v36  ;;  %v2090_v13 = vsel %vm2089_vm5, 1, %v10097_v16  ;;  %v2104_v35 = vmul.u32 %v2102_v0, %v2077_v27 }
 0x2cd   :  { %v1979_v40 = vclz %v1978_v1  ;;  %v2065_v29 = vsel %vm2063_vm4, %v7587_v14, 2102212464  ;;  %v2092_v24 = vadd.s32 %v2090_v13, %v2084_v12  ;;  %vm2093_vm13 = vc.u32 %v2091_v58, %v2087_v11 }
 0x2ce   :  { %v1967_v45 = vadd.s32 %v7577_v41, %v7553_v9  ;;  %v2086_v61 = vshrl.u32 %v2082_v46, 16  ;;  %v2094_v59 = vsel %vm2093_vm13, 1, %v10097_v16  ;;  %v2105_v3 = vmul.u32 %v2101_v26, %v2078_v52 }
 0x2cf   :  { %v5313_v60 = vadd.s32 4294967294, %v1979_v40  ;;  %v2096_v43 = vadd.s32 %v2094_v59, %v2092_v24  ;;  %v2103_v28 = vmul.u32 %v2101_v26, %v2077_v27  ;;  %v2107_v56 = vshll.u32 %v2104_v35, 16 }
 0x2d0   :  { %v1850_v63 = vadd.f32 -0.4999988, %v1849_v4  ;;  %v1859_v19 = vadd.f32 1.0, %v1858_v53  ;;  %v2064_v1 = vsel %vm2060_vm2, %v2044_v21, %v7599_v15  ;;  %v2066_v12 = vsel %vm2062_vm12, %v7585_v10, %v2065_v29  ;;  %v10168_v10 = vld [vmem:[#allocation14_spill] sm:$0xff] }
 0x2d1   :  { %vm5314_vm3 = vcmp.lt.s32.totalorder %v5313_v60, 0  ;;  %v2097_v9 = vadd.s32 %v2096_v43, %v2086_v61  ;;  %vm2111_vm14 = vc.u32 %v2103_v28, %v2107_v56  ;;  %v2113_v41 = vadd.s32 %v2107_v56, %v2103_v28 }
 0x2d2   :  { %v1982_v14 = vsel %vm5314_vm3, 0, %v5313_v60  ;;  %v2106_v11 = vmul.u32 %v2102_v0, %v2078_v52  ;;  %v2109_v40 = vshll.u32 %v2105_v3, 16  ;;  %v2112_v27 = vsel %vm2111_vm14, 1, %v10097_v16 }
 0x2d3   :  { %v1983_v46 = vsub.s32 32, %v1982_v14  ;;  %v1987_v4 = vsub.s32 4294967266, %v1982_v14  ;;  %v2067_v26 = vsel %vm2061_vm15, %v2064_v1, %v2066_v12  ;;  %v2088_v58 = vshrl.u32 %v2083_v7, 16 }
 0x2d4   :  { %vm1875_vm6 = vcmp.lt.s32.totalorder %v10150_v55, 0  ;;  %v1984_v15 = vshll.u32 %v1975_v36, %v1982_v14  ;;  %v2114_v21 = vadd.s32 %v2112_v27, %v2106_v11  ;;  %vm2115_vm11 = vc.u32 %v2113_v41, %v2109_v40 }
 0x2d5   :  { %v10058_v53 = vand.u32 2147483647, %v10168_v10  ;;  %v1985_v13 = vshrl.u32 %v1967_v45, %v1983_v46  ;;  %v1988_v56 = vadd.s32 127, %v1987_v4  ;;  %v7688_v29 = vadd.s32 %v2097_v9, %v2088_v58  ;;  %v396_v9 = vpop.f32.mrf.mxu1 }
 0x2d6   :  { %v2116_v52 = vsel %vm2115_vm11, 1, %v10097_v16  ;;  %v1851_v0 = vmul.f32 %v1850_v63, %v7563_v39  ;;  %v7693_v24 = vmul.f32 %v1859_v19, %v7550_v37  ;;  %v2108_v30 = vshrl.u32 %v2104_v35, 16 }
 0x2d7   :  { %v2118_v7 = vadd.s32 %v2116_v52, %v2114_v21  ;;  %v1986_v61 = vor.u32 %v1985_v13, %v1984_v15  ;;  %v1989_v59 = vshll.u32 %v1988_v56, 23  ;;  %v1997_v36 = vsub.s32 4, %v7644_v54 }
 0x2d8   :  { %v7696_v60 = vadd.s32 %v2113_v41, %v2109_v40  ;;  %v10169_v45 = vand.u32 2147483647, %v10150_v55  ;;  %v2110_v28 = vshrl.u32 %v2105_v3, 16  ;;  %v2190_v63 = vand.u32 8388607, %v10058_v53 }
 0x2d9   :  { %v2119_v1 = vadd.s32 %v2118_v7, %v2108_v30  ;;  %v2204_v19 = vshrl.u32 %v10090_v34, %v6828_v6  ;;  %v1990_v37 = vor.u32 4788187, %v1989_v59  ;;  %v2203_v39 = vshll.u32 %v10100_v32, %v6646_v25  ;;  %v5593_v40 = vld [vmem:[%s9967_s4] ss:$0 sm:$0xff] }
 0x2da   :  { %vm7700_vm7 = vcmp.le.f32.partialorder %v10169_v45, 0.7853982  ;;  %vm2123_vm8 = vc.u32 %v7688_v29, %v7696_v60  ;;  %v2207_v35 = vshrl.u32 %v10101_v2, %v6828_v6  ;;  %v1993_v12 = vcvt.s32.f32 %v1986_v61 }
 0x2db   :  { %v2120_v3 = vadd.s32 %v2119_v1, %v2110_v28  ;;  %v2206_v41 = vshll.u32 %v10090_v34, %v6646_v25  ;;  %v2210_v14 = vshrl.u32 %v10091_v22, %v6828_v6  ;;  %v1991_v11 = vand.u32 2147483647, %v1990_v37 }
 0x2dc   :  { %v397_v27 = vadd.f32 %v5593_v40, %v396_v9  ;;  %v7721_v46 = vor.u32 %v2204_v19, %v2203_v39  ;;  %v2209_v4 = vshll.u32 %v10101_v2, %v6646_v25  ;;  %v2212_v21 = vshll.u32 %v10091_v22, %v6646_v25  ;;  %v10172_v19 = vld [vmem:[#allocation24_spill] sm:$0xff] }
 0x2dd   :  { %v2124_v58 = vadd.s32 1, %v2120_v3  ;;  %v7725_v15 = vor.u32 %v2207_v35, %v2206_v41  ;;  %v2213_v13 = vshrl.u32 %v10102_v50, %v6828_v6  ;;  %v1994_v56 = vmul.f32 %v1993_v12, %v1991_v11  ;;  %v399_v35 = vpop.f32.mrf.mxu1 }
 0x2de   :  { %v1998_v52 = vsel %vm1875_vm6, %v1997_v36, %v7644_v54  ;;  %5487 = vtanh.f32 %v397_v27  ;;  %v2121_v30 = vmul.u32 %v7628_v38, %v2067_v26  ;;  %v2191_v61 = vor.u32 8388608, %v2190_v63 }
 0x2df   :  { %v2125_v7 = vsel %vm2123_vm8, %v2124_v58, %v2120_v3  ;;  %v7738_v59 = vor.u32 %v2210_v14, %v2209_v4  ;;  %v2214_v45 = vor.u32 %v2213_v13, %v2212_v21  ;;  %v1995_v28 = vxor.u32 2147483648, %v1994_v56 }
 0x2e0   :  { %v2126_v1 = vadd.s32 %v2125_v7, %v2121_v30  ;;  %vm2215_vm9 = vcmp.lt.s32.totalorder %v10172_v19, 1  ;;  %vm2218_vm10 = vcmp.lt.s32.totalorder %v10172_v19, 4  ;;  %v1852_v37 = vadd.f32 1.0, %v1851_v0 }
 0x2e1   :  { %v1866_v54 = vxor.u32 2147483648, %v7693_v24  ;;  %v2227_v38 = vsel %vm2215_vm9, %v7721_v46, %v7725_v15  ;;  %v2228_v26 = vsel %vm2218_vm10, %v2214_v45, 1326507024  ;;  %v1996_v36 = vsel %vm1875_vm6, %v1995_v28, %v1994_v56 }
 0x2e2   :  { %v2000_v63 = vsel %vm7700_vm7, 0, %v1998_v52  ;;  %v2127_v39 = vadd.s32 536870912, %v2126_v1  ;;  %vm2217_vm2 = vcmp.lt.s32.totalorder %v10172_v19, 3  ;;  %v7757_v0 = vsel %vm7700_vm7, %v10150_v55, %v1996_v36 }
 0x2e3   :  { %vm2216_vm4 = vcmp.lt.s32.totalorder %v10172_v19, 2  ;;  %v2229_v12 = vsel %vm2217_vm2, %v7738_v59, %v2228_v26  ;;  %v7763_v9 = vshll.u32 %v2191_v61, 8  ;;  %v2001_v41 = vmul.f32 %v7757_v0, %v7757_v0 }
 0x2e4   :  { %v7765_v3 = vpop.eup %5487  ;;  %v400_v14 = vadd.f32 %v5593_v40, %v399_v35  ;;  %v7769_v11 = vshrl.u32 %v2127_v39, 30  ;;  %v7773_v43 = vsel %vm2216_vm4, %v2227_v38, %v2229_v12  ;;  %v5345_v27 = vadd.s32 4294967169, %v7662_v23 }
 0x2e5   :  { %v7777_v4 = vmul.f32 1e-15, %v7409_v20  ;;  %vm1865_vm12 = vcmp.eq.s32.totalorder %v7664_v51, 0  ;;  %v1869_v58 = vxor.u32 2147483648, %v1852_v37  ;;  %451 = vst.msk [vmem:[%s9968_s10 + $0xb8] sm:$0xff] %vm111_vm0, %v7765_v3  ;;  %vm1868_vm15 = vcmp.eq.s32.totalorder %v7664_v51, 2 }
 0x2e6   :  { %v2002_v40 = vmul.f32 -0.001358992, %v2001_v41  ;;  %v2009_v21 = vmul.f32 -0.00019511016, %v2001_v41  ;;  %5489 = vtanh.f32 %v400_v14  ;;  %v2129_v13 = vshll.u32 %v7769_v11, 30 }
 0x2e7   :  { %10173 = vst [vmem:[#allocation21_spill] sm:$0xff] %v7777_v4  ;;  %v2017_v23 = vadd.s32 3, %v2000_v63  ;;  %v7788_v20 = vand.u32 65535, %v7763_v9  ;;  %v2235_v56 = vshrl.u32 %v7773_v43, 16  ;;  %v1867_v52 = vsel %vm1865_vm12, %v1852_v37, %v1866_v54 }
 0x2e8   :  { %v2003_v30 = vadd.f32 0.041655596, %v2002_v40  ;;  %v2010_v7 = vadd.f32 0.008332121, %v2009_v21  ;;  %v7791_v61 = vsub.s32 %v2126_v1, %v2129_v13  ;;  %vm1864_vm1 = vcmp.lt.s32.totalorder %v7664_v51, 2 }
 0x2e9   :  { %v1870_v45 = vsel %vm1868_vm15, %v1869_v58, %v7693_v24  ;;  %v2201_v28 = vshrl.u32 %v10100_v32, %v6828_v6  ;;  %v7798_v38 = vmul.u32 %v2235_v56, %v7788_v20  ;;  %v7802_v54 = vadd.s32 1, %v5345_v27  ;;  %v401_v24 = vpop.f32.mrf.mxu1 }
 0x2ea   :  { %v2004_v26 = vmul.f32 %v2003_v30, %v2001_v41  ;;  %v2011_v36 = vmul.f32 %v2010_v7, %v2001_v41  ;;  %vm2131_vm5 = vcmp.lt.s32.totalorder %v7791_v61, 0  ;;  %v2132_v37 = vsub.s32 0, %v7791_v61 }
 0x2eb   :  { %v1871_v1 = vsel %vm1864_vm1, %v1867_v52, %v1870_v45  ;;  %v2018_v63 = vand.u32 3, %v2017_v23  ;;  %v2200_v51 = vshll.u32 %v10096_v17, %v6646_v25  ;;  %v2234_v58 = vand.u32 65535, %v7773_v43 }
 0x2ec   :  { %v7806_v39 = vpop.eup %5489  ;;  %v2005_v35 = vadd.f32 -0.4999988, %v2004_v26  ;;  %v2012_v12 = vadd.f32 -0.16666654, %v2011_v36  ;;  %v2133_v14 = vsel %vm2131_vm5, %v2132_v37, %v7791_v61  ;;  %v3736_v40 = vand.u32 2139095040, %v7777_v4 }
 0x2ed   :  { %vm1861_vm13 = vweird.f32 %v10138_v49  ;;  %452 = vst.msk [vmem:[%s9968_s10 + $0xc0] sm:$0xff] %vm111_vm0, %v7806_v39  ;;  %v2134_v25 = vclz %v2133_v14  ;;  %v7817_v27 = vor.u32 %v2201_v28, %v2200_v51  ;;  %v2224_v23 = vsel %vm2218_vm10, %v7738_v59, 920167782 }
 0x2ee   :  { %v2006_v21 = vmul.f32 %v2005_v35, %v2001_v41  ;;  %v2013_v13 = vmul.f32 %v2012_v12, %v2001_v41  ;;  %v2240_v43 = vshll.u32 %v7798_v38, 16  ;;  %vm3589_vm3 = vcmp.gt.s32.totalorder %v7802_v54, 0 }
 0x2ef   :  { %v1872_v49 = vsel %vm1861_vm13, nan, %v1871_v1  ;;  %vm2016_vm14 = vweird.f32 %v10150_v55  ;;  %v5316_v52 = vadd.s32 4294967294, %v2134_v25  ;;  %v7826_v30 = vshrl.u32 %v7763_v9, 16 }
 0x2f0   :  { %v2007_v7 = vadd.f32 1.0, %v2006_v21  ;;  %v2014_v45 = vadd.f32 1.0, %v2013_v13  ;;  %vm2019_vm6 = vcmp.lt.s32.totalorder %v2018_v63, 2  ;;  %v2236_v41 = vmul.u32 %v2234_v58, %v7788_v20 }
 0x2f1   :  { %vm5317_vm11 = vcmp.lt.s32.totalorder %v5316_v52, 0  ;;  %v2223_v59 = vsel %vm2215_vm9, %v7817_v27, %v7721_v46  ;;  %v2225_v28 = vsel %vm2217_vm2, %v7725_v15, %v2224_v23  ;;  %v7837_v26 = vmul.u32 %v2234_v58, %v7826_v30 }
 0x2f2   :  { %v2015_v36 = vmul.f32 %v2014_v45, %v7757_v0  ;;  %v2024_v37 = vxor.u32 2147483648, %v2007_v7  ;;  %v2137_v1 = vsel %vm5317_vm11, 0, %v5316_v52  ;;  %vm2244_vm7 = vc.u32 %v2236_v41, %v2240_v43 }
 0x2f3   :  { %vm2020_vm8 = vcmp.eq.s32.totalorder %v2018_v63, 0  ;;  %vm2023_vm12 = vcmp.eq.s32.totalorder %v2018_v63, 2  ;;  %v2122_v51 = vadd.s32 %v7696_v60, %v7688_v29  ;;  %v2138_v24 = vsub.s32 32, %v2137_v1 }
 0x2f4   :  { %v2021_v35 = vxor.u32 2147483648, %v2015_v36  ;;  %v2142_v12 = vsub.s32 4294967266, %v2137_v1  ;;  %v2226_v14 = vsel %vm2216_vm4, %v2223_v59, %v2225_v28  ;;  %v2239_v25 = vmul.u32 %v2235_v56, %v7826_v30 }
 0x2f5   :  { %v2140_v58 = vshrl.u32 %v2122_v51, %v2138_v24  ;;  %v2242_v21 = vshll.u32 %v7837_v26, 16  ;;  %v2245_v0 = vsel %vm2244_vm7, 1, %v10097_v16  ;;  %v2246_v13 = vadd.s32 %v2240_v43, %v2236_v41 }
 0x2f6   :  { %v2022_v23 = vsel %vm2020_vm8, %v2007_v7, %v2021_v35  ;;  %v2025_v52 = vsel %vm2023_vm12, %v2024_v37, %v2015_v36  ;;  %v2139_v45 = vshll.u32 %v7791_v61, %v2137_v1  ;;  %v2143_v53 = vadd.s32 127, %v2142_v12 }
 0x2f7   :  { %v2026_v29 = vsel %vm2019_vm6, %v2022_v23, %v2025_v52  ;;  %v2247_v60 = vadd.s32 %v2245_v0, %v2239_v25  ;;  %vm2248_vm15 = vc.u32 %v2246_v13, %v2242_v21  ;;  %v2256_v4 = vand.u32 65535, %v2226_v14 }
 0x2f8   :  { %v2027_v59 = vsel %vm2016_vm14, nan, %v2026_v29  ;;  %v2141_v56 = vor.u32 %v2140_v58, %v2139_v45  ;;  %v2144_v28 = vshll.u32 %v2143_v53, 23  ;;  %v2249_v51 = vsel %vm2248_vm15, 1, %v10097_v16 }
 0x2f9   :  { %v7853_v24 = vsub.s32 32, %v7654_v48  ;;  %v7856_v43 = vshrl.u32 %v7636_v42, 5  ;;  %v3737_v61 = vshrl.u32 %v3736_v40, 23  ;;  %v4357_v7 = vpack.c.bf16 %v2027_v59, %v1872_v49 }
 0x2fa   :  { %v7859_v63 = vsub.s32 32, %v7657_v44  ;;  %v7864_v55 = vsel %vm3589_vm3, %v7802_v54, 0  ;;  %v2145_v41 = vor.u32 4788187, %v2144_v28  ;;  %v2257_v53 = vshrl.u32 %v2226_v14, 16 }
 0x2fb   :  { %v7867_v36 = vshrl.u32 %v7641_v57, 5  ;;  %v7870_v37 = vsub.s32 32, %v7660_v8  ;;  %5380 = vmatmul.msk.bf16.gmra.mxu2 %vm111_vm0, %v4357_v7  ;;  %v2220_v42 = vsel %vm2218_vm10, %v7725_v15, 2102212464  ;;  %v2251_v40 = vadd.s32 %v2249_v51, %v2247_v60 }
 0x2fc   :  { %v2146_v49 = vand.u32 2147483647, %v2145_v41  ;;  %v2148_v1 = vcvt.s32.f32 %v2141_v56  ;;  %v2259_v54 = vmul.u32 %v2257_v53, %v7788_v20  ;;  %v2260_v35 = vmul.u32 %v2256_v4, %v7826_v30 }
 0x2fd   :  { %10174 = vst [vmem:[#allocation23_spill] sm:$0xff] %v7867_v36  ;;  %v7879_v12 = vshrl.u32 %v7864_v55, 5  ;;  %v5348_v57 = vadd.s32 4294967169, %v3737_v61  ;;  %v2199_v14 = vshrl.u32 %v10096_v17, %v6828_v6  ;;  %v2241_v25 = vshrl.u32 %v7798_v38, 16 }
 0x2fe   :  { %v7885_v58 = vmul.f32 1e-15, %v7451_v5  ;;  %v2149_v15 = vmul.f32 %v2148_v1, %v2146_v49  ;;  %v2258_v21 = vmul.u32 %v2256_v4, %v7788_v20  ;;  %v2262_v0 = vshll.u32 %v2259_v54, 16 }
 0x2ff   :  { %10175 = vst [vmem:[#allocation14_spill] sm:$0xff] %v7879_v12  ;;  %v2219_v13 = vsel %vm2215_vm9, %v2199_v14, %v7817_v27  ;;  %v2221_v23 = vsel %vm2217_vm2, %v7721_v46, %v2220_v42  ;;  %v2252_v52 = vadd.s32 %v2251_v40, %v2241_v25  ;;  %v2261_v6 = vmul.u32 %v2257_v53, %v7826_v30 }
 0x300   :  { %10176 = vst [vmem:[#allocation24_spill] sm:$0xff] %v7885_v58  ;;  %v2150_v45 = vxor.u32 2147483648, %v2149_v15  ;;  %v2264_v38 = vshll.u32 %v2260_v35, 16  ;;  %vm2266_vm10 = vc.u32 %v2258_v21, %v2262_v0  ;;  %v2268_v5 = vadd.s32 %v2262_v0, %v2258_v21 }
 0x301   :  { %v10177_v29 = vand.u32 2147483647, %v10159_v47  ;;  %vm2030_vm5 = vcmp.lt.s32.totalorder %v10159_v47, 0  ;;  %v2243_v20 = vshrl.u32 %v7837_v26, 16  ;;  %v2267_v27 = vsel %vm2266_vm10, 1, %v10097_v16  ;;  %v10180_v26 = vld [vmem:[#allocation16_spill] sm:$0xff] }
 0x302   :  { %v2151_v46 = vsel %vm2030_vm5, %v2150_v45, %v2149_v15  ;;  %v2222_v30 = vsel %vm2216_vm4, %v2219_v13, %v2221_v23  ;;  %v2269_v60 = vadd.s32 %v2267_v27, %v2261_v6  ;;  %vm2270_vm9 = vc.u32 %v2268_v5, %v2264_v38 }
 0x303   :  { %vm7897_vm1 = vcmp.le.f32.partialorder %v10177_v29, 0.7853982  ;;  %v7913_v56 = vadd.s32 %v2252_v52, %v2243_v20  ;;  %v2271_v28 = vsel %vm2270_vm9, 1, %v10097_v16  ;;  %v10061_v51 = vand.u32 2147483647, %v10180_v26 }
 0x304   :  { %v7911_v59 = vsel %vm7897_vm1, %v10159_v47, %v2151_v46  ;;  %v7917_v61 = vadd.s32 1, %v5348_v57  ;;  %v2263_v19 = vshrl.u32 %v2259_v54, 16  ;;  %v2273_v41 = vadd.s32 %v2271_v28, %v2269_v60 }
 0x305   :  { %v2156_v7 = vmul.f32 %v7911_v59, %v7911_v59  ;;  %v3891_v53 = vand.u32 2139095040, %v7885_v58  ;;  %v2152_v42 = vsub.s32 4, %v7769_v11  ;;  %v7923_v40 = vadd.s32 %v2268_v5, %v2264_v38 }
 0x306   :  { %v2276_v49 = vmul.u32 %v7763_v9, %v2222_v30  ;;  %v2265_v25 = vshrl.u32 %v2260_v35, 16  ;;  %v2274_v15 = vadd.s32 %v2273_v41, %v2263_v19  ;;  %v2345_v57 = vand.u32 8388607, %v10061_v51 }
 0x307   :  { %v2157_v1 = vmul.f32 -0.001358992, %v2156_v7  ;;  %v2164_v14 = vmul.f32 -0.00019511016, %v2156_v7  ;;  %vm2278_vm2 = vc.u32 %v7913_v56, %v7923_v40  ;;  %v2356_v54 = vshrl.u32 %v10100_v32, %v6964_v18 }
 0x308   :  { %v2359_v21 = vshrl.u32 %v10090_v34, %v6964_v18  ;;  %v2275_v23 = vadd.s32 %v2274_v15, %v2265_v25  ;;  %v2362_v9 = vshrl.u32 %v10101_v2, %v6964_v18  ;;  %v2355_v35 = vshll.u32 %v10096_v17, %v6843_v33 }
 0x309   :  { %v2158_v0 = vadd.f32 0.041655596, %v2157_v1  ;;  %v2165_v13 = vadd.f32 0.008332121, %v2164_v14  ;;  %v2358_v52 = vshll.u32 %v10100_v32, %v6843_v33  ;;  %v2364_v6 = vshll.u32 %v10101_v2, %v6843_v33 }
 0x30a   :  { %v2365_v45 = vshrl.u32 %v10091_v22, %v6964_v18  ;;  %v2279_v29 = vadd.s32 1, %v2275_v23  ;;  %v2361_v20 = vshll.u32 %v10090_v34, %v6843_v33  ;;  %v2357_v27 = vor.u32 %v2356_v54, %v2355_v35 }
 0x30b   :  { %v2159_v38 = vmul.f32 %v2158_v0, %v2156_v7  ;;  %v2166_v5 = vmul.f32 %v2165_v13, %v2156_v7  ;;  %v2367_v30 = vshll.u32 %v10091_v22, %v6843_v33  ;;  %v2368_v60 = vshrl.u32 %v10102_v50, %v6964_v18  ;;  %v10181_v0 = vld [vmem:[#allocation25_spill] sm:$0xff] }
 0x30c   :  { %v2366_v46 = vor.u32 %v2365_v45, %v2364_v6  ;;  %v2280_v19 = vsel %vm2278_vm2, %v2279_v29, %v2275_v23  ;;  %v2360_v41 = vor.u32 %v2359_v21, %v2358_v52  ;;  %v2363_v1 = vor.u32 %v2362_v9, %v2361_v20 }
 0x30d   :  { %v2167_v28 = vadd.f32 -0.16666654, %v2166_v5  ;;  %vm3744_vm4 = vcmp.gt.s32.totalorder %v7917_v61, 0  ;;  %v2160_v14 = vadd.f32 -0.4999988, %v2159_v38  ;;  %v2281_v25 = vadd.s32 %v2280_v19, %v2276_v49 }
 0x30e   :  { %v2369_v15 = vor.u32 %v2368_v60, %v2367_v30  ;;  %v2153_v54 = vsel %vm2030_vm5, %v2152_v42, %v7769_v11  ;;  %v2346_v33 = vor.u32 8388608, %v2345_v57  ;;  %vm2370_vm13 = vcmp.lt.s32.totalorder %v10181_v0, 1 }
 0x30f   :  { %vm2373_vm3 = vcmp.lt.s32.totalorder %v10181_v0, 4  ;;  %v2168_v13 = vmul.f32 %v2167_v28, %v2156_v7  ;;  %v2282_v35 = vadd.s32 536870912, %v2281_v25  ;;  %vm2372_vm14 = vcmp.lt.s32.totalorder %v10181_v0, 3 }
 0x310   :  { %v2379_v21 = vsel %vm2373_vm3, %v2366_v46, 920167782  ;;  %v3892_v23 = vshrl.u32 %v3891_v53, 23  ;;  %v2378_v49 = vsel %vm2370_vm13, %v2357_v27, %v2360_v41  ;;  %v2382_v11 = vsel %vm2370_vm13, %v2360_v41, %v2363_v1 }
 0x311   :  { %v2380_v9 = vsel %vm2372_vm14, %v2363_v1, %v2379_v21  ;;  %v2155_v42 = vsel %vm7897_vm1, 0, %v2153_v54  ;;  %v2161_v57 = vmul.f32 %v2160_v14, %v2156_v7  ;;  %v7970_v52 = vshrl.u32 %v2282_v35, 30 }
 0x312   :  { %v2383_v6 = vsel %vm2373_vm3, %v2369_v15, 1326507024  ;;  %v7975_v53 = vand.u32 31, %v7864_v55  ;;  %vm2371_vm6 = vcmp.lt.s32.totalorder %v10181_v0, 2  ;;  %v7980_v38 = vshll.u32 %v2346_v33, 8 }
 0x313   :  { %v2384_v45 = vsel %vm2372_vm14, %v2366_v46, %v2383_v6  ;;  %v2169_v5 = vadd.f32 1.0, %v2168_v13  ;;  %v2284_v4 = vshll.u32 %v7970_v52, 30  ;;  %v2381_v7 = vsel %vm2371_vm6, %v2378_v49, %v2380_v9 }
 0x314   :  { %v2385_v29 = vsel %vm2371_vm6, %v2382_v11, %v2384_v45  ;;  %v7990_v55 = vsel %vm3744_vm4, %v7917_v61, 0  ;;  %v7992_v20 = vadd.s32 4294967169, %v3892_v23  ;;  %v2172_v30 = vadd.s32 3, %v2155_v42 }
 0x315   :  { %v2389_v46 = vand.u32 65535, %v2385_v29  ;;  %v7994_v60 = vadd.f32 1.0, %v2161_v57  ;;  %v7996_v28 = vsub.s32 %v2281_v25, %v2284_v4  ;;  %v2354_v19 = vshrl.u32 %v10096_v17, %v6964_v18 }
 0x316   :  { %v2390_v14 = vshrl.u32 %v2385_v29, 16  ;;  %v2375_v15 = vsel %vm2373_vm3, %v2363_v1, 2102212464  ;;  %v2387_v54 = vand.u32 65535, %v7980_v38  ;;  %v2388_v61 = vshrl.u32 %v7980_v38, 16 }
 0x317   :  { %v2412_v33 = vshrl.u32 %v2381_v7, 16  ;;  %v8005_v13 = vmul.f32 %v2169_v5, %v7911_v59  ;;  %vm2286_vm11 = vcmp.lt.s32.totalorder %v7996_v28, 0  ;;  %v2287_v25 = vsub.s32 0, %v7996_v28 }
 0x318   :  { %v2411_v35 = vand.u32 65535, %v2381_v7  ;;  %v8009_v21 = vand.u32 3, %v2172_v30  ;;  %vm2185_vm7 = vcmp.lt.s32.totalorder %v10168_v10, 0  ;;  %v2277_v18 = vadd.s32 %v7923_v40, %v7913_v56 }
 0x319   :  { %v2392_v1 = vmul.u32 %v2390_v14, %v2387_v54  ;;  %v2393_v23 = vmul.u32 %v2389_v46, %v2388_v61  ;;  %v2179_v49 = vxor.u32 2147483648, %v7994_v60  ;;  %v2288_v9 = vsel %vm2286_vm11, %v2287_v25, %v7996_v28 }
 0x31a   :  { %v2374_v59 = vsel %vm2370_vm13, %v2354_v19, %v2357_v27  ;;  %v2376_v11 = vsel %vm2372_vm14, %v2360_v41, %v2375_v15  ;;  %v2289_v42 = vclz %v2288_v9  ;;  %v2391_v57 = vmul.u32 %v2389_v46, %v2387_v54 }
 0x31b   :  { %v2395_v6 = vshll.u32 %v2392_v1, 16  ;;  %v2414_v45 = vmul.u32 %v2412_v33, %v2387_v54  ;;  %v2176_v5 = vxor.u32 2147483648, %v8005_v13  ;;  %v2307_v56 = vsub.s32 4, %v7970_v52 }
 0x31c   :  { %v2394_v40 = vmul.u32 %v2390_v14, %v2388_v61  ;;  %v2415_v4 = vmul.u32 %v2411_v35, %v2388_v61  ;;  %vm2175_vm8 = vcmp.eq.s32.totalorder %v8009_v21, 0  ;;  %vm2178_vm12 = vcmp.eq.s32.totalorder %v8009_v21, 2 }
 0x31d   :  { %v10182_v7 = vand.u32 2147483647, %v10168_v10  ;;  %v5319_v41 = vadd.s32 4294967294, %v2289_v42  ;;  %v2397_v29 = vshll.u32 %v2393_v23, 16  ;;  %vm2399_vm10 = vc.u32 %v2391_v57, %v2395_v6 }
 0x31e   :  { %v2401_v30 = vadd.s32 %v2395_v6, %v2391_v57  ;;  %v2396_v46 = vshrl.u32 %v2392_v1, 16  ;;  %v2400_v19 = vsel %vm2399_vm10, 1, %v10097_v16  ;;  %v2413_v15 = vmul.u32 %v2411_v35, %v2387_v54 }
 0x31f   :  { %vm8026_vm15 = vcmp.le.f32.partialorder %v10182_v7, 0.7853982  ;;  %v2417_v14 = vshll.u32 %v2414_v45, 16  ;;  %vm5320_vm1 = vcmp.lt.s32.totalorder %v5319_v41, 0  ;;  %v2402_v25 = vadd.s32 %v2400_v19, %v2394_v40 }
 0x320   :  { %vm2403_vm5 = vc.u32 %v2401_v30, %v2397_v29  ;;  %v2419_v9 = vshll.u32 %v2415_v4, 16  ;;  %v2292_v51 = vsel %vm5320_vm1, 0, %v5319_v41  ;;  %v2416_v8 = vmul.u32 %v2412_v33, %v2388_v61  ;;  %v10185_v61 = vld [vmem:[#allocation20_spill] sm:$0xff] }
 0x321   :  { %v2404_v58 = vsel %vm2403_vm5, 1, %v10097_v16  ;;  %vm2421_vm9 = vc.u32 %v2413_v15, %v2417_v14  ;;  %v2423_v7 = vadd.s32 %v2417_v14, %v2413_v15  ;;  %v2293_v12 = vsub.s32 32, %v2292_v51 }
 0x322   :  { %v2297_v36 = vsub.s32 4294967266, %v2292_v51  ;;  %v2406_v42 = vadd.s32 %v2404_v58, %v2402_v25  ;;  %v2294_v57 = vshll.u32 %v7996_v28, %v2292_v51  ;;  %v2308_v54 = vsel %vm2185_vm7, %v2307_v56, %v7970_v52  ;;  %v10187_v56 = vld [vmem:[#allocation26_spill] sm:$0xff] }
 0x323   :  { %v2422_v35 = vsel %vm2421_vm9, 1, %v10097_v16  ;;  %vm2425_vm2 = vc.u32 %v2423_v7, %v2419_v9  ;;  %v2295_v1 = vshrl.u32 %v2277_v18, %v2293_v12  ;;  %v2377_v29 = vsel %vm2371_vm6, %v2374_v59, %v2376_v11 }
 0x324   :  { %v2298_v6 = vadd.s32 127, %v2297_v36  ;;  %v2407_v40 = vadd.s32 %v2406_v42, %v2396_v46  ;;  %v2424_v41 = vadd.s32 %v2422_v35, %v2416_v8  ;;  %v2398_v30 = vshrl.u32 %v2393_v23, 16 }
 0x325   :  { %v2426_v58 = vsel %vm2425_vm2, 1, %v10097_v16  ;;  %v2493_v33 = vand.u32 2147483647, %v10185_v61  ;;  %v2296_v51 = vor.u32 %v2295_v1, %v2294_v57  ;;  %v2418_v19 = vshrl.u32 %v2414_v45, 16 }
 0x326   :  { %v2299_v28 = vshll.u32 %v2298_v6, 23  ;;  %v2428_v15 = vadd.s32 %v2426_v58, %v2424_v41  ;;  %vm2174_vm4 = vcmp.lt.s32.totalorder %v8009_v21, 2  ;;  %v2177_v36 = vsel %vm2175_vm8, %v7994_v60, %v2176_v5  ;;  %v10186_v60 = vld [vmem:[#allocation10_spill] sm:$0xff] }
 0x327   :  { %v2180_v8 = vsel %vm2178_vm12, %v2179_v49, %v8005_v13  ;;  %v2310_v12 = vsel %vm8026_vm15, 0, %v2308_v54  ;;  %v8050_v0 = vadd.s32 %v2407_v40, %v2398_v30  ;;  %v2420_v18 = vshrl.u32 %v2415_v4, 16 }
 0x328   :  { %v2300_v52 = vor.u32 4788187, %v2299_v28  ;;  %v8052_v23 = vadd.s32 %v2423_v7, %v2419_v9  ;;  %v2429_v59 = vadd.s32 %v2428_v15, %v2418_v19  ;;  %v2431_v11 = vmul.u32 %v7980_v38, %v2377_v29  ;;  %v10188_v15 = vld [vmem:[#allocation9_spill] sm:$0xff] }
 0x329   :  { %v2500_v45 = vand.u32 8388607, %v2493_v33  ;;  %v2510_v5 = vshll.u32 %v10096_v17, %v10186_v60  ;;  %v2511_v13 = vshrl.u32 %v10100_v32, %v10187_v56  ;;  %v2303_v46 = vcvt.s32.f32 %v2296_v51 }
 0x32a   :  { %v2301_v49 = vand.u32 2147483647, %v2300_v52  ;;  %v2430_v14 = vadd.s32 %v2429_v59, %v2420_v18  ;;  %v2514_v4 = vshrl.u32 %v10090_v34, %v10187_v56  ;;  %vm2433_vm13 = vc.u32 %v8050_v0, %v8052_v23 }
 0x32b   :  { %v2517_v38 = vshrl.u32 %v10101_v2, %v10187_v56  ;;  %v2519_v25 = vshll.u32 %v10101_v2, %v10186_v60  ;;  %v2520_v9 = vshrl.u32 %v10091_v22, %v10187_v56  ;;  %v2513_v57 = vshll.u32 %v10100_v32, %v10186_v60 }
 0x32c   :  { %v2304_v7 = vmul.f32 %v2303_v46, %v2301_v49  ;;  %v2434_v42 = vadd.s32 1, %v2430_v14  ;;  %v2516_v54 = vshll.u32 %v10090_v34, %v10186_v60  ;;  %v2512_v35 = vor.u32 %v2511_v13, %v2510_v5 }
 0x32d   :  { %v2521_v1 = vor.u32 %v2520_v9, %v2519_v25  ;;  %v2522_v6 = vshll.u32 %v10091_v22, %v10186_v60  ;;  %v2523_v40 = vshrl.u32 %v10102_v50, %v10187_v56  ;;  %v8079_v30 = vor.u32 %v2514_v4, %v2513_v57 }
 0x32e   :  { %v2305_v41 = vxor.u32 2147483648, %v2304_v7  ;;  %v2435_v29 = vsel %vm2433_vm13, %v2434_v42, %v2430_v14  ;;  %v2518_v58 = vor.u32 %v2517_v38, %v2516_v54  ;;  %v2501_v28 = vor.u32 8388608, %v2500_v45 }
 0x32f   :  { %v2436_v51 = vadd.s32 %v2435_v29, %v2431_v11  ;;  %v2524_v19 = vor.u32 %v2523_v40, %v2522_v6  ;;  %vm2528_vm3 = vcmp.lt.s32.totalorder %v10188_v15, 4  ;;  %vm2171_vm14 = vweird.f32 %v10159_v47 }
 0x330   :  { %v2181_v52 = vsel %vm2174_vm4, %v2177_v36, %v2180_v8  ;;  %v2306_v18 = vsel %vm2185_vm7, %v2305_v41, %v2304_v7  ;;  %v2534_v59 = vsel %vm2528_vm3, %v2521_v1, 920167782  ;;  %v2327_v11 = vadd.s32 3, %v2310_v12 }
 0x331   :  { %v8092_v60 = vsel %vm8026_vm15, %v10168_v10, %v2306_v18  ;;  %v2437_v45 = vadd.s32 536870912, %v2436_v51  ;;  %vm2525_vm6 = vcmp.lt.s32.totalorder %v10188_v15, 1  ;;  %vm2527_vm11 = vcmp.lt.s32.totalorder %v10188_v15, 3 }
 0x332   :  { %v2311_v5 = vmul.f32 %v8092_v60, %v8092_v60  ;;  %v2533_v21 = vsel %vm2525_vm6, %v2512_v35, %v8079_v30  ;;  %v2537_v36 = vsel %vm2525_vm6, %v8079_v30, %v2518_v58  ;;  %v2535_v8 = vsel %vm2527_vm11, %v2518_v58, %v2534_v59 }
 0x333   :  { %v8104_v27 = vshrl.u32 %v2437_v45, 30  ;;  %v2538_v12 = vsel %vm2528_vm3, %v2524_v19, 1326507024  ;;  %v8110_v13 = vshll.u32 %v2501_v28, 8  ;;  %vm2526_vm7 = vcmp.lt.s32.totalorder %v10188_v15, 2 }
 0x334   :  { %v2312_v49 = vmul.f32 -0.001358992, %v2311_v5  ;;  %v2319_v46 = vmul.f32 -0.00019511016, %v2311_v5  ;;  %v2539_v14 = vsel %vm2527_vm11, %v2521_v1, %v2538_v12  ;;  %v8117_v4 = vsel %vm2171_vm14, nan, %v2181_v52 }
 0x335   :  { %v8119_v38 = vand.u32 3, %v2327_v11  ;;  %v2439_v25 = vshll.u32 %v8104_v27, 30  ;;  %v2540_v9 = vsel %vm2526_vm7, %v2537_v36, %v2539_v14  ;;  %v2536_v57 = vsel %vm2526_vm7, %v2533_v21, %v2535_v8 }
 0x336   :  { %v2313_v7 = vadd.f32 0.041655596, %v2312_v49  ;;  %v2320_v42 = vadd.f32 0.008332121, %v2319_v46  ;;  %v2544_v54 = vand.u32 65535, %v2540_v9  ;;  %v2509_v47 = vshrl.u32 %v10096_v17, %v10187_v56 }
 0x337   :  { %v8126_v6 = vsub.s32 %v2436_v51, %v2439_v25  ;;  %v2542_v1 = vand.u32 65535, %v8110_v13  ;;  %v2545_v40 = vshrl.u32 %v2540_v9, 16  ;;  %v2432_v28 = vadd.s32 %v8052_v23, %v8050_v0 }
 0x338   :  { %v2314_v41 = vmul.f32 %v2313_v7, %v2311_v5  ;;  %v2321_v29 = vmul.f32 %v2320_v42, %v2311_v5  ;;  %v2543_v19 = vshrl.u32 %v8110_v13, 16  ;;  %v2566_v51 = vand.u32 65535, %v2536_v57 }
 0x339   :  { %vm2441_vm8 = vcmp.lt.s32.totalorder %v8126_v6, 0  ;;  %v2442_v52 = vsub.s32 0, %v8126_v6  ;;  %v2547_v18 = vmul.u32 %v2545_v40, %v2542_v1  ;;  %vm2333_vm12 = vcmp.eq.s32.totalorder %v8119_v38, 2 }
 0x33a   :  { %v2315_v59 = vadd.f32 -0.4999988, %v2314_v41  ;;  %v2322_v11 = vadd.f32 -0.16666654, %v2321_v29  ;;  %v2530_v56 = vsel %vm2528_vm3, %v2518_v58, 2102212464  ;;  %v2548_v45 = vmul.u32 %v2544_v54, %v2543_v19 }
 0x33b   :  { %vm2330_vm15 = vcmp.eq.s32.totalorder %v8119_v38, 0  ;;  %v2443_v0 = vsel %vm2441_vm8, %v2442_v52, %v8126_v6  ;;  %v2529_v23 = vsel %vm2525_vm6, %v2509_v47, %v2512_v35  ;;  %v2550_v21 = vshll.u32 %v2547_v18, 16 }
 0x33c   :  { %v2567_v36 = vshrl.u32 %v2536_v57, 16  ;;  %v2316_v8 = vmul.f32 %v2315_v59, %v2311_v5  ;;  %v2323_v12 = vmul.f32 %v2322_v11, %v2311_v5  ;;  %vm2329_vm10 = vcmp.lt.s32.totalorder %v8119_v38, 2 }
 0x33d   :  { %v2444_v49 = vclz %v2443_v0  ;;  %v2546_v46 = vmul.u32 %v2544_v54, %v2542_v1  ;;  %vm2326_vm1 = vweird.f32 %v10168_v10  ;;  %v2531_v58 = vsel %vm2527_vm11, %v8079_v30, %v2530_v56 }
 0x33e   :  { %v2549_v14 = vmul.u32 %v2545_v40, %v2543_v19  ;;  %v2552_v25 = vshll.u32 %v2548_v45, 16  ;;  %v2568_v9 = vmul.u32 %v2566_v51, %v2542_v1  ;;  %v2317_v7 = vadd.f32 1.0, %v2316_v8 }
 0x33f   :  { %v2324_v42 = vadd.f32 1.0, %v2323_v12  ;;  %v5322_v35 = vadd.s32 4294967294, %v2444_v49  ;;  %vm2554_vm5 = vc.u32 %v2546_v46, %v2550_v21  ;;  %v2556_v5 = vadd.s32 %v2550_v21, %v2546_v46 }
 0x340   :  { %v2555_v57 = vsel %vm2554_vm5, 1, %v10097_v16  ;;  %v2569_v47 = vmul.u32 %v2567_v36, %v2542_v1  ;;  %v2570_v41 = vmul.u32 %v2566_v51, %v2543_v19  ;;  %v2334_v29 = vxor.u32 2147483648, %v2317_v7 }
 0x341   :  { %v2325_v54 = vmul.f32 %v2324_v42, %v8092_v60  ;;  %vm5323_vm9 = vcmp.lt.s32.totalorder %v5322_v35, 0  ;;  %v2557_v52 = vadd.s32 %v2555_v57, %v2549_v14  ;;  %v2551_v11 = vshrl.u32 %v2547_v18, 16 }
 0x342   :  { %v2447_v59 = vsel %vm5323_vm9, 0, %v5322_v35  ;;  %vm2558_vm2 = vc.u32 %v2556_v5, %v2552_v25  ;;  %v2572_v30 = vshll.u32 %v2569_v47, 16  ;;  %v2553_v0 = vshrl.u32 %v2548_v45, 16 }
 0x343   :  { %v2331_v40 = vxor.u32 2147483648, %v2325_v54  ;;  %v2448_v56 = vsub.s32 32, %v2447_v59  ;;  %v2571_v8 = vmul.u32 %v2567_v36, %v2543_v19  ;;  %v2335_v12 = vsel %vm2333_vm12, %v2334_v29, %v2325_v54 }
 0x344   :  { %v2449_v21 = vshll.u32 %v8126_v6, %v2447_v59  ;;  %v2452_v1 = vsub.s32 4294967266, %v2447_v59  ;;  %v2559_v51 = vsel %vm2558_vm2, 1, %v10097_v16  ;;  %v2574_v18 = vshll.u32 %v2570_v41, 16 }
 0x345   :  { %v2332_v60 = vsel %vm2330_vm15, %v2317_v7, %v2331_v40  ;;  %v2450_v49 = vshrl.u32 %v2432_v28, %v2448_v56  ;;  %v2561_v46 = vadd.s32 %v2559_v51, %v2557_v52  ;;  %vm2576_vm4 = vc.u32 %v2568_v9, %v2572_v30 }
 0x346   :  { %v2336_v14 = vsel %vm2329_vm10, %v2332_v60, %v2335_v12  ;;  %v2453_v25 = vadd.s32 127, %v2452_v1  ;;  %v2578_v19 = vadd.s32 %v2572_v30, %v2568_v9  ;;  %v2577_v42 = vsel %vm2576_vm4, 1, %v10097_v16 }
 0x347   :  { %v2337_v45 = vsel %vm2326_vm1, nan, %v2336_v14  ;;  %v2451_v36 = vor.u32 %v2450_v49, %v2449_v21  ;;  %v2562_v6 = vadd.s32 %v2561_v46, %v2551_v11  ;;  %v2579_v7 = vadd.s32 %v2577_v42, %v2571_v8  ;;  %v10190_v11 = vld [vmem:[#allocation22_spill] sm:$0xff] }
 0x348   :  { %v4358_v35 = vpack.c.bf16 %v2337_v45, %v8117_v4  ;;  %v2454_v57 = vshll.u32 %v2453_v25, 23  ;;  %vm2580_vm13 = vc.u32 %v2578_v19, %v2574_v18  ;;  %v8163_v28 = vsub.s32 32, %v7975_v53 }
 0x349   :  { %v8166_v38 = vshrl.u32 %v7990_v55, 5  ;;  %v8168_v5 = vadd.s32 %v2562_v6, %v2553_v0  ;;  %v2581_v10 = vsel %vm2580_vm13, 1, %v10097_v16  ;;  %v2532_v54 = vsel %vm2526_vm7, %v2529_v23, %v2531_v58 }
 0x34a   :  { %5381 = vmatmul.msk.bf16.gmra.mxu2 %vm111_vm0, %v4358_v35  ;;  %v2455_v9 = vor.u32 4788187, %v2454_v57  ;;  %v2573_v4 = vshrl.u32 %v2569_v47, 16  ;;  %v2583_v29 = vadd.s32 %v2581_v10, %v2579_v7  ;;  %v3898_v52 = vadd.s32 1, %v7992_v20 }
 0x34b   :  { %10189 = vst [vmem:[#allocation16_spill] sm:$0xff] %v8166_v38  ;;  %vm2340_vm3 = vcmp.lt.s32.totalorder %v10180_v26, 0  ;;  %v8176_v59 = vadd.s32 %v2578_v19, %v2574_v18  ;;  %v10068_v30 = vand.u32 2147483647, %v10190_v11  ;;  %v2458_v56 = vcvt.s32.f32 %v2451_v36 }
 0x34c   :  { %v2456_v40 = vand.u32 2147483647, %v2455_v9  ;;  %v2575_v0 = vshrl.u32 %v2570_v41, 16  ;;  %v2584_v8 = vadd.s32 %v2583_v29, %v2573_v4  ;;  %v10191_v12 = vand.u32 2147483647, %v10180_v26 }
 0x34d   :  { %v2462_v15 = vsub.s32 4, %v8104_v27  ;;  %v2586_v20 = vmul.u32 %v8110_v13, %v2532_v54  ;;  %vm2588_vm6 = vc.u32 %v8168_v5, %v8176_v59  ;;  %v2655_v47 = vand.u32 8388607, %v10068_v30 }
 0x34e   :  { %vm8181_vm14 = vcmp.le.f32.partialorder %v10191_v12, 0.7853982  ;;  %v2459_v23 = vmul.f32 %v2458_v56, %v2456_v40  ;;  %v2585_v58 = vadd.s32 %v2584_v8, %v2575_v0  ;;  %v2669_v41 = vshrl.u32 %v10090_v34, %v7170_v31  ;;  %v10195_v56 = vld [vmem:[#allocation3_spill] sm:$0xff] }
 0x34f   :  { %v2666_v1 = vshrl.u32 %v10100_v32, %v7170_v31  ;;  %v2668_v51 = vshll.u32 %v10100_v32, %v6977_v62  ;;  %v2671_v13 = vshll.u32 %v10090_v34, %v6977_v62  ;;  %v2672_v60 = vshrl.u32 %v10101_v2, %v7170_v31 }
 0x350   :  { %v2460_v49 = vxor.u32 2147483648, %v2459_v23  ;;  %v2589_v46 = vadd.s32 1, %v2585_v58  ;;  %v2674_v18 = vshll.u32 %v10101_v2, %v6977_v62  ;;  %v2675_v14 = vshrl.u32 %v10091_v22, %v7170_v31 }
 0x351   :  { %v2665_v25 = vshll.u32 %v10096_v17, %v6977_v62  ;;  %v8207_v19 = vor.u32 %v2669_v41, %v2668_v51  ;;  %v2677_v45 = vshll.u32 %v10091_v22, %v6977_v62  ;;  %v2678_v36 = vshrl.u32 %v10102_v50, %v7170_v31 }
 0x352   :  { %v2461_v6 = vsel %vm2340_vm3, %v2460_v49, %v2459_v23  ;;  %v2590_v42 = vsel %vm2588_vm6, %v2589_v46, %v2585_v58  ;;  %v2673_v35 = vor.u32 %v2672_v60, %v2671_v13  ;;  %v2676_v57 = vor.u32 %v2675_v14, %v2674_v18 }
 0x353   :  { %v8219_v7 = vand.u32 31, %v7990_v55  ;;  %v8224_v10 = vsel %vm8181_vm14, %v10180_v26, %v2461_v6  ;;  %v2591_v62 = vadd.s32 %v2590_v42, %v2586_v20  ;;  %v2679_v9 = vor.u32 %v2678_v36, %v2677_v45 }
 0x354   :  { %vm3899_vm11 = vcmp.gt.s32.totalorder %v3898_v52, 0  ;;  %v8228_v54 = vmul.f32 %v8224_v10, %v8224_v10  ;;  %v2656_v4 = vor.u32 8388608, %v2655_v47  ;;  %v2667_v29 = vor.u32 %v2666_v1, %v2665_v25 }
 0x355   :  { %10194 = vst [vmem:[#allocation25_spill] sm:$0xff] %v8219_v7  ;;  %v2463_v40 = vsel %vm2340_vm3, %v2462_v15, %v8104_v27  ;;  %v2592_v55 = vadd.s32 536870912, %v2591_v62  ;;  %vm2680_vm7 = vcmp.lt.s32.totalorder %v10195_v56, 1  ;;  %vm2683_vm8 = vcmp.lt.s32.totalorder %v10195_v56, 4 }
 0x356   :  { %v2467_v0 = vmul.f32 -0.001358992, %v8228_v54  ;;  %v2474_v8 = vmul.f32 -0.00019511016, %v8228_v54  ;;  %v2689_v12 = vsel %vm2683_vm8, %v2676_v57, 920167782  ;;  %v2692_v20 = vsel %vm2680_vm7, %v8207_v19, %v2673_v35 }
 0x357   :  { %v2593_v23 = vshrl.u32 %v2592_v55, 30  ;;  %vm2681_vm12 = vcmp.lt.s32.totalorder %v10195_v56, 2  ;;  %vm2682_vm15 = vcmp.lt.s32.totalorder %v10195_v56, 3  ;;  %v2693_v27 = vsel %vm2683_vm8, %v2679_v9, 1326507024 }
 0x358   :  { %v2475_v15 = vadd.f32 0.008332121, %v2474_v8  ;;  %v2688_v58 = vsel %vm2680_vm7, %v2667_v29, %v8207_v19  ;;  %v2694_v47 = vsel %vm2682_vm15, %v2676_v57, %v2693_v27  ;;  %v8251_v41 = vshll.u32 %v2656_v4, 8 }
 0x359   :  { %v2468_v1 = vadd.f32 0.041655596, %v2467_v0  ;;  %v2594_v51 = vshll.u32 %v2593_v23, 30  ;;  %v2690_v13 = vsel %vm2682_vm15, %v2673_v35, %v2689_v12  ;;  %v2695_v60 = vsel %vm2681_vm12, %v2692_v20, %v2694_v47 }
 0x35a   :  { %v8258_v49 = vsub.s32 32, %v8219_v7  ;;  %v8261_v46 = vsel %vm3899_vm11, %v3898_v52, 0  ;;  %v8264_v18 = vmul.f32 1e-15, %v7765_v3  ;;  %v2476_v14 = vmul.f32 %v2475_v15, %v8228_v54 }
 0x35b   :  { %vm2495_vm10 = vcmp.lt.s32.totalorder %v10185_v61, 0  ;;  %v2595_v25 = vsub.s32 %v2591_v62, %v2594_v51  ;;  %v2699_v45 = vand.u32 65535, %v2695_v60  ;;  %v2700_v36 = vshrl.u32 %v2695_v60, 16 }
 0x35c   :  { %10196 = vst [vmem:[#allocation20_spill] sm:$0xff] %v8264_v18  ;;  %v2465_v6 = vsel %vm8181_vm14, 0, %v2463_v40  ;;  %v2617_v42 = vsub.s32 4, %v2593_v23  ;;  %v2691_v57 = vsel %vm2681_vm12, %v2688_v58, %v2690_v13  ;;  %v2697_v52 = vand.u32 65535, %v8251_v41 }
 0x35d   :  { %v2469_v9 = vmul.f32 %v2468_v1, %v8228_v54  ;;  %vm2596_vm1 = vcmp.lt.s32.totalorder %v2595_v25, 0  ;;  %v2597_v3 = vsub.s32 0, %v2595_v25  ;;  %v2698_v4 = vshrl.u32 %v8251_v41, 16 }
 0x35e   :  { %v2477_v55 = vadd.f32 -0.16666654, %v2476_v14  ;;  %vm8277_vm5 = vcmp.le.f32.partialorder %v2493_v33, 0.7853982  ;;  %v2664_v21 = vshrl.u32 %v10096_v17, %v7170_v31  ;;  %v2702_v40 = vmul.u32 %v2700_v36, %v2697_v52 }
 0x35f   :  { %v2482_v0 = vadd.s32 3, %v2465_v6  ;;  %v2598_v8 = vsel %vm2596_vm1, %v2597_v3, %v2595_v25  ;;  %v2703_v12 = vmul.u32 %v2699_v45, %v2698_v4  ;;  %v2722_v20 = vshrl.u32 %v2691_v57, 16 }
 0x360   :  { %v2587_v27 = vadd.s32 %v8176_v59, %v8168_v5  ;;  %v2599_v15 = vclz %v2598_v8  ;;  %v2684_v58 = vsel %vm2680_vm7, %v2664_v21, %v2667_v29  ;;  %v2705_v47 = vshll.u32 %v2702_v40, 16 }
 0x361   :  { %v2470_v33 = vadd.f32 -0.4999988, %v2469_v9  ;;  %v2618_v1 = vsel %vm2495_vm10, %v2617_v42, %v2593_v23  ;;  %v2685_v31 = vsel %vm2683_vm8, %v2673_v35, 2102212464  ;;  %v2701_v51 = vmul.u32 %v2699_v45, %v2697_v52 }
 0x362   :  { %v2478_v13 = vmul.f32 %v2477_v55, %v8228_v54  ;;  %v5325_v60 = vadd.s32 4294967294, %v2599_v15  ;;  %v2704_v14 = vmul.u32 %v2700_v36, %v2698_v4  ;;  %v2721_v6 = vand.u32 65535, %v2691_v57 }
 0x363   :  { %v2707_v3 = vshll.u32 %v2703_v12, 16  ;;  %vm2709_vm9 = vc.u32 %v2701_v51, %v2705_v47  ;;  %v2711_v5 = vadd.s32 %v2705_v47, %v2701_v51  ;;  %v2724_v59 = vmul.u32 %v2722_v20, %v2697_v52 }
 0x364   :  { %vm5326_vm2 = vcmp.lt.s32.totalorder %v5325_v60, 0  ;;  %v2620_v29 = vsel %vm8277_vm5, 0, %v2618_v1  ;;  %v2686_v23 = vsel %vm2682_vm15, %v8207_v19, %v2685_v31  ;;  %v2710_v35 = vsel %vm2709_vm9, 1, %v10097_v16 }
 0x365   :  { %v2471_v45 = vmul.f32 %v2470_v33, %v8228_v54  ;;  %v2602_v42 = vsel %vm5326_vm2, 0, %v5325_v60  ;;  %v2712_v9 = vadd.s32 %v2710_v35, %v2704_v14  ;;  %vm2713_vm4 = vc.u32 %v2711_v5, %v2707_v3 }
 0x366   :  { %v2479_v36 = vadd.f32 1.0, %v2478_v13  ;;  %v2603_v57 = vsub.s32 32, %v2602_v42  ;;  %v2607_v55 = vsub.s32 4294967266, %v2602_v42  ;;  %v2723_v21 = vmul.u32 %v2721_v6, %v2697_v52 }
 0x367   :  { %v2706_v8 = vshrl.u32 %v2702_v40, 16  ;;  %v2714_v15 = vsel %vm2713_vm4, 1, %v10097_v16  ;;  %v2725_v47 = vmul.u32 %v2721_v6, %v2698_v4  ;;  %v2727_v1 = vshll.u32 %v2724_v59, 16 }
 0x368   :  { %v2604_v51 = vshll.u32 %v2595_v25, %v2602_v42  ;;  %v2605_v30 = vshrl.u32 %v2587_v27, %v2603_v57  ;;  %v2608_v38 = vadd.s32 127, %v2607_v55  ;;  %v2716_v19 = vadd.s32 %v2714_v15, %v2712_v9 }
 0x369   :  { %v8300_v31 = vadd.f32 1.0, %v2471_v45  ;;  %v2637_v7 = vadd.s32 3, %v2620_v29  ;;  %v2726_v54 = vmul.u32 %v2722_v20, %v2698_v4  ;;  %vm2731_vm13 = vc.u32 %v2723_v21, %v2727_v1  ;;  %v10199_v45 = vld [vmem:[#allocation15_spill] sm:$0xff] }
 0x36a   :  { %v2606_v33 = vor.u32 %v2605_v30, %v2604_v51  ;;  %v2609_v60 = vshll.u32 %v2608_v38, 23  ;;  %v2717_v13 = vadd.s32 %v2716_v19, %v2706_v8  ;;  %v2732_v14 = vsel %vm2731_vm13, 1, %v10097_v16 }
 0x36b   :  { %v2708_v52 = vshrl.u32 %v2703_v12, 16  ;;  %v2729_v40 = vshll.u32 %v2725_v47, 16  ;;  %v2733_v3 = vadd.s32 %v2727_v1, %v2723_v21  ;;  %v2734_v5 = vadd.s32 %v2732_v14, %v2726_v54  ;;  %v10201_v21 = vld [vmem:[#allocation12_spill] sm:$0xff] }
 0x36c   :  { %v4046_v6 = vand.u32 2139095040, %v8264_v18  ;;  %v8305_v25 = vmul.f32 %v2479_v36, %v8224_v10  ;;  %v8307_v27 = vand.u32 3, %v2482_v0  ;;  %v2610_v35 = vor.u32 4788187, %v2609_v60 }
 0x36d   :  { %v8309_v29 = vand.u32 3, %v2637_v7  ;;  %v2687_v38 = vsel %vm2681_vm12, %v2684_v58, %v2686_v23  ;;  %v8313_v30 = vadd.s32 %v2717_v13, %v2708_v52  ;;  %vm2735_vm3 = vc.u32 %v2733_v3, %v2729_v40  ;;  %v10200_v23 = vld [vmem:[#allocation13_spill] sm:$0xff] }
 0x36e   :  { %v2611_v4 = vand.u32 2147483647, %v2610_v35  ;;  %v2613_v12 = vcvt.s32.f32 %v2606_v33  ;;  %v2736_v20 = vsel %vm2735_vm3, 1, %v10097_v16  ;;  %v2803_v42 = vand.u32 2147483647, %v10199_v45 }
 0x36f   :  { %v2489_v10 = vxor.u32 2147483648, %v8300_v31  ;;  %v2728_v9 = vshrl.u32 %v2724_v59, 16  ;;  %v8318_v0 = vadd.s32 %v2733_v3, %v2729_v40  ;;  %v2738_v36 = vadd.s32 %v2736_v20, %v2734_v5 }
 0x370   :  { %vm2485_vm14 = vcmp.eq.s32.totalorder %v8307_v27, 0  ;;  %v2486_v7 = vxor.u32 2147483648, %v8305_v25  ;;  %v2614_v56 = vmul.f32 %v2613_v12, %v2611_v4  ;;  %v2730_v58 = vshrl.u32 %v2725_v47, 16 }
 0x371   :  { %v2824_v57 = vshrl.u32 %v10090_v34, %v10200_v23  ;;  %v2739_v55 = vadd.s32 %v2738_v36, %v2728_v9  ;;  %vm2743_vm6 = vc.u32 %v8313_v30, %v8318_v0  ;;  %v2820_v8 = vshll.u32 %v10096_v17, %v10201_v21 }
 0x372   :  { %v2827_v59 = vshrl.u32 %v10101_v2, %v10200_v23  ;;  %v2615_v15 = vxor.u32 2147483648, %v2614_v56  ;;  %v2810_v1 = vand.u32 8388607, %v2803_v42  ;;  %v2821_v47 = vshrl.u32 %v10100_v32, %v10200_v23 }
 0x373   :  { %v2823_v51 = vshll.u32 %v10100_v32, %v10201_v21  ;;  %v2740_v19 = vadd.s32 %v2739_v55, %v2730_v58  ;;  %v2826_v54 = vshll.u32 %v10090_v34, %v10201_v21  ;;  %v2829_v33 = vshll.u32 %v10101_v2, %v10201_v21  ;;  %v10202_v58 = vld [vmem:[#allocation4_spill] sm:$0xff] }
 0x374   :  { %v2830_v60 = vshrl.u32 %v10091_v22, %v10200_v23  ;;  %v2616_v13 = vsel %vm2495_vm10, %v2615_v15, %v2614_v56  ;;  %v2832_v52 = vshll.u32 %v10091_v22, %v10201_v21  ;;  %v2833_v40 = vshrl.u32 %v10102_v50, %v10200_v23 }
 0x375   :  { %v8344_v14 = vor.u32 %v2824_v57, %v2823_v51  ;;  %v8353_v3 = vsel %vm8277_vm5, %v10185_v61, %v2616_v13  ;;  %v2744_v5 = vadd.s32 1, %v2740_v19  ;;  %v8355_v35 = vor.u32 %v2827_v59, %v2826_v54 }
 0x376   :  { %v2831_v4 = vor.u32 %v2830_v60, %v2829_v33  ;;  %vm2488_vm11 = vcmp.eq.s32.totalorder %v8307_v27, 2  ;;  %v2621_v12 = vmul.f32 %v8353_v3, %v8353_v3  ;;  %v2741_v20 = vmul.u32 %v8251_v41, %v2687_v38 }
 0x377   :  { %v2811_v9 = vor.u32 8388608, %v2810_v1  ;;  %v2834_v36 = vor.u32 %v2833_v40, %v2832_v52  ;;  %vm2484_vm7 = vcmp.lt.s32.totalorder %v8307_v27, 2  ;;  %v2745_v62 = vsel %vm2743_vm6, %v2744_v5, %v2740_v19 }
 0x378   :  { %v8365_v56 = vor.u32 %v2821_v47, %v2820_v8  ;;  %vm2835_vm8 = vcmp.lt.s32.totalorder %v10202_v58, 1  ;;  %vm2838_vm12 = vcmp.lt.s32.totalorder %v10202_v58, 4  ;;  %v2622_v57 = vmul.f32 -0.001358992, %v2621_v12 }
 0x379   :  { %v2629_v55 = vmul.f32 -0.00019511016, %v2621_v12  ;;  %v2746_v21 = vadd.s32 %v2745_v62, %v2741_v20  ;;  %v2844_v41 = vsel %vm2838_vm12, %v2831_v4, 920167782  ;;  %v2487_v38 = vsel %vm2485_vm14, %v8300_v31, %v2486_v7 }
 0x37a   :  { %vm2836_vm15 = vcmp.lt.s32.totalorder %v10202_v58, 2  ;;  %v2847_v8 = vsel %vm2835_vm8, %v8344_v14, %v8355_v35  ;;  %v2848_v59 = vsel %vm2838_vm12, %v2834_v36, 1326507024  ;;  %v2623_v15 = vadd.f32 0.041655596, %v2622_v57 }
 0x37b   :  { %v2630_v1 = vadd.f32 0.008332121, %v2629_v55  ;;  %v2747_v47 = vadd.s32 536870912, %v2746_v21  ;;  %vm2837_vm10 = vcmp.lt.s32.totalorder %v10202_v58, 3  ;;  %v2843_v7 = vsel %vm2835_vm8, %v8365_v56, %v8344_v14  ;;  %v10204_v58 = vld [vmem:[#allocation19_spill] sm:$0xff] }
 0x37c   :  { %v2845_v51 = vsel %vm2837_vm10, %v8355_v35, %v2844_v41  ;;  %v2849_v19 = vsel %vm2837_vm10, %v2831_v4, %v2848_v59  ;;  %v8391_v54 = vshll.u32 %v2811_v9, 8  ;;  %vm2481_vm1 = vweird.f32 %v10180_v26 }
 0x37d   :  { %v2624_v33 = vmul.f32 %v2623_v15, %v2621_v12  ;;  %v2631_v60 = vmul.f32 %v2630_v1, %v2621_v12  ;;  %v8394_v13 = vshrl.u32 %v2747_v47, 30  ;;  %v2850_v52 = vsel %vm2836_vm15, %v2847_v8, %v2849_v19 }
 0x37e   :  { %v2852_v40 = vand.u32 65535, %v8391_v54  ;;  %v8400_v5 = vshrl.u32 %v8391_v54, 16  ;;  %v2854_v20 = vand.u32 65535, %v2850_v52  ;;  %v2855_v36 = vshrl.u32 %v2850_v52, 16 }
 0x37f   :  { %v2625_v62 = vadd.f32 -0.4999988, %v2624_v33  ;;  %v2632_v4 = vadd.f32 -0.16666654, %v2631_v60  ;;  %v2749_v9 = vshll.u32 %v8394_v13, 30  ;;  %v2846_v57 = vsel %vm2836_vm15, %v2843_v7, %v2845_v51 }
 0x380   :  { %v2490_v55 = vsel %vm2488_vm11, %v2489_v10, %v8305_v25  ;;  %vm2640_vm5 = vcmp.eq.s32.totalorder %v8309_v29, 0  ;;  %vm2643_vm9 = vcmp.eq.s32.totalorder %v8309_v29, 2  ;;  %v2857_v41 = vmul.u32 %v2855_v36, %v2852_v40 }
 0x381   :  { %v2858_v8 = vmul.u32 %v2854_v20, %v8400_v5  ;;  %v2491_v59 = vsel %vm2484_vm7, %v2487_v38, %v2490_v55  ;;  %v2626_v15 = vmul.f32 %v2625_v62, %v2621_v12  ;;  %v2633_v1 = vmul.f32 %v2632_v4, %v2621_v12 }
 0x382   :  { %vm2639_vm2 = vcmp.lt.s32.totalorder %v8309_v29, 2  ;;  %v2750_v47 = vsub.s32 %v2746_v21, %v2749_v9  ;;  %vm2636_vm4 = vweird.f32 %v10185_v61  ;;  %v2856_v31 = vmul.u32 %v2854_v20, %v2852_v40 }
 0x383   :  { %v2860_v7 = vshll.u32 %v2857_v41, 16  ;;  %v2876_v25 = vand.u32 65535, %v2846_v57  ;;  %v2877_v10 = vshrl.u32 %v2846_v57, 16  ;;  %v2627_v51 = vadd.f32 1.0, %v2626_v15 }
 0x384   :  { %v2634_v19 = vadd.f32 1.0, %v2633_v1  ;;  %vm2751_vm13 = vcmp.lt.s32.totalorder %v2750_v47, 0  ;;  %v2752_v33 = vsub.s32 0, %v2750_v47  ;;  %v2859_v60 = vmul.u32 %v2855_v36, %v8400_v5 }
 0x385   :  { %v2862_v52 = vshll.u32 %v2858_v8, 16  ;;  %vm2864_vm3 = vc.u32 %v2856_v31, %v2860_v7  ;;  %v2866_v27 = vadd.s32 %v2860_v7, %v2856_v31  ;;  %v2644_v38 = vxor.u32 2147483648, %v2627_v51 }
 0x386   :  { %v2635_v12 = vmul.f32 %v2634_v19, %v8353_v3  ;;  %v2753_v62 = vsel %vm2751_vm13, %v2752_v33, %v2750_v47  ;;  %v2865_v21 = vsel %vm2864_vm3, 1, %v10097_v16  ;;  %v2492_v20 = vsel %vm2481_vm1, nan, %v2491_v59 }
 0x387   :  { %v2754_v4 = vclz %v2753_v62  ;;  %v2867_v9 = vadd.s32 %v2865_v21, %v2859_v60  ;;  %vm2868_vm14 = vc.u32 %v2866_v27, %v2862_v52  ;;  %v2819_v55 = vshrl.u32 %v10096_v17, %v10200_v23 }
 0x388   :  { %v2641_v57 = vxor.u32 2147483648, %v2635_v12  ;;  %v2840_v36 = vsel %vm2838_vm12, %v8355_v35, 2102212464  ;;  %v2869_v3 = vsel %vm2868_vm14, 1, %v10097_v16  ;;  %v2645_v15 = vsel %vm2643_vm9, %v2644_v38, %v2635_v12 }
 0x389   :  { %v2742_v26 = vadd.s32 %v8318_v0, %v8313_v30  ;;  %v5328_v59 = vadd.s32 4294967294, %v2754_v4  ;;  %v2861_v1 = vshrl.u32 %v2857_v41, 16  ;;  %v2871_v7 = vadd.s32 %v2869_v3, %v2867_v9 }
 0x38a   :  { %v2642_v31 = vsel %vm2640_vm5, %v2627_v51, %v2641_v57  ;;  %v2879_v19 = vmul.u32 %v2877_v10, %v2852_v40  ;;  %v2880_v23 = vmul.u32 %v2876_v25, %v8400_v5  ;;  %v2839_v33 = vsel %vm2835_vm8, %v2819_v55, %v8365_v56  ;;  %v10203_v55 = vld [vmem:[#allocation6_spill] sm:$0xff] }
 0x38b   :  { %v2646_v35 = vsel %vm2639_vm2, %v2642_v31, %v2645_v15  ;;  %vm5329_vm6 = vcmp.lt.s32.totalorder %v5328_v59, 0  ;;  %v2841_v30 = vsel %vm2837_vm10, %v8344_v14, %v2840_v36  ;;  %v2872_v51 = vadd.s32 %v2871_v7, %v2861_v1 }
 0x38c   :  { %v2647_v0 = vsel %vm2636_vm4, nan, %v2646_v35  ;;  %v2757_v41 = vsel %vm5329_vm6, 0, %v5328_v59  ;;  %v2882_v60 = vshll.u32 %v2879_v19, 16  ;;  %v2878_v29 = vmul.u32 %v2876_v25, %v2852_v40 }
 0x38d   :  { %v4359_v52 = vpack.c.bf16 %v2647_v0, %v2492_v20  ;;  %v2758_v27 = vsub.s32 32, %v2757_v41  ;;  %v2762_v12 = vsub.s32 4294967266, %v2757_v41  ;;  %v2759_v38 = vshll.u32 %v2750_v47, %v2757_v41 }
 0x38e   :  { %v2863_v62 = vshrl.u32 %v2858_v8, 16  ;;  %v2881_v21 = vmul.u32 %v2877_v10, %v8400_v5  ;;  %v2884_v4 = vshll.u32 %v2880_v23, 16  ;;  %vm2886_vm11 = vc.u32 %v2878_v29, %v2882_v60 }
 0x38f   :  { %5382 = vmatmul.msk.bf16.gmra.mxu2 %vm111_vm0, %v4359_v52  ;;  %v2760_v56 = vshrl.u32 %v2742_v26, %v2758_v27  ;;  %v2763_v9 = vadd.s32 127, %v2762_v12  ;;  %v2888_v14 = vadd.s32 %v2882_v60, %v2878_v29  ;;  %v8448_v61 = vand.u32 31, %v8261_v46 }
 0x390   :  { %v8450_v57 = vadd.s32 %v2872_v51, %v2863_v62  ;;  %v2887_v20 = vsel %vm2886_vm11, 1, %v10097_v16  ;;  %v10072_v40 = vand.u32 2147483647, %v10203_v55  ;;  %v8456_v5 = vshrl.u32 %v4046_v6, 23 }
 0x391   :  { %v2761_v47 = vor.u32 %v2760_v56, %v2759_v38  ;;  %v2764_v8 = vshll.u32 %v2763_v9, 23  ;;  %v2889_v25 = vadd.s32 %v2887_v20, %v2881_v21  ;;  %vm2890_vm7 = vc.u32 %v2888_v14, %v2884_v4 }
 0x392   :  { %vm2650_vm8 = vcmp.lt.s32.totalorder %v10190_v11, 0  ;;  %v2842_v10 = vsel %vm2836_vm15, %v2839_v33, %v2841_v30  ;;  %v2891_v36 = vsel %vm2890_vm7, 1, %v10097_v16  ;;  %v2883_v15 = vshrl.u32 %v2879_v19, 16  ;;  %v10205_v30 = vld [vmem:[#allocation27_spill] sm:$0xff] }
 0x393   :  { %v2765_v3 = vor.u32 4788187, %v2764_v8  ;;  %v8462_v26 = vadd.s32 %v2888_v14, %v2884_v4  ;;  %v2893_v59 = vadd.s32 %v2891_v36, %v2889_v25  ;;  %v2768_v1 = vcvt.s32.f32 %v2761_v47 }
 0x394   :  { %v2772_v31 = vsub.s32 4, %v8394_v13  ;;  %v2885_v7 = vshrl.u32 %v2880_v23, 16  ;;  %v2965_v6 = vand.u32 8388607, %v10072_v40  ;;  %v2976_v33 = vshrl.u32 %v10100_v32, %v10204_v58 }
 0x395   :  { %v2766_v35 = vand.u32 2147483647, %v2765_v3  ;;  %v2894_v0 = vadd.s32 %v2893_v59, %v2883_v15  ;;  %vm2898_vm12 = vc.u32 %v8450_v57, %v8462_v26  ;;  %v2978_v19 = vshll.u32 %v10100_v32, %v10205_v30 }
 0x396   :  { %v2979_v41 = vshrl.u32 %v10090_v34, %v10204_v58  ;;  %v2981_v23 = vshll.u32 %v10090_v34, %v10205_v30  ;;  %v2982_v51 = vshrl.u32 %v10101_v2, %v10204_v58  ;;  %v2984_v27 = vshll.u32 %v10101_v2, %v10205_v30 }
 0x397   :  { %v2769_v60 = vmul.f32 %v2768_v1, %v2766_v35  ;;  %v2895_v52 = vadd.s32 %v2894_v0, %v2885_v7  ;;  %v2985_v12 = vshrl.u32 %v10091_v22, %v10204_v58  ;;  %v2975_v29 = vshll.u32 %v10096_v17, %v10205_v30 }
 0x398   :  { %v8485_v38 = vor.u32 %v2979_v41, %v2978_v19  ;;  %v2987_v62 = vshll.u32 %v10091_v22, %v10205_v30  ;;  %v2988_v21 = vshrl.u32 %v10102_v50, %v10204_v58  ;;  %v8491_v9 = vor.u32 %v2982_v51, %v2981_v23 }
 0x399   :  { %v2770_v4 = vxor.u32 2147483648, %v2769_v60  ;;  %v2899_v56 = vadd.s32 1, %v2895_v52  ;;  %v2986_v14 = vor.u32 %v2985_v12, %v2984_v27  ;;  %v2773_v20 = vsel %vm2650_vm8, %v2772_v31, %v8394_v13 }
 0x39a   :  { %v2896_v47 = vmul.u32 %v8391_v54, %v2842_v10  ;;  %v2966_v8 = vor.u32 8388608, %v2965_v6  ;;  %v2989_v25 = vor.u32 %v2988_v21, %v2987_v62  ;;  %v10206_v36 = vand.u32 2147483647, %v10190_v11  ;;  %v10209_v10 = vld [vmem:[#allocation5_spill] sm:$0xff] }
 0x39b   :  { %v2771_v15 = vsel %vm2650_vm8, %v2770_v4, %v2769_v60  ;;  %v2900_v59 = vsel %vm2898_vm12, %v2899_v56, %v2895_v52  ;;  %v8508_v1 = vor.u32 %v2976_v33, %v2975_v29  ;;  %vm2990_vm10 = vcmp.lt.s32.totalorder %v10209_v10, 1 }
 0x39c   :  { %vm8499_vm15 = vcmp.le.f32.partialorder %v10206_v36, 0.7853982  ;;  %v2901_v13 = vadd.s32 %v2900_v59, %v2896_v47  ;;  %vm2993_vm1 = vcmp.lt.s32.totalorder %v10209_v10, 4  ;;  %v3002_v35 = vsel %vm2990_vm10, %v8485_v38, %v8491_v9 }
 0x39d   :  { %v8513_v54 = vsel %vm8499_vm15, %v10190_v11, %v2771_v15  ;;  %v2775_v31 = vsel %vm8499_vm15, 0, %v2773_v20  ;;  %v2999_v6 = vsel %vm2993_vm1, %v2986_v14, 920167782  ;;  %vm2992_vm5 = vcmp.lt.s32.totalorder %v10209_v10, 3 }
 0x39e   :  { %v8521_v7 = vmul.f32 %v8513_v54, %v8513_v54  ;;  %v2902_v0 = vadd.s32 536870912, %v2901_v13  ;;  %v3003_v33 = vsel %vm2993_vm1, %v2989_v25, 1326507024  ;;  %v8532_v30 = vshll.u32 %v2966_v8, 8 }
 0x39f   :  { %vm2991_vm9 = vcmp.lt.s32.totalorder %v10209_v10, 2  ;;  %v3004_v23 = vsel %vm2992_vm5, %v2986_v14, %v3003_v33  ;;  %v2998_v60 = vsel %vm2990_vm10, %v8508_v1, %v8485_v38  ;;  %v3000_v52 = vsel %vm2992_vm5, %v8491_v9, %v2999_v6 }
 0x3a0   :  { %v2777_v19 = vmul.f32 -0.001358992, %v8521_v7  ;;  %v2784_v41 = vmul.f32 -0.00019511016, %v8521_v7  ;;  %v2903_v51 = vshrl.u32 %v2902_v0, 30  ;;  %v3005_v27 = vsel %vm2991_vm9, %v3002_v35, %v3004_v23 }
 0x3a1   :  { %v3007_v29 = vand.u32 65535, %v8532_v30  ;;  %v3009_v62 = vand.u32 65535, %v3005_v27  ;;  %v3010_v21 = vshrl.u32 %v3005_v27, 16  ;;  %v8550_v4 = vshrl.u32 %v8261_v46, 5 }
 0x3a2   :  { %v2785_v12 = vadd.f32 0.008332121, %v2784_v41  ;;  %v8553_v56 = vsub.s32 32, %v8448_v61  ;;  %v2778_v14 = vadd.f32 0.041655596, %v2777_v19  ;;  %v2904_v20 = vshll.u32 %v2903_v51, 30 }
 0x3a3   :  { %10210 = vst [vmem:[#allocation10_spill] sm:$0xff] %v8550_v4  ;;  %v2792_v8 = vadd.s32 3, %v2775_v31  ;;  %v3008_v25 = vshrl.u32 %v8532_v30, 16  ;;  %v3012_v36 = vmul.u32 %v3010_v21, %v3007_v29  ;;  %v8558_v3 = vadd.s32 4294967169, %v8456_v5 }
 0x3a4   :  { %v2786_v47 = vmul.f32 %v2785_v12, %v8521_v7  ;;  %vm2805_vm2 = vcmp.lt.s32.totalorder %v10199_v45, 0  ;;  %v2905_v15 = vsub.s32 %v2901_v13, %v2904_v20  ;;  %v3001_v46 = vsel %vm2991_vm9, %v2998_v60, %v3000_v52 }
 0x3a5   :  { %vm8565_vm4 = vcmp.le.f32.partialorder %v2803_v42, 0.7853982  ;;  %v2927_v6 = vsub.s32 4, %v2903_v51  ;;  %v3013_v31 = vmul.u32 %v3009_v62, %v3008_v25  ;;  %v3015_v35 = vshll.u32 %v3012_v36, 16 }
 0x3a6   :  { %v2779_v0 = vmul.f32 %v2778_v14, %v8521_v7  ;;  %vm2906_vm13 = vcmp.lt.s32.totalorder %v2905_v15, 0  ;;  %v2907_v5 = vsub.s32 0, %v2905_v15  ;;  %v3011_v33 = vmul.u32 %v3009_v62, %v3007_v29 }
 0x3a7   :  { %v2787_v19 = vadd.f32 -0.16666654, %v2786_v47  ;;  %v8570_v41 = vand.u32 3, %v2792_v8  ;;  %v2974_v13 = vshrl.u32 %v10096_v17, %v10204_v58  ;;  %v3032_v23 = vshrl.u32 %v3001_v46, 16 }
 0x3a8   :  { %v2908_v60 = vsel %vm2906_vm13, %v2907_v5, %v2905_v15  ;;  %v3014_v42 = vmul.u32 %v3010_v21, %v3008_v25  ;;  %vm3019_vm3 = vc.u32 %v3011_v33, %v3015_v35  ;;  %v3021_v52 = vadd.s32 %v3015_v35, %v3011_v33 }
 0x3a9   :  { %v2909_v27 = vclz %v2908_v60  ;;  %v2995_v12 = vsel %vm2993_vm1, %v8491_v9, 2102212464  ;;  %v3017_v14 = vshll.u32 %v3013_v31, 16  ;;  %v3020_v20 = vsel %vm3019_vm3, 1, %v10097_v16 }
 0x3aa   :  { %v2780_v62 = vadd.f32 -0.4999988, %v2779_v0  ;;  %v2928_v47 = vsel %vm2805_vm2, %v2927_v6, %v2903_v51  ;;  %v3022_v8 = vadd.s32 %v3020_v20, %v3014_v42  ;;  %v3031_v40 = vand.u32 65535, %v3001_v46 }
 0x3ab   :  { %v2788_v58 = vmul.f32 %v2787_v19, %v8521_v7  ;;  %v2897_v21 = vadd.s32 %v8462_v26, %v8450_v57  ;;  %v5331_v35 = vadd.s32 4294967294, %v2909_v27  ;;  %vm3023_vm14 = vc.u32 %v3021_v52, %v3017_v14 }
 0x3ac   :  { %v2994_v9 = vsel %vm2990_vm10, %v2974_v13, %v8508_v1  ;;  %v2996_v0 = vsel %vm2992_vm5, %v8485_v38, %v2995_v12  ;;  %v3024_v5 = vsel %vm3023_vm14, 1, %v10097_v16  ;;  %v3034_v51 = vmul.u32 %v3032_v23, %v3007_v29 }
 0x3ad   :  { %vm5332_vm6 = vcmp.lt.s32.totalorder %v5331_v35, 0  ;;  %v2930_v46 = vsel %vm8565_vm4, 0, %v2928_v47  ;;  %v3016_v6 = vshrl.u32 %v3012_v36, 16  ;;  %v3026_v33 = vadd.s32 %v3024_v5, %v3022_v8 }
 0x3ae   :  { %v2781_v57 = vmul.f32 %v2780_v62, %v8521_v7  ;;  %v2912_v26 = vsel %vm5332_vm6, 0, %v5331_v35  ;;  %v3035_v19 = vmul.u32 %v3031_v40, %v3008_v25  ;;  %v3037_v60 = vshll.u32 %v3034_v51, 16 }
 0x3af   :  { %v2789_v42 = vadd.f32 1.0, %v2788_v58  ;;  %v2913_v1 = vsub.s32 32, %v2912_v26  ;;  %v2917_v13 = vsub.s32 4294967266, %v2912_v26  ;;  %v3033_v52 = vmul.u32 %v3031_v40, %v3007_v29 }
 0x3b0   :  { %v2947_v27 = vadd.s32 3, %v2930_v46  ;;  %v3018_v38 = vshrl.u32 %v3013_v31, 16  ;;  %v3027_v12 = vadd.s32 %v3026_v33, %v3016_v6  ;;  %v3036_v14 = vmul.u32 %v3032_v23, %v3008_v25 }
 0x3b1   :  { %v2914_v20 = vshll.u32 %v2905_v15, %v2912_v26  ;;  %v2915_v18 = vshrl.u32 %v2897_v21, %v2913_v1  ;;  %v2918_v4 = vadd.s32 127, %v2917_v13  ;;  %vm3041_vm11 = vc.u32 %v3033_v52, %v3037_v60 }
 0x3b2   :  { %v8593_v47 = vadd.f32 1.0, %v2781_v57  ;;  %v3039_v36 = vshll.u32 %v3035_v19, 16  ;;  %v3042_v7 = vsel %vm3041_vm11, 1, %v10097_v16  ;;  %v3043_v62 = vadd.s32 %v3037_v60, %v3033_v52 }
 0x3b3   :  { %v8597_v8 = vmul.f32 %v2789_v42, %v8513_v54  ;;  %v2916_v58 = vor.u32 %v2915_v18, %v2914_v20  ;;  %v2919_v35 = vshll.u32 %v2918_v4, 23  ;;  %v3044_v40 = vadd.s32 %v3042_v7, %v3036_v14  ;;  %v10213_v54 = vld [vmem:[#allocation7_spill] sm:$0xff] }
 0x3b4   :  { %v8600_v29 = vadd.s32 1, %v8558_v3  ;;  %v8603_v25 = vmul.f32 1e-15, %v7806_v39  ;;  %v8605_v15 = vadd.s32 %v3027_v12, %v3018_v38  ;;  %vm3045_vm7 = vc.u32 %v3043_v62, %v3039_v36 }
 0x3b5   :  { %v2920_v31 = vor.u32 4788187, %v2919_v35  ;;  %v2997_v23 = vsel %vm2991_vm9, %v2994_v9, %v2996_v0  ;;  %v3046_v21 = vsel %vm3045_vm7, 1, %v10097_v16  ;;  %v3113_v5 = vand.u32 2147483647, %v10213_v54 }
 0x3b6   :  { %v8611_v18 = vand.u32 3, %v2947_v27  ;;  %v3038_v4 = vshrl.u32 %v3034_v51, 16  ;;  %v8613_v46 = vadd.s32 %v3043_v62, %v3039_v36  ;;  %v3048_v3 = vadd.s32 %v3046_v21, %v3044_v40 }
 0x3b7   :  { %vm2795_vm8 = vcmp.eq.s32.totalorder %v8570_v41, 0  ;;  %v2796_v39 = vxor.u32 2147483648, %v8597_v8  ;;  %v2799_v6 = vxor.u32 2147483648, %v8593_v47  ;;  %v2921_v33 = vand.u32 2147483647, %v2920_v31 }
 0x3b8   :  { %v2923_v57 = vcvt.s32.f32 %v2916_v58  ;;  %v3040_v10 = vshrl.u32 %v3035_v19, 16  ;;  %v3049_v9 = vadd.s32 %v3048_v3, %v3038_v4  ;;  %vm3053_vm12 = vc.u32 %v8605_v15, %v8613_v46 }
 0x3b9   :  { %v3134_v0 = vshrl.u32 %v10090_v34, %v7853_v24  ;;  %v3120_v26 = vand.u32 8388607, %v3113_v5  ;;  %v3131_v60 = vshrl.u32 %v10100_v32, %v7853_v24  ;;  %v3137_v42 = vshrl.u32 %v10101_v2, %v7853_v24 }
 0x3ba   :  { %v2924_v51 = vmul.f32 %v2923_v57, %v2921_v33  ;;  %v3050_v1 = vadd.s32 %v3049_v9, %v3040_v10  ;;  %v3133_v19 = vshll.u32 %v10100_v32, %v7654_v48  ;;  %v3136_v13 = vshll.u32 %v10090_v34, %v7654_v48  ;;  %v10214_v10 = vld [vmem:[#allocation18_spill] sm:$0xff] }
 0x3bb   :  { %v3140_v52 = vshrl.u32 %v10091_v22, %v7853_v24  ;;  %v3130_v38 = vshll.u32 %v10096_v17, %v7654_v48  ;;  %v3142_v12 = vshll.u32 %v10091_v22, %v7654_v48  ;;  %v3143_v14 = vshrl.u32 %v10102_v50, %v7853_v24 }
 0x3bc   :  { %v2925_v27 = vxor.u32 2147483648, %v2924_v51  ;;  %v3054_v20 = vadd.s32 1, %v3050_v1  ;;  %v8640_v36 = vor.u32 %v3134_v0, %v3133_v19  ;;  %v8642_v7 = vor.u32 %v3137_v42, %v3136_v13 }
 0x3bd   :  { %v3139_v62 = vshll.u32 %v10101_v2, %v7654_v48  ;;  %v3051_v35 = vmul.u32 %v8532_v30, %v2997_v23  ;;  %v3121_v40 = vor.u32 8388608, %v3120_v26  ;;  %v3144_v31 = vor.u32 %v3143_v14, %v3142_v12 }
 0x3be   :  { %v2926_v58 = vsel %vm2805_vm2, %v2925_v27, %v2924_v51  ;;  %v3055_v4 = vsel %vm3053_vm12, %v3054_v20, %v3050_v1  ;;  %v8657_v3 = vor.u32 %v3131_v60, %v3130_v38  ;;  %vm3145_vm15 = vcmp.lt.s32.totalorder %v10214_v10, 1 }
 0x3bf   :  { %v8652_v21 = vsel %vm8565_vm4, %v10199_v45, %v2926_v58  ;;  %v3141_v33 = vor.u32 %v3140_v52, %v3139_v62  ;;  %v3056_v57 = vadd.s32 %v3055_v4, %v3051_v35  ;;  %vm3148_vm10 = vcmp.lt.s32.totalorder %v10214_v10, 4 }
 0x3c0   :  { %v2931_v48 = vmul.f32 %v8652_v21, %v8652_v21  ;;  %v2797_v30 = vsel %vm2795_vm8, %v8593_v47, %v2796_v39  ;;  %vm3146_vm1 = vcmp.lt.s32.totalorder %v10214_v10, 2  ;;  %v3157_v59 = vsel %vm3145_vm15, %v8640_v36, %v8642_v7 }
 0x3c1   :  { %v3158_v23 = vsel %vm3148_vm10, %v3144_v31, 1326507024  ;;  %v3057_v51 = vadd.s32 536870912, %v3056_v57  ;;  %vm3147_vm5 = vcmp.lt.s32.totalorder %v10214_v10, 3  ;;  %v3153_v39 = vsel %vm3145_vm15, %v8657_v3, %v8640_v36 }
 0x3c2   :  { %v2932_v9 = vmul.f32 -0.001358992, %v2931_v48  ;;  %v2939_v0 = vmul.f32 -0.00019511016, %v2931_v48  ;;  %v3154_v26 = vsel %vm3148_vm10, %v3141_v33, 920167782  ;;  %v3159_v60 = vsel %vm3147_vm5, %v3141_v33, %v3158_v23 }
 0x3c3   :  { %v8682_v42 = vshll.u32 %v3121_v40, 8  ;;  %v8684_v13 = vshrl.u32 %v3057_v51, 30  ;;  %v3160_v52 = vsel %vm3146_vm1, %v3157_v59, %v3159_v60  ;;  %vm2791_vm9 = vweird.f32 %v10190_v11 }
 0x3c4   :  { %v2933_v1 = vadd.f32 0.041655596, %v2932_v9  ;;  %v2940_v19 = vadd.f32 0.008332121, %v2939_v0  ;;  %v3164_v12 = vand.u32 65535, %v3160_v52  ;;  %v3165_v14 = vshrl.u32 %v3160_v52, 16 }
 0x3c5   :  { %v8689_v27 = vand.u32 65535, %v8682_v42  ;;  %v8692_v38 = vshrl.u32 %v8682_v42, 16  ;;  %v3059_v58 = vshll.u32 %v8684_v13, 30  ;;  %v3155_v35 = vsel %vm3147_vm5, %v8642_v7, %v3154_v26 }
 0x3c6   :  { %v2934_v20 = vmul.f32 %v2933_v1, %v2931_v48  ;;  %v2941_v62 = vmul.f32 %v2940_v19, %v2931_v48  ;;  %vm2794_vm2 = vcmp.lt.s32.totalorder %v8570_v41, 2  ;;  %vm2798_vm4 = vcmp.eq.s32.totalorder %v8570_v41, 2 }
 0x3c7   :  { %v3167_v40 = vmul.u32 %v3165_v14, %v8689_v27  ;;  %v8703_v31 = vmul.u32 %v3164_v12, %v8692_v38  ;;  %v2800_v4 = vsel %vm2798_vm4, %v2799_v6, %v8597_v8  ;;  %v3060_v23 = vsub.s32 %v3056_v57, %v3059_v58 }
 0x3c8   :  { %v2935_v33 = vadd.f32 -0.4999988, %v2934_v20  ;;  %v2942_v59 = vadd.f32 -0.16666654, %v2941_v62  ;;  %v2801_v9 = vsel %vm2794_vm2, %v2797_v30, %v2800_v4  ;;  %v3156_v0 = vsel %vm3146_vm1, %v3153_v39, %v3155_v35 }
 0x3c9   :  { %v3166_v51 = vmul.u32 %v3164_v12, %v8689_v27  ;;  %v3170_v26 = vshll.u32 %v3167_v40, 16  ;;  %vm2949_vm13 = vcmp.lt.s32.totalorder %v8611_v18, 2  ;;  %vm3061_vm3 = vcmp.lt.s32.totalorder %v3060_v23, 0 }
 0x3ca   :  { %v2936_v41 = vmul.f32 %v2935_v33, %v2931_v48  ;;  %v2943_v60 = vmul.f32 %v2942_v59, %v2931_v48  ;;  %v3062_v1 = vsub.s32 0, %v3060_v23  ;;  %vm2946_vm14 = vweird.f32 %v10199_v45 }
 0x3cb   :  { %v3169_v47 = vmul.u32 %v3165_v14, %v8692_v38  ;;  %v3172_v8 = vshll.u32 %v8703_v31, 16  ;;  %vm3174_vm6 = vc.u32 %v3166_v51, %v3170_v26  ;;  %v3176_v6 = vadd.s32 %v3170_v26, %v3166_v51 }
 0x3cc   :  { %v2937_v57 = vadd.f32 1.0, %v2936_v41  ;;  %v2944_v30 = vadd.f32 1.0, %v2943_v60  ;;  %v3063_v39 = vsel %vm3061_vm3, %v3062_v1, %v3060_v23  ;;  %v3175_v19 = vsel %vm3174_vm6, 1, %v10097_v16 }
 0x3cd   :  { %vm2950_vm11 = vcmp.eq.s32.totalorder %v8611_v18, 0  ;;  %v3064_v48 = vclz %v3063_v39  ;;  %v3177_v52 = vadd.s32 %v3175_v19, %v3169_v47  ;;  %vm3178_vm7 = vc.u32 %v3176_v6, %v3172_v8 }
 0x3ce   :  { %v2945_v12 = vmul.f32 %v2944_v30, %v8652_v21  ;;  %v2954_v20 = vxor.u32 2147483648, %v2937_v57  ;;  %v3179_v62 = vsel %vm3178_vm7, 1, %v10097_v16  ;;  %v3186_v14 = vand.u32 65535, %v3156_v0 }
 0x3cf   :  { %v2802_v58 = vsel %vm2791_vm9, nan, %v2801_v9  ;;  %vm2953_vm8 = vcmp.eq.s32.totalorder %v8611_v18, 2  ;;  %v5334_v35 = vadd.s32 4294967294, %v3064_v48  ;;  %v3129_v4 = vshrl.u32 %v10096_v17, %v7853_v24 }
 0x3d0   :  { %v2951_v33 = vxor.u32 2147483648, %v2945_v12  ;;  %v3052_v59 = vadd.s32 %v8613_v46, %v8605_v15  ;;  %v3181_v51 = vadd.s32 %v3179_v62, %v3177_v52  ;;  %v3187_v26 = vshrl.u32 %v3156_v0, 16 }
 0x3d1   :  { %v2955_v21 = vsel %vm2953_vm8, %v2954_v20, %v2945_v12  ;;  %vm5335_vm12 = vcmp.lt.s32.totalorder %v5334_v35, 0  ;;  %v3149_v41 = vsel %vm3145_vm15, %v3129_v4, %v8657_v3  ;;  %v3171_v11 = vshrl.u32 %v3167_v40, 16 }
 0x3d2   :  { %v2952_v9 = vsel %vm2950_vm11, %v2937_v57, %v2951_v33  ;;  %v3067_v60 = vsel %vm5335_vm12, 0, %v5334_v35  ;;  %v3189_v1 = vmul.u32 %v3187_v26, %v8689_v27  ;;  %v3190_v24 = vmul.u32 %v3186_v14, %v8692_v38  ;;  %v10215_v35 = vld [vmem:[#allocation11_spill] sm:$0xff] }
 0x3d3   :  { %v2956_v15 = vsel %vm2949_vm13, %v2952_v9, %v2955_v21  ;;  %v3068_v46 = vsub.s32 32, %v3067_v60  ;;  %v3072_v0 = vsub.s32 4294967266, %v3067_v60  ;;  %v3150_v47 = vsel %vm3148_vm10, %v8642_v7, 2102212464 }
 0x3d4   :  { %v2957_v3 = vsel %vm2946_vm14, nan, %v2956_v15  ;;  %v3182_v40 = vadd.s32 %v3181_v51, %v3171_v11  ;;  %v3188_v8 = vmul.u32 %v3186_v14, %v8689_v27  ;;  %v3192_v6 = vshll.u32 %v3189_v1, 16 }
 0x3d5   :  { %v4360_v57 = vpack.c.bf16 %v2957_v3, %v2802_v58  ;;  %v3069_v30 = vshll.u32 %v3060_v23, %v3067_v60  ;;  %v3070_v39 = vshrl.u32 %v3052_v59, %v3068_v46  ;;  %v3073_v19 = vadd.s32 127, %v3072_v0 }
 0x3d6   :  { %v3191_v18 = vmul.u32 %v3187_v26, %v8692_v38  ;;  %v3194_v48 = vshll.u32 %v3190_v24, 16  ;;  %vm3196_vm15 = vc.u32 %v3188_v8, %v3192_v6  ;;  %v3198_v52 = vadd.s32 %v3192_v6, %v3188_v8 }
 0x3d7   :  { %5383 = vmatmul.msk.bf16.gmra.mxu2 %vm111_vm0, %v4360_v57  ;;  %v3071_v12 = vor.u32 %v3070_v39, %v3069_v30  ;;  %v3074_v7 = vshll.u32 %v3073_v19, 23  ;;  %v3173_v45 = vshrl.u32 %v8703_v31, 16  ;;  %v3197_v20 = vsel %vm3196_vm15, 1, %v10097_v16 }
 0x3d8   :  { %v3082_v27 = vsub.s32 4, %v8684_v13  ;;  %v3151_v23 = vsel %vm3147_vm5, %v8640_v36, %v3150_v47  ;;  %v3199_v62 = vadd.s32 %v3197_v20, %v3191_v18  ;;  %vm3200_vm10 = vc.u32 %v3198_v52, %v3194_v48 }
 0x3d9   :  { %v3075_v38 = vor.u32 4788187, %v3074_v7  ;;  %v8749_v14 = vadd.s32 %v3182_v40, %v3173_v45  ;;  %v3201_v58 = vsel %vm3200_vm10, 1, %v10097_v16  ;;  %v3268_v4 = vand.u32 2147483647, %v10215_v35 }
 0x3da   :  { %v10216_v33 = vand.u32 2147483647, %v10203_v55  ;;  %vm2960_vm2 = vcmp.lt.s32.totalorder %v10203_v55, 0  ;;  %v3193_v59 = vshrl.u32 %v3189_v1, 16  ;;  %v3203_v51 = vadd.s32 %v3201_v58, %v3199_v62 }
 0x3db   :  { %v3076_v36 = vand.u32 2147483647, %v3075_v38  ;;  %v3078_v26 = vcvt.s32.f32 %v3071_v12  ;;  %v3152_v21 = vsel %vm3146_vm1, %v3149_v41, %v3151_v23  ;;  %v8762_v11 = vadd.s32 %v3198_v52, %v3194_v48 }
 0x3dc   :  { %vm8755_vm9 = vcmp.le.f32.partialorder %v10216_v33, 0.7853982  ;;  %v8767_v9 = vsel %vm2960_vm2, %v3082_v27, %v8684_v13  ;;  %v3195_v60 = vshrl.u32 %v3190_v24, 16  ;;  %v3204_v15 = vadd.s32 %v3203_v51, %v3193_v59 }
 0x3dd   :  { %v3289_v46 = vshrl.u32 %v10090_v34, %v7859_v63  ;;  %v3079_v0 = vmul.f32 %v3078_v26, %v3076_v36  ;;  %vm3208_vm5 = vc.u32 %v8749_v14, %v8762_v11  ;;  %v3275_v10 = vand.u32 8388607, %v3268_v4 }
 0x3de   :  { %v3292_v41 = vshrl.u32 %v10101_v2, %v7859_v63  ;;  %vm4054_vm1 = vcmp.gt.s32.totalorder %v8600_v29, 0  ;;  %v3205_v1 = vadd.s32 %v3204_v15, %v3195_v60  ;;  %v3288_v13 = vshll.u32 %v10100_v32, %v7657_v44 }
 0x3df   :  { %v3291_v24 = vshll.u32 %v10090_v34, %v7657_v44  ;;  %v3295_v47 = vshrl.u32 %v10091_v22, %v7859_v63  ;;  %v3080_v3 = vxor.u32 2147483648, %v3079_v0  ;;  %v3286_v40 = vshrl.u32 %v10100_v32, %v7859_v63 }
 0x3e0   :  { %v3297_v8 = vshll.u32 %v10091_v22, %v7657_v44  ;;  %v3298_v6 = vshrl.u32 %v10102_v50, %v7859_v63  ;;  %v3209_v57 = vadd.s32 1, %v3205_v1  ;;  %v8790_v30 = vor.u32 %v3289_v46, %v3288_v13 }
 0x3e1   :  { %v3293_v39 = vor.u32 %v3292_v41, %v3291_v24  ;;  %v3294_v19 = vshll.u32 %v10101_v2, %v7657_v44  ;;  %v3081_v18 = vsel %vm2960_vm2, %v3080_v3, %v3079_v0  ;;  %v3206_v48 = vmul.u32 %v8682_v42, %v3152_v21 }
 0x3e2   :  { %v3285_v52 = vshll.u32 %v10096_v17, %v7657_v44  ;;  %v3299_v12 = vor.u32 %v3298_v6, %v3297_v8  ;;  %v8802_v7 = vsel %vm8755_vm9, %v10203_v55, %v3081_v18  ;;  %v3210_v45 = vsel %vm3208_vm5, %v3209_v57, %v3205_v1 }
 0x3e3   :  { %v3276_v20 = vor.u32 8388608, %v3275_v10  ;;  %v3296_v27 = vor.u32 %v3295_v47, %v3294_v19  ;;  %v8809_v23 = vmul.f32 %v8802_v7, %v8802_v7  ;;  %v3211_v42 = vadd.s32 %v3210_v45, %v3206_v48 }
 0x3e4   :  { %vm3300_vm4 = vcmp.lt.s32.totalorder %v7856_v43, 1  ;;  %vm3303_vm13 = vcmp.lt.s32.totalorder %v7856_v43, 4  ;;  %v3085_v44 = vsel %vm8755_vm9, 0, %v8767_v9  ;;  %v3287_v62 = vor.u32 %v3286_v40, %v3285_v52 }
 0x3e5   :  { %v3312_v38 = vsel %vm3300_vm4, %v8790_v30, %v3293_v39  ;;  %v3313_v58 = vsel %vm3303_vm13, %v3299_v12, 1326507024  ;;  %v3087_v33 = vmul.f32 -0.001358992, %v8809_v23  ;;  %v3094_v59 = vmul.f32 -0.00019511016, %v8809_v23 }
 0x3e6   :  { %v3212_v51 = vadd.s32 536870912, %v3211_v42  ;;  %vm3302_vm3 = vcmp.lt.s32.totalorder %v7856_v43, 3  ;;  %vm3301_vm14 = vcmp.lt.s32.totalorder %v7856_v43, 2  ;;  %v3309_v31 = vsel %vm3303_vm13, %v3296_v27, 920167782 }
 0x3e7   :  { %v3314_v36 = vsel %vm3302_vm3, %v3296_v27, %v3313_v58  ;;  %v8829_v26 = vshll.u32 %v3276_v20, 8  ;;  %v3088_v21 = vadd.f32 0.041655596, %v3087_v33  ;;  %v3095_v9 = vadd.f32 0.008332121, %v3094_v59 }
 0x3e8   :  { %v3213_v60 = vshrl.u32 %v3212_v51, 30  ;;  %v3315_v15 = vsel %vm3301_vm14, %v3312_v38, %v3314_v36  ;;  %v8840_v1 = vsel %vm4054_vm1, %v8600_v29, 0  ;;  %vm3115_vm6 = vcmp.lt.s32.totalorder %v10213_v54, 0 }
 0x3e9   :  { %v3317_v46 = vand.u32 65535, %v8829_v26  ;;  %v8835_v0 = vshrl.u32 %v8829_v26, 16  ;;  %v3319_v10 = vand.u32 65535, %v3315_v15  ;;  %v3320_v41 = vshrl.u32 %v3315_v15, 16 }
 0x3ea   :  { %v3096_v13 = vmul.f32 %v3095_v9, %v8809_v23  ;;  %v3214_v24 = vshll.u32 %v3213_v60, 30  ;;  %v3308_v47 = vsel %vm3300_vm4, %v3287_v62, %v8790_v30  ;;  %v3310_v3 = vsel %vm3302_vm3, %v3293_v39, %v3309_v31 }
 0x3eb   :  { %v3322_v40 = vmul.u32 %v3320_v41, %v3317_v46  ;;  %v8850_v8 = vmul.u32 %v3319_v10, %v8835_v0  ;;  %v3089_v6 = vmul.f32 %v3088_v21, %v8809_v23  ;;  %v3102_v57 = vadd.s32 3, %v3085_v44 }
 0x3ec   :  { %v3097_v29 = vadd.f32 -0.16666654, %v3096_v13  ;;  %v3215_v19 = vsub.s32 %v3211_v42, %v3214_v24  ;;  %v3237_v18 = vsub.s32 4, %v3213_v60  ;;  %v3284_v48 = vshrl.u32 %v10096_v17, %v7859_v63 }
 0x3ed   :  { %v3321_v52 = vmul.u32 %v3319_v10, %v3317_v46  ;;  %v3325_v12 = vshll.u32 %v3322_v40, 16  ;;  %v3305_v20 = vsel %vm3303_vm13, %v3293_v39, 2102212464  ;;  %v3311_v27 = vsel %vm3301_vm14, %v3308_v47, %v3310_v3 }
 0x3ee   :  { %vm3216_vm11 = vcmp.lt.s32.totalorder %v3215_v19, 0  ;;  %v3217_v45 = vsub.s32 0, %v3215_v19  ;;  %v3324_v38 = vmul.u32 %v3320_v41, %v8835_v0  ;;  %v3327_v58 = vshll.u32 %v8850_v8, 16 }
 0x3ef   :  { %vm3329_vm7 = vc.u32 %v3321_v52, %v3325_v12  ;;  %v3331_v42 = vadd.s32 %v3325_v12, %v3321_v52  ;;  %v3090_v44 = vadd.f32 -0.4999988, %v3089_v6  ;;  %v3098_v33 = vmul.f32 %v3097_v29, %v8809_v23 }
 0x3f0   :  { %v3218_v63 = vsel %vm3216_vm11, %v3217_v45, %v3215_v19  ;;  %v3330_v59 = vsel %vm3329_vm7, 1, %v10097_v16  ;;  %v3238_v31 = vsel %vm3115_vm6, %v3237_v18, %v3213_v60  ;;  %v8866_v36 = vshrl.u32 %v8840_v1, 5 }
 0x3f1   :  { %v3219_v51 = vclz %v3218_v63  ;;  %v3332_v39 = vadd.s32 %v3330_v59, %v3324_v38  ;;  %vm3333_vm8 = vc.u32 %v3331_v42, %v3327_v58  ;;  %v4201_v21 = vand.u32 2139095040, %v8603_v25 }
 0x3f2   :  { %v3334_v9 = vsel %vm3333_vm8, 1, %v10097_v16  ;;  %v3341_v15 = vand.u32 65535, %v3311_v27  ;;  %vm8872_vm12 = vcmp.le.f32.partialorder %v3113_v5, 0.7853982  ;;  %v3304_v60 = vsel %vm3300_vm4, %v3284_v48, %v3287_v62 }
 0x3f3   :  { %v5337_v41 = vadd.s32 4294967294, %v3219_v51  ;;  %v3306_v13 = vsel %vm3302_vm3, %v8790_v30, %v3305_v20  ;;  %v3091_v24 = vmul.f32 %v3090_v44, %v8809_v23  ;;  %v3099_v47 = vadd.f32 1.0, %v3098_v33 }
 0x3f4   :  { %v3240_v3 = vsel %vm8872_vm12, 0, %v3238_v31  ;;  %v3342_v6 = vshrl.u32 %v3311_v27, 16  ;;  %v8884_v29 = vand.u32 3, %v3102_v57  ;;  %v3207_v5 = vadd.s32 %v8762_v11, %v8749_v14 }
 0x3f5   :  { %vm5338_vm15 = vcmp.lt.s32.totalorder %v5337_v41, 0  ;;  %v3336_v18 = vadd.s32 %v3334_v9, %v3332_v39  ;;  %v8890_v62 = vsel %vm3301_vm14, %v3304_v60, %v3306_v13  ;;  %v3345_v23 = vmul.u32 %v3341_v15, %v8835_v0  ;;  %v8915_v13 = vld [vmem:[%s9970_s6] ss:$0 sm:$0xff] }
 0x3f6   :  { %v3222_v52 = vsel %vm5338_vm15, 0, %v5337_v41  ;;  %v3344_v30 = vmul.u32 %v3342_v6, %v3317_v46  ;;  %v3257_v45 = vadd.s32 3, %v3240_v3  ;;  %v3326_v20 = vshrl.u32 %v3322_v40, 16 }
 0x3f7   :  { %v3223_v48 = vsub.s32 32, %v3222_v52  ;;  %v3227_v12 = vsub.s32 4294967266, %v3222_v52  ;;  %v8893_v27 = vadd.f32 1.0, %v3091_v24  ;;  %v8896_v57 = vmul.f32 %v3099_v47, %v8802_v7  ;;  %v4450_v24 = vpop.f32.mrf.mxu2  ;;  %v4541_v47 = vld [vmem:[%s9971_s7 + $0x10] sm:$0xff] }
 0x3f8   :  { %v3343_v14 = vmul.u32 %v3341_v15, %v3317_v46  ;;  %v3347_v11 = vshll.u32 %v3344_v30, 16  ;;  %v3224_v38 = vshll.u32 %v3215_v19, %v3222_v52  ;;  %v3337_v43 = vadd.s32 %v3336_v18, %v3326_v20  ;;  %v10221_v46 = vld [vmem:[#allocation28_spill] sm:$0xff] }
 0x3f9   :  { %v3225_v58 = vshrl.u32 %v3207_v5, %v3223_v48  ;;  %v3228_v42 = vadd.s32 127, %v3227_v12  ;;  %v3346_v44 = vmul.u32 %v3342_v6, %v8835_v0  ;;  %v3349_v33 = vshll.u32 %v3345_v23, 16 }
 0x3fa   :  { %vm3351_vm10 = vc.u32 %v3343_v14, %v3347_v11  ;;  %v3353_v63 = vadd.s32 %v3347_v11, %v3343_v14  ;;  %v3328_v40 = vshrl.u32 %v8850_v8, 16  ;;  %v8901_v39 = vand.u32 3, %v3257_v45  ;;  %v4542_v8 = vld [vmem:[%s9971_s7 + $0x18] sm:$0xff]  ;;  %v4540_v45 = vld [vmem:[%s9971_s7 + $0x8] sm:$0xff] }
 0x3fb   :  { %v3226_v59 = vor.u32 %v3225_v58, %v3224_v38  ;;  %v3229_v51 = vshll.u32 %v3228_v42, 23  ;;  %v3352_v31 = vsel %vm3351_vm10, 1, %v10097_v16  ;;  %v3423_v19 = vand.u32 2147483647, %v10221_v46  ;;  %4635 = vmatpush.msra.mxu3 %v4542_v8  ;;  %v4539_v38 = vld [vmem:[%s9971_s7] sm:$0xff] }
 0x3fc   :  { %v3354_v7 = vadd.s32 %v3352_v31, %v3346_v44  ;;  %vm3355_vm9 = vc.u32 %v3353_v63, %v3349_v33  ;;  %v3109_v9 = vxor.u32 2147483648, %v8893_v27  ;;  %v8905_v41 = vadd.s32 %v3337_v43, %v3328_v40  ;;  %v10222_v44 = vld [vmem:[#allocation8_spill] sm:$0xff] }
 0x3fd   :  { %v3230_v15 = vor.u32 4788187, %v3229_v51  ;;  %v3356_v0 = vsel %vm3355_vm9, 1, %v10097_v16  ;;  %v3106_v60 = vxor.u32 2147483648, %v8896_v57  ;;  %v3348_v3 = vshrl.u32 %v3344_v30, 16  ;;  %4636 = vmatpush.msra.mxu3 %v4541_v47 }
 0x3fe   :  { %v3358_v6 = vadd.s32 %v3356_v0, %v3354_v7  ;;  %vm3108_vm2 = vcmp.eq.s32.totalorder %v8884_v29, 2  ;;  %v3233_v18 = vcvt.s32.f32 %v3226_v59  ;;  %v8921_v52 = vadd.s32 %v3353_v63, %v3349_v33 }
 0x3ff   :  { %v3231_v5 = vand.u32 2147483647, %v3230_v15  ;;  %v3361_v48 = vmul.u32 %v8829_v26, %v8890_v62  ;;  %vm3105_vm5 = vcmp.eq.s32.totalorder %v8884_v29, 0  ;;  %v4451_v12 = vadd.f32 %v8915_v13, %v4450_v24  ;;  %4637 = vmatpush.msra.mxu3 %v4540_v45 }
 0x400   :  { %v3350_v30 = vshrl.u32 %v3345_v23, 16  ;;  %v3359_v20 = vadd.s32 %v3358_v6, %v3348_v3  ;;  %v3430_v14 = vand.u32 8388607, %v3423_v19  ;;  %vm4547_vm1 = vcmask 261120   ;;  %v4452_v3 = vpop.f32.mrf.mxu2 }
 0x401   :  { %v3234_v11 = vmul.f32 %v3233_v18, %v3231_v5  ;;  %vm3363_vm4 = vc.u32 %v8905_v41, %v8921_v52  ;;  %v3444_v26 = vshrl.u32 %v10090_v34, %v7870_v37  ;;  %v4514_v62 = vmax.f32 %v4451_v12, 0.0  ;;  %4638 = vmatpush.msra.mxu3 %v4539_v38 }
 0x402   :  { %v3360_v58 = vadd.s32 %v3359_v20, %v3350_v30  ;;  %v3441_v23 = vshrl.u32 %v10100_v32, %v7870_v37  ;;  %v3447_v42 = vshrl.u32 %v10101_v2, %v7870_v37  ;;  %v3443_v33 = vshll.u32 %v10100_v32, %v10222_v44  ;;  %v10223_v20 = vld [vmem:[#allocation23_spill] sm:$0xff] }
 0x403   :  { %v3235_v43 = vxor.u32 2147483648, %v3234_v11  ;;  %v3449_v63 = vshll.u32 %v10101_v2, %v10222_v44  ;;  %v3450_v59 = vshrl.u32 %v10091_v22, %v7870_v37  ;;  %v3446_v40 = vshll.u32 %v10090_v34, %v10222_v44  ;;  %5389 = vmatmul.msk.f32.vlgmr.msra.gmra.mxu3 %vm4547_vm1, %v4514_v62 }
 0x404   :  { %v3364_v51 = vadd.s32 1, %v3360_v58  ;;  %v3452_v31 = vshll.u32 %v10091_v22, %v10222_v44  ;;  %v3453_v7 = vshrl.u32 %v10102_v50, %v7870_v37  ;;  %vm3104_vm13 = vcmp.lt.s32.totalorder %v8884_v29, 2 }
 0x405   :  { %v3236_v15 = vsel %vm3115_vm6, %v3235_v43, %v3234_v11  ;;  %v3440_v0 = vshll.u32 %v10096_v17, %v10222_v44  ;;  %v8960_v8 = vor.u32 %v3444_v26, %v3443_v33  ;;  %v3451_v24 = vor.u32 %v3450_v59, %v3449_v63 }
 0x406   :  { %v8965_v47 = vsel %vm8872_vm12, %v10213_v54, %v3236_v15  ;;  %v3365_v6 = vsel %vm3363_vm4, %v3364_v51, %v3360_v58  ;;  %v8971_v5 = vor.u32 %v3447_v42, %v3446_v40  ;;  %v3454_v18 = vor.u32 %v3453_v7, %v3452_v31 }
 0x407   :  { %v3241_v12 = vmul.f32 %v8965_v47, %v8965_v47  ;;  %v4453_v45 = vadd.f32 %v8915_v13, %v4452_v3  ;;  %v3366_v30 = vadd.s32 %v3365_v6, %v3361_v48  ;;  %vm3458_vm3 = vcmp.lt.s32.totalorder %v10223_v20, 4 }
 0x408   :  { %v3110_v10 = vsel %vm3108_vm2, %v3109_v9, %v8896_v57  ;;  %v3431_v11 = vor.u32 8388608, %v3430_v14  ;;  %v8980_v26 = vor.u32 %v3441_v23, %v3440_v0  ;;  %v3464_v62 = vsel %vm3458_vm3, %v3451_v24, 920167782 }
 0x409   :  { %v3107_v38 = vsel %vm3105_vm5, %v8893_v27, %v3106_v60  ;;  %v3242_v58 = vmul.f32 -0.001358992, %v3241_v12  ;;  %v3249_v42 = vmul.f32 -0.00019511016, %v3241_v12  ;;  %v3367_v43 = vadd.s32 536870912, %v3366_v30 }
 0x40a   :  { %v4515_v48 = vmax.f32 %v4453_v45, 0.0  ;;  %vm3455_vm14 = vcmp.lt.s32.totalorder %v10223_v20, 1  ;;  %vm3457_vm6 = vcmp.lt.s32.totalorder %v10223_v20, 3  ;;  %v3468_v57 = vsel %vm3458_vm3, %v3454_v18, 1326507024 }
 0x40b   :  { %v3243_v9 = vadd.f32 0.041655596, %v3242_v58  ;;  %v3250_v14 = vadd.f32 0.008332121, %v3249_v42  ;;  %v8991_v23 = vshrl.u32 %v3367_v43, 30  ;;  %v3467_v27 = vsel %vm3455_vm14, %v8960_v8, %v8971_v5 }
 0x40c   :  { %v3463_v60 = vsel %vm3455_vm14, %v8980_v26, %v8960_v8  ;;  %v3465_v44 = vsel %vm3457_vm6, %v8971_v5, %v3464_v62  ;;  %v3469_v33 = vsel %vm3457_vm6, %v3451_v24, %v3468_v57  ;;  %v9006_v63 = vshll.u32 %v3431_v11, 8  ;;  %5390 = vmatmul.msk.f32.gmra.mxu3 %vm4547_vm1, %v4515_v48 }
 0x40d   :  { %v3244_v59 = vmul.f32 %v3243_v9, %v3241_v12  ;;  %v3251_v51 = vmul.f32 %v3250_v14, %v3241_v12  ;;  %v3369_v40 = vshll.u32 %v8991_v23, 30  ;;  %vm3456_vm11 = vcmp.lt.s32.totalorder %v10223_v20, 2 }
 0x40e   :  { %v9012_v31 = vshrl.u32 %v4201_v21, 23  ;;  %vm3101_vm7 = vweird.f32 %v10203_v55  ;;  %v3111_v7 = vsel %vm3104_vm13, %v3107_v38, %v3110_v10  ;;  %v3470_v15 = vsel %vm3456_vm11, %v3467_v27, %v3469_v33 }
 0x40f   :  { %v3245_v0 = vadd.f32 -0.4999988, %v3244_v59  ;;  %v3252_v24 = vadd.f32 -0.16666654, %v3251_v51  ;;  %vm3263_vm8 = vcmp.eq.s32.totalorder %v8901_v39, 2  ;;  %v9021_v3 = vsub.s32 %v3366_v30, %v3369_v40 }
 0x410   :  { %v3466_v21 = vsel %vm3456_vm11, %v3463_v60, %v3465_v44  ;;  %vm3260_vm12 = vcmp.eq.s32.totalorder %v8901_v39, 0  ;;  %v3472_v6 = vand.u32 65535, %v9006_v63  ;;  %v3473_v29 = vshrl.u32 %v9006_v63, 16 }
 0x411   :  { %v3474_v18 = vand.u32 65535, %v3470_v15  ;;  %v3475_v45 = vshrl.u32 %v3470_v15, 16  ;;  %v3246_v10 = vmul.f32 %v3245_v0, %v3241_v12  ;;  %v3253_v11 = vmul.f32 %v3252_v24, %v3241_v12 }
 0x412   :  { %vm3259_vm15 = vcmp.lt.s32.totalorder %v8901_v39, 2  ;;  %vm3371_vm10 = vcmp.lt.s32.totalorder %v9021_v3, 0  ;;  %v3372_v30 = vsub.s32 0, %v9021_v3  ;;  %v3112_v62 = vsel %vm3101_vm7, nan, %v3111_v7 }
 0x413   :  { %vm3256_vm9 = vweird.f32 %v10213_v54  ;;  %v3362_v38 = vadd.s32 %v8921_v52, %v8905_v41  ;;  %v3477_v58 = vmul.u32 %v3475_v45, %v3472_v6  ;;  %v3496_v42 = vand.u32 65535, %v3466_v21 }
 0x414   :  { %v3247_v43 = vadd.f32 1.0, %v3246_v10  ;;  %v3254_v48 = vadd.f32 1.0, %v3253_v11  ;;  %v3373_v12 = vsel %vm3371_vm10, %v3372_v30, %v9021_v3  ;;  %v3478_v57 = vmul.u32 %v3474_v18, %v3473_v29 }
 0x415   :  { %v3374_v9 = vclz %v3373_v12  ;;  %v3439_v14 = vshrl.u32 %v10096_v17, %v7870_v37  ;;  %v3480_v27 = vshll.u32 %v3477_v58, 16  ;;  %v3497_v60 = vshrl.u32 %v3466_v21, 16 }
 0x416   :  { %v3255_v55 = vmul.f32 %v3254_v48, %v8965_v47  ;;  %v3264_v44 = vxor.u32 2147483648, %v3247_v43  ;;  %v3460_v41 = vsel %vm3458_vm3, %v8971_v5, 2102212464  ;;  %v3476_v52 = vmul.u32 %v3474_v18, %v3472_v6 }
 0x417   :  { %v5340_v33 = vadd.s32 4294967294, %v3374_v9  ;;  %v3479_v59 = vmul.u32 %v3475_v45, %v3473_v29  ;;  %v3481_v51 = vshrl.u32 %v3477_v58, 16  ;;  %v3498_v40 = vmul.u32 %v3496_v42, %v3472_v6 }
 0x418   :  { %v3261_v7 = vxor.u32 2147483648, %v3255_v55  ;;  %v3482_v15 = vshll.u32 %v3478_v57, 16  ;;  %vm3484_vm2 = vc.u32 %v3476_v52, %v3480_v27  ;;  %v3486_v0 = vadd.s32 %v3480_v27, %v3476_v52 }
 0x419   :  { %v3265_v37 = vsel %vm3263_vm8, %v3264_v44, %v3255_v55  ;;  %vm5341_vm5 = vcmp.lt.s32.totalorder %v5340_v33, 0  ;;  %v3485_v47 = vsel %vm3484_vm2, 1, %v10097_v16  ;;  %v3499_v24 = vmul.u32 %v3497_v60, %v3472_v6 }
 0x41a   :  { %v3262_v21 = vsel %vm3260_vm12, %v3247_v43, %v3261_v7  ;;  %v3377_v5 = vsel %vm5341_vm5, 0, %v5340_v33  ;;  %v3487_v18 = vadd.s32 %v3485_v47, %v3479_v59  ;;  %vm3488_vm4 = vc.u32 %v3486_v0, %v3482_v15 }
 0x41b   :  { %v3266_v45 = vsel %vm3259_vm15, %v3262_v21, %v3265_v37  ;;  %v3378_v10 = vsub.s32 32, %v3377_v5  ;;  %v3382_v11 = vsub.s32 4294967266, %v3377_v5  ;;  %v3500_v30 = vmul.u32 %v3496_v42, %v3473_v29 }
 0x41c   :  { %v3267_v58 = vsel %vm3256_vm9, nan, %v3266_v45  ;;  %v3379_v48 = vshll.u32 %v9021_v3, %v3377_v5  ;;  %v3489_v12 = vsel %vm3488_vm4, 1, %v10097_v16  ;;  %v3502_v6 = vshll.u32 %v3499_v24, 16 }
 0x41d   :  { %v4361_v9 = vpack.c.bf16 %v3267_v58, %v3112_v62  ;;  %v3380_v27 = vshrl.u32 %v3362_v38, %v3378_v10  ;;  %v3383_v43 = vadd.s32 127, %v3382_v11  ;;  %v3491_v55 = vadd.s32 %v3489_v12, %v3487_v18 }
 0x41e   :  { %v3459_v39 = vsel %vm3455_vm14, %v3439_v14, %v8980_v26  ;;  %v3461_v42 = vsel %vm3457_vm6, %v8960_v8, %v3460_v41  ;;  %v3501_v44 = vmul.u32 %v3497_v60, %v3473_v29  ;;  %vm3506_vm13 = vc.u32 %v3498_v40, %v3502_v6  ;;  %v10224_v14 = vld [vmem:[#allocation17_spill] sm:$0xff] }
 0x41f   :  { %5384 = vmatmul.msk.bf16.gmra.mxu2 %vm111_vm0, %v4361_v9  ;;  %v3381_v54 = vor.u32 %v3380_v27, %v3379_v48  ;;  %v3384_v3 = vshll.u32 %v3383_v43, 23  ;;  %v3492_v52 = vadd.s32 %v3491_v55, %v3481_v51  ;;  %v3507_v62 = vsel %vm3506_vm13, 1, %v10097_v16 }
 0x420   :  { %v3483_v38 = vshrl.u32 %v3478_v57, 16  ;;  %v3504_v33 = vshll.u32 %v3500_v30, 16  ;;  %v3508_v59 = vadd.s32 %v3502_v6, %v3498_v40  ;;  %v3509_v7 = vadd.s32 %v3507_v62, %v3501_v44 }
 0x421   :  { %v5357_v15 = vadd.s32 4294967169, %v9012_v31  ;;  %vm3270_vm3 = vcmp.lt.s32.totalorder %v10215_v35, 0  ;;  %v3385_v26 = vor.u32 4788187, %v3384_v3  ;;  %v3578_v8 = vand.u32 2147483647, %v10224_v14 }
 0x422   :  { %vm9067_vm14 = vcmp.le.f32.partialorder %v3268_v4, 0.7853982  ;;  %v3462_v60 = vsel %vm3456_vm11, %v3459_v39, %v3461_v42  ;;  %v9073_v57 = vadd.s32 %v3492_v52, %v3483_v38  ;;  %vm3510_vm6 = vc.u32 %v3508_v59, %v3504_v33 }
 0x423   :  { %v3386_v41 = vand.u32 2147483647, %v3385_v26  ;;  %v3388_v51 = vcvt.s32.f32 %v3381_v54  ;;  %v3392_v31 = vsub.s32 4, %v8991_v23  ;;  %v3511_v40 = vsel %vm3510_vm6, 1, %v10097_v16  ;;  %v10227_v26 = vld [vmem:[#allocation14_spill] sm:$0xff] }
 0x424   :  { %v3503_v0 = vshrl.u32 %v3499_v24, 16  ;;  %v3505_v37 = vshrl.u32 %v3500_v30, 16  ;;  %v9077_v47 = vadd.s32 %v3508_v59, %v3504_v33  ;;  %v3513_v4 = vadd.s32 %v3511_v40, %v3509_v7 }
 0x425   :  { %v3389_v21 = vmul.f32 %v3388_v51, %v3386_v41  ;;  %v3585_v5 = vand.u32 8388607, %v3578_v8  ;;  %v3595_v20 = vshll.u32 %v10096_v17, %v7975_v53  ;;  %v3599_v18 = vshrl.u32 %v10090_v34, %v8163_v28 }
 0x426   :  { %v3514_v45 = vadd.s32 %v3513_v4, %v3503_v0  ;;  %vm3518_vm11 = vc.u32 %v9073_v57, %v9077_v47  ;;  %v3596_v24 = vshrl.u32 %v10100_v32, %v8163_v28  ;;  %v3602_v10 = vshrl.u32 %v10101_v2, %v8163_v28 }
 0x427   :  { %v3390_v11 = vxor.u32 2147483648, %v3389_v21  ;;  %v3598_v30 = vshll.u32 %v10100_v32, %v7975_v53  ;;  %v3604_v58 = vshll.u32 %v10101_v2, %v7975_v53  ;;  %v3605_v48 = vshrl.u32 %v10091_v22, %v8163_v28 }
 0x428   :  { %v3515_v12 = vadd.s32 %v3514_v45, %v3505_v37  ;;  %v3601_v6 = vshll.u32 %v10090_v34, %v7975_v53  ;;  %v3607_v9 = vshll.u32 %v10091_v22, %v7975_v53  ;;  %v3608_v27 = vshrl.u32 %v10102_v50, %v8163_v28 }
 0x429   :  { %v3391_v43 = vsel %vm3270_vm3, %v3390_v11, %v3389_v21  ;;  %v3586_v55 = vor.u32 8388608, %v3585_v5  ;;  %v9105_v39 = vor.u32 %v3599_v18, %v3598_v30  ;;  %v3606_v42 = vor.u32 %v3605_v48, %v3604_v58 }
 0x42a   :  { %v9110_v44 = vsel %vm9067_vm14, %v10215_v35, %v3391_v43  ;;  %v3519_v54 = vadd.s32 1, %v3515_v12  ;;  %v3603_v3 = vor.u32 %v3602_v10, %v3601_v6  ;;  %v3609_v52 = vor.u32 %v3608_v27, %v3607_v9 }
 0x42b   :  { %v9112_v62 = vadd.s32 1, %v5357_v15  ;;  %v3393_v53 = vsel %vm3270_vm3, %v3392_v31, %v8991_v23  ;;  %v3396_v38 = vmul.f32 %v9110_v44, %v9110_v44  ;;  %v3516_v33 = vmul.u32 %v9006_v63, %v3462_v60 }
 0x42c   :  { %v3520_v59 = vsel %vm3518_vm11, %v3519_v54, %v3515_v12  ;;  %v9123_v7 = vor.u32 %v3596_v24, %v3595_v20  ;;  %vm3610_vm7 = vcmp.lt.s32.totalorder %v10227_v26, 1  ;;  %vm3613_vm8 = vcmp.lt.s32.totalorder %v10227_v26, 4 }
 0x42d   :  { %v3397_v15 = vmul.f32 -0.001358992, %v3396_v38  ;;  %v3404_v41 = vmul.f32 -0.00019511016, %v3396_v38  ;;  %v3521_v51 = vadd.s32 %v3520_v59, %v3516_v33  ;;  %v3619_v23 = vsel %vm3613_vm8, %v3606_v42, 920167782 }
 0x42e   :  { %v3395_v31 = vsel %vm9067_vm14, 0, %v3393_v53  ;;  %v3622_v63 = vsel %vm3610_vm7, %v9105_v39, %v3603_v3  ;;  %v3623_v60 = vsel %vm3613_vm8, %v3609_v52, 1326507024  ;;  %v9136_v40 = vshll.u32 %v3586_v55, 8 }
 0x42f   :  { %v3398_v0 = vadd.f32 0.041655596, %v3397_v15  ;;  %v3405_v37 = vadd.f32 0.008332121, %v3404_v41  ;;  %v3522_v4 = vadd.s32 536870912, %v3521_v51  ;;  %vm3612_vm12 = vcmp.lt.s32.totalorder %v10227_v26, 3 }
 0x430   :  { %vm3611_vm15 = vcmp.lt.s32.totalorder %v10227_v26, 2  ;;  %v3618_v29 = vsel %vm3610_vm7, %v9123_v7, %v9105_v39  ;;  %v3620_v21 = vsel %vm3612_vm12, %v3603_v3, %v3619_v23  ;;  %v3624_v5 = vsel %vm3612_vm12, %v3606_v42, %v3623_v60 }
 0x431   :  { %v3406_v20 = vmul.f32 %v3405_v37, %v3396_v38  ;;  %v3412_v18 = vadd.s32 3, %v3395_v31  ;;  %v3523_v45 = vshrl.u32 %v3522_v4, 30  ;;  %v3625_v24 = vsel %vm3611_vm15, %v3622_v63, %v3624_v5 }
 0x432   :  { %v3627_v10 = vand.u32 65535, %v9136_v40  ;;  %v3628_v11 = vshrl.u32 %v9136_v40, 16  ;;  %v3629_v30 = vand.u32 65535, %v3625_v24  ;;  %v3630_v58 = vshrl.u32 %v3625_v24, 16 }
 0x433   :  { %v3399_v48 = vmul.f32 %v3398_v0, %v3396_v38  ;;  %v3407_v12 = vadd.f32 -0.16666654, %v3406_v20  ;;  %v3524_v6 = vshll.u32 %v3523_v45, 30  ;;  %v3621_v9 = vsel %vm3611_vm15, %v3618_v29, %v3620_v21 }
 0x434   :  { %v9155_v27 = vand.u32 31, %v8840_v1  ;;  %vm4209_vm10 = vcmp.gt.s32.totalorder %v9112_v62, 0  ;;  %v3632_v43 = vmul.u32 %v3630_v58, %v3627_v10  ;;  %v9158_v55 = vmul.u32 %v3629_v30, %v3628_v11 }
 0x435   :  { %v9160_v42 = vand.u32 3, %v3412_v18  ;;  %vm3425_vm9 = vcmp.lt.s32.totalorder %v10221_v46, 0  ;;  %v3525_v54 = vsub.s32 %v3521_v51, %v3524_v6  ;;  %v3594_v52 = vshrl.u32 %v10096_v17, %v8163_v28 }
 0x436   :  { %v3547_v53 = vsub.s32 4, %v3523_v45  ;;  %v3631_v33 = vmul.u32 %v3629_v30, %v3627_v10  ;;  %v3635_v59 = vshll.u32 %v3632_v43, 16  ;;  %v3652_v15 = vshrl.u32 %v3621_v9, 16 }
 0x437   :  { %v3400_v41 = vadd.f32 -0.4999988, %v3399_v48  ;;  %v3408_v1 = vmul.f32 %v3407_v12, %v3396_v38  ;;  %vm3526_vm2 = vcmp.lt.s32.totalorder %v3525_v54, 0  ;;  %v3527_v23 = vsub.s32 0, %v3525_v54 }
 0x438   :  { %v3634_v31 = vmul.u32 %v3630_v58, %v3628_v11  ;;  %v3637_v63 = vshll.u32 %v9158_v55, 16  ;;  %vm3639_vm5 = vc.u32 %v3631_v33, %v3635_v59  ;;  %v3641_v60 = vadd.s32 %v3635_v59, %v3631_v33 }
 0x439   :  { %v3528_v0 = vsel %vm3526_vm2, %v3527_v23, %v3525_v54  ;;  %v3615_v51 = vsel %vm3613_vm8, %v3603_v3, 2102212464  ;;  %v3640_v37 = vsel %vm3639_vm5, 1, %v10097_v16  ;;  %v3651_v28 = vand.u32 65535, %v3621_v9 }
 0x43a   :  { %v3529_v4 = vclz %v3528_v0  ;;  %v3548_v29 = vsel %vm3425_vm9, %v3547_v53, %v3523_v45  ;;  %v3642_v21 = vadd.s32 %v3640_v37, %v3634_v31  ;;  %vm3643_vm4 = vc.u32 %v3641_v60, %v3637_v63 }
 0x43b   :  { %v3401_v5 = vmul.f32 %v3400_v41, %v3396_v38  ;;  %v3409_v20 = vadd.f32 1.0, %v3408_v1  ;;  %v3644_v18 = vsel %vm3643_vm4, 1, %v10097_v16  ;;  %v3654_v24 = vmul.u32 %v3652_v15, %v3627_v10 }
 0x43c   :  { %v9175_v30 = vsel %vm4209_vm10, %v9112_v62, 0  ;;  %vm9179_vm13 = vcmp.le.f32.partialorder %v3423_v19, 0.7853982  ;;  %v3517_v45 = vadd.s32 %v9077_v47, %v9073_v57  ;;  %v5343_v58 = vadd.s32 4294967294, %v3529_v4 }
 0x43d   :  { %v3550_v38 = vsel %vm9179_vm13, 0, %v3548_v29  ;;  %v3614_v48 = vsel %vm3610_vm7, %v3594_v52, %v9123_v7  ;;  %v3646_v12 = vadd.s32 %v3644_v18, %v3642_v21  ;;  %v3655_v62 = vmul.u32 %v3651_v28, %v3628_v11 }
 0x43e   :  { %vm3415_vm3 = vcmp.eq.s32.totalorder %v9160_v42, 0  ;;  %vm5344_vm14 = vcmp.lt.s32.totalorder %v5343_v58, 0  ;;  %v3616_v19 = vsel %vm3612_vm12, %v9105_v39, %v3615_v51  ;;  %v3653_v6 = vmul.u32 %v3651_v28, %v3627_v10 }
 0x43f   :  { %v3657_v9 = vshll.u32 %v3654_v24, 16  ;;  %v3402_v57 = vadd.f32 1.0, %v3401_v5  ;;  %v3410_v47 = vmul.f32 %v3409_v20, %v9110_v44  ;;  %v3532_v53 = vsel %vm5344_vm14, 0, %v5343_v58  ;;  %v10230_v20 = vld [vmem:[#allocation21_spill] sm:$0xff]  ;;  %v4455_v58 = vpop.f32.mrf.mxu2 }
 0x440   :  { %v3636_v33 = vshrl.u32 %v3632_v43, 16  ;;  %v3533_v59 = vsub.s32 32, %v3532_v53  ;;  %v3537_v41 = vsub.s32 4294967266, %v3532_v53  ;;  %v3567_v1 = vadd.s32 3, %v3550_v38 }
 0x441   :  { %v3656_v7 = vmul.u32 %v3652_v15, %v3628_v11  ;;  %v3659_v23 = vshll.u32 %v3655_v62, 16  ;;  %vm3661_vm6 = vc.u32 %v3653_v6, %v3657_v9  ;;  %v3663_v31 = vadd.s32 %v3657_v9, %v3653_v6 }
 0x442   :  { %v3647_v52 = vadd.s32 %v3646_v12, %v3636_v33  ;;  %v3534_v63 = vshll.u32 %v3525_v54, %v3532_v53  ;;  %v3535_v60 = vshrl.u32 %v3517_v45, %v3533_v59  ;;  %v3538_v0 = vadd.s32 127, %v3537_v41  ;;  %v10231_v41 = vld [vmem:[#allocation25_spill] sm:$0xff] }
 0x443   :  { %v3662_v39 = vsel %vm3661_vm6, 1, %v10097_v16  ;;  %v3416_v10 = vxor.u32 2147483648, %v3410_v47  ;;  %v3419_v51 = vxor.u32 2147483648, %v3402_v57  ;;  %vm3665_vm11 = vc.u32 %v3663_v31, %v3659_v23 }
 0x444   :  { %v3664_v37 = vadd.s32 %v3662_v39, %v3656_v7  ;;  %v3536_v44 = vor.u32 %v3535_v60, %v3534_v63  ;;  %v3539_v28 = vshll.u32 %v3538_v0, 23  ;;  %v3638_v43 = vshrl.u32 %v9158_v55, 16 }
 0x445   :  { %v3666_v4 = vsel %vm3665_vm11, 1, %v10097_v16  ;;  %vm3418_vm7 = vcmp.eq.s32.totalorder %v9160_v42, 2  ;;  %v3617_v11 = vsel %vm3611_vm15, %v3614_v48, %v3616_v19  ;;  %v3658_v54 = vshrl.u32 %v3654_v24, 16 }
 0x446   :  { %v3668_v15 = vadd.s32 %v3666_v4, %v3664_v37  ;;  %v3540_v29 = vor.u32 4788187, %v3539_v28  ;;  %v9201_v21 = vand.u32 3, %v3567_v1  ;;  %v9203_v5 = vadd.s32 %v3647_v52, %v3638_v43 }
 0x447   :  { %v3733_v18 = vand.u32 2147483647, %v10230_v20  ;;  %v3417_v45 = vsel %vm3415_vm3, %v3402_v57, %v3416_v10  ;;  %v3420_v55 = vsel %vm3418_vm7, %v3419_v51, %v3410_v47  ;;  %v3660_v38 = vshrl.u32 %v3655_v62, 16  ;;  %v4457_v4 = vpop.f32.mrf.mxu2 }
 0x448   :  { %v3669_v12 = vadd.s32 %v3668_v15, %v3658_v54  ;;  %v3541_v6 = vand.u32 2147483647, %v3540_v29  ;;  %v3543_v9 = vcvt.s32.f32 %v3536_v44  ;;  %v4456_v26 = vadd.f32 %v8915_v13, %v4455_v58  ;;  %v10232_v15 = vld [vmem:[#allocation16_spill] sm:$0xff] }
 0x449   :  { %v9209_v24 = vadd.s32 %v3663_v31, %v3659_v23  ;;  %v3671_v19 = vmul.u32 %v9136_v40, %v3617_v11  ;;  %v3754_v53 = vshrl.u32 %v10090_v34, %v8258_v49  ;;  %v3757_v33 = vshrl.u32 %v10101_v2, %v8258_v49 }
 0x44a   :  { %v3670_v48 = vadd.s32 %v3669_v12, %v3660_v38  ;;  %vm3414_vm8 = vcmp.lt.s32.totalorder %v9160_v42, 2  ;;  %v3544_v57 = vmul.f32 %v3543_v9, %v3541_v6  ;;  %v4516_v62 = vmax.f32 %v4456_v26, 0.0 }
 0x44b   :  { %vm3673_vm12 = vc.u32 %v9203_v5, %v9209_v24  ;;  %v3740_v47 = vand.u32 8388607, %v3733_v18  ;;  %v3753_v40 = vshll.u32 %v10100_v32, %v10231_v41  ;;  %v3756_v1 = vshll.u32 %v10090_v34, %v10231_v41 }
 0x44c   :  { %v3674_v59 = vadd.s32 1, %v3670_v48  ;;  %v3760_v7 = vshrl.u32 %v10091_v22, %v8258_v49  ;;  %v3545_v52 = vxor.u32 2147483648, %v3544_v57  ;;  %5391 = vmatmul.msk.f32.gmra.mxu3 %vm4547_vm1, %v4516_v62  ;;  %v3751_v23 = vshrl.u32 %v10100_v32, %v8258_v49 }
 0x44d   :  { %v3762_v31 = vshll.u32 %v10091_v22, %v10231_v41  ;;  %v3763_v63 = vshrl.u32 %v10102_v50, %v8258_v49  ;;  %v9234_v0 = vor.u32 %v3754_v53, %v3753_v40  ;;  %v9236_v39 = vor.u32 %v3757_v33, %v3756_v1 }
 0x44e   :  { %v3675_v60 = vsel %vm3673_vm12, %v3674_v59, %v3670_v48  ;;  %v3759_v10 = vshll.u32 %v10101_v2, %v10231_v41  ;;  %v3546_v51 = vsel %vm3425_vm9, %v3545_v52, %v3544_v57  ;;  %v3750_v44 = vshll.u32 %v10096_v17, %v10231_v41 }
 0x44f   :  { %v3676_v37 = vadd.s32 %v3675_v60, %v3671_v19  ;;  %v3764_v28 = vor.u32 %v3763_v63, %v3762_v31  ;;  %v9247_v43 = vsel %vm9179_vm13, %v10221_v46, %v3546_v51  ;;  %v3741_v11 = vor.u32 8388608, %v3740_v47 }
 0x450   :  { %v3761_v54 = vor.u32 %v3760_v7, %v3759_v10  ;;  %vm3765_vm15 = vcmp.lt.s32.totalorder %v10232_v15, 1  ;;  %v3551_v29 = vmul.f32 %v9247_v43, %v9247_v43  ;;  %v4458_v58 = vadd.f32 %v8915_v13, %v4457_v4 }
 0x451   :  { %v3677_v38 = vadd.s32 536870912, %v3676_v37  ;;  %vm3768_vm10 = vcmp.lt.s32.totalorder %v10232_v15, 4  ;;  %v3752_v12 = vor.u32 %v3751_v23, %v3750_v44  ;;  %vm3767_vm9 = vcmp.lt.s32.totalorder %v10232_v15, 3 }
 0x452   :  { %v3777_v3 = vsel %vm3765_vm15, %v9234_v0, %v9236_v39  ;;  %v3778_v6 = vsel %vm3768_vm10, %v3764_v28, 1326507024  ;;  %v3552_v9 = vmul.f32 -0.001358992, %v3551_v29  ;;  %v3559_v26 = vmul.f32 -0.00019511016, %v3551_v29 }
 0x453   :  { %v4517_v48 = vmax.f32 %v4458_v58, 0.0  ;;  %v9261_v19 = vshrl.u32 %v3677_v38, 30  ;;  %v3421_v13 = vsel %vm3414_vm8, %v3417_v45, %v3420_v55  ;;  %v3774_v53 = vsel %vm3768_vm10, %v3761_v54, 920167782 }
 0x454   :  { %v3779_v33 = vsel %vm3767_vm9, %v3761_v54, %v3778_v6  ;;  %v9269_v57 = vshll.u32 %v3741_v11, 8  ;;  %v3553_v62 = vadd.f32 0.041655596, %v3552_v9  ;;  %v3560_v47 = vadd.f32 0.008332121, %v3559_v26 }
 0x455   :  { %v3679_v59 = vshll.u32 %v9261_v19, 30  ;;  %vm3766_vm2 = vcmp.lt.s32.totalorder %v10232_v15, 2  ;;  %5392 = vmatmul.msk.f32.gmra.mxu3 %vm4547_vm1, %v4517_v48  ;;  %v9275_v41 = vand.u32 31, %v9175_v30  ;;  %vm3411_vm5 = vweird.f32 %v10215_v35 }
 0x456   :  { %v3773_v42 = vsel %vm3765_vm15, %v3752_v12, %v9234_v0  ;;  %v3780_v45 = vsel %vm3766_vm2, %v3777_v3, %v3779_v33  ;;  %v3554_v55 = vmul.f32 %v3553_v62, %v3551_v29  ;;  %v3561_v40 = vmul.f32 %v3560_v47, %v3551_v29 }
 0x457   :  { %v9283_v1 = vsub.s32 %v3676_v37, %v3679_v59  ;;  %v3775_v7 = vsel %vm3767_vm9, %v9236_v39, %v3774_v53  ;;  %v9288_v52 = vsel %vm3411_vm5, nan, %v3421_v13  ;;  %v3782_v23 = vand.u32 65535, %v9269_v57 }
 0x458   :  { %v3784_v35 = vand.u32 65535, %v3780_v45  ;;  %v3785_v31 = vshrl.u32 %v3780_v45, 16  ;;  %v3555_v63 = vadd.f32 -0.4999988, %v3554_v55  ;;  %v3562_v60 = vadd.f32 -0.16666654, %v3561_v40 }
 0x459   :  { %vm3573_vm4 = vcmp.eq.s32.totalorder %v9201_v21, 2  ;;  %vm3681_vm13 = vcmp.lt.s32.totalorder %v9283_v1, 0  ;;  %v3682_v10 = vsub.s32 0, %v9283_v1  ;;  %vm3570_vm3 = vcmp.eq.s32.totalorder %v9201_v21, 0 }
 0x45a   :  { %v3749_v51 = vshrl.u32 %v10096_v17, %v8258_v49  ;;  %v3776_v37 = vsel %vm3766_vm2, %v3773_v42, %v3775_v7  ;;  %v3783_v44 = vshrl.u32 %v9269_v57, 16  ;;  %v3787_v28 = vmul.u32 %v3785_v31, %v3782_v23 }
 0x45b   :  { %v3556_v4 = vmul.f32 %v3555_v63, %v3551_v29  ;;  %v3563_v11 = vmul.f32 %v3562_v60, %v3551_v29  ;;  %vm3569_vm14 = vcmp.lt.s32.totalorder %v9201_v21, 2  ;;  %v3672_v54 = vadd.s32 %v9209_v24, %v9203_v5 }
 0x45c   :  { %v3683_v58 = vsel %vm3681_vm13, %v3682_v10, %v9283_v1  ;;  %vm3566_vm6 = vweird.f32 %v10221_v46  ;;  %v3769_v49 = vsel %vm3765_vm15, %v3749_v51, %v3752_v12  ;;  %v3788_v3 = vmul.u32 %v3784_v35, %v3783_v44 }
 0x45d   :  { %v3684_v38 = vclz %v3683_v58  ;;  %v3790_v6 = vshll.u32 %v3787_v28, 16  ;;  %v3557_v9 = vadd.f32 1.0, %v3556_v4  ;;  %v3564_v26 = vadd.f32 1.0, %v3563_v11 }
 0x45e   :  { %v3786_v48 = vmul.u32 %v3784_v35, %v3782_v23  ;;  %v3807_v13 = vshrl.u32 %v3776_v37, 16  ;;  %v3770_v53 = vsel %vm3768_vm10, %v9236_v39, 2102212464  ;;  %v3789_v5 = vmul.u32 %v3785_v31, %v3783_v44 }
 0x45f   :  { %v5346_v29 = vadd.s32 4294967294, %v3684_v38  ;;  %v3806_v24 = vand.u32 65535, %v3776_v37  ;;  %v3565_v33 = vmul.f32 %v3564_v26, %v9247_v43  ;;  %v3574_v62 = vxor.u32 2147483648, %v3557_v9 }
 0x460   :  { %vm3794_vm11 = vc.u32 %v3786_v48, %v3790_v6  ;;  %v3796_v47 = vadd.s32 %v3790_v6, %v3786_v48  ;;  %v3791_v12 = vshrl.u32 %v3787_v28, 16  ;;  %v3792_v59 = vshll.u32 %v3788_v3, 16 }
 0x461   :  { %vm5347_vm7 = vcmp.lt.s32.totalorder %v5346_v29, 0  ;;  %v3795_v42 = vsel %vm3794_vm11, 1, %v10097_v16  ;;  %v3571_v45 = vxor.u32 2147483648, %v3565_v33  ;;  %v3809_v7 = vmul.u32 %v3807_v13, %v3782_v23 }
 0x462   :  { %v3687_v55 = vsel %vm5347_vm7, 0, %v5346_v29  ;;  %v3797_v40 = vadd.s32 %v3795_v42, %v3789_v5  ;;  %v3575_v35 = vsel %vm3573_vm4, %v3574_v62, %v3565_v33  ;;  %vm3798_vm8 = vc.u32 %v3796_v47, %v3792_v59  ;;  %v10233_v59 = vld [vmem:[#allocation24_spill] sm:$0xff] }
 0x463   :  { %v3688_v39 = vsub.s32 32, %v3687_v55  ;;  %v3692_v31 = vsub.s32 4294967266, %v3687_v55  ;;  %v3572_v43 = vsel %vm3570_vm3, %v3557_v9, %v3571_v45  ;;  %v3689_v63 = vshll.u32 %v9283_v1, %v3687_v55 }
 0x464   :  { %v3799_v60 = vsel %vm3798_vm8, 1, %v10097_v16  ;;  %v3810_v10 = vmul.u32 %v3806_v24, %v3783_v44  ;;  %v3576_v51 = vsel %vm3569_vm14, %v3572_v43, %v3575_v35  ;;  %v3771_v58 = vsel %vm3767_vm9, %v9234_v0, %v3770_v53 }
 0x465   :  { %v3690_v37 = vshrl.u32 %v3672_v54, %v3688_v39  ;;  %v3693_v28 = vadd.s32 127, %v3692_v31  ;;  %v3801_v4 = vadd.s32 %v3799_v60, %v3797_v40  ;;  %v3577_v11 = vsel %vm3566_vm6, nan, %v3576_v51 }
 0x466   :  { %v3808_v38 = vmul.u32 %v3806_v24, %v3782_v23  ;;  %v3812_v6 = vshll.u32 %v3809_v7, 16  ;;  %v4362_v1 = vpack.c.bf16 %v3577_v11, %v9288_v52  ;;  %v3811_v29 = vmul.u32 %v3807_v13, %v3783_v44 }
 0x467   :  { %v3691_v9 = vor.u32 %v3690_v37, %v3689_v63  ;;  %v3694_v26 = vshll.u32 %v3693_v28, 23  ;;  %v3802_v48 = vadd.s32 %v3801_v4, %v3791_v12  ;;  %v3814_v21 = vshll.u32 %v3810_v10, 16 }
 0x468   :  { %vm3816_vm12 = vc.u32 %v3808_v38, %v3812_v6  ;;  %v3818_v54 = vadd.s32 %v3812_v6, %v3808_v38  ;;  %v9327_v5 = vsub.s32 32, %v9155_v27  ;;  %5385 = vmatmul.msk.bf16.gmra.mxu2 %vm111_vm0, %v4362_v1  ;;  %v3793_v33 = vshrl.u32 %v3788_v3, 16 }
 0x469   :  { %v3695_v46 = vor.u32 4788187, %v3694_v26  ;;  %v3817_v0 = vsel %vm3816_vm12, 1, %v10097_v16  ;;  %v9332_v23 = vshrl.u32 %v9175_v30, 5  ;;  %v3772_v52 = vsel %vm3766_vm2, %v3769_v49, %v3771_v58 }
 0x46a   :  { %v3819_v53 = vadd.s32 %v3817_v0, %v3811_v29  ;;  %vm3820_vm15 = vc.u32 %v3818_v54, %v3814_v21  ;;  %v3698_v13 = vcvt.s32.f32 %v3691_v9  ;;  %v9336_v24 = vadd.s32 %v3802_v48, %v3793_v33  ;;  %v10236_v33 = vld [vmem:[#allocation10_spill] sm:$0xff] }
 0x46b   :  { %v3696_v44 = vand.u32 2147483647, %v3695_v46  ;;  %v3821_v62 = vsel %vm3820_vm15, 1, %v10097_v16  ;;  %v9340_v47 = vsub.s32 32, %v9275_v41  ;;  %v3813_v3 = vshrl.u32 %v3809_v7, 16 }
 0x46c   :  { %v3823_v12 = vadd.s32 %v3821_v62, %v3819_v53  ;;  %v3888_v42 = vand.u32 2147483647, %v10233_v59  ;;  %vm9345_vm10 = vcmp.le.f32.partialorder %v3578_v8, 0.7853982  ;;  %vm3580_vm9 = vcmp.lt.s32.totalorder %v10224_v14, 0 }
 0x46d   :  { %v3699_v15 = vmul.f32 %v3698_v13, %v3696_v44  ;;  %v9350_v49 = vadd.s32 %v3818_v54, %v3814_v21  ;;  %v3702_v45 = vsub.s32 4, %v9261_v19  ;;  %v3815_v55 = vshrl.u32 %v3810_v10, 16 }
 0x46e   :  { %v3824_v40 = vadd.s32 %v3823_v12, %v3813_v3  ;;  %v3826_v7 = vmul.u32 %v9269_v57, %v3772_v52  ;;  %v3909_v8 = vshrl.u32 %v10090_v34, %v8553_v56  ;;  %v3912_v39 = vshrl.u32 %v10101_v2, %v8553_v56 }
 0x46f   :  { %v3700_v35 = vxor.u32 2147483648, %v3699_v15  ;;  %vm3828_vm2 = vc.u32 %v9336_v24, %v9350_v49  ;;  %v3895_v43 = vand.u32 8388607, %v3888_v42  ;;  %v3908_v63 = vshll.u32 %v10100_v32, %v8448_v61 }
 0x470   :  { %v3825_v31 = vadd.s32 %v3824_v40, %v3815_v55  ;;  %v3915_v57 = vshrl.u32 %v10091_v22, %v8553_v56  ;;  %v3911_v10 = vshll.u32 %v10090_v34, %v8448_v61  ;;  %v3917_v51 = vshll.u32 %v10091_v22, %v8448_v61 }
 0x471   :  { %v3701_v60 = vsel %vm3580_vm9, %v3700_v35, %v3699_v15  ;;  %v3918_v37 = vshrl.u32 %v10102_v50, %v8553_v56  ;;  %v3906_v11 = vshrl.u32 %v10100_v32, %v8553_v56  ;;  %v3914_v58 = vshll.u32 %v10101_v2, %v8448_v61 }
 0x472   :  { %v9377_v28 = vsel %vm9345_vm10, %v10224_v14, %v3701_v60  ;;  %v3829_v4 = vadd.s32 1, %v3825_v31  ;;  %v9387_v6 = vor.u32 %v3909_v8, %v3908_v63  ;;  %v3913_v1 = vor.u32 %v3912_v39, %v3911_v10 }
 0x473   :  { %v9385_v38 = vmul.f32 %v9377_v28, %v9377_v28  ;;  %v3919_v9 = vor.u32 %v3918_v37, %v3917_v51  ;;  %v3703_v26 = vsel %vm3580_vm9, %v3702_v45, %v9261_v19  ;;  %v3896_v29 = vor.u32 8388608, %v3895_v43 }
 0x474   :  { %v3830_v48 = vsel %vm3828_vm2, %v3829_v4, %v3825_v31  ;;  %v3916_v21 = vor.u32 %v3915_v57, %v3914_v58  ;;  %v3905_v46 = vshll.u32 %v10096_v17, %v8448_v61  ;;  %vm3920_vm5 = vcmp.lt.s32.totalorder %v10236_v33, 1 }
 0x475   :  { %v3831_v54 = vadd.s32 %v3830_v48, %v3826_v7  ;;  %vm3923_vm4 = vcmp.lt.s32.totalorder %v10236_v33, 4  ;;  %v3707_v0 = vmul.f32 -0.001358992, %v9385_v38  ;;  %v3714_v52 = vmul.f32 -0.00019511016, %v9385_v38 }
 0x476   :  { %v3933_v19 = vsel %vm3923_vm4, %v3919_v9, 1326507024  ;;  %v3907_v44 = vor.u32 %v3906_v11, %v3905_v46  ;;  %vm3922_vm13 = vcmp.lt.s32.totalorder %v10236_v33, 3  ;;  %v3932_v13 = vsel %vm3920_vm5, %v9387_v6, %v3913_v1 }
 0x477   :  { %v3832_v53 = vadd.s32 536870912, %v3831_v54  ;;  %v3705_v61 = vsel %vm9345_vm10, 0, %v3703_v26  ;;  %v3929_v62 = vsel %vm3923_vm4, %v3916_v21, 920167782  ;;  %v3934_v3 = vsel %vm3922_vm13, %v3916_v21, %v3933_v19 }
 0x478   :  { %v9413_v12 = vshll.u32 %v3896_v29, 8  ;;  %v4224_v15 = vshll.u32 %v10101_v2, %v9275_v41  ;;  %v4225_v45 = vshrl.u32 %v10091_v22, %v9340_v47  ;;  %vm3921_vm3 = vcmp.lt.s32.totalorder %v10236_v33, 2 }
 0x479   :  { %v3833_v55 = vshrl.u32 %v3832_v53, 30  ;;  %v9422_v30 = vshll.u32 %v10091_v22, %v9275_v41  ;;  %v3708_v40 = vadd.f32 0.041655596, %v3707_v0  ;;  %v3715_v7 = vadd.f32 0.008332121, %v3714_v52 }
 0x47a   :  { %v3935_v35 = vsel %vm3921_vm3, %v3932_v13, %v3934_v3  ;;  %v3722_v8 = vadd.s32 3, %v3705_v61  ;;  %v3928_v31 = vsel %vm3920_vm5, %v3907_v44, %v9387_v6  ;;  %v3930_v43 = vsel %vm3922_vm13, %v3913_v1, %v3929_v62 }
 0x47b   :  { %v3834_v39 = vshll.u32 %v3833_v55, 30  ;;  %v9433_v63 = vshrl.u32 %v10102_v50, %v9340_v47  ;;  %v3937_v57 = vand.u32 65535, %v9413_v12  ;;  %v3939_v60 = vand.u32 65535, %v3935_v35 }
 0x47c   :  { %v3940_v10 = vshrl.u32 %v3935_v35, 16  ;;  %v9436_v51 = vor.u32 %v4225_v45, %v4224_v15  ;;  %vm3735_vm14 = vcmp.lt.s32.totalorder %v10230_v20, 0  ;;  %v3938_v4 = vshrl.u32 %v9413_v12, 16 }
 0x47d   :  { %v3835_v37 = vsub.s32 %v3831_v54, %v3834_v39  ;;  %v3709_v11 = vmul.f32 %v3708_v40, %v9385_v38  ;;  %v3716_v58 = vmul.f32 %v3715_v7, %v9385_v38  ;;  %v3931_v9 = vsel %vm3921_vm3, %v3928_v31, %v3930_v43 }
 0x47e   :  { %v3942_v26 = vmul.u32 %v3940_v10, %v3937_v57  ;;  %v9444_v48 = vand.u32 3, %v3722_v8  ;;  %vm9448_vm6 = vcmp.le.f32.partialorder %v3733_v18, 0.7853982  ;;  %v9452_v54 = vmul.u32 %v3939_v60, %v3938_v4 }
 0x47f   :  { %vm3836_vm11 = vcmp.lt.s32.totalorder %v3835_v37, 0  ;;  %v3837_v21 = vsub.s32 0, %v3835_v37  ;;  %v3904_v46 = vshrl.u32 %v10096_v17, %v8553_v56  ;;  %v3925_v0 = vsel %vm3923_vm4, %v3913_v1, 2102212464 }
 0x480   :  { %v3941_v52 = vmul.u32 %v3939_v60, %v3937_v57  ;;  %v3945_v19 = vshll.u32 %v3942_v26, 16  ;;  %v3857_v13 = vsub.s32 4, %v3833_v55  ;;  %v3961_v61 = vand.u32 65535, %v3931_v9 }
 0x481   :  { %v3838_v53 = vsel %vm3836_vm11, %v3837_v21, %v3835_v37  ;;  %v3962_v62 = vshrl.u32 %v3931_v9, 16  ;;  %v3710_v18 = vadd.f32 -0.4999988, %v3709_v11  ;;  %v3717_v3 = vadd.f32 -0.16666654, %v3716_v58 }
 0x482   :  { %v3839_v15 = vclz %v3838_v53  ;;  %vm3949_vm7 = vc.u32 %v3941_v52, %v3945_v19  ;;  %v3944_v45 = vmul.u32 %v3940_v10, %v3938_v4  ;;  %v3947_v40 = vshll.u32 %v9452_v54, 16 }
 0x483   :  { %v3950_v7 = vsel %vm3949_vm7, 1, %v10097_v16  ;;  %v3951_v35 = vadd.s32 %v3945_v19, %v3941_v52  ;;  %v3827_v56 = vadd.s32 %v9350_v49, %v9336_v24  ;;  %v3924_v8 = vsel %vm3920_vm5, %v3904_v46, %v3907_v44 }
 0x484   :  { %v5349_v1 = vadd.s32 4294967294, %v3839_v15  ;;  %v3926_v39 = vsel %vm3922_vm13, %v9387_v6, %v3925_v0  ;;  %v3858_v31 = vsel %vm3735_vm14, %v3857_v13, %v3833_v55  ;;  %v3952_v43 = vadd.s32 %v3950_v7, %v3944_v45 }
 0x485   :  { %vm3953_vm8 = vc.u32 %v3951_v35, %v3947_v40  ;;  %v3964_v60 = vmul.u32 %v3962_v62, %v3937_v57  ;;  %v3963_v11 = vmul.u32 %v3961_v61, %v3937_v57  ;;  %v3965_v58 = vmul.u32 %v3961_v61, %v3938_v4 }
 0x486   :  { %vm5350_vm12 = vcmp.lt.s32.totalorder %v5349_v1, 0  ;;  %v3954_v10 = vsel %vm3953_vm8, 1, %v10097_v16  ;;  %v3711_v24 = vmul.f32 %v3710_v18, %v9385_v38  ;;  %v3718_v49 = vmul.f32 %v3717_v3, %v9385_v38 }
 0x487   :  { %v3842_v44 = vsel %vm5350_vm12, 0, %v5349_v1  ;;  %v3956_v9 = vadd.s32 %v3954_v10, %v3952_v43  ;;  %v3860_v6 = vsel %vm9448_vm6, 0, %v3858_v31  ;;  %v3967_v55 = vshll.u32 %v3964_v60, 16 }
 0x488   :  { %v3843_v21 = vsub.s32 32, %v3842_v44  ;;  %v3847_v46 = vsub.s32 4294967266, %v3842_v44  ;;  %v3844_v0 = vshll.u32 %v3835_v37, %v3842_v44  ;;  %v3946_v52 = vshrl.u32 %v3942_v26, 16 }
 0x489   :  { %v3966_v19 = vmul.u32 %v3962_v62, %v3938_v4  ;;  %v3969_v53 = vshll.u32 %v3965_v58, 16  ;;  %vm3971_vm15 = vc.u32 %v3963_v11, %v3967_v55  ;;  %v3973_v57 = vadd.s32 %v3967_v55, %v3963_v11  ;;  %v10239_v62 = vld [vmem:[#allocation20_spill] sm:$0xff] }
 0x48a   :  { %v3845_v13 = vshrl.u32 %v3827_v56, %v3843_v21  ;;  %v3848_v15 = vadd.s32 127, %v3847_v46  ;;  %v9474_v61 = vadd.f32 1.0, %v3711_v24  ;;  %v3719_v18 = vadd.f32 1.0, %v3718_v49  ;;  %v4460_v24 = vpop.f32.mrf.mxu2 }
 0x48b   :  { %v3957_v38 = vadd.s32 %v3956_v9, %v3946_v52  ;;  %v3972_v3 = vsel %vm3971_vm15, 1, %v10097_v16  ;;  %vm3975_vm10 = vc.u32 %v3973_v57, %v3969_v53  ;;  %v3927_v37 = vsel %vm3921_vm3, %v3924_v8, %v3926_v39  ;;  %v9493_v39 = vld [vmem:[%s9970_s6] ss:$0 sm:$0xff] }
 0x48c   :  { %v3846_v45 = vor.u32 %v3845_v13, %v3844_v0  ;;  %v3849_v40 = vshll.u32 %v3848_v15, 23  ;;  %v3974_v7 = vadd.s32 %v3972_v3, %v3966_v19  ;;  %v3948_v4 = vshrl.u32 %v9452_v54, 16 }
 0x48d   :  { %v3976_v26 = vsel %vm3975_vm10, 1, %v10097_v16  ;;  %v4043_v35 = vand.u32 2147483647, %v10239_v62  ;;  %v9482_v1 = vadd.s32 3, %v3860_v6  ;;  %v3968_v31 = vshrl.u32 %v3964_v60, 16 }
 0x48e   :  { %v3850_v56 = vor.u32 4788187, %v3849_v40  ;;  %v3978_v43 = vadd.s32 %v3976_v26, %v3974_v7  ;;  %v9485_v10 = vmul.f32 %v3719_v18, %v9377_v28  ;;  %v3729_v11 = vxor.u32 2147483648, %v9474_v61 }
 0x48f   :  { %v9488_v49 = vadd.s32 %v3957_v38, %v3948_v4  ;;  %v3970_v33 = vshrl.u32 %v3965_v58, 16  ;;  %v3853_v54 = vcvt.s32.f32 %v3846_v45  ;;  %v4461_v44 = vadd.f32 %v9493_v39, %v4460_v24 }
 0x490   :  { %v3851_v8 = vand.u32 2147483647, %v3850_v56  ;;  %v3979_v60 = vadd.s32 %v3978_v43, %v3968_v31  ;;  %v9496_v9 = vadd.s32 %v3973_v57, %v3969_v53  ;;  %v3981_v28 = vmul.u32 %v9413_v12, %v3927_v37 }
 0x491   :  { %v4050_v21 = vand.u32 8388607, %v4043_v35  ;;  %v4064_v58 = vshrl.u32 %v10090_v34, %v9327_v5  ;;  %v4518_v6 = vmax.f32 %v4461_v44, 0.0  ;;  %v4067_v0 = vshrl.u32 %v10101_v2, %v9327_v5 }
 0x492   :  { %v3854_v46 = vmul.f32 %v3853_v54, %v3851_v8  ;;  %v3980_v55 = vadd.s32 %v3979_v60, %v3970_v33  ;;  %vm3983_vm9 = vc.u32 %v9488_v49, %v9496_v9  ;;  %v4060_v52 = vshll.u32 %v10096_v17, %v9155_v27  ;;  %v4462_v56 = vpop.f32.mrf.mxu2 }
 0x493   :  { %v4061_v12 = vshrl.u32 %v10100_v32, %v9327_v5  ;;  %v4070_v19 = vshrl.u32 %v10091_v22, %v9327_v5  ;;  %vm3725_vm2 = vcmp.eq.s32.totalorder %v9444_v48, 0  ;;  %5393 = vmatmul.msk.f32.gmra.mxu3 %vm4547_vm1, %v4518_v6  ;;  %v4063_v15 = vshll.u32 %v10100_v32, %v9155_v27 }
 0x494   :  { %v3855_v53 = vxor.u32 2147483648, %v3854_v46  ;;  %v3984_v13 = vadd.s32 1, %v3980_v55  ;;  %v4066_v57 = vshll.u32 %v10090_v34, %v9155_v27  ;;  %v4051_v18 = vor.u32 8388608, %v4050_v21 }
 0x495   :  { %v4069_v38 = vshll.u32 %v10101_v2, %v9155_v27  ;;  %v4072_v3 = vshll.u32 %v10091_v22, %v9155_v27  ;;  %v4073_v45 = vshrl.u32 %v10102_v50, %v9327_v5  ;;  %v9527_v37 = vor.u32 %v4064_v58, %v4063_v15 }
 0x496   :  { %v3856_v40 = vsel %vm3735_vm14, %v3855_v53, %v3854_v46  ;;  %v3985_v7 = vsel %vm3983_vm9, %v3984_v13, %v3980_v55  ;;  %v9529_v4 = vor.u32 %v4067_v0, %v4066_v57  ;;  %vm3728_vm5 = vcmp.eq.s32.totalorder %v9444_v48, 2 }
 0x497   :  { %v9535_v26 = vsel %vm9448_vm6, %v10230_v20, %v3856_v40  ;;  %v3986_v22 = vadd.s32 %v3985_v7, %v3981_v28  ;;  %v4071_v27 = vor.u32 %v4070_v19, %v4069_v38  ;;  %v4074_v31 = vor.u32 %v4073_v45, %v4072_v3 }
 0x498   :  { %v3726_v50 = vxor.u32 2147483648, %v9485_v10  ;;  %v3861_v43 = vmul.f32 %v9535_v26, %v9535_v26  ;;  %v4463_v24 = vadd.f32 %v9493_v39, %v4462_v56  ;;  %v9541_v33 = vor.u32 %v4061_v12, %v4060_v52 }
 0x499   :  { %v3987_v8 = vadd.s32 536870912, %v3986_v22  ;;  %vm4075_vm4 = vcmp.lt.s32.totalorder %v8866_v36, 1  ;;  %vm4077_vm13 = vcmp.lt.s32.totalorder %v8866_v36, 3  ;;  %vm4078_vm3 = vcmp.lt.s32.totalorder %v8866_v36, 4 }
 0x49a   :  { %v3862_v29 = vmul.f32 -0.001358992, %v3861_v43  ;;  %v3869_v54 = vmul.f32 -0.00019511016, %v3861_v43  ;;  %v4519_v44 = vmax.f32 %v4463_v24, 0.0  ;;  %v4087_v60 = vsel %vm4075_vm4, %v9527_v37, %v9529_v4 }
 0x49b   :  { %v9550_v28 = vshrl.u32 %v3987_v8, 30  ;;  %v4084_v21 = vsel %vm4078_vm3, %v4071_v27, 920167782  ;;  %v4088_v58 = vsel %vm4078_vm3, %v4074_v31, 1326507024  ;;  %v9556_v46 = vshll.u32 %v4051_v18, 8 }
 0x49c   :  { %vm3721_vm14 = vweird.f32 %v10224_v14  ;;  %v3863_v6 = vadd.f32 0.041655596, %v3862_v29  ;;  %v3870_v55 = vadd.f32 0.008332121, %v3869_v54  ;;  %vm4076_vm6 = vcmp.lt.s32.totalorder %v8866_v36, 2  ;;  %5394 = vmatmul.msk.f32.gmra.mxu3 %vm4547_vm1, %v4519_v44 }
 0x49d   :  { %v4089_v0 = vsel %vm4077_vm13, %v4071_v27, %v4088_v58  ;;  %v3727_v52 = vsel %vm3725_vm2, %v9474_v61, %v3726_v50  ;;  %v3878_v12 = vand.u32 3, %v9482_v1  ;;  %v3989_v19 = vshll.u32 %v9550_v28, 30 }
 0x49e   :  { %v4090_v53 = vsel %vm4076_vm6, %v4087_v60, %v4089_v0  ;;  %v3864_v13 = vmul.f32 %v3863_v6, %v3861_v43  ;;  %v3871_v15 = vmul.f32 %v3870_v55, %v3861_v43  ;;  %v4083_v57 = vsel %vm4075_vm4, %v9541_v33, %v9527_v37 }
 0x49f   :  { %v4085_v18 = vsel %vm4077_vm13, %v9529_v4, %v4084_v21  ;;  %v9577_v38 = vsub.s32 %v3986_v22, %v3989_v19  ;;  %v4092_v1 = vand.u32 65535, %v9556_v46  ;;  %v4094_v3 = vand.u32 65535, %v4090_v53 }
 0x4a0   :  { %v4095_v45 = vshrl.u32 %v4090_v53, 16  ;;  %vm3724_vm11 = vcmp.lt.s32.totalorder %v9444_v48, 2  ;;  %v3730_v40 = vsel %vm3728_vm5, %v3729_v11, %v9485_v10  ;;  %v3865_v7 = vadd.f32 -0.4999988, %v3864_v13 }
 0x4a1   :  { %v3872_v56 = vadd.f32 -0.16666654, %v3871_v15  ;;  %vm3880_vm7 = vcmp.eq.s32.totalorder %v3878_v12, 0  ;;  %vm3991_vm8 = vcmp.lt.s32.totalorder %v9577_v38, 0  ;;  %v3992_v22 = vsub.s32 0, %v9577_v38 }
 0x4a2   :  { %v4093_v27 = vshrl.u32 %v9556_v46, 16  ;;  %v4097_v31 = vmul.u32 %v4095_v45, %v4092_v1  ;;  %v3731_v50 = vsel %vm3724_vm11, %v3727_v52, %v3730_v40  ;;  %v3866_v24 = vmul.f32 %v3865_v7, %v3861_v43 }
 0x4a3   :  { %v3873_v8 = vmul.f32 %v3872_v56, %v3861_v43  ;;  %vm3879_vm12 = vcmp.lt.s32.totalorder %v3878_v12, 2  ;;  %v4086_v61 = vsel %vm4076_vm6, %v4083_v57, %v4085_v18  ;;  %vm3876_vm15 = vweird.f32 %v10230_v20 }
 0x4a4   :  { %vm3883_vm10 = vcmp.eq.s32.totalorder %v3878_v12, 2  ;;  %v3993_v48 = vsel %vm3991_vm8, %v3992_v22, %v9577_v38  ;;  %v9593_v10 = vmul.u32 %v4094_v3, %v4093_v27  ;;  %v4100_v11 = vshll.u32 %v4097_v31, 16 }
 0x4a5   :  { %v3867_v29 = vadd.f32 1.0, %v3866_v24  ;;  %v3874_v54 = vadd.f32 1.0, %v3873_v8  ;;  %v3994_v44 = vclz %v3993_v48  ;;  %v4096_v60 = vmul.u32 %v4094_v3, %v4092_v1 }
 0x4a6   :  { %vm4233_vm9 = vcmp.lt.s32.totalorder %v9332_v23, 4  ;;  %v3732_v43 = vsel %vm3721_vm14, nan, %v3731_v50  ;;  %v3982_v21 = vadd.s32 %v9496_v9, %v9488_v49  ;;  %v4099_v58 = vmul.u32 %v4095_v45, %v4093_v27 }
 0x4a7   :  { %v4116_v6 = vand.u32 65535, %v4086_v61  ;;  %v3875_v55 = vmul.f32 %v3874_v54, %v9535_v26  ;;  %v3884_v0 = vxor.u32 2147483648, %v3867_v29  ;;  %v5352_v52 = vadd.s32 4294967294, %v3994_v44 }
 0x4a8   :  { %vm4104_vm2 = vc.u32 %v4096_v60, %v4100_v11  ;;  %v4102_v19 = vshll.u32 %v9593_v10, 16  ;;  %v4106_v13 = vadd.s32 %v4100_v11, %v4096_v60  ;;  %v4117_v15 = vshrl.u32 %v4086_v61, 16 }
 0x4a9   :  { %v4105_v53 = vsel %vm4104_vm2, 1, %v10097_v16  ;;  %v3881_v57 = vxor.u32 2147483648, %v3875_v55  ;;  %vm5353_vm5 = vcmp.lt.s32.totalorder %v5352_v52, 0  ;;  %v4059_v14 = vshrl.u32 %v10096_v17, %v9327_v5 }
 0x4aa   :  { %v4107_v18 = vadd.s32 %v4105_v53, %v4099_v58  ;;  %v3885_v49 = vsel %vm3883_vm10, %v3884_v0, %v3875_v55  ;;  %v3997_v9 = vsel %vm5353_vm5, 0, %v5352_v52  ;;  %vm4108_vm14 = vc.u32 %v4106_v13, %v4102_v19 }
 0x4ab   :  { %v4119_v26 = vmul.u32 %v4117_v15, %v4092_v1  ;;  %v3882_v3 = vsel %vm3880_vm7, %v3867_v29, %v3881_v57  ;;  %v3998_v45 = vsub.s32 32, %v3997_v9  ;;  %v4002_v40 = vsub.s32 4294967266, %v3997_v9 }
 0x4ac   :  { %v4120_v7 = vmul.u32 %v4116_v6, %v4093_v27  ;;  %v3886_v56 = vsel %vm3879_vm12, %v3882_v3, %v3885_v49  ;;  %v4109_v22 = vsel %vm4108_vm14, 1, %v10097_v16  ;;  %v4118_v50 = vmul.u32 %v4116_v6, %v4092_v1 }
 0x4ad   :  { %v4122_v24 = vshll.u32 %v4119_v26, 16  ;;  %v3887_v5 = vsel %vm3876_vm15, nan, %v3886_v56  ;;  %v4000_v8 = vshrl.u32 %v3982_v21, %v3998_v45  ;;  %v4003_v61 = vadd.s32 127, %v4002_v40 }
 0x4ae   :  { %v4111_v48 = vadd.s32 %v4109_v22, %v4107_v18  ;;  %v4363_v11 = vpack.c.bf16 %v3887_v5, %v3732_v43  ;;  %v3999_v54 = vshll.u32 %v9577_v38, %v3997_v9  ;;  %v4080_v29 = vsel %vm4078_vm3, %v9529_v4, 2102212464 }
 0x4af   :  { %v4101_v44 = vshrl.u32 %v4097_v31, 16  ;;  %v4004_v12 = vshll.u32 %v4003_v61, 23  ;;  %v4121_v60 = vmul.u32 %v4117_v15, %v4093_v27  ;;  %v4124_v58 = vshll.u32 %v4120_v7, 16 }
 0x4b0   :  { %vm4126_vm11 = vc.u32 %v4118_v50, %v4122_v24  ;;  %5386 = vmatmul.msk.bf16.gmra.mxu2 %vm111_vm0, %v4363_v11  ;;  %v4001_v1 = vor.u32 %v4000_v8, %v3999_v54  ;;  %v4128_v6 = vadd.s32 %v4122_v24, %v4118_v50  ;;  %v4229_v43 = vor.u32 %v9433_v63, %v9422_v30 }
 0x4b1   :  { %v4112_v20 = vadd.s32 %v4111_v48, %v4101_v44  ;;  %v4127_v21 = vsel %vm4126_vm11, 1, %v10097_v16  ;;  %v4239_v38 = vsel %vm4233_vm9, %v9436_v51, 920167782  ;;  %v4005_v4 = vor.u32 4788187, %v4004_v12 }
 0x4b2   :  { %v4129_v31 = vadd.s32 %v4127_v21, %v4121_v60  ;;  %v4079_v27 = vsel %vm4075_vm4, %v4059_v14, %v9541_v33  ;;  %v4103_v55 = vshrl.u32 %v9593_v10, 16  ;;  %vm4130_vm3 = vc.u32 %v4128_v6, %v4124_v58 }
 0x4b3   :  { %v4198_v0 = vand.u32 2147483647, %v8603_v25  ;;  %v4081_v52 = vsel %vm4077_vm13, %v9527_v37, %v4080_v29  ;;  %v4123_v30 = vshrl.u32 %v4119_v26, 16  ;;  %v4131_v63 = vsel %vm4130_vm3, 1, %v10097_v16 }
 0x4b4   :  { %v4215_v19 = vshll.u32 %v10096_v17, %v9275_v41  ;;  %v4008_v53 = vcvt.s32.f32 %v4001_v1  ;;  %v9633_v13 = vadd.s32 %v4112_v20, %v4103_v55  ;;  %v4125_v15 = vshrl.u32 %v4120_v7, 16 }
 0x4b5   :  { %v4133_v33 = vadd.s32 %v4131_v63, %v4129_v31  ;;  %v4006_v57 = vand.u32 2147483647, %v4005_v4  ;;  %v4205_v10 = vand.u32 8388607, %v4198_v0  ;;  %v4216_v14 = vshrl.u32 %v10100_v32, %v9340_v47 }
 0x4b6   :  { %v4218_v37 = vshll.u32 %v10100_v32, %v9275_v41  ;;  %v4219_v49 = vshrl.u32 %v10090_v34, %v9340_v47  ;;  %v4221_v9 = vshll.u32 %v10090_v34, %v9275_v41  ;;  %v4222_v26 = vshrl.u32 %v10101_v2, %v9340_v47 }
 0x4b7   :  { %v4134_v18 = vadd.s32 %v4133_v33, %v4123_v30  ;;  %v9647_v3 = vadd.s32 %v4128_v6, %v4124_v58  ;;  %v4206_v45 = vor.u32 8388608, %v4205_v10  ;;  %v9649_v40 = vor.u32 %v4216_v14, %v4215_v19 }
 0x4b8   :  { %vm4230_vm4 = vcmp.lt.s32.totalorder %v9332_v23, 1  ;;  %v4082_v32 = vsel %vm4076_vm6, %v4079_v27, %v4081_v52  ;;  %v9654_v56 = vor.u32 %v4219_v49, %v4218_v37  ;;  %v9656_v22 = vor.u32 %v4222_v26, %v4221_v9 }
 0x4b9   :  { %v4135_v7 = vadd.s32 %v4134_v18, %v4125_v15  ;;  %v4243_v34 = vsel %vm4233_vm9, %v4229_v43, 1326507024  ;;  %v4009_v41 = vmul.f32 %v4008_v53, %v4006_v57  ;;  %vm4138_vm13 = vc.u32 %v9633_v13, %v9647_v3 }
 0x4ba   :  { %vm4232_vm7 = vcmp.lt.s32.totalorder %v9332_v23, 3  ;;  %vm4231_vm8 = vcmp.lt.s32.totalorder %v9332_v23, 2  ;;  %v4238_v36 = vsel %vm4230_vm4, %v9649_v40, %v9654_v56  ;;  %v9668_v50 = vshll.u32 %v4206_v45, 8 }
 0x4bb   :  { %v4139_v2 = vadd.s32 1, %v4135_v7  ;;  %v4136_v24 = vmul.u32 %v9556_v46, %v4082_v32  ;;  %v4240_v5 = vsel %vm4232_vm7, %v9656_v22, %v4239_v38  ;;  %v4242_v8 = vsel %vm4230_vm4, %v9654_v56, %v9656_v22 }
 0x4bc   :  { %v4244_v48 = vsel %vm4232_vm7, %v9436_v51, %v4243_v34  ;;  %v4010_v11 = vxor.u32 2147483648, %v4009_v41  ;;  %v4241_v29 = vsel %vm4231_vm8, %v4238_v36, %v4240_v5  ;;  %v4247_v44 = vand.u32 65535, %v9668_v50 }
 0x4bd   :  { %v4140_v61 = vsel %vm4138_vm13, %v4139_v2, %v4135_v7  ;;  %v4245_v46 = vsel %vm4231_vm8, %v4242_v8, %v4244_v48  ;;  %v4248_v12 = vshrl.u32 %v9668_v50, 16  ;;  %vm3890_vm6 = vcmp.lt.s32.totalorder %v10233_v59, 0 }
 0x4be   :  { %v4141_v54 = vadd.s32 %v4140_v61, %v4136_v24  ;;  %v4249_v60 = vand.u32 65535, %v4245_v46  ;;  %v4250_v58 = vshrl.u32 %v4245_v46, 16  ;;  %v4272_v6 = vshrl.u32 %v4241_v29, 16 }
 0x4bf   :  { %v4011_v43 = vsel %vm3890_vm6, %v4010_v11, %v4009_v41  ;;  %vm9695_vm12 = vcmp.le.f32.partialorder %v3888_v42, 0.7853982  ;;  %v4271_v33 = vand.u32 65535, %v4241_v29  ;;  %v4214_v36 = vshrl.u32 %v10096_v17, %v9340_v47 }
 0x4c0   :  { %v4142_v1 = vadd.s32 536870912, %v4141_v54  ;;  %v4252_v20 = vmul.u32 %v4250_v58, %v4247_v44  ;;  %v4253_v21 = vmul.u32 %v4249_v60, %v4248_v12  ;;  %v4251_v38 = vmul.u32 %v4249_v60, %v4247_v44 }
 0x4c1   :  { %v9702_v30 = vsel %vm9695_vm12, %v10233_v59, %v4011_v43  ;;  %v4274_v19 = vmul.u32 %v4272_v6, %v4247_v44  ;;  %v4254_v53 = vmul.u32 %v4250_v58, %v4248_v12  ;;  %v4275_v9 = vmul.u32 %v4271_v33, %v4248_v12 }
 0x4c2   :  { %v9688_v51 = vshrl.u32 %v4142_v1, 30  ;;  %v4255_v4 = vshll.u32 %v4252_v20, 16  ;;  %v4257_v55 = vshll.u32 %v4253_v21, 16  ;;  %v9707_v57 = vmul.f32 %v9702_v30, %v9702_v30 }
 0x4c3   :  { %v4277_v18 = vshll.u32 %v4274_v19, 16  ;;  %v4273_v45 = vmul.u32 %v4271_v33, %v4247_v44  ;;  %v4256_v34 = vshrl.u32 %v4252_v20, 16  ;;  %v4276_v41 = vmul.u32 %v4272_v6, %v4248_v12 }
 0x4c4   :  { %v4144_v31 = vshll.u32 %v9688_v51, 30  ;;  %vm4259_vm15 = vc.u32 %v4251_v38, %v4255_v4  ;;  %v4261_v52 = vadd.s32 %v4255_v4, %v4251_v38  ;;  %v4024_v32 = vmul.f32 -0.00019511016, %v9707_v57 }
 0x4c5   :  { %v4260_v15 = vsel %vm4259_vm15, 1, %v10097_v16  ;;  %vm4281_vm5 = vc.u32 %v4273_v45, %v4277_v18  ;;  %v4283_v2 = vadd.s32 %v4277_v18, %v4273_v45  ;;  %v4279_v24 = vshll.u32 %v4275_v9, 16 }
 0x4c6   :  { %v4145_v63 = vsub.s32 %v4141_v54, %v4144_v31  ;;  %vm4263_vm10 = vc.u32 %v4261_v52, %v4257_v55  ;;  %v4262_v10 = vadd.s32 %v4260_v15, %v4254_v53  ;;  %v4282_v5 = vsel %vm4281_vm5, 1, %v10097_v16 }
 0x4c7   :  { %v4264_v14 = vsel %vm4263_vm10, 1, %v10097_v16  ;;  %v4137_v8 = vadd.s32 %v9647_v3, %v9633_v13  ;;  %v4284_v11 = vadd.s32 %v4282_v5, %v4276_v41  ;;  %v4235_v46 = vsel %vm4233_vm9, %v9656_v22, 2102212464 }
 0x4c8   :  { %vm4146_vm2 = vcmp.lt.s32.totalorder %v4145_v63, 0  ;;  %v4147_v42 = vsub.s32 0, %v4145_v63  ;;  %v4266_v26 = vadd.s32 %v4264_v14, %v4262_v10  ;;  %vm4285_vm11 = vc.u32 %v4283_v2, %v4279_v24 }
 0x4c9   :  { %v4025_v44 = vadd.f32 0.008332121, %v4024_v32  ;;  %v4258_v12 = vshrl.u32 %v4253_v21, 16  ;;  %v4278_v60 = vshrl.u32 %v4274_v19, 16  ;;  %v4286_v17 = vsel %vm4285_vm11, 1, %v10097_v16  ;;  %v4465_v19 = vpop.f32.mrf.mxu2 }
 0x4ca   :  { %v4148_v37 = vsel %vm4146_vm2, %v4147_v42, %v4145_v63  ;;  %v4267_v48 = vadd.s32 %v4266_v26, %v4256_v34  ;;  %v4288_v20 = vadd.s32 %v4286_v17, %v4284_v11  ;;  %v4017_v13 = vmul.f32 -0.001358992, %v9707_v57 }
 0x4cb   :  { %v4149_v49 = vclz %v4148_v37  ;;  %v4234_v3 = vsel %vm4230_vm4, %v4214_v36, %v9649_v40  ;;  %v4236_v22 = vsel %vm4232_vm7, %v9654_v56, %v4235_v46  ;;  %v4280_v38 = vshrl.u32 %v4275_v9, 16 }
 0x4cc   :  { %v9727_v6 = vadd.s32 %v4267_v48, %v4258_v12  ;;  %v4289_v16 = vadd.s32 %v4288_v20, %v4278_v60  ;;  %v4026_v4 = vmul.f32 %v4025_v44, %v9707_v57  ;;  %v9730_v31 = vadd.s32 %v4283_v2, %v4279_v24 }
 0x4cd   :  { %v5355_v7 = vadd.s32 4294967294, %v4149_v49  ;;  %v4237_v52 = vsel %vm4231_vm8, %v4234_v3, %v4236_v22  ;;  %v4018_v40 = vadd.f32 0.041655596, %v4017_v13  ;;  %v4466_v15 = vadd.f32 %v9493_v39, %v4465_v19 }
 0x4ce   :  { %vm4293_vm9 = vc.u32 %v9727_v6, %v9730_v31  ;;  %v4012_v42 = vsub.s32 4, %v9550_v28  ;;  %v4027_v10 = vadd.f32 -0.16666654, %v4026_v4  ;;  %v4291_v14 = vmul.u32 %v9668_v50, %v4237_v52 }
 0x4cf   :  { %vm5356_vm14 = vcmp.lt.s32.totalorder %v5355_v7, 0  ;;  %v4520_v18 = vmax.f32 %v4466_v15, 0.0  ;;  %v4019_v49 = vmul.f32 %v4018_v40, %v9707_v57  ;;  %vm4045_vm3 = vcmp.lt.s32.totalorder %v10239_v62, 0 }
 0x4d0   :  { %v4152_v61 = vsel %vm5356_vm14, 0, %v5355_v7  ;;  %v4013_v45 = vsel %vm3890_vm6, %v4012_v42, %v9550_v28  ;;  %v4028_v32 = vmul.f32 %v4027_v10, %v9707_v57  ;;  %vm9748_vm4 = vcmp.le.f32.partialorder %v4043_v35, 0.7853982 }
 0x4d1   :  { %v4153_v54 = vsub.s32 32, %v4152_v61  ;;  %v4157_v29 = vsub.s32 4294967266, %v4152_v61  ;;  %v4154_v47 = vshll.u32 %v4145_v63, %v4152_v61  ;;  %v4290_v63 = vadd.s32 %v4289_v16, %v4280_v38  ;;  %5395 = vmatmul.msk.f32.gmra.mxu3 %vm4547_vm1, %v4520_v18  ;;  %v4467_v28 = vpop.f32.mrf.mxu2 }
 0x4d2   :  { %v4167_v41 = vsub.s32 4, %v9688_v51  ;;  %v4020_v2 = vadd.f32 -0.4999988, %v4019_v49  ;;  %v4015_v5 = vsel %vm9695_vm12, 0, %v4013_v45  ;;  %v4468_v35 = vadd.f32 %v9493_v39, %v4467_v28 }
 0x4d3   :  { %v4155_v58 = vshrl.u32 %v4137_v8, %v4153_v54  ;;  %v4158_v1 = vadd.s32 127, %v4157_v29  ;;  %v4294_v33 = vadd.s32 1, %v4290_v63  ;;  %v4029_v61 = vadd.f32 1.0, %v4028_v32 }
 0x4d4   :  { %v4168_v11 = vsel %vm4045_vm3, %v4167_v41, %v9688_v51  ;;  %v4521_v46 = vmax.f32 %v4468_v35, 0.0  ;;  %v4021_v44 = vmul.f32 %v4020_v2, %v9707_v57  ;;  %v4032_v12 = vadd.s32 3, %v4015_v5 }
 0x4d5   :  { %v4156_v21 = vor.u32 %v4155_v58, %v4154_v47  ;;  %v4159_v43 = vshll.u32 %v4158_v1, 23  ;;  %v4295_v23 = vsel %vm4293_vm9, %v4294_v33, %v4290_v63  ;;  %v4030_v27 = vmul.f32 %v4029_v61, %v9702_v30 }
 0x4d6   :  { %v4296_v9 = vadd.s32 %v4295_v23, %v4291_v14  ;;  %v4170_v58 = vsel %vm9748_vm4, 0, %v4168_v11  ;;  %v4022_v13 = vadd.f32 1.0, %v4021_v44  ;;  %v4033_v3 = vand.u32 3, %v4032_v12 }
 0x4d7   :  { %v4160_v55 = vor.u32 4788187, %v4159_v43  ;;  %v4163_v53 = vcvt.s32.f32 %v4156_v21  ;;  %v4187_v43 = vadd.s32 3, %v4170_v58  ;;  %v4036_v16 = vxor.u32 2147483648, %v4030_v27 }
 0x4d8   :  { %v4297_v7 = vadd.s32 536870912, %v4296_v9  ;;  %vm4035_vm7 = vcmp.eq.s32.totalorder %v4033_v3, 0  ;;  %v4039_v30 = vxor.u32 2147483648, %v4022_v13  ;;  %v4292_v42 = vadd.s32 %v9730_v31, %v9727_v6 }
 0x4d9   :  { %v4161_v56 = vand.u32 2147483647, %v4160_v55  ;;  %5396 = vmatmul.msk.f32.gmra.mxu3 %vm4547_vm1, %v4521_v46  ;;  %v4188_v19 = vand.u32 3, %v4187_v43  ;;  %vm4034_vm6 = vcmp.lt.s32.totalorder %v4033_v3, 2  ;;  %vm4038_vm12 = vcmp.eq.s32.totalorder %v4033_v3, 2 }
 0x4da   :  { %v9756_v24 = vshrl.u32 %v4297_v7, 30  ;;  %vm4031_vm2 = vweird.f32 %v10233_v59  ;;  %vm4186_vm14 = vweird.f32 %v10239_v62  ;;  %vm4200_vm11 = vcmp.lt.s32.totalorder %v8603_v25, 0 }
 0x4db   :  { %v4164_v37 = vmul.f32 %v4163_v53, %v4161_v56  ;;  %v4037_v56 = vsel %vm4035_vm7, %v4022_v13, %v4036_v16  ;;  %vm4190_vm15 = vcmp.eq.s32.totalorder %v4188_v19, 0  ;;  %vm4193_vm10 = vcmp.eq.s32.totalorder %v4188_v19, 2 }
 0x4dc   :  { %v4299_v48 = vshll.u32 %v9756_v24, 30  ;;  %vm4189_vm5 = vcmp.lt.s32.totalorder %v4188_v19, 2  ;;  %vm9778_vm9 = vcmp.le.f32.partialorder %v4198_v0, 0.7853982  ;;  %v4322_v11 = vsub.s32 4, %v9756_v24 }
 0x4dd   :  { %v4165_v26 = vxor.u32 2147483648, %v4164_v37  ;;  %vm4341_vm7 = vweird.f32 %v8603_v25 }
 0x4de   :  { %v4300_v60 = vsub.s32 %v4296_v9, %v4299_v48 }
 0x4df   :  { %v4166_v34 = vsel %vm4045_vm3, %v4165_v26, %v4164_v37  ;;  %v4040_v37 = vsel %vm4038_vm12, %v4039_v30, %v4030_v27 }
 0x4e0   :  { %v4169_v36 = vsel %vm9748_vm4, %v10239_v62, %v4166_v34  ;;  %vm4301_vm13 = vcmp.lt.s32.totalorder %v4300_v60, 0  ;;  %v4302_v1 = vsub.s32 0, %v4300_v60  ;;  %v4041_v49 = vsel %vm4034_vm6, %v4037_v56, %v4040_v37 }
 0x4e1   :  { %v4171_v8 = vmul.f32 %v4169_v36, %v4169_v36  ;;  %v4042_v50 = vsel %vm4031_vm2, nan, %v4041_v49 }
 0x4e2   :  { %v4303_v22 = vsel %vm4301_vm13, %v4302_v1, %v4300_v60 }
 0x4e3   :  { %v4172_v54 = vmul.f32 -0.001358992, %v4171_v8  ;;  %v4179_v29 = vmul.f32 -0.00019511016, %v4171_v8  ;;  %v4304_v38 = vclz %v4303_v22 }
 0x4e5   :  { %v4173_v17 = vadd.f32 0.041655596, %v4172_v54  ;;  %v4180_v47 = vadd.f32 0.008332121, %v4179_v29  ;;  %v5358_v52 = vadd.s32 4294967294, %v4304_v38 }
 0x4e7   :  { %v4174_v20 = vmul.f32 %v4173_v17, %v4171_v8  ;;  %v4181_v51 = vmul.f32 %v4180_v47, %v4171_v8  ;;  %vm5359_vm8 = vcmp.lt.s32.totalorder %v5358_v52, 0  ;;  %v4323_v47 = vsel %vm4200_vm11, %v4322_v11, %v9756_v24 }
 0x4e8   :  { %v4307_v53 = vsel %vm5359_vm8, 0, %v5358_v52  ;;  %v4325_v58 = vsel %vm9778_vm9, 0, %v4323_v47 }
 0x4e9   :  { %v4175_v21 = vadd.f32 -0.4999988, %v4174_v20  ;;  %v4182_v57 = vadd.f32 -0.16666654, %v4181_v51  ;;  %v4308_v10 = vsub.s32 32, %v4307_v53  ;;  %v4312_v14 = vsub.s32 4294967266, %v4307_v53 }
 0x4ea   :  { %v4309_v9 = vshll.u32 %v4300_v60, %v4307_v53 }
 0x4eb   :  { %v4176_v4 = vmul.f32 %v4175_v21, %v4171_v8  ;;  %v4183_v55 = vmul.f32 %v4182_v57, %v4171_v8  ;;  %v4310_v23 = vshrl.u32 %v4292_v42, %v4308_v10  ;;  %v4313_v26 = vadd.s32 127, %v4312_v14 }
 0x4ec   :  { %v4342_v21 = vadd.s32 3, %v4325_v58 }
 0x4ed   :  { %v4177_v63 = vadd.f32 1.0, %v4176_v4  ;;  %v4184_v40 = vadd.f32 1.0, %v4183_v55  ;;  %v4311_v31 = vor.u32 %v4310_v23, %v4309_v9  ;;  %v4314_v7 = vshll.u32 %v4313_v26, 23  ;;  %v4640_v9 = vpop.f32.mrf.mxu3 }
 0x4ee   :  { %v4343_v4 = vand.u32 3, %v4342_v21 }
 0x4ef   :  { %v4185_v15 = vmul.f32 %v4184_v40, %v4169_v36  ;;  %v4194_v33 = vxor.u32 2147483648, %v4177_v63  ;;  %v4315_v2 = vor.u32 4788187, %v4314_v7  ;;  %v4470_v36 = vpop.f32.mrf.mxu2  ;;  %v4318_v5 = vcvt.s32.f32 %v4311_v31 }
 0x4f0   :  { %v4471_v8 = vadd.f32 %v9493_v39, %v4470_v36  ;;  %vm4345_vm3 = vcmp.eq.s32.totalorder %v4343_v4, 0  ;;  %vm4348_vm4 = vcmp.eq.s32.totalorder %v4343_v4, 2  ;;  %vm4344_vm13 = vcmp.lt.s32.totalorder %v4343_v4, 2 }
 0x4f1   :  { %v4191_v18 = vxor.u32 2147483648, %v4185_v15  ;;  %v4195_v32 = vsel %vm4193_vm10, %v4194_v33, %v4185_v15  ;;  %v4316_v28 = vand.u32 2147483647, %v4315_v2 }
 0x4f2   :  { %v4522_v35 = vmax.f32 %v4471_v8, 0.0 }
 0x4f3   :  { %v4192_v45 = vsel %vm4190_vm15, %v4177_v63, %v4191_v18  ;;  %v4319_v59 = vmul.f32 %v4318_v5, %v4316_v28 }
 0x4f4   :  { %v4196_v6 = vsel %vm4189_vm5, %v4192_v45, %v4195_v32  ;;  %5397 = vmatmul.msk.f32.gmra.mxu3 %vm4547_vm1, %v4522_v35 }
 0x4f5   :  { %v4197_v34 = vsel %vm4186_vm14, nan, %v4196_v6  ;;  %v4320_v61 = vxor.u32 2147483648, %v4319_v59  ;;  %v4643_v7 = vpop.f32.mrf.mxu3 }
 0x4f6   :  { %v4364_v41 = vpack.c.bf16 %v4197_v34, %v4042_v50 }
 0x4f7   :  { %v4321_v48 = vsel %vm4200_vm11, %v4320_v61, %v4319_v59  ;;  %v4472_v29 = vpop.f32.mrf.mxu2 }
 0x4f8   :  { %5387 = vmatmul.msk.bf16.gmra.mxu2 %vm111_vm0, %v4364_v41  ;;  %v4324_v54 = vsel %vm9778_vm9, %v8603_v25, %v4321_v48  ;;  %v4473_v44 = vadd.f32 %v9493_v39, %v4472_v29  ;;  %v16_v25 = vstv %s9972_s8 }
 0x4f9   :  { %v4326_v46 = vmul.f32 %v4324_v54, %v4324_v54  ;;  %17 = vst [vmem:[#allocation2] sm:$0x1] %v16_v25 }
 0x4fa   :  { %v4523_v17 = vmax.f32 %v4473_v44, 0.0 }
 0x4fb   :  { %v4327_v12 = vmul.f32 -0.001358992, %v4326_v46  ;;  %v4334_v60 = vmul.f32 -0.00019511016, %v4326_v46 }
 0x4fc   :  { %5398 = vmatmul.msk.f32.gmra.mxu3 %vm4547_vm1, %v4523_v17 }
 0x4fd   :  { %v4328_v0 = vadd.f32 0.041655596, %v4327_v12  ;;  %v4335_v27 = vadd.f32 0.008332121, %v4334_v60  ;;  %v4646_v59 = vpop.f32.mrf.mxu3 }
 0x4ff   :  { %v4329_v1 = vmul.f32 %v4328_v0, %v4326_v46  ;;  %v4336_v20 = vmul.f32 %v4335_v27, %v4326_v46  ;;  %v4475_v51 = vpop.f32.mrf.mxu2 }
 0x500   :  { %v4476_v22 = vadd.f32 %v9493_v39, %v4475_v51  ;;  %v9805_v6 = vld [vmem:[#allocation2] ss:$0 sm:$0xff] }
 0x501   :  { %v4330_v13 = vadd.f32 -0.4999988, %v4329_v1  ;;  %v4337_v3 = vadd.f32 -0.16666654, %v4336_v20  ;;  %v4641_v31 = vadd.f32 %v9805_v6, %v4640_v9  ;;  %v4644_v50 = vadd.f32 %v9805_v6, %v4643_v7 }
 0x502   :  { %v4524_v38 = vmax.f32 %v4476_v22, 0.0  ;;  %v4647_v35 = vadd.f32 %v9805_v6, %v4646_v59 }
 0x503   :  { %v4331_v57 = vmul.f32 %v4330_v13, %v4326_v46  ;;  %v4338_v43 = vmul.f32 %v4337_v3, %v4326_v46  ;;  %v4715_v34 = vsub.f32 0.0, %v4641_v31  ;;  %v4716_v2 = vsub.f32 0.0, %v4644_v50  ;;  %v9837_v31 = vld [vmem:[%s9970_s6] ss:$0 sm:$0xff] }
 0x504   :  { %5399 = vmatmul.msk.f32.gmra.mxu3 %vm4547_vm1, %v4524_v38  ;;  %v4717_v62 = vsub.f32 0.0, %v4647_v35 }
 0x505   :  { %v4332_v16 = vadd.f32 1.0, %v4331_v57  ;;  %v4339_v24 = vadd.f32 1.0, %v4338_v43  ;;  %v4740_v28 = vmul.f32 1.442695, %v4715_v34  ;;  %v4742_v5 = vmul.f32 1.442695, %v4716_v2  ;;  %v4649_v60 = vpop.f32.mrf.mxu3 }
 0x506   :  { %v4744_v46 = vmul.f32 1.442695, %v4717_v62  ;;  %v4650_v17 = vadd.f32 %v9805_v6, %v4649_v60 }
 0x507   :  { %v4340_v55 = vmul.f32 %v4339_v24, %v4324_v54  ;;  %v4349_v52 = vxor.u32 2147483648, %v4332_v16  ;;  %v4477_v30 = vpop.f32.mrf.mxu2  ;;  %5491 = vpow2.f32 %v4740_v28 }
 0x508   :  { %v4478_v40 = vadd.f32 %v9493_v39, %v4477_v30  ;;  %5493 = vpow2.f32 %v4742_v5  ;;  %v4718_v0 = vsub.f32 0.0, %v4650_v17 }
 0x509   :  { %v4346_v63 = vxor.u32 2147483648, %v4340_v55  ;;  %v4350_v56 = vsel %vm4348_vm4, %v4349_v52, %v4340_v55 }
 0x50a   :  { %v4525_v53 = vmax.f32 %v4478_v40, 0.0  ;;  %v4746_v1 = vmul.f32 1.442695, %v4718_v0 }
 0x50b   :  { %v4347_v19 = vsel %vm4345_vm3, %v4332_v16, %v4346_v63 }
 0x50c   :  { %v4351_v15 = vsel %vm4344_vm13, %v4347_v19, %v4350_v56  ;;  %5400 = vmatmul.msk.f32.gmra.mxu3 %vm4547_vm1, %v4525_v53 }
 0x50d   :  { %v4352_v33 = vsel %vm4341_vm7, nan, %v4351_v15  ;;  %v5492_v48 = vpop.eup %5491 }
 0x50e   :  { %v4365_v42 = vpack.c.bf16 %v4352_v33, %v4352_v33  ;;  %v5494_v54 = vpop.eup %5493  ;;  %v4790_v29 = vadd.f32 1.0, %v5492_v48 }
 0x50f   :  { %v4480_v10 = vpop.f32.mrf.mxu2  ;;  %v4791_v12 = vadd.f32 1.0, %v5494_v54 }
 0x510   :  { %5388 = vmatmul.msk.bf16.gmra.mxu2 %vm111_vm0, %v4365_v42  ;;  %v4481_v14 = vadd.f32 %v9493_v39, %v4480_v10  ;;  %5495 = vrcp.f32 %v4790_v29  ;;  %vm5190_vm0 = vcmask 7168   ;;  %v4824_v38 = vand.u32 2147483647, %v4790_v29 }
 0x511   :  { %5497 = vrcp.f32 %v4791_v12  ;;  %v4826_v16 = vand.u32 2147483648, %v4790_v29  ;;  %v4841_v52 = vand.u32 2147483648, %v4791_v12  ;;  %v4839_v40 = vand.u32 2147483647, %v4791_v12 }
 0x512   :  { %v4526_v37 = vmax.f32 %v4481_v14, 0.0  ;;  %5499 = vpow2.f32 %v4744_v46  ;;  %vm4820_vm12 = vweird.f32 %v4790_v29  ;;  %vm4835_vm15 = vweird.f32 %v4791_v12 }
 0x513   :  { %5501 = vpow2.f32 %v4746_v1  ;;  %vm4825_vm2 = vcmp.eq.f32.partialorder %v4824_v38, 8.507059e+37  ;;  %v4827_v33 = vor.u32 1.1754944e-38, %v4826_v16  ;;  %vm4840_vm14 = vcmp.eq.f32.partialorder %v4839_v40, 8.507059e+37 }
 0x514   :  { %5401 = vmatmul.msk.f32.gmra.mxu3 %vm4547_vm1, %v4526_v37 }
 0x516   :  { %v5496_v58 = vpop.eup %5495  ;;  %v4652_v43 = vpop.f32.mrf.mxu3 }
 0x517   :  { %v4482_v18 = vpop.f32.mrf.mxu2  ;;  %v5498_v20 = vpop.eup %5497  ;;  %v4816_v13 = vmul.f32 %v5496_v58, %v4790_v29  ;;  %v4653_v4 = vadd.f32 %v9805_v6, %v4652_v43  ;;  %vm4821_vm8 = vweird.f32 %v5496_v58 }
 0x518   :  { %v4483_v23 = vadd.f32 %v9493_v39, %v4482_v18  ;;  %v5500_v3 = vpop.eup %5499  ;;  %v4831_v22 = vmul.f32 %v5498_v20, %v4791_v12  ;;  %vm4836_vm6 = vweird.f32 %v5498_v20  ;;  %vm4822_vm10 = vmor %vm4820_vm12, %vm4821_vm8  ;;  %v4842_v18 = vor.u32 1.1754944e-38, %v4841_v52 }
 0x519   :  { %v4817_v21 = vsub.f32 1.0, %v4816_v13  ;;  %v9818_v57 = vadd.f32 1.0, %v5500_v3  ;;  %v4719_v19 = vsub.f32 0.0, %v4653_v4  ;;  %v5502_v15 = vpop.eup %5501  ;;  %vm4837_vm5 = vmor %vm4835_vm15, %vm4836_vm6 }
 0x51a   :  { %v4527_v49 = vmax.f32 %v4483_v23, 0.0  ;;  %v4832_v24 = vsub.f32 1.0, %v4831_v22  ;;  %v4793_v23 = vadd.f32 1.0, %v5502_v15 }
 0x51b   :  { %v4818_v55 = vmul.f32 %v5496_v58, %v4817_v21  ;;  %5503 = vrcp.f32 %v9818_v57  ;;  %v4748_v10 = vmul.f32 1.442695, %v4719_v19  ;;  %v4856_v50 = vand.u32 2147483648, %v9818_v57 }
 0x51c   :  { %5402 = vmatmul.msk.f32.gmra.mxu3 %vm4547_vm1, %v4527_v49  ;;  %v4833_v63 = vmul.f32 %v5498_v20, %v4832_v24  ;;  %v4854_v2 = vand.u32 2147483647, %v9818_v57  ;;  %vm4850_vm9 = vweird.f32 %v9818_v57  ;;  %v4869_v46 = vand.u32 2147483647, %v4793_v23 }
 0x51d   :  { %v4819_v56 = vadd.f32 %v5496_v58, %v4818_v55  ;;  %5505 = vpow2.f32 %v4748_v10  ;;  %v4857_v35 = vor.u32 1.1754944e-38, %v4856_v50  ;;  %vm4865_vm7 = vweird.f32 %v4793_v23 }
 0x51e   :  { %v4834_v42 = vadd.f32 %v5498_v20, %v4833_v63  ;;  %5507 = vrcp.f32 %v4793_v23  ;;  %vm4855_vm4 = vcmp.eq.f32.partialorder %v4854_v2, 8.507059e+37  ;;  %vm4870_vm6 = vcmp.eq.f32.partialorder %v4869_v46, 8.507059e+37 }
 0x51f   :  { %v4485_v26 = vpop.f32.mrf.mxu2  ;;  %v4823_v14 = vsel %vm4822_vm10, %v5496_v58, %v4819_v56 }
 0x520   :  { %v4486_v45 = vadd.f32 %v9493_v39, %v4485_v26  ;;  %v4828_v49 = vsel %vm4825_vm2, %v4827_v33, %v4823_v14  ;;  %v4838_v25 = vsel %vm4837_vm5, %v5498_v20, %v4834_v42 }
 0x521   :  { %v5504_v9 = vpop.eup %5503  ;;  %5191 = vst.msk [vmem:[%s9973_s9] sm:$0xff] %vm5190_vm0, %v4828_v49 }
 0x522   :  { %v4528_v32 = vmax.f32 %v4486_v45, 0.0  ;;  %v4846_v26 = vmul.f32 %v5504_v9, %v9818_v57  ;;  %vm4851_vm11 = vweird.f32 %v5504_v9 }
 0x523   :  { %v5506_v34 = vpop.eup %5505  ;;  %vm4852_vm3 = vmor %vm4850_vm9, %vm4851_vm11 }
 0x524   :  { %5403 = vmatmul.msk.f32.gmra.mxu3 %vm4547_vm1, %v4528_v32  ;;  %v4847_v32 = vsub.f32 1.0, %v4846_v26  ;;  %v4794_v5 = vadd.f32 1.0, %v5506_v34 }
 0x526   :  { %5509 = vrcp.f32 %v4794_v5  ;;  %v4886_v20 = vand.u32 2147483648, %v4794_v5  ;;  %v4884_v22 = vand.u32 2147483647, %v4794_v5  ;;  %vm4880_vm15 = vweird.f32 %v4794_v5 }
 0x527   :  { %v4487_v41 = vpop.f32.mrf.mxu2 }
 0x528   :  { %v4488_v36 = vadd.f32 %v9493_v39, %v4487_v41  ;;  %v4848_v41 = vmul.f32 %v5504_v9, %v4847_v32  ;;  %v4887_v24 = vor.u32 1.1754944e-38, %v4886_v20  ;;  %vm4885_vm2 = vcmp.eq.f32.partialorder %v4884_v22, 8.507059e+37 }
 0x52a   :  { %v4529_v8 = vmax.f32 %v4488_v36, 0.0  ;;  %v5508_v36 = vpop.eup %5507 }
 0x52b   :  { %v4861_v59 = vmul.f32 %v5508_v36, %v4793_v23  ;;  %vm4866_vm13 = vweird.f32 %v5508_v36 }
 0x52c   :  { %5404 = vmatmul.msk.f32.gmra.mxu3 %vm4547_vm1, %v4529_v8  ;;  %v4849_v8 = vadd.f32 %v5504_v9, %v4848_v41  ;;  %v5510_v60 = vpop.eup %5509  ;;  %vm4867_vm8 = vmor %vm4865_vm7, %vm4866_vm13 }
 0x52d   :  { %v4862_v62 = vsub.f32 1.0, %v4861_v59  ;;  %vm4881_vm12 = vweird.f32 %v5510_v60 }
 0x52e   :  { %vm4882_vm10 = vmor %vm4880_vm15, %vm4881_vm12 }
 0x52f   :  { %v4490_v61 = vpop.f32.mrf.mxu2  ;;  %v4863_v29 = vmul.f32 %v5508_v36, %v4862_v62 }
 0x530   :  { %v4491_v11 = vadd.f32 %v9493_v39, %v4490_v61  ;;  %v4853_v61 = vsel %vm4852_vm3, %v5504_v9, %v4849_v8 }
 0x531   :  { %v4858_v48 = vsel %vm4855_vm4, %v4857_v35, %v4853_v61  ;;  %v4864_v12 = vadd.f32 %v5508_v36, %v4863_v29 }
 0x532   :  { %v4530_v44 = vmax.f32 %v4491_v11, 0.0  ;;  %v4871_v11 = vand.u32 2147483648, %v4793_v23  ;;  %5193 = vst.msk [vmem:[%s9973_s9 + $0x10] sm:$0xff] %vm5190_vm0, %v4858_v48 }
 0x533   :  { %v4868_v0 = vsel %vm4867_vm8, %v5508_v36, %v4864_v12 }
 0x534   :  { %5405 = vmatmul.msk.f32.gmra.mxu3 %vm4547_vm1, %v4530_v44 }
 0x537   :  { %v4492_v47 = vpop.f32.mrf.mxu2 }
 0x538   :  { %v4493_v27 = vadd.f32 %v9493_v39, %v4492_v47  ;;  %v4872_v47 = vor.u32 1.1754944e-38, %v4871_v11 }
 0x53a   :  { %v4531_v51 = vmax.f32 %v4493_v27, 0.0  ;;  %v4876_v27 = vmul.f32 %v5510_v60, %v4794_v5  ;;  %v4873_v58 = vsel %vm4870_vm6, %v4872_v47, %v4868_v0 }
 0x53b   :  { %5194 = vst.msk [vmem:[%s9973_s9 + $0x18] sm:$0xff] %vm5190_vm0, %v4873_v58 }
 0x53c   :  { %5406 = vmatmul.msk.f32.gmra.mxu3 %vm4547_vm1, %v4531_v51  ;;  %v4877_v1 = vsub.f32 1.0, %v4876_v27  ;;  %v4655_v51 = vpop.f32.mrf.mxu3 }
 0x53d   :  { %v4656_v21 = vadd.f32 %v9805_v6, %v4655_v51 }
 0x53e   :  { %v4878_v3 = vmul.f32 %v5510_v60, %v4877_v1 }
 0x53f   :  { %v4495_v30 = vpop.f32.mrf.mxu2  ;;  %v4720_v38 = vsub.f32 0.0, %v4656_v21 }
 0x540   :  { %v4496_v53 = vadd.f32 %v9493_v39, %v4495_v30  ;;  %v4843_v39 = vsel %vm4840_vm14, %v4842_v18, %v4838_v25  ;;  %v4879_v43 = vadd.f32 %v5510_v60, %v4878_v3 }
 0x541   :  { %5192 = vst.msk [vmem:[%s9973_s9 + $0x8] sm:$0xff] %vm5190_vm0, %v4843_v39  ;;  %v4750_v55 = vmul.f32 1.442695, %v4720_v38 }
 0x542   :  { %v4532_v37 = vmax.f32 %v4496_v53, 0.0  ;;  %v4883_v4 = vsel %vm4882_vm10, %v5510_v60, %v4879_v43 }
 0x543   :  { %v4888_v52 = vsel %vm4885_vm2, %v4887_v24, %v4883_v4  ;;  %5511 = vpow2.f32 %v4750_v55 }
 0x544   :  { %5407 = vmatmul.msk.f32.gmra.mxu3 %vm4547_vm1, %v4532_v37  ;;  %5195 = vst.msk [vmem:[%s9973_s9 + $0x20] sm:$0xff] %vm5190_vm0, %v4888_v52 }
 0x547   :  { %v4497_v45 = vpop.f32.mrf.mxu2 }
 0x548   :  { %v4498_v7 = vadd.f32 %v9837_v31, %v4497_v45 }
 0x549   :  { %v5512_v19 = vpop.eup %5511 }
 0x54a   :  { %v4533_v28 = vmax.f32 %v4498_v7, 0.0  ;;  %v4795_v53 = vadd.f32 1.0, %v5512_v19 }
 0x54c   :  { %5408 = vmatmul.msk.f32.gmra.mxu3 %vm4547_vm1, %v4533_v28  ;;  %v4901_v37 = vand.u32 2147483648, %v4795_v53  ;;  %v4899_v23 = vand.u32 2147483647, %v4795_v53  ;;  %vm4895_vm14 = vweird.f32 %v4795_v53 }
 0x54e   :  { %v4902_v26 = vor.u32 1.1754944e-38, %v4901_v37  ;;  %vm4900_vm9 = vcmp.eq.f32.partialorder %v4899_v23, 8.507059e+37 }
 0x54f   :  { %v4500_v54 = vpop.f32.mrf.mxu2 }
 0x550   :  { %v4501_v44 = vadd.f32 %v9837_v31, %v4500_v54 }
 0x552   :  { %v4534_v17 = vmax.f32 %v4501_v44, 0.0 }
 0x554   :  { %5409 = vmatmul.msk.f32.gmra.mxu3 %vm4547_vm1, %v4534_v17  ;;  %v4658_v30 = vpop.f32.mrf.mxu3 }
 0x555   :  { %v4659_v63 = vadd.f32 %v9805_v6, %v4658_v30 }
 0x557   :  { %v4502_v13 = vpop.f32.mrf.mxu2  ;;  %v4721_v40 = vsub.f32 0.0, %v4659_v63 }
 0x558   :  { %v4503_v57 = vadd.f32 %v9837_v31, %v4502_v13 }
 0x559   :  { %v4752_v56 = vmul.f32 1.442695, %v4721_v40 }
 0x55a   :  { %v4535_v16 = vmax.f32 %v4503_v57, 0.0 }
 0x55b   :  { %5513 = vpow2.f32 %v4752_v56 }
 0x55c   :  { %5410 = vmatmul.msk.f32.gmra.mxu3 %vm4547_vm1, %v4535_v16  ;;  %5515 = vrcp.f32 %v4795_v53  ;;  %v4661_v7 = vpop.f32.mrf.mxu3 }
 0x55d   :  { %v4662_v41 = vadd.f32 %v9805_v6, %v4661_v7 }
 0x55f   :  { %v4722_v28 = vsub.f32 0.0, %v4662_v41 }
 0x561   :  { %v5514_v15 = vpop.eup %5513  ;;  %v4754_v59 = vmul.f32 1.442695, %v4722_v28 }
 0x562   :  { %v5516_v33 = vpop.eup %5515  ;;  %v4796_v42 = vadd.f32 1.0, %v5514_v15 }
 0x563   :  { %v4891_v10 = vmul.f32 %v5516_v33, %v4795_v53  ;;  %vm4896_vm5 = vweird.f32 %v5516_v33 }
 0x564   :  { %5517 = vrcp.f32 %v4796_v42  ;;  %vm4897_vm11 = vmor %vm4895_vm14, %vm4896_vm5  ;;  %v4916_v36 = vand.u32 2147483648, %v4796_v42  ;;  %v4914_v8 = vand.u32 2147483647, %v4796_v42  ;;  %vm4910_vm4 = vweird.f32 %v4796_v42 }
 0x565   :  { %v4892_v14 = vsub.f32 1.0, %v4891_v10  ;;  %5519 = vpow2.f32 %v4754_v59 }
 0x566   :  { %v4917_v48 = vor.u32 1.1754944e-38, %v4916_v36  ;;  %vm4915_vm7 = vcmp.eq.f32.partialorder %v4914_v8, 8.507059e+37 }
 0x567   :  { %v4893_v18 = vmul.f32 %v5516_v33, %v4892_v14 }
 0x569   :  { %v4894_v25 = vadd.f32 %v5516_v33, %v4893_v18 }
 0x56a   :  { %v5518_v9 = vpop.eup %5517 }
 0x56b   :  { %v4898_v45 = vsel %vm4897_vm11, %v5516_v33, %v4894_v25  ;;  %v4906_v32 = vmul.f32 %v5518_v9, %v4796_v42  ;;  %vm4911_vm3 = vweird.f32 %v5518_v9  ;;  %v5520_v60 = vpop.eup %5519 }
 0x56c   :  { %v4903_v34 = vsel %vm4900_vm9, %v4902_v26, %v4898_v45  ;;  %vm4912_vm13 = vmor %vm4910_vm4, %vm4911_vm3  ;;  %v4797_v47 = vadd.f32 1.0, %v5520_v60 }
 0x56d   :  { %5196 = vst.msk [vmem:[%s9973_s9 + $0x28] sm:$0xff] %vm5190_vm0, %v4903_v34  ;;  %v4907_v2 = vsub.f32 1.0, %v4906_v32 }
 0x56e   :  { %v4931_v43 = vand.u32 2147483648, %v4797_v47  ;;  %v4929_v16 = vand.u32 2147483647, %v4797_v47  ;;  %vm4925_vm6 = vweird.f32 %v4797_v47 }
 0x56f   :  { %v4908_v5 = vmul.f32 %v5518_v9, %v4907_v2 }
 0x570   :  { %v4932_v19 = vor.u32 1.1754944e-38, %v4931_v43  ;;  %vm4930_vm15 = vcmp.eq.f32.partialorder %v4929_v16, 8.507059e+37 }
 0x571   :  { %v4909_v61 = vadd.f32 %v5518_v9, %v4908_v5 }
 0x573   :  { %v4913_v11 = vsel %vm4912_vm13, %v5518_v9, %v4909_v61 }
 0x574   :  { %v4918_v46 = vsel %vm4915_vm7, %v4917_v48, %v4913_v11 }
 0x575   :  { %5197 = vst.msk [vmem:[%s9973_s9 + $0x30] sm:$0xff] %vm5190_vm0, %v4918_v46 }
 0x577   :  { %v4664_v54 = vpop.f32.mrf.mxu3 }
 0x578   :  { %v4665_v44 = vadd.f32 %v9805_v6, %v4664_v54 }
 0x57a   :  { %v4723_v12 = vsub.f32 0.0, %v4665_v44 }
 0x57b   :  { %v4505_v49 = vpop.f32.mrf.mxu2 }
 0x57c   :  { %v4506_v39 = vadd.f32 %v9837_v31, %v4505_v49  ;;  %v4756_v17 = vmul.f32 1.442695, %v4723_v12 }
 0x57e   :  { %v4536_v50 = vmax.f32 %v4506_v39, 0.0  ;;  %5521 = vpow2.f32 %v4756_v17 }
 0x57f   :  { %5523 = vrcp.f32 %v4797_v47  ;;  %v4667_v0 = vpop.f32.mrf.mxu3 }
 0x580   :  { %5411 = vmatmul.msk.f32.gmra.mxu3 %vm4547_vm1, %v4536_v50  ;;  %v4668_v27 = vadd.f32 %v9805_v6, %v4667_v0 }
 0x582   :  { %v4724_v58 = vsub.f32 0.0, %v4668_v27 }
 0x583   :  { %v4507_v35 = vpop.f32.mrf.mxu2 }
 0x584   :  { %v4508_v62 = vadd.f32 %v9837_v31, %v4507_v35  ;;  %v5522_v1 = vpop.eup %5521  ;;  %v4758_v20 = vmul.f32 1.442695, %v4724_v58 }
 0x585   :  { %v5524_v51 = vpop.eup %5523  ;;  %v4798_v13 = vadd.f32 1.0, %v5522_v1 }
 0x586   :  { %v4537_v29 = vmax.f32 %v4508_v62, 0.0  ;;  %v4921_v3 = vmul.f32 %v5524_v51, %v4797_v47  ;;  %5525 = vpow2.f32 %v4758_v20  ;;  %vm4926_vm8 = vweird.f32 %v5524_v51 }
 0x587   :  { %5527 = vrcp.f32 %v4798_v13  ;;  %v4670_v22 = vpop.f32.mrf.mxu3  ;;  %vm4927_vm12 = vmor %vm4925_vm6, %vm4926_vm8  ;;  %v4944_v23 = vand.u32 2147483647, %v4798_v13  ;;  %vm4940_vm2 = vweird.f32 %v4798_v13 }
 0x588   :  { %5412 = vmatmul.msk.f32.gmra.mxu3 %vm4547_vm1, %v4537_v29  ;;  %v4922_v21 = vsub.f32 1.0, %v4921_v3  ;;  %v4671_v57 = vadd.f32 %v9805_v6, %v4670_v22 }
 0x589   :  { %vm4945_vm14 = vcmp.eq.f32.partialorder %v4944_v23, 8.507059e+37 }
 0x58a   :  { %v4923_v38 = vmul.f32 %v5524_v51, %v4922_v21  ;;  %v4725_v24 = vsub.f32 0.0, %v4671_v57 }
 0x58c   :  { %v5526_v4 = vpop.eup %5525  ;;  %v4924_v52 = vadd.f32 %v5524_v51, %v4923_v38  ;;  %v4760_v30 = vmul.f32 1.442695, %v4725_v24 }
 0x58d   :  { %v5528_v63 = vpop.eup %5527  ;;  %v4799_v56 = vadd.f32 1.0, %v5526_v4 }
 0x58e   :  { %v4928_v53 = vsel %vm4927_vm12, %v5524_v51, %v4924_v52  ;;  %v4936_v15 = vmul.f32 %v5528_v63, %v4798_v13  ;;  %5529 = vpow2.f32 %v4760_v30  ;;  %vm4941_vm10 = vweird.f32 %v5528_v63 }
 0x58f   :  { %v4933_v42 = vsel %vm4930_vm15, %v4932_v19, %v4928_v53  ;;  %5531 = vrcp.f32 %v4799_v56  ;;  %v4673_v10 = vpop.f32.mrf.mxu3  ;;  %vm4942_vm5 = vmor %vm4940_vm2, %vm4941_vm10  ;;  %v4961_v5 = vand.u32 2147483648, %v4799_v56  ;;  %v4959_v59 = vand.u32 2147483647, %v4799_v56 }
 0x590   :  { %5198 = vst.msk [vmem:[%s9973_s9 + $0x38] sm:$0xff] %vm5190_vm0, %v4933_v42  ;;  %v4937_v14 = vsub.f32 1.0, %v4936_v15  ;;  %v4674_v37 = vadd.f32 %v9805_v6, %v4673_v10  ;;  %vm4955_vm11 = vweird.f32 %v4799_v56 }
 0x591   :  { %v4962_v54 = vor.u32 1.1754944e-38, %v4961_v5  ;;  %vm4960_vm3 = vcmp.eq.f32.partialorder %v4959_v59, 8.507059e+37 }
 0x592   :  { %v4938_v18 = vmul.f32 %v5528_v63, %v4937_v14  ;;  %v4726_v49 = vsub.f32 0.0, %v4674_v37 }
 0x593   :  { %v4510_v55 = vpop.f32.mrf.mxu2 }
 0x594   :  { %v4511_v40 = vadd.f32 %v9837_v31, %v4510_v55  ;;  %v4946_v31 = vand.u32 2147483648, %v4798_v13  ;;  %v5530_v25 = vpop.eup %5529  ;;  %v4939_v39 = vadd.f32 %v5528_v63, %v4938_v18  ;;  %v4762_v26 = vmul.f32 1.442695, %v4726_v49 }
 0x595   :  { %v5532_v45 = vpop.eup %5531  ;;  %v4800_v7 = vadd.f32 1.0, %v5530_v25 }
 0x596   :  { %v4538_v33 = vmax.f32 %v4511_v40, 0.0  ;;  %v4947_v32 = vor.u32 1.1754944e-38, %v4946_v31  ;;  %v4943_v50 = vsel %vm4942_vm5, %v5528_v63, %v4939_v39  ;;  %v4951_v34 = vmul.f32 %v5532_v45, %v4799_v56 }
 0x597   :  { %5533 = vpow2.f32 %v4762_v26  ;;  %v4676_v2 = vpop.f32.mrf.mxu3  ;;  %v4976_v0 = vand.u32 2147483648, %v4800_v7  ;;  %v4974_v58 = vand.u32 2147483647, %v4800_v7  ;;  %vm4970_vm13 = vweird.f32 %v4800_v7 }
 0x598   :  { %5413 = vmatmul.msk.f32.gmra.mxu3 %vm4547_vm1, %v4538_v33  ;;  %v4948_v41 = vsel %vm4945_vm14, %v4947_v32, %v4943_v50  ;;  %5535 = vrcp.f32 %v4800_v7  ;;  %v4952_v36 = vsub.f32 1.0, %v4951_v34  ;;  %v4677_v28 = vadd.f32 %v9805_v6, %v4676_v2 }
 0x599   :  { %5199 = vst.msk [vmem:[%s9973_s9 + $0x40] sm:$0xff] %vm5190_vm0, %v4948_v41  ;;  %vm4956_vm1 = vweird.f32 %v5532_v45  ;;  %v4977_v22 = vor.u32 1.1754944e-38, %v4976_v0  ;;  %vm4975_vm8 = vcmp.eq.f32.partialorder %v4974_v58, 8.507059e+37 }
 0x59a   :  { %v4953_v8 = vmul.f32 %v5532_v45, %v4952_v36  ;;  %v4727_v35 = vsub.f32 0.0, %v4677_v28  ;;  %vm4957_vm9 = vmor %vm4955_vm11, %vm4956_vm1 }
 0x59b   :  { %v4512_v9 = vpop.f32.mrf.mxu2 }
 0x59c   :  { %v4954_v62 = vadd.f32 %v5532_v45, %v4953_v8  ;;  %v4764_v48 = vmul.f32 1.442695, %v4727_v35 }
 0x59d   :  { %v5534_v61 = vpop.eup %5533 }
 0x59e   :  { %v5536_v11 = vpop.eup %5535  ;;  %v4801_v29 = vadd.f32 1.0, %v5534_v61  ;;  %v4958_v46 = vsel %vm4957_vm9, %v5532_v45, %v4954_v62  ;;  %5537 = vpow2.f32 %v4764_v48 }
 0x59f   :  { %v4966_v44 = vmul.f32 %v5536_v11, %v4800_v7  ;;  %v4963_v12 = vsel %vm4960_vm3, %v4962_v54, %v4958_v46  ;;  %v4679_v60 = vpop.f32.mrf.mxu3  ;;  %vm4971_vm4 = vweird.f32 %v5536_v11 }
 0x5a0   :  { %5539 = vrcp.f32 %v4801_v29  ;;  %5200 = vst.msk [vmem:[%s9973_s9 + $0x48] sm:$0xff] %vm5190_vm0, %v4963_v12  ;;  %v4680_v47 = vadd.f32 %v9805_v6, %v4679_v60  ;;  %vm4972_vm7 = vmor %vm4970_vm13, %vm4971_vm4  ;;  %v4991_v55 = vand.u32 2147483648, %v4801_v29  ;;  %v4989_v30 = vand.u32 2147483647, %v4801_v29 }
 0x5a1   :  { %v4967_v17 = vsub.f32 1.0, %v4966_v44  ;;  %vm4985_vm12 = vweird.f32 %v4801_v29 }
 0x5a2   :  { %v4728_v1 = vsub.f32 0.0, %v4680_v47  ;;  %v4992_v15 = vor.u32 1.1754944e-38, %v4991_v55  ;;  %vm4990_vm10 = vcmp.eq.f32.partialorder %v4989_v30, 8.507059e+37 }
 0x5a3   :  { %v4968_v27 = vmul.f32 %v5536_v11, %v4967_v17 }
 0x5a4   :  { %v5538_v20 = vpop.eup %5537  ;;  %v4766_v13 = vmul.f32 1.442695, %v4728_v1 }
 0x5a5   :  { %v4969_v51 = vadd.f32 %v5536_v11, %v4968_v27  ;;  %v4802_v21 = vadd.f32 1.0, %v5538_v20 }
 0x5a6   :  { %v5540_v3 = vpop.eup %5539  ;;  %5541 = vpow2.f32 %v4766_v13 }
 0x5a7   :  { %v4973_v57 = vsel %vm4972_vm7, %v5536_v11, %v4969_v51  ;;  %v4981_v43 = vmul.f32 %v5540_v3, %v4801_v29  ;;  %5543 = vrcp.f32 %v4802_v21  ;;  %v4682_v16 = vpop.f32.mrf.mxu3  ;;  %vm4986_vm6 = vweird.f32 %v5540_v3 }
 0x5a8   :  { %v4978_v38 = vsel %vm4975_vm8, %v4977_v22, %v4973_v57  ;;  %v4683_v4 = vadd.f32 %v9805_v6, %v4682_v16  ;;  %vm4987_vm15 = vmor %vm4985_vm12, %vm4986_vm6  ;;  %v5006_v23 = vand.u32 2147483648, %v4802_v21  ;;  %v5004_v25 = vand.u32 2147483647, %v4802_v21 }
 0x5a9   :  { %5201 = vst.msk [vmem:[%s9973_s9 + $0x50] sm:$0xff] %vm5190_vm0, %v4978_v38  ;;  %v4982_v24 = vsub.f32 1.0, %v4981_v43  ;;  %vm5000_vm5 = vweird.f32 %v4802_v21 }
 0x5aa   :  { %v4729_v63 = vsub.f32 0.0, %v4683_v4  ;;  %v5007_v7 = vor.u32 1.1754944e-38, %v5006_v23  ;;  %vm5005_vm1 = vcmp.eq.f32.partialorder %v5004_v25, 8.507059e+37 }
 0x5ab   :  { %v4983_v52 = vmul.f32 %v5540_v3, %v4982_v24 }
 0x5ac   :  { %v5542_v40 = vpop.eup %5541  ;;  %v4768_v56 = vmul.f32 1.442695, %v4729_v63 }
 0x5ad   :  { %v4984_v19 = vadd.f32 %v5540_v3, %v4983_v52  ;;  %v5544_v53 = vpop.eup %5543  ;;  %v4803_v33 = vadd.f32 1.0, %v5542_v40 }
 0x5ae   :  { %v4996_v10 = vmul.f32 %v5544_v53, %v4802_v21  ;;  %5545 = vpow2.f32 %v4768_v56  ;;  %vm5001_vm2 = vweird.f32 %v5544_v53 }
 0x5af   :  { %v4988_v42 = vsel %vm4987_vm15, %v5540_v3, %v4984_v19  ;;  %5547 = vrcp.f32 %v4803_v33  ;;  %v4685_v37 = vpop.f32.mrf.mxu3  ;;  %vm5002_vm14 = vmor %vm5000_vm5, %vm5001_vm2  ;;  %v5021_v8 = vand.u32 2147483648, %v4803_v33  ;;  %v5019_v35 = vand.u32 2147483647, %v4803_v33 }
 0x5b0   :  { %v4993_v14 = vsel %vm4990_vm10, %v4992_v15, %v4988_v42  ;;  %v4997_v31 = vsub.f32 1.0, %v4996_v10  ;;  %v4686_v18 = vadd.f32 %v9805_v6, %v4685_v37  ;;  %vm5015_vm9 = vweird.f32 %v4803_v33 }
 0x5b1   :  { %5202 = vst.msk [vmem:[%s9973_s9 + $0x58] sm:$0xff] %vm5190_vm0, %v4993_v14  ;;  %v5022_v29 = vor.u32 1.1754944e-38, %v5021_v8  ;;  %vm5020_vm4 = vcmp.eq.f32.partialorder %v5019_v35, 8.507059e+37 }
 0x5b2   :  { %v4998_v49 = vmul.f32 %v5544_v53, %v4997_v31  ;;  %v4730_v9 = vsub.f32 0.0, %v4686_v18 }
 0x5b4   :  { %v5546_v39 = vpop.eup %5545  ;;  %v4999_v26 = vadd.f32 %v5544_v53, %v4998_v49  ;;  %v4770_v45 = vmul.f32 1.442695, %v4730_v9 }
 0x5b5   :  { %v5548_v32 = vpop.eup %5547  ;;  %v4804_v50 = vadd.f32 1.0, %v5546_v39 }
 0x5b6   :  { %v5003_v34 = vsel %vm5002_vm14, %v5544_v53, %v4999_v26  ;;  %v5011_v41 = vmul.f32 %v5548_v32, %v4803_v33  ;;  %5549 = vpow2.f32 %v4770_v45  ;;  %vm5016_vm11 = vweird.f32 %v5548_v32 }
 0x5b7   :  { %v5008_v2 = vsel %vm5005_vm1, %v5007_v7, %v5003_v34  ;;  %5551 = vrcp.f32 %v4804_v50  ;;  %v4688_v36 = vpop.f32.mrf.mxu3  ;;  %vm5017_vm3 = vmor %vm5015_vm9, %vm5016_vm11  ;;  %v5036_v27 = vand.u32 2147483648, %v4804_v50  ;;  %v5034_v1 = vand.u32 2147483647, %v4804_v50 }
 0x5b8   :  { %5203 = vst.msk [vmem:[%s9973_s9 + $0x60] sm:$0xff] %vm5190_vm0, %v5008_v2  ;;  %v5012_v28 = vsub.f32 1.0, %v5011_v41  ;;  %v4689_v5 = vadd.f32 %v9805_v6, %v4688_v36  ;;  %vm5030_vm7 = vweird.f32 %v4804_v50 }
 0x5b9   :  { %v5037_v21 = vor.u32 1.1754944e-38, %v5036_v27  ;;  %vm5035_vm6 = vcmp.eq.f32.partialorder %v5034_v1, 8.507059e+37 }
 0x5ba   :  { %v5013_v59 = vmul.f32 %v5548_v32, %v5012_v28  ;;  %v4731_v61 = vsub.f32 0.0, %v4689_v5 }
 0x5bc   :  { %v5550_v62 = vpop.eup %5549  ;;  %v5014_v48 = vadd.f32 %v5548_v32, %v5013_v59  ;;  %v4772_v11 = vmul.f32 1.442695, %v4731_v61 }
 0x5bd   :  { %v5552_v54 = vpop.eup %5551  ;;  %v4805_v46 = vadd.f32 1.0, %v5550_v62 }
 0x5be   :  { %v5018_v44 = vsel %vm5017_vm3, %v5548_v32, %v5014_v48  ;;  %v5026_v12 = vmul.f32 %v5552_v54, %v4804_v50  ;;  %5553 = vpow2.f32 %v4772_v11  ;;  %vm5031_vm13 = vweird.f32 %v5552_v54 }
 0x5bf   :  { %v5023_v60 = vsel %vm5020_vm4, %v5022_v29, %v5018_v44  ;;  %5555 = vrcp.f32 %v4805_v46  ;;  %v4691_v17 = vpop.f32.mrf.mxu3  ;;  %vm5032_vm8 = vmor %vm5030_vm7, %vm5031_vm13  ;;  %v5051_v52 = vand.u32 2147483648, %v4805_v46  ;;  %v5049_v63 = vand.u32 2147483647, %v4805_v46 }
 0x5c0   :  { %5204 = vst.msk [vmem:[%s9973_s9 + $0x68] sm:$0xff] %vm5190_vm0, %v5023_v60  ;;  %v5027_v47 = vsub.f32 1.0, %v5026_v12  ;;  %v4692_v0 = vadd.f32 %v9805_v6, %v4691_v17  ;;  %vm5045_vm15 = vweird.f32 %v4805_v46 }
 0x5c1   :  { %v5052_v33 = vor.u32 1.1754944e-38, %v5051_v52  ;;  %vm5050_vm2 = vcmp.eq.f32.partialorder %v5049_v63, 8.507059e+37 }
 0x5c2   :  { %v5028_v58 = vmul.f32 %v5552_v54, %v5027_v47  ;;  %v4732_v20 = vsub.f32 0.0, %v4692_v0 }
 0x5c4   :  { %v5554_v51 = vpop.eup %5553  ;;  %v5029_v13 = vadd.f32 %v5552_v54, %v5028_v58  ;;  %v4774_v3 = vmul.f32 1.442695, %v4732_v20 }
 0x5c5   :  { %v5556_v22 = vpop.eup %5555  ;;  %v4806_v57 = vadd.f32 1.0, %v5554_v51 }
 0x5c6   :  { %v5033_v43 = vsel %vm5032_vm8, %v5552_v54, %v5029_v13  ;;  %v5041_v38 = vmul.f32 %v5556_v22, %v4805_v46  ;;  %5557 = vpow2.f32 %v4774_v3  ;;  %vm5046_vm12 = vweird.f32 %v5556_v22 }
 0x5c7   :  { %v5038_v16 = vsel %vm5035_vm6, %v5037_v21, %v5033_v43  ;;  %5559 = vrcp.f32 %v4806_v57  ;;  %v4694_v24 = vpop.f32.mrf.mxu3  ;;  %vm5047_vm10 = vmor %vm5045_vm15, %vm5046_vm12  ;;  %v5066_v49 = vand.u32 2147483648, %v4806_v57  ;;  %v5064_v9 = vand.u32 2147483647, %v4806_v57 }
 0x5c8   :  { %5205 = vst.msk [vmem:[%s9973_s9 + $0x70] sm:$0xff] %vm5190_vm0, %v5038_v16  ;;  %v5042_v4 = vsub.f32 1.0, %v5041_v38  ;;  %v4695_v55 = vadd.f32 %v9805_v6, %v4694_v24  ;;  %vm5060_vm14 = vweird.f32 %v4806_v57 }
 0x5c9   :  { %v5067_v50 = vor.u32 1.1754944e-38, %v5066_v49  ;;  %vm5065_vm11 = vcmp.eq.f32.partialorder %v5064_v9, 8.507059e+37 }
 0x5ca   :  { %v5043_v30 = vmul.f32 %v5556_v22, %v5042_v4  ;;  %v4733_v40 = vsub.f32 0.0, %v4695_v55 }
 0x5cc   :  { %v5558_v19 = vpop.eup %5557  ;;  %v5044_v56 = vadd.f32 %v5556_v22, %v5043_v30  ;;  %v4776_v53 = vmul.f32 1.442695, %v4733_v40 }
 0x5cd   :  { %v5560_v15 = vpop.eup %5559  ;;  %v4807_v42 = vadd.f32 1.0, %v5558_v19 }
 0x5ce   :  { %v5048_v10 = vsel %vm5047_vm10, %v5556_v22, %v5044_v56  ;;  %v5056_v14 = vmul.f32 %v5560_v15, %v4806_v57  ;;  %5561 = vpow2.f32 %v4776_v53  ;;  %vm5061_vm5 = vweird.f32 %v5560_v15 }
 0x5cf   :  { %v5053_v37 = vsel %vm5050_vm2, %v5052_v33, %v5048_v10  ;;  %5563 = vrcp.f32 %v4807_v42  ;;  %v4697_v31 = vpop.f32.mrf.mxu3  ;;  %vm5062_vm1 = vmor %vm5060_vm14, %vm5061_vm5  ;;  %v5081_v59 = vand.u32 2147483648, %v4807_v42  ;;  %v5079_v61 = vand.u32 2147483647, %v4807_v42 }
 0x5d0   :  { %5206 = vst.msk [vmem:[%s9973_s9 + $0x78] sm:$0xff] %vm5190_vm0, %v5053_v37  ;;  %v5057_v18 = vsub.f32 1.0, %v5056_v14  ;;  %v4698_v23 = vadd.f32 %v9805_v6, %v4697_v31  ;;  %vm5075_vm3 = vweird.f32 %v4807_v42 }
 0x5d1   :  { %v5082_v46 = vor.u32 1.1754944e-38, %v5081_v59  ;;  %vm5080_vm13 = vcmp.eq.f32.partialorder %v5079_v61, 8.507059e+37 }
 0x5d2   :  { %v5058_v25 = vmul.f32 %v5560_v15, %v5057_v18  ;;  %v4734_v39 = vsub.f32 0.0, %v4698_v23 }
 0x5d4   :  { %v5562_v26 = vpop.eup %5561  ;;  %v5059_v45 = vadd.f32 %v5560_v15, %v5058_v25  ;;  %v4778_v32 = vmul.f32 1.442695, %v4734_v39  ;;  %v5596_v39 = vld [vmem:[#allocation2] ss:$0 sm:$0xff] }
 0x5d5   :  { %v5564_v7 = vpop.eup %5563  ;;  %v4808_v34 = vadd.f32 1.0, %v5562_v26 }
 0x5d6   :  { %v5063_v41 = vsel %vm5062_vm1, %v5560_v15, %v5059_v45  ;;  %v5071_v2 = vmul.f32 %v5564_v7, %v4807_v42  ;;  %5565 = vpow2.f32 %v4778_v32  ;;  %vm5076_vm9 = vweird.f32 %v5564_v7 }
 0x5d7   :  { %v5068_v36 = vsel %vm5065_vm11, %v5067_v50, %v5063_v41  ;;  %5567 = vrcp.f32 %v4808_v34  ;;  %v4700_v28 = vpop.f32.mrf.mxu3  ;;  %vm5077_vm4 = vmor %vm5075_vm3, %vm5076_vm9  ;;  %v5096_v58 = vand.u32 2147483648, %v4808_v34  ;;  %v5094_v20 = vand.u32 2147483647, %v4808_v34 }
 0x5d8   :  { %5207 = vst.msk [vmem:[%s9973_s9 + $0x80] sm:$0xff] %vm5190_vm0, %v5068_v36  ;;  %v5072_v5 = vsub.f32 1.0, %v5071_v2  ;;  %v4701_v8 = vadd.f32 %v9805_v6, %v4700_v28  ;;  %vm5090_vm8 = vweird.f32 %v4808_v34 }
 0x5d9   :  { %v5097_v57 = vor.u32 1.1754944e-38, %v5096_v58  ;;  %vm5095_vm12 = vcmp.eq.f32.partialorder %v5094_v20, 8.507059e+37 }
 0x5da   :  { %v5073_v35 = vmul.f32 %v5564_v7, %v5072_v5  ;;  %v4735_v62 = vsub.f32 0.0, %v4701_v8 }
 0x5dc   :  { %v5566_v48 = vpop.eup %5565  ;;  %v5074_v11 = vadd.f32 %v5564_v7, %v5073_v35  ;;  %v4780_v54 = vmul.f32 1.442695, %v4735_v62 }
 0x5dd   :  { %v5568_v29 = vpop.eup %5567  ;;  %v4809_v44 = vadd.f32 1.0, %v5566_v48 }
 0x5de   :  { %v5078_v12 = vsel %vm5077_vm4, %v5564_v7, %v5074_v11  ;;  %v5086_v60 = vmul.f32 %v5568_v29, %v4808_v34  ;;  %5569 = vpow2.f32 %v4780_v54  ;;  %vm5091_vm7 = vweird.f32 %v5568_v29 }
 0x5df   :  { %v5083_v17 = vsel %vm5080_vm13, %v5082_v46, %v5078_v12  ;;  %5571 = vrcp.f32 %v4809_v44  ;;  %v4703_v47 = vpop.f32.mrf.mxu3  ;;  %vm5092_vm6 = vmor %vm5090_vm8, %vm5091_vm7  ;;  %v5111_v4 = vand.u32 2147483648, %v4809_v44  ;;  %v5109_v52 = vand.u32 2147483647, %v4809_v44 }
 0x5e0   :  { %5208 = vst.msk [vmem:[%s9973_s9 + $0x88] sm:$0xff] %vm5190_vm0, %v5083_v17  ;;  %v5087_v0 = vsub.f32 1.0, %v5086_v60  ;;  %v4704_v27 = vadd.f32 %v9805_v6, %v4703_v47  ;;  %vm5105_vm10 = vweird.f32 %v4809_v44 }
 0x5e1   :  { %v5112_v19 = vor.u32 1.1754944e-38, %v5111_v4  ;;  %vm5110_vm5 = vcmp.eq.f32.partialorder %v5109_v52, 8.507059e+37 }
 0x5e2   :  { %v5088_v1 = vmul.f32 %v5568_v29, %v5087_v0  ;;  %v4736_v51 = vsub.f32 0.0, %v4704_v27 }
 0x5e4   :  { %v5570_v13 = vpop.eup %5569  ;;  %v5089_v3 = vadd.f32 %v5568_v29, %v5088_v1  ;;  %v4782_v22 = vmul.f32 1.442695, %v4736_v51 }
 0x5e5   :  { %v5572_v21 = vpop.eup %5571  ;;  %v4810_v43 = vadd.f32 1.0, %v5570_v13 }
 0x5e6   :  { %v5093_v38 = vsel %vm5092_vm6, %v5568_v29, %v5089_v3  ;;  %v5101_v16 = vmul.f32 %v5572_v21, %v4809_v44  ;;  %5573 = vpow2.f32 %v4782_v22  ;;  %vm5106_vm15 = vweird.f32 %v5572_v21 }
 0x5e7   :  { %v5098_v24 = vsel %vm5095_vm12, %v5097_v57, %v5093_v38  ;;  %5575 = vrcp.f32 %v4810_v43  ;;  %vm5107_vm2 = vmor %vm5105_vm10, %vm5106_vm15  ;;  %v5126_v10 = vand.u32 2147483648, %v4810_v43  ;;  %v5124_v37 = vand.u32 2147483647, %v4810_v43 }
 0x5e8   :  { %5209 = vst.msk [vmem:[%s9973_s9 + $0x90] sm:$0xff] %vm5190_vm0, %v5098_v24  ;;  %v5102_v6 = vsub.f32 1.0, %v5101_v16  ;;  %vm5120_vm1 = vweird.f32 %v4810_v43 }
 0x5e9   :  { %v5127_v23 = vor.u32 1.1754944e-38, %v5126_v10  ;;  %vm5125_vm9 = vcmp.eq.f32.partialorder %v5124_v37, 8.507059e+37 }
 0x5ea   :  { %v5103_v55 = vmul.f32 %v5572_v21, %v5102_v6 }
 0x5ec   :  { %v5574_v30 = vpop.eup %5573  ;;  %v5104_v63 = vadd.f32 %v5572_v21, %v5103_v55 }
 0x5ed   :  { %v5576_v40 = vpop.eup %5575  ;;  %v4811_v56 = vadd.f32 1.0, %v5574_v30 }
 0x5ee   :  { %v5108_v53 = vsel %vm5107_vm2, %v5572_v21, %v5104_v63  ;;  %v5116_v15 = vmul.f32 %v5576_v40, %v4810_v43  ;;  %vm5121_vm14 = vweird.f32 %v5576_v40 }
 0x5ef   :  { %v5113_v33 = vsel %vm5110_vm5, %v5112_v19, %v5108_v53  ;;  %5577 = vrcp.f32 %v4811_v56  ;;  %vm5122_vm11 = vmor %vm5120_vm1, %vm5121_vm14  ;;  %v5141_v50 = vand.u32 2147483648, %v4811_v56  ;;  %v5139_v41 = vand.u32 2147483647, %v4811_v56 }
 0x5f0   :  { %5210 = vst.msk [vmem:[%s9973_s9 + $0x98] sm:$0xff] %vm5190_vm0, %v5113_v33  ;;  %v5117_v42 = vsub.f32 1.0, %v5116_v15  ;;  %vm5135_vm4 = vweird.f32 %v4811_v56 }
 0x5f1   :  { %v5142_v28 = vor.u32 1.1754944e-38, %v5141_v50  ;;  %vm5140_vm7 = vcmp.eq.f32.partialorder %v5139_v41, 8.507059e+37 }
 0x5f2   :  { %v5118_v14 = vmul.f32 %v5576_v40, %v5117_v42 }
 0x5f4   :  { %v5119_v31 = vadd.f32 %v5576_v40, %v5118_v14 }
 0x5f5   :  { %v5578_v18 = vpop.eup %5577 }
 0x5f6   :  { %v5123_v25 = vsel %vm5122_vm11, %v5576_v40, %v5119_v31  ;;  %v5131_v9 = vmul.f32 %v5578_v18, %v4811_v56  ;;  %vm5136_vm3 = vweird.f32 %v5578_v18 }
 0x5f7   :  { %v5128_v45 = vsel %vm5125_vm9, %v5127_v23, %v5123_v25  ;;  %vm5137_vm13 = vmor %vm5135_vm4, %vm5136_vm3 }
 0x5f8   :  { %5211 = vst.msk [vmem:[%s9973_s9 + $0xa0] sm:$0xff] %vm5190_vm0, %v5128_v45  ;;  %v5132_v32 = vsub.f32 1.0, %v5131_v9 }
 0x5fa   :  { %v5133_v34 = vmul.f32 %v5578_v18, %v5132_v32 }
 0x5fc   :  { %v5134_v36 = vadd.f32 %v5578_v18, %v5133_v34 }
 0x5fe   :  { %v5138_v8 = vsel %vm5137_vm13, %v5578_v18, %v5134_v36 }
 0x5ff   :  { %v5143_v35 = vsel %vm5140_vm7, %v5142_v28, %v5138_v8 }
 0x600   :  { %5212 = vst.msk [vmem:[%s9973_s9 + $0xa8] sm:$0xff] %vm5190_vm0, %v5143_v35 }
 0x603   :  { %v4706_v49 = vpop.f32.mrf.mxu3 }
 0x604   :  { %v4707_v26 = vadd.f32 %v5596_v39, %v4706_v49 }
 0x606   :  { %v4737_v7 = vsub.f32 0.0, %v4707_v26 }
 0x608   :  { %v4784_v2 = vmul.f32 1.442695, %v4737_v7 }
 0x60a   :  { %5579 = vpow2.f32 %v4784_v2 }
 0x60b   :  { %v4709_v5 = vpop.f32.mrf.mxu3 }
 0x60c   :  { %v4710_v59 = vadd.f32 %v5596_v39, %v4709_v5 }
 0x60e   :  { %v4738_v61 = vsub.f32 0.0, %v4710_v59 }
 0x610   :  { %v5580_v62 = vpop.eup %5579  ;;  %v4786_v48 = vmul.f32 1.442695, %v4738_v61 }
 0x611   :  { %v4812_v11 = vadd.f32 1.0, %v5580_v62 }
 0x612   :  { %5581 = vpow2.f32 %v4786_v48 }
 0x613   :  { %5583 = vrcp.f32 %v4812_v11  ;;  %v5156_v60 = vand.u32 2147483648, %v4812_v11  ;;  %v5154_v47 = vand.u32 2147483647, %v4812_v11  ;;  %vm5150_vm6 = vweird.f32 %v4812_v11 }
 0x615   :  { %v5157_v58 = vor.u32 1.1754944e-38, %v5156_v60  ;;  %vm5155_vm15 = vcmp.eq.f32.partialorder %v5154_v47, 8.507059e+37 }
 0x618   :  { %v5582_v54 = vpop.eup %5581 }
 0x619   :  { %v5584_v29 = vpop.eup %5583  ;;  %v4813_v46 = vadd.f32 1.0, %v5582_v54 }
 0x61a   :  { %v5146_v44 = vmul.f32 %v5584_v29, %v4812_v11  ;;  %vm5151_vm8 = vweird.f32 %v5584_v29 }
 0x61b   :  { %5585 = vrcp.f32 %v4813_v46  ;;  %vm5152_vm12 = vmor %vm5150_vm6, %vm5151_vm8  ;;  %v4712_v51 = vpop.f32.mrf.mxu3  ;;  %v5171_v21 = vand.u32 2147483648, %v4813_v46  ;;  %v5169_v38 = vand.u32 2147483647, %v4813_v46  ;;  %vm5165_vm2 = vweird.f32 %v4813_v46 }
 0x61c   :  { %v5147_v12 = vsub.f32 1.0, %v5146_v44  ;;  %v4713_v3 = vadd.f32 %v5596_v39, %v4712_v51 }
 0x61d   :  { %v5172_v6 = vor.u32 1.1754944e-38, %v5171_v21  ;;  %vm5170_vm14 = vcmp.eq.f32.partialorder %v5169_v38, 8.507059e+37 }
 0x61e   :  { %v5148_v17 = vmul.f32 %v5584_v29, %v5147_v12  ;;  %v4739_v57 = vsub.f32 0.0, %v4713_v3 }
 0x620   :  { %v5149_v0 = vadd.f32 %v5584_v29, %v5148_v17  ;;  %v4788_v16 = vmul.f32 1.442695, %v4739_v57 }
 0x621   :  { %v5586_v27 = vpop.eup %5585 }
 0x622   :  { %v5153_v1 = vsel %vm5152_vm12, %v5584_v29, %v5149_v0  ;;  %v5161_v20 = vmul.f32 %v5586_v27, %v4813_v46  ;;  %vm5166_vm10 = vweird.f32 %v5586_v27  ;;  %5587 = vpow2.f32 %v4788_v16 }
 0x623   :  { %v5158_v13 = vsel %vm5155_vm15, %v5157_v58, %v5153_v1  ;;  %vm5167_vm5 = vmor %vm5165_vm2, %vm5166_vm10 }
 0x624   :  { %5213 = vst.msk [vmem:[%s9973_s9 + $0xb0] sm:$0xff] %vm5190_vm0, %v5158_v13  ;;  %v5162_v22 = vsub.f32 1.0, %v5161_v20 }
 0x626   :  { %v5163_v43 = vmul.f32 %v5586_v27, %v5162_v22 }
 0x628   :  { %v5164_v24 = vadd.f32 %v5586_v27, %v5163_v43  ;;  %v5588_v52 = vpop.eup %5587 }
 0x629   :  { %v4814_v30 = vadd.f32 1.0, %v5588_v52 }
 0x62a   :  { %v5168_v4 = vsel %vm5167_vm5, %v5586_v27, %v5164_v24 }
 0x62b   :  { %v5173_v55 = vsel %vm5170_vm14, %v5172_v6, %v5168_v4  ;;  %5589 = vrcp.f32 %v4814_v30  ;;  %v5186_v56 = vand.u32 2147483648, %v4814_v30  ;;  %v5184_v15 = vand.u32 2147483647, %v4814_v30 }
 0x62c   :  { %5214 = vst.msk [vmem:[%s9973_s9 + $0xb8] sm:$0xff] %vm5190_vm0, %v5173_v55  ;;  %vm5180_vm11 = vweird.f32 %v4814_v30 }
 0x62d   :  { %v5187_v42 = vor.u32 1.1754944e-38, %v5186_v56  ;;  %vm5185_vm3 = vcmp.eq.f32.partialorder %v5184_v15, 8.507059e+37 }
 0x631   :  { %v5590_v63 = vpop.eup %5589 }
 0x632   :  { %v5176_v40 = vmul.f32 %v5590_v63, %v4814_v30  ;;  %vm5181_vm1 = vweird.f32 %v5590_v63 }
 0x633   :  { %vm5182_vm9 = vmor %vm5180_vm11, %vm5181_vm1 }
 0x634   :  { %v5177_v19 = vsub.f32 1.0, %v5176_v40 }
 0x636   :  { %v5178_v53 = vmul.f32 %v5590_v63, %v5177_v19 }
 0x638   :  { %v5179_v33 = vadd.f32 %v5590_v63, %v5178_v53 }
 0x63a   :  { %v5183_v10 = vsel %vm5182_vm9, %v5590_v63, %v5179_v33 }
 0x63b   :  { %v5188_v14 = vsel %vm5185_vm3, %v5187_v42, %v5183_v10 }
 0x63c   :  { %5215 = vst.msk [vmem:[%s9973_s9 + $0xc0] sm:$0xff] %vm5190_vm0, %v5188_v14 }

</bundles_post_ra>
